<compile_context>
chip_gen: v6e
topology: v6e:2x2x1
jax: 0.10.0
libtpu: 0.0.40
codegen_flags: <defaults>
</compile_context>

<pallas_src>
import functools

import jax
import jax.numpy as jnp
from jax.experimental import pallas as pl
from jax.experimental.pallas import tpu as pltpu

_EPS = 1e-5  # BatchNorm2d eps


# ----------------------------- Pallas kernels -------------------------------

def _mm_kernel(a_ref, w_ref, b_ref, o_ref, acc_ref, *, relu):
    # acc = A @ W (bf16 in, f32 acc); out = relu?(acc + shift)
    @pl.when(pl.program_id(2) == 0)
    def _():
        acc_ref[...] = jnp.zeros_like(acc_ref)

    acc_ref[...] += jnp.dot(a_ref[...], w_ref[...],
                            preferred_element_type=jnp.float32)

    @pl.when(pl.program_id(2) == pl.num_programs(2) - 1)
    def _():
        y = acc_ref[...] + b_ref[...]
        if relu:
            y = jnp.maximum(y, 0.0)
        o_ref[...] = y


def _mm_res_kernel(a_ref, w_ref, b_ref, r_ref, o_ref, acc_ref, *, relu):
    # acc = A @ W; out = relu?(acc + shift + residual)   (residual added in f32)
    @pl.when(pl.program_id(2) == 0)
    def _():
        acc_ref[...] = jnp.zeros_like(acc_ref)

    acc_ref[...] += jnp.dot(a_ref[...], w_ref[...],
                            preferred_element_type=jnp.float32)

    @pl.when(pl.program_id(2) == pl.num_programs(2) - 1)
    def _():
        y = acc_ref[...] + b_ref[...] + r_ref[...]
        if relu:
            y = jnp.maximum(y, 0.0)
        o_ref[...] = y


def _head_kernel(x_ref, w_ref, b_ref, o_ref):
    # AdaptiveAvgPool2d((1,1)) + Flatten + Linear(256, 4)
    pooled = jnp.mean(x_ref[...], axis=1)  # (N, C)
    o_ref[...] = jnp.dot(pooled, w_ref[...],
                         preferred_element_type=jnp.float32) + b_ref[...]


# ----------------------------- tiling helpers --------------------------------

def _round_up(x, m):
    return (x + m - 1) // m * m


def _pick_tile(dim, pref, unit):
    """Pick a tile (multiple of `unit`, <= pref) minimizing padded extent."""
    d = _round_up(dim, unit)
    best = None
    for t in range(pref, unit - 1, -unit):
        p = _round_up(d, t)
        if best is None or p < best[1]:
            best = (t, p)
    return best


@functools.lru_cache(maxsize=1)
def _tn_pref():
    # v5e MXU is 4x128x128 -> prefer 128-wide N tiles; v6e/v7x prefer 256.
    try:
        kind = jax.devices()[0].device_kind.lower()
    except Exception:  # pragma: no cover - defensive
        kind = ""
    return 128 if "v5" in kind else 256


def _vmem_limit(tm, tk, tn, has_res):
    # double-buffered bf16 A/W tiles + f32 out + shift + residual + f32 acc
    b = 2 * (tm * tk * 2 + tk * tn * 2 + tn * 4)
    b += 2 * tm * tn * 4
    b += tm * tn * 4
    if has_res:
        b += 2 * tm * tn * 4
    return min(32 * 1024 * 1024, max(4 * b, 8 * 1024 * 1024))


# ----------------------------- matmul wrapper ---------------------------------

def _matmul_bn(a, w, shift, *, relu, residual=None):
    """out = relu?( A @ W + shift [+ residual] ).

    a: (M, K) bf16 im2col activations, w: (K, N) bf16 BN-scale-folded weights,
    shift: (N,) f32, residual: (M, N) f32 or None.  Returns (M, N) f32.
    """
    m, kdim = a.shape
    n = w.shape[1]

    tm, mp = _pick_tile(m, 256, 8)
    tk, kp = _pick_tile(kdim, 512, 128)
    tn, np_ = _pick_tile(n, _tn_pref(), 128)

    a = jnp.pad(a, ((0, mp - m), (0, kp - kdim)))
    w = jnp.pad(w, ((0, kp - kdim), (0, np_ - n)))
    shift = jnp.pad(shift, ((0, np_ - n),)).reshape(1, np_)

    in_specs = [
        pl.BlockSpec((tm, tk), lambda i, j, kk: (i, kk)),
        pl.BlockSpec((tk, tn), lambda i, j, kk: (kk, j)),
        pl.BlockSpec((1, tn), lambda i, j, kk: (0, j)),
    ]
    args = [a, w, shift]
    if residual is None:
        kernel = functools.partial(_mm_kernel, relu=relu)
    else:
        r = jnp.pad(residual.astype(jnp.float32),
                    ((0, mp - m), (0, np_ - n)))
        in_specs.append(pl.BlockSpec((tm, tn), lambda i, j, kk: (i, j)))
        args.append(r)
        kernel = functools.partial(_mm_res_kernel, relu=relu)

    out = pl.pallas_call(
        kernel,
        grid_spec=pltpu.PrefetchScalarGridSpec(
            num_scalar_prefetch=0,
            grid=(mp // tm, np_ // tn, kp // tk),
            in_specs=in_specs,
            out_specs=pl.BlockSpec((tm, tn), lambda i, j, kk: (i, j)),
            scratch_shapes=[pltpu.VMEM((tm, tn), jnp.float32)],
        ),
        out_shape=jax.ShapeDtypeStruct((mp, np_), jnp.float32),
        compiler_params=pltpu.CompilerParams(
            dimension_semantics=("parallel", "parallel", "arbitrary"),
            vmem_limit_bytes=_vmem_limit(tm, tk, tn, residual is not None),
        ),
    )(*args)
    return out[:m, :n]


# ----------------------------- conv / pool glue --------------------------------

def _im2col(x, kh, kw, stride, pad):
    n, h, w, c = x.shape
    xp = jnp.pad(x, ((0, 0), (pad, pad), (pad, pad), (0, 0)))
    ho = (h + 2 * pad - kh) // stride + 1
    wo = (w + 2 * pad - kw) // stride + 1
    taps = [xp[:, i:i + stride * ho:stride, j:j + stride * wo:stride, :]
            for i in range(kh) for j in range(kw)]
    patches = jnp.stack(taps, axis=3)                # (N, Ho, Wo, kh*kw, C)
    return patches.reshape(n * ho * wo, kh * kw * c), (n, ho, wo)


def _maxpool2d(x, k=3, stride=2, pad=1):
    # TODO(synk): MaxPool handled by XLA reduce_window (VPU-trivial); fusing it
    # into the following conv's Pallas kernel would remove one HBM round-trip.
    return jax.lax.reduce_window(
        x, -jnp.inf, jax.lax.max,
        window_dimensions=(1, k, k, 1),
        window_strides=(1, stride, stride, 1),
        padding=((0, 0), (pad, pad), (pad, pad), (0, 0)))


# ----------------------------- parameter setup -------------------------------

class _Keys:
    """Deterministic stream of PRNG keys."""

    def __init__(self, seed=0):
        self._key = jax.random.PRNGKey(seed)

    def __call__(self):
        self._key, sub = jax.random.split(self._key)
        return sub


def _conv_bn(keys, x, cin, cout, ksz, stride, pad, *, relu,
             conv_bias=False, residual=None):
    """Conv2d(cin, cout, ksz, stride, pad) + BatchNorm2d(cout) [+res] [+ReLU]."""
    assert x.shape[-1] == cin
    fan_in = cin * ksz * ksz
    w = jax.random.normal(keys(), (ksz, ksz, cin, cout), jnp.float32)
    w = (w * jnp.sqrt(2.0 / fan_in)).reshape(ksz * ksz * cin, cout)
    # BatchNorm2d eval-mode fold: gamma=1, beta=0, running_mean=0, running_var=1.
    scale = jnp.full((cout,), 1.0 / jnp.sqrt(1.0 + _EPS), jnp.float32)
    shift = jnp.zeros((cout,), jnp.float32)
    if conv_bias:
        bound = 1.0 / jnp.sqrt(fan_in)
        cb = jax.random.uniform(keys(), (cout,), jnp.float32, -bound, bound)
        shift = shift + cb * scale
    # Fold BN scale into the weights; MXU operands are bf16, epilogue stays f32.
    w = (w * scale[None, :]).astype(jnp.bfloat16)
    a, (n, ho, wo) = _im2col(x.astype(jnp.bfloat16), ksz, ksz, stride, pad)
    r = None if residual is None else residual.reshape(n * ho * wo, cout)
    y = _matmul_bn(a, w, shift, relu=relu, residual=r)
    return y.reshape(n, ho, wo, cout)


def _bottleneck(keys, x, inplanes, planes, stride):
    expansion = 4
    identity = x
    out = _conv_bn(keys, x, inplanes, planes, 1, 1, 0, relu=True)
    out = _conv_bn(keys, out, planes, planes, 3, stride, 1, relu=True)
    if stride != 1 or inplanes != planes * expansion:
        identity = _conv_bn(keys, x, inplanes, planes * expansion, 1, stride, 0,
                            relu=False)
    out = _conv_bn(keys, out, planes, planes * expansion, 1, 1, 0, relu=True,
                   residual=identity)
    return out


def _resnet_layer(keys, x, inplanes, planes, blocks, stride):
    x = _bottleneck(keys, x, inplanes, planes, stride)
    for _ in range(blocks - 1):
        x = _bottleneck(keys, x, planes * 4, planes, 1)
    return x


def _full_spec(a):
    nd = a.ndim
    return pl.BlockSpec(a.shape, lambda i: (0,) * nd)


def _head(keys, x, dim_in=256, dim_out=4):
    n, h, w, c = x.shape
    xf = x.reshape(n, h * w, c)
    bound = 1.0 / jnp.sqrt(dim_in)
    wl = jax.random.uniform(keys(), (dim_in, dim_out), jnp.float32, -bound, bound)
    bl = jax.random.uniform(keys(), (1, dim_out), jnp.float32, -bound, bound)
    return pl.pallas_call(
        _head_kernel,
        grid=(1,),
        in_specs=[_full_spec(xf), _full_spec(wl), _full_spec(bl)],
        out_specs=pl.BlockSpec((n, dim_out), lambda i: (0, 0)),
        out_shape=jax.ShapeDtypeStruct((n, dim_out), jnp.float32),
    )(xf, wl, bl)


# ----------------------------- full forward ---------------------------------

def cnn_res3_forward(x_nchw, seed=0):
    keys = _Keys(seed)
    x = jnp.transpose(x_nchw, (0, 2, 3, 1)).astype(jnp.float32)  # NCHW -> NHWC

    # res_regulate = resnet50.{conv1, bn1, relu, maxpool, layer1, layer2, layer3}
    x = _conv_bn(keys, x, 3, 64, 7, 2, 3, relu=True)          # conv1+bn1+relu
    x = _maxpool2d(x, 3, 2, 1)                                 # maxpool
    x = _resnet_layer(keys, x, 64, 64, 3, 1)                   # layer1 -> 256ch
    x = _resnet_layer(keys, x, 256, 128, 4, 2)                 # layer2 -> 512ch
    x = _resnet_layer(keys, x, 512, 256, 6, 2)                 # layer3 -> 1024ch

    # reduce_dim: Conv2d(1024,256,3,same) + BN
    x = _conv_bn(keys, x, 1024, 256, 3, 1, 1, relu=False, conv_bias=True)
    x_snap = x  # self.identical = nn.Sequential()

    # layer_final, then x = layer_final(x) + x_snap (no ReLU after the add)
    y = _conv_bn(keys, x, 256, 128, 3, 1, 1, relu=True, conv_bias=True)
    y = _conv_bn(keys, y, 128, 128, 3, 1, 1, relu=True, conv_bias=True)
    y = _conv_bn(keys, y, 128, 256, 3, 1, 1, relu=False, conv_bias=True,
                 residual=x_snap)

    # AdaptiveAvgPool2d((1,1)) + Flatten + Linear(256, 4)
    return _head(keys, y, 256, 4)


if __name__ == "__main__":
    key = jax.random.PRNGKey(0)
    x = jax.random.normal(key, (2, 3, 32, 32), jnp.float32)  # NCHW, like PyTorch
    fwd = jax.jit(cnn_res3_forward)   # weights + glue + kernels in one program
    out = fwd(x)
    out = jax.block_until_ready(out)
    assert out.shape == (2, 4), out.shape
    assert bool(jnp.all(jnp.isfinite(out)))
    print("KERNEL_OK")
</pallas_src>

<mosaic_0001>
module attributes {stable_mosaic.version = 11 : i64} {
  func.func @_mm_kernel(%arg0: i32, %arg1: i32, %arg2: i32, %arg3: memref<256x256xbf16, #tpu.memory_space<vmem>>, %arg4: memref<256x128xbf16, #tpu.memory_space<vmem>>, %arg5: memref<1x128xf32, #tpu.memory_space<vmem>>, %arg6: memref<256x128xf32, #tpu.memory_space<vmem>>, %arg7: memref<256x128xf32, #tpu.memory_space<vmem>>) attributes {dimension_semantics = [#tpu.dimension_semantics<parallel>, #tpu.dimension_semantics<parallel>, #tpu.dimension_semantics<arbitrary>], iteration_bounds = array<i64: 2, 1, 1>, scalar_prefetch = 0 : i64, scratch_operands = 1 : i64, tpu.core_type = #tpu.core_type<tc>, window_params = [{transform_indices = @transform_0, window_bounds = array<i64: 256, 256>}, {transform_indices = @transform_1, window_bounds = array<i64: 256, 128>}, {transform_indices = @transform_2, window_bounds = array<i64: 1, 128>}, {transform_indices = @transform_3, window_bounds = array<i64: 256, 128>}]} {
    %c0_i32 = arith.constant 0 : i32
    %0 = arith.cmpi eq, %arg2, %c0_i32 : i32
    %1 = arith.extui %0 : i1 to i32
    %c0_i32_0 = arith.constant 0 : i32
    %2 = arith.cmpi ne, %1, %c0_i32_0 : i32
    scf.if %2 {
      %cst_10 = arith.constant 0.000000e+00 : f32
      %12 = vector.broadcast %cst_10 : f32 to vector<256x128xf32>
      %c0_11 = arith.constant 0 : index
      %c0_12 = arith.constant 0 : index
      %13 = vector.load %arg7[%c0_11, %c0_12] : memref<256x128xf32, #tpu.memory_space<vmem>>, vector<256x128xf32>
      tpu.vector_store %arg7[%c0_11, %c0_12], %12 {strides = array<i32>} : memref<256x128xf32, #tpu.memory_space<vmem>>, vector<256x128xf32>,
    } else {
    }
    %c0 = arith.constant 0 : index
    %c0_1 = arith.constant 0 : index
    %3 = vector.load %arg7[%c0, %c0_1] : memref<256x128xf32, #tpu.memory_space<vmem>>, vector<256x128xf32>
    %c0_2 = arith.constant 0 : index
    %c0_3 = arith.constant 0 : index
    %4 = vector.load %arg3[%c0_2, %c0_3] : memref<256x256xbf16, #tpu.memory_space<vmem>>, vector<256x256xbf16>
    %c0_4 = arith.constant 0 : index
    %c0_5 = arith.constant 0 : index
    %5 = vector.load %arg4[%c0_4, %c0_5] : memref<256x128xbf16, #tpu.memory_space<vmem>>, vector<256x128xbf16>
    %cst = arith.constant dense<0.000000e+00> : vector<256x128xf32>
    %6 = tpu.matmul %4, %5, %cst {dimension_numbers = #tpu.dot_dimension_numbers<[1], [0], [0], [1], [0, 0, 1, 1], [], []>} : vector<256x256xbf16>, vector<256x128xbf16>, vector<256x128xf32> -> vector<256x128xf32>
    %7 = arith.addf %3, %6 : vector<256x128xf32>
    %c0_6 = arith.constant 0 : index
    %c0_7 = arith.constant 0 : index
    %8 = vector.load %arg7[%c0_6, %c0_7] : memref<256x128xf32, #tpu.memory_space<vmem>>, vector<256x128xf32>
    tpu.vector_store %arg7[%c0_6, %c0_7], %7 {strides = array<i32>} : memref<256x128xf32, #tpu.memory_space<vmem>>, vector<256x128xf32>,
    %c0_i32_8 = arith.constant 0 : i32
    %9 = arith.cmpi eq, %arg2, %c0_i32_8 : i32
    %10 = arith.extui %9 : i1 to i32
    %c0_i32_9 = arith.constant 0 : i32
    %11 = arith.cmpi ne, %10, %c0_i32_9 : i32
    scf.if %11 {
      %c0_10 = arith.constant 0 : index
      %c0_11 = arith.constant 0 : index
      %12 = vector.load %arg7[%c0_10, %c0_11] : memref<256x128xf32, #tpu.memory_space<vmem>>, vector<256x128xf32>
      %c0_12 = arith.constant 0 : index
      %c0_13 = arith.constant 0 : index
      %13 = vector.load %arg5[%c0_12, %c0_13] : memref<1x128xf32, #tpu.memory_space<vmem>>, vector<1x128xf32>
      %14 = vector.broadcast %13 : vector<1x128xf32> to vector<256x128xf32>
      %15 = arith.addf %12, %14 : vector<256x128xf32>
      %cst_14 = arith.constant 0.000000e+00 : f32
      %16 = vector.broadcast %cst_14 : f32 to vector<256x128xf32>
      %17 = arith.maximumf %15, %16 : vector<256x128xf32>
      %c0_15 = arith.constant 0 : index
      %c0_16 = arith.constant 0 : index
      %18 = vector.load %arg6[%c0_15, %c0_16] : memref<256x128xf32, #tpu.memory_space<vmem>>, vector<256x128xf32>
      tpu.vector_store %arg6[%c0_15, %c0_16], %17 {strides = array<i32>} : memref<256x128xf32, #tpu.memory_space<vmem>>, vector<256x128xf32>,
    } else {
    }
    return
  }
  func.func @transform_0(%arg0: i32, %arg1: i32, %arg2: i32) -> (i32, i32) {
    %c0_i32 = arith.constant 0 : i32
    return %arg0, %arg2 : i32, i32
  }
  func.func @transform_1(%arg0: i32, %arg1: i32, %arg2: i32) -> (i32, i32) {
    %c0_i32 = arith.constant 0 : i32
    return %arg2, %arg1 : i32, i32
  }
  func.func @transform_2(%arg0: i32, %arg1: i32, %arg2: i32) -> (i32, i32) {
    %c0_i32 = arith.constant 0 : i32
    %c0_i32_0 = arith.constant 0 : i32
    return %c0_i32, %arg1 : i32, i32
  }
  func.func @transform_3(%arg0: i32, %arg1: i32, %arg2: i32) -> (i32, i32) {
    %c0_i32 = arith.constant 0 : i32
    return %arg0, %arg1 : i32, i32
  }
}

module attributes {stable_mosaic.version = 11 : i64} {
  func.func @_mm_kernel(%arg0: i32, %arg1: i32, %arg2: i32, %arg3: memref<128x128xbf16, #tpu.memory_space<vmem>>, %arg4: memref<128x128xbf16, #tpu.memory_space<vmem>>, %arg5: memref<1x128xf32, #tpu.memory_space<vmem>>, %arg6: memref<128x128xf32, #tpu.memory_space<vmem>>, %arg7: memref<128x128xf32, #tpu.memory_space<vmem>>) attributes {dimension_semantics = [#tpu.dimension_semantics<parallel>, #tpu.dimension_semantics<parallel>, #tpu.dimension_semantics<arbitrary>], iteration_bounds = array<i64: 1, 1, 1>, scalar_prefetch = 0 : i64, scratch_operands = 1 : i64, tpu.core_type = #tpu.core_type<tc>, window_params = [{transform_indices = @transform_0, window_bounds = array<i64: 128, 128>}, {transform_indices = @transform_1, window_bounds = array<i64: 128, 128>}, {transform_indices = @transform_2, window_bounds = array<i64: 1, 128>}, {transform_indices = @transform_3, window_bounds = array<i64: 128, 128>}]} {
    %c0_i32 = arith.constant 0 : i32
    %0 = arith.cmpi eq, %arg2, %c0_i32 : i32
    %1 = arith.extui %0 : i1 to i32
    %c0_i32_0 = arith.constant 0 : i32
    %2 = arith.cmpi ne, %1, %c0_i32_0 : i32
    scf.if %2 {
      %cst_10 = arith.constant 0.000000e+00 : f32
      %12 = vector.broadcast %cst_10 : f32 to vector<128x128xf32>
      %c0_11 = arith.constant 0 : index
      %c0_12 = arith.constant 0 : index
      %13 = vector.load %arg7[%c0_11, %c0_12] : memref<128x128xf32, #tpu.memory_space<vmem>>, vector<128x128xf32>
      tpu.vector_store %arg7[%c0_11, %c0_12], %12 {strides = array<i32>} : memref<128x128xf32, #tpu.memory_space<vmem>>, vector<128x128xf32>,
    } else {
    }
    %c0 = arith.constant 0 : index
    %c0_1 = arith.constant 0 : index
    %3 = vector.load %arg7[%c0, %c0_1] : memref<128x128xf32, #tpu.memory_space<vmem>>, vector<128x128xf32>
    %c0_2 = arith.constant 0 : index
    %c0_3 = arith.constant 0 : index
    %4 = vector.load %arg3[%c0_2, %c0_3] : memref<128x128xbf16, #tpu.memory_space<vmem>>, vector<128x128xbf16>
    %c0_4 = arith.constant 0 : index
    %c0_5 = arith.constant 0 : index
    %5 = vector.load %arg4[%c0_4, %c0_5] : memref<128x128xbf16, #tpu.memory_space<vmem>>, vector<128x128xbf16>
    %cst = arith.constant dense<0.000000e+00> : vector<128x128xf32>
    %6 = tpu.matmul %4, %5, %cst {dimension_numbers = #tpu.dot_dimension_numbers<[1], [0], [0], [1], [0, 0, 1, 1], [], []>} : vector<128x128xbf16>, vector<128x128xbf16>, vector<128x128xf32> -> vector<128x128xf32>
    %7 = arith.addf %3, %6 : vector<128x128xf32>
    %c0_6 = arith.constant 0 : index
    %c0_7 = arith.constant 0 : index
    %8 = vector.load %arg7[%c0_6, %c0_7] : memref<128x128xf32, #tpu.memory_space<vmem>>, vector<128x128xf32>
    tpu.vector_store %arg7[%c0_6, %c0_7], %7 {strides = array<i32>} : memref<128x128xf32, #tpu.memory_space<vmem>>, vector<128x128xf32>,
    %c0_i32_8 = arith.constant 0 : i32
    %9 = arith.cmpi eq, %arg2, %c0_i32_8 : i32
    %10 = arith.extui %9 : i1 to i32
    %c0_i32_9 = arith.constant 0 : i32
    %11 = arith.cmpi ne, %10, %c0_i32_9 : i32
    scf.if %11 {
      %c0_10 = arith.constant 0 : index
      %c0_11 = arith.constant 0 : index
      %12 = vector.load %arg7[%c0_10, %c0_11] : memref<128x128xf32, #tpu.memory_space<vmem>>, vector<128x128xf32>
      %c0_12 = arith.constant 0 : index
      %c0_13 = arith.constant 0 : index
      %13 = vector.load %arg5[%c0_12, %c0_13] : memref<1x128xf32, #tpu.memory_space<vmem>>, vector<1x128xf32>
      %14 = vector.broadcast %13 : vector<1x128xf32> to vector<128x128xf32>
      %15 = arith.addf %12, %14 : vector<128x128xf32>
      %cst_14 = arith.constant 0.000000e+00 : f32
      %16 = vector.broadcast %cst_14 : f32 to vector<128x128xf32>
      %17 = arith.maximumf %15, %16 : vector<128x128xf32>
      %c0_15 = arith.constant 0 : index
      %c0_16 = arith.constant 0 : index
      %18 = vector.load %arg6[%c0_15, %c0_16] : memref<128x128xf32, #tpu.memory_space<vmem>>, vector<128x128xf32>
      tpu.vector_store %arg6[%c0_15, %c0_16], %17 {strides = array<i32>} : memref<128x128xf32, #tpu.memory_space<vmem>>, vector<128x128xf32>,
    } else {
    }
    return
  }
  func.func @transform_0(%arg0: i32, %arg1: i32, %arg2: i32) -> (i32, i32) {
    %c0_i32 = arith.constant 0 : i32
    return %arg0, %arg2 : i32, i32
  }
  func.func @transform_1(%arg0: i32, %arg1: i32, %arg2: i32) -> (i32, i32) {
    %c0_i32 = arith.constant 0 : i32
    return %arg2, %arg1 : i32, i32
  }
  func.func @transform_2(%arg0: i32, %arg1: i32, %arg2: i32) -> (i32, i32) {
    %c0_i32 = arith.constant 0 : i32
    %c0_i32_0 = arith.constant 0 : i32
    return %c0_i32, %arg1 : i32, i32
  }
  func.func @transform_3(%arg0: i32, %arg1: i32, %arg2: i32) -> (i32, i32) {
    %c0_i32 = arith.constant 0 : i32
    return %arg0, %arg1 : i32, i32
  }
}

module attributes {stable_mosaic.version = 11 : i64} {
  func.func @_mm_kernel(%arg0: i32, %arg1: i32, %arg2: i32, %arg3: memref<128x128xbf16, #tpu.memory_space<vmem>>, %arg4: memref<128x128xbf16, #tpu.memory_space<vmem>>, %arg5: memref<1x128xf32, #tpu.memory_space<vmem>>, %arg6: memref<128x128xf32, #tpu.memory_space<vmem>>, %arg7: memref<128x128xf32, #tpu.memory_space<vmem>>) attributes {dimension_semantics = [#tpu.dimension_semantics<parallel>, #tpu.dimension_semantics<parallel>, #tpu.dimension_semantics<arbitrary>], iteration_bounds = array<i64: 1, 1, 5>, scalar_prefetch = 0 : i64, scratch_operands = 1 : i64, tpu.core_type = #tpu.core_type<tc>, window_params = [{transform_indices = @transform_0, window_bounds = array<i64: 128, 128>}, {transform_indices = @transform_1, window_bounds = array<i64: 128, 128>}, {transform_indices = @transform_2, window_bounds = array<i64: 1, 128>}, {transform_indices = @transform_3, window_bounds = array<i64: 128, 128>}]} {
    %c0_i32 = arith.constant 0 : i32
    %0 = arith.cmpi eq, %arg2, %c0_i32 : i32
    %1 = arith.extui %0 : i1 to i32
    %c0_i32_0 = arith.constant 0 : i32
    %2 = arith.cmpi ne, %1, %c0_i32_0 : i32
    scf.if %2 {
      %cst_9 = arith.constant 0.000000e+00 : f32
      %12 = vector.broadcast %cst_9 : f32 to vector<128x128xf32>
      %c0_10 = arith.constant 0 : index
      %c0_11 = arith.constant 0 : index
      %13 = vector.load %arg7[%c0_10, %c0_11] : memref<128x128xf32, #tpu.memory_space<vmem>>, vector<128x128xf32>
      tpu.vector_store %arg7[%c0_10, %c0_11], %12 {strides = array<i32>} : memref<128x128xf32, #tpu.memory_space<vmem>>, vector<128x128xf32>,
    } else {
    }
    %c0 = arith.constant 0 : index
    %c0_1 = arith.constant 0 : index
    %3 = vector.load %arg7[%c0, %c0_1] : memref<128x128xf32, #tpu.memory_space<vmem>>, vector<128x128xf32>
    %c0_2 = arith.constant 0 : index
    %c0_3 = arith.constant 0 : index
    %4 = vector.load %arg3[%c0_2, %c0_3] : memref<128x128xbf16, #tpu.memory_space<vmem>>, vector<128x128xbf16>
    %c0_4 = arith.constant 0 : index
    %c0_5 = arith.constant 0 : index
    %5 = vector.load %arg4[%c0_4, %c0_5] : memref<128x128xbf16, #tpu.memory_space<vmem>>, vector<128x128xbf16>
    %cst = arith.constant dense<0.000000e+00> : vector<128x128xf32>
    %6 = tpu.matmul %4, %5, %cst {dimension_numbers = #tpu.dot_dimension_numbers<[1], [0], [0], [1], [0, 0, 1, 1], [], []>} : vector<128x128xbf16>, vector<128x128xbf16>, vector<128x128xf32> -> vector<128x128xf32>
    %7 = arith.addf %3, %6 : vector<128x128xf32>
    %c0_6 = arith.constant 0 : index
    %c0_7 = arith.constant 0 : index
    %8 = vector.load %arg7[%c0_6, %c0_7] : memref<128x128xf32, #tpu.memory_space<vmem>>, vector<128x128xf32>
    tpu.vector_store %arg7[%c0_6, %c0_7], %7 {strides = array<i32>} : memref<128x128xf32, #tpu.memory_space<vmem>>, vector<128x128xf32>,
    %c4_i32 = arith.constant 4 : i32
    %9 = arith.cmpi eq, %arg2, %c4_i32 : i32
    %10 = arith.extui %9 : i1 to i32
    %c0_i32_8 = arith.constant 0 : i32
    %11 = arith.cmpi ne, %10, %c0_i32_8 : i32
    scf.if %11 {
      %c0_9 = arith.constant 0 : index
      %c0_10 = arith.constant 0 : index
      %12 = vector.load %arg7[%c0_9, %c0_10] : memref<128x128xf32, #tpu.memory_space<vmem>>, vector<128x128xf32>
      %c0_11 = arith.constant 0 : index
      %c0_12 = arith.constant 0 : index
      %13 = vector.load %arg5[%c0_11, %c0_12] : memref<1x128xf32, #tpu.memory_space<vmem>>, vector<1x128xf32>
      %14 = vector.broadcast %13 : vector<1x128xf32> to vector<128x128xf32>
      %15 = arith.addf %12, %14 : vector<128x128xf32>
      %cst_13 = arith.constant 0.000000e+00 : f32
      %16 = vector.broadcast %cst_13 : f32 to vector<128x128xf32>
      %17 = arith.maximumf %15, %16 : vector<128x128xf32>
      %c0_14 = arith.constant 0 : index
      %c0_15 = arith.constant 0 : index
      %18 = vector.load %arg6[%c0_14, %c0_15] : memref<128x128xf32, #tpu.memory_space<vmem>>, vector<128x128xf32>
      tpu.vector_store %arg6[%c0_14, %c0_15], %17 {strides = array<i32>} : memref<128x128xf32, #tpu.memory_space<vmem>>, vector<128x128xf32>,
    } else {
    }
    return
  }
  func.func @transform_0(%arg0: i32, %arg1: i32, %arg2: i32) -> (i32, i32) {
    %c0_i32 = arith.constant 0 : i32
    return %arg0, %arg2 : i32, i32
  }
  func.func @transform_1(%arg0: i32, %arg1: i32, %arg2: i32) -> (i32, i32) {
    %c0_i32 = arith.constant 0 : i32
    return %arg2, %arg1 : i32, i32
  }
  func.func @transform_2(%arg0: i32, %arg1: i32, %arg2: i32) -> (i32, i32) {
    %c0_i32 = arith.constant 0 : i32
    %c0_i32_0 = arith.constant 0 : i32
    return %c0_i32, %arg1 : i32, i32
  }
  func.func @transform_3(%arg0: i32, %arg1: i32, %arg2: i32) -> (i32, i32) {
    %c0_i32 = arith.constant 0 : i32
    return %arg0, %arg1 : i32, i32
  }
}

module attributes {stable_mosaic.version = 11 : i64} {
  func.func @_mm_kernel(%arg0: i32, %arg1: i32, %arg2: i32, %arg3: memref<128x128xbf16, #tpu.memory_space<vmem>>, %arg4: memref<128x256xbf16, #tpu.memory_space<vmem>>, %arg5: memref<1x256xf32, #tpu.memory_space<vmem>>, %arg6: memref<128x256xf32, #tpu.memory_space<vmem>>, %arg7: memref<128x256xf32, #tpu.memory_space<vmem>>) attributes {dimension_semantics = [#tpu.dimension_semantics<parallel>, #tpu.dimension_semantics<parallel>, #tpu.dimension_semantics<arbitrary>], iteration_bounds = array<i64: 1, 1, 1>, scalar_prefetch = 0 : i64, scratch_operands = 1 : i64, tpu.core_type = #tpu.core_type<tc>, window_params = [{transform_indices = @transform_0, window_bounds = array<i64: 128, 128>}, {transform_indices = @transform_1, window_bounds = array<i64: 128, 256>}, {transform_indices = @transform_2, window_bounds = array<i64: 1, 256>}, {transform_indices = @transform_3, window_bounds = array<i64: 128, 256>}]} {
    %c0_i32 = arith.constant 0 : i32
    %0 = arith.cmpi eq, %arg2, %c0_i32 : i32
    %1 = arith.extui %0 : i1 to i32
    %c0_i32_0 = arith.constant 0 : i32
    %2 = arith.cmpi ne, %1, %c0_i32_0 : i32
    scf.if %2 {
      %cst_10 = arith.constant 0.000000e+00 : f32
      %12 = vector.broadcast %cst_10 : f32 to vector<128x256xf32>
      %c0_11 = arith.constant 0 : index
      %c0_12 = arith.constant 0 : index
      %13 = vector.load %arg7[%c0_11, %c0_12] : memref<128x256xf32, #tpu.memory_space<vmem>>, vector<128x256xf32>
      tpu.vector_store %arg7[%c0_11, %c0_12], %12 {strides = array<i32>} : memref<128x256xf32, #tpu.memory_space<vmem>>, vector<128x256xf32>,
    } else {
    }
    %c0 = arith.constant 0 : index
    %c0_1 = arith.constant 0 : index
    %3 = vector.load %arg7[%c0, %c0_1] : memref<128x256xf32, #tpu.memory_space<vmem>>, vector<128x256xf32>
    %c0_2 = arith.constant 0 : index
    %c0_3 = arith.constant 0 : index
    %4 = vector.load %arg3[%c0_2, %c0_3] : memref<128x128xbf16, #tpu.memory_space<vmem>>, vector<128x128xbf16>
    %c0_4 = arith.constant 0 : index
    %c0_5 = arith.constant 0 : index
    %5 = vector.load %arg4[%c0_4, %c0_5] : memref<128x256xbf16, #tpu.memory_space<vmem>>, vector<128x256xbf16>
    %cst = arith.constant dense<0.000000e+00> : vector<128x256xf32>
    %6 = tpu.matmul %4, %5, %cst {dimension_numbers = #tpu.dot_dimension_numbers<[1], [0], [0], [1], [0, 0, 1, 1], [], []>} : vector<128x128xbf16>, vector<128x256xbf16>, vector<128x256xf32> -> vector<128x256xf32>
    %7 = arith.addf %3, %6 : vector<128x256xf32>
    %c0_6 = arith.constant 0 : index
    %c0_7 = arith.constant 0 : index
    %8 = vector.load %arg7[%c0_6, %c0_7] : memref<128x256xf32, #tpu.memory_space<vmem>>, vector<128x256xf32>
    tpu.vector_store %arg7[%c0_6, %c0_7], %7 {strides = array<i32>} : memref<128x256xf32, #tpu.memory_space<vmem>>, vector<128x256xf32>,
    %c0_i32_8 = arith.constant 0 : i32
    %9 = arith.cmpi eq, %arg2, %c0_i32_8 : i32
    %10 = arith.extui %9 : i1 to i32
    %c0_i32_9 = arith.constant 0 : i32
    %11 = arith.cmpi ne, %10, %c0_i32_9 : i32
    scf.if %11 {
      %c0_10 = arith.constant 0 : index
      %c0_11 = arith.constant 0 : index
      %12 = vector.load %arg7[%c0_10, %c0_11] : memref<128x256xf32, #tpu.memory_space<vmem>>, vector<128x256xf32>
      %c0_12 = arith.constant 0 : index
      %c0_13 = arith.constant 0 : index
      %13 = vector.load %arg5[%c0_12, %c0_13] : memref<1x256xf32, #tpu.memory_space<vmem>>, vector<1x256xf32>
      %14 = vector.broadcast %13 : vector<1x256xf32> to vector<128x256xf32>
      %15 = arith.addf %12, %14 : vector<128x256xf32>
      %c0_14 = arith.constant 0 : index
      %c0_15 = arith.constant 0 : index
      %16 = vector.load %arg6[%c0_14, %c0_15] : memref<128x256xf32, #tpu.memory_space<vmem>>, vector<128x256xf32>
      tpu.vector_store %arg6[%c0_14, %c0_15], %15 {strides = array<i32>} : memref<128x256xf32, #tpu.memory_space<vmem>>, vector<128x256xf32>,
    } else {
    }
    return
  }
  func.func @transform_0(%arg0: i32, %arg1: i32, %arg2: i32) -> (i32, i32) {
    %c0_i32 = arith.constant 0 : i32
    return %arg0, %arg2 : i32, i32
  }
  func.func @transform_1(%arg0: i32, %arg1: i32, %arg2: i32) -> (i32, i32) {
    %c0_i32 = arith.constant 0 : i32
    return %arg2, %arg1 : i32, i32
  }
  func.func @transform_2(%arg0: i32, %arg1: i32, %arg2: i32) -> (i32, i32) {
    %c0_i32 = arith.constant 0 : i32
    %c0_i32_0 = arith.constant 0 : i32
    return %c0_i32, %arg1 : i32, i32
  }
  func.func @transform_3(%arg0: i32, %arg1: i32, %arg2: i32) -> (i32, i32) {
    %c0_i32 = arith.constant 0 : i32
    return %arg0, %arg1 : i32, i32
  }
}

module attributes {stable_mosaic.version = 11 : i64} {
  func.func @_mm_res_kernel(%arg0: i32, %arg1: i32, %arg2: i32, %arg3: memref<128x128xbf16, #tpu.memory_space<vmem>>, %arg4: memref<128x256xbf16, #tpu.memory_space<vmem>>, %arg5: memref<1x256xf32, #tpu.memory_space<vmem>>, %arg6: memref<128x256xf32, #tpu.memory_space<vmem>>, %arg7: memref<128x256xf32, #tpu.memory_space<vmem>>, %arg8: memref<128x256xf32, #tpu.memory_space<vmem>>) attributes {dimension_semantics = [#tpu.dimension_semantics<parallel>, #tpu.dimension_semantics<parallel>, #tpu.dimension_semantics<arbitrary>], iteration_bounds = array<i64: 1, 1, 1>, scalar_prefetch = 0 : i64, scratch_operands = 1 : i64, tpu.core_type = #tpu.core_type<tc>, window_params = [{transform_indices = @transform_0, window_bounds = array<i64: 128, 128>}, {transform_indices = @transform_1, window_bounds = array<i64: 128, 256>}, {transform_indices = @transform_2, window_bounds = array<i64: 1, 256>}, {transform_indices = @transform_3, window_bounds = array<i64: 128, 256>}, {transform_indices = @transform_4, window_bounds = array<i64: 128, 256>}]} {
    %c0_i32 = arith.constant 0 : i32
    %0 = arith.cmpi eq, %arg2, %c0_i32 : i32
    %1 = arith.extui %0 : i1 to i32
    %c0_i32_0 = arith.constant 0 : i32
    %2 = arith.cmpi ne, %1, %c0_i32_0 : i32
    scf.if %2 {
      %cst_10 = arith.constant 0.000000e+00 : f32
      %12 = vector.broadcast %cst_10 : f32 to vector<128x256xf32>
      %c0_11 = arith.constant 0 : index
      %c0_12 = arith.constant 0 : index
      %13 = vector.load %arg8[%c0_11, %c0_12] : memref<128x256xf32, #tpu.memory_space<vmem>>, vector<128x256xf32>
      tpu.vector_store %arg8[%c0_11, %c0_12], %12 {strides = array<i32>} : memref<128x256xf32, #tpu.memory_space<vmem>>, vector<128x256xf32>,
    } else {
    }
    %c0 = arith.constant 0 : index
    %c0_1 = arith.constant 0 : index
    %3 = vector.load %arg8[%c0, %c0_1] : memref<128x256xf32, #tpu.memory_space<vmem>>, vector<128x256xf32>
    %c0_2 = arith.constant 0 : index
    %c0_3 = arith.constant 0 : index
    %4 = vector.load %arg3[%c0_2, %c0_3] : memref<128x128xbf16, #tpu.memory_space<vmem>>, vector<128x128xbf16>
    %c0_4 = arith.constant 0 : index
    %c0_5 = arith.constant 0 : index
    %5 = vector.load %arg4[%c0_4, %c0_5] : memref<128x256xbf16, #tpu.memory_space<vmem>>, vector<128x256xbf16>
    %cst = arith.constant dense<0.000000e+00> : vector<128x256xf32>
    %6 = tpu.matmul %4, %5, %cst {dimension_numbers = #tpu.dot_dimension_numbers<[1], [0], [0], [1], [0, 0, 1, 1], [], []>} : vector<128x128xbf16>, vector<128x256xbf16>, vector<128x256xf32> -> vector<128x256xf32>
    %7 = arith.addf %3, %6 : vector<128x256xf32>
    %c0_6 = arith.constant 0 : index
    %c0_7 = arith.constant 0 : index
    %8 = vector.load %arg8[%c0_6, %c0_7] : memref<128x256xf32, #tpu.memory_space<vmem>>, vector<128x256xf32>
    tpu.vector_store %arg8[%c0_6, %c0_7], %7 {strides = array<i32>} : memref<128x256xf32, #tpu.memory_space<vmem>>, vector<128x256xf32>,
    %c0_i32_8 = arith.constant 0 : i32
    %9 = arith.cmpi eq, %arg2, %c0_i32_8 : i32
    %10 = arith.extui %9 : i1 to i32
    %c0_i32_9 = arith.constant 0 : i32
    %11 = arith.cmpi ne, %10, %c0_i32_9 : i32
    scf.if %11 {
      %c0_10 = arith.constant 0 : index
      %c0_11 = arith.constant 0 : index
      %12 = vector.load %arg8[%c0_10, %c0_11] : memref<128x256xf32, #tpu.memory_space<vmem>>, vector<128x256xf32>
      %c0_12 = arith.constant 0 : index
      %c0_13 = arith.constant 0 : index
      %13 = vector.load %arg5[%c0_12, %c0_13] : memref<1x256xf32, #tpu.memory_space<vmem>>, vector<1x256xf32>
      %14 = vector.broadcast %13 : vector<1x256xf32> to vector<128x256xf32>
      %15 = arith.addf %12, %14 : vector<128x256xf32>
      %c0_14 = arith.constant 0 : index
      %c0_15 = arith.constant 0 : index
      %16 = vector.load %arg6[%c0_14, %c0_15] : memref<128x256xf32, #tpu.memory_space<vmem>>, vector<128x256xf32>
      %17 = arith.addf %15, %16 : vector<128x256xf32>
      %cst_16 = arith.constant 0.000000e+00 : f32
      %18 = vector.broadcast %cst_16 : f32 to vector<128x256xf32>
      %19 = arith.maximumf %17, %18 : vector<128x256xf32>
      %c0_17 = arith.constant 0 : index
      %c0_18 = arith.constant 0 : index
      %20 = vector.load %arg7[%c0_17, %c0_18] : memref<128x256xf32, #tpu.memory_space<vmem>>, vector<128x256xf32>
      tpu.vector_store %arg7[%c0_17, %c0_18], %19 {strides = array<i32>} : memref<128x256xf32, #tpu.memory_space<vmem>>, vector<128x256xf32>,
    } else {
    }
    return
  }
  func.func @transform_0(%arg0: i32, %arg1: i32, %arg2: i32) -> (i32, i32) {
    %c0_i32 = arith.constant 0 : i32
    return %arg0, %arg2 : i32, i32
  }
  func.func @transform_1(%arg0: i32, %arg1: i32, %arg2: i32) -> (i32, i32) {
    %c0_i32 = arith.constant 0 : i32
    return %arg2, %arg1 : i32, i32
  }
  func.func @transform_2(%arg0: i32, %arg1: i32, %arg2: i32) -> (i32, i32) {
    %c0_i32 = arith.constant 0 : i32
    %c0_i32_0 = arith.constant 0 : i32
    return %c0_i32, %arg1 : i32, i32
  }
  func.func @transform_3(%arg0: i32, %arg1: i32, %arg2: i32) -> (i32, i32) {
    %c0_i32 = arith.constant 0 : i32
    return %arg0, %arg1 : i32, i32
  }
  func.func @transform_4(%arg0: i32, %arg1: i32, %arg2: i32) -> (i32, i32) {
    %c0_i32 = arith.constant 0 : i32
    return %arg0, %arg1 : i32, i32
  }
}

module attributes {stable_mosaic.version = 11 : i64} {
  func.func @_mm_kernel(%arg0: i32, %arg1: i32, %arg2: i32, %arg3: memref<128x256xbf16, #tpu.memory_space<vmem>>, %arg4: memref<256x128xbf16, #tpu.memory_space<vmem>>, %arg5: memref<1x128xf32, #tpu.memory_space<vmem>>, %arg6: memref<128x128xf32, #tpu.memory_space<vmem>>, %arg7: memref<128x128xf32, #tpu.memory_space<vmem>>) attributes {dimension_semantics = [#tpu.dimension_semantics<parallel>, #tpu.dimension_semantics<parallel>, #tpu.dimension_semantics<arbitrary>], iteration_bounds = array<i64: 1, 1, 1>, scalar_prefetch = 0 : i64, scratch_operands = 1 : i64, tpu.core_type = #tpu.core_type<tc>, window_params = [{transform_indices = @transform_0, window_bounds = array<i64: 128, 256>}, {transform_indices = @transform_1, window_bounds = array<i64: 256, 128>}, {transform_indices = @transform_2, window_bounds = array<i64: 1, 128>}, {transform_indices = @transform_3, window_bounds = array<i64: 128, 128>}]} {
    %c0_i32 = arith.constant 0 : i32
    %0 = arith.cmpi eq, %arg2, %c0_i32 : i32
    %1 = arith.extui %0 : i1 to i32
    %c0_i32_0 = arith.constant 0 : i32
    %2 = arith.cmpi ne, %1, %c0_i32_0 : i32
    scf.if %2 {
      %cst_10 = arith.constant 0.000000e+00 : f32
      %12 = vector.broadcast %cst_10 : f32 to vector<128x128xf32>
      %c0_11 = arith.constant 0 : index
      %c0_12 = arith.constant 0 : index
      %13 = vector.load %arg7[%c0_11, %c0_12] : memref<128x128xf32, #tpu.memory_space<vmem>>, vector<128x128xf32>
      tpu.vector_store %arg7[%c0_11, %c0_12], %12 {strides = array<i32>} : memref<128x128xf32, #tpu.memory_space<vmem>>, vector<128x128xf32>,
    } else {
    }
    %c0 = arith.constant 0 : index
    %c0_1 = arith.constant 0 : index
    %3 = vector.load %arg7[%c0, %c0_1] : memref<128x128xf32, #tpu.memory_space<vmem>>, vector<128x128xf32>
    %c0_2 = arith.constant 0 : index
    %c0_3 = arith.constant 0 : index
    %4 = vector.load %arg3[%c0_2, %c0_3] : memref<128x256xbf16, #tpu.memory_space<vmem>>, vector<128x256xbf16>
    %c0_4 = arith.constant 0 : index
    %c0_5 = arith.constant 0 : index
    %5 = vector.load %arg4[%c0_4, %c0_5] : memref<256x128xbf16, #tpu.memory_space<vmem>>, vector<256x128xbf16>
    %cst = arith.constant dense<0.000000e+00> : vector<128x128xf32>
    %6 = tpu.matmul %4, %5, %cst {dimension_numbers = #tpu.dot_dimension_numbers<[1], [0], [0], [1], [0, 0, 1, 1], [], []>} : vector<128x256xbf16>, vector<256x128xbf16>, vector<128x128xf32> -> vector<128x128xf32>
    %7 = arith.addf %3, %6 : vector<128x128xf32>
    %c0_6 = arith.constant 0 : index
    %c0_7 = arith.constant 0 : index
    %8 = vector.load %arg7[%c0_6, %c0_7] : memref<128x128xf32, #tpu.memory_space<vmem>>, vector<128x128xf32>
    tpu.vector_store %arg7[%c0_6, %c0_7], %7 {strides = array<i32>} : memref<128x128xf32, #tpu.memory_space<vmem>>, vector<128x128xf32>,
    %c0_i32_8 = arith.constant 0 : i32
    %9 = arith.cmpi eq, %arg2, %c0_i32_8 : i32
    %10 = arith.extui %9 : i1 to i32
    %c0_i32_9 = arith.constant 0 : i32
    %11 = arith.cmpi ne, %10, %c0_i32_9 : i32
    scf.if %11 {
      %c0_10 = arith.constant 0 : index
      %c0_11 = arith.constant 0 : index
      %12 = vector.load %arg7[%c0_10, %c0_11] : memref<128x128xf32, #tpu.memory_space<vmem>>, vector<128x128xf32>
      %c0_12 = arith.constant 0 : index
      %c0_13 = arith.constant 0 : index
      %13 = vector.load %arg5[%c0_12, %c0_13] : memref<1x128xf32, #tpu.memory_space<vmem>>, vector<1x128xf32>
      %14 = vector.broadcast %13 : vector<1x128xf32> to vector<128x128xf32>
      %15 = arith.addf %12, %14 : vector<128x128xf32>
      %cst_14 = arith.constant 0.000000e+00 : f32
      %16 = vector.broadcast %cst_14 : f32 to vector<128x128xf32>
      %17 = arith.maximumf %15, %16 : vector<128x128xf32>
      %c0_15 = arith.constant 0 : index
      %c0_16 = arith.constant 0 : index
      %18 = vector.load %arg6[%c0_15, %c0_16] : memref<128x128xf32, #tpu.memory_space<vmem>>, vector<128x128xf32>
      tpu.vector_store %arg6[%c0_15, %c0_16], %17 {strides = array<i32>} : memref<128x128xf32, #tpu.memory_space<vmem>>, vector<128x128xf32>,
    } else {
    }
    return
  }
  func.func @transform_0(%arg0: i32, %arg1: i32, %arg2: i32) -> (i32, i32) {
    %c0_i32 = arith.constant 0 : i32
    return %arg0, %arg2 : i32, i32
  }
  func.func @transform_1(%arg0: i32, %arg1: i32, %arg2: i32) -> (i32, i32) {
    %c0_i32 = arith.constant 0 : i32
    return %arg2, %arg1 : i32, i32
  }
  func.func @transform_2(%arg0: i32, %arg1: i32, %arg2: i32) -> (i32, i32) {
    %c0_i32 = arith.constant 0 : i32
    %c0_i32_0 = arith.constant 0 : i32
    return %c0_i32, %arg1 : i32, i32
  }
  func.func @transform_3(%arg0: i32, %arg1: i32, %arg2: i32) -> (i32, i32) {
    %c0_i32 = arith.constant 0 : i32
    return %arg0, %arg1 : i32, i32
  }
}

module attributes {stable_mosaic.version = 11 : i64} {
  func.func @_mm_kernel(%arg0: i32, %arg1: i32, %arg2: i32, %arg3: memref<32x384xbf16, #tpu.memory_space<vmem>>, %arg4: memref<384x128xbf16, #tpu.memory_space<vmem>>, %arg5: memref<1x128xf32, #tpu.memory_space<vmem>>, %arg6: memref<32x128xf32, #tpu.memory_space<vmem>>, %arg7: memref<32x128xf32, #tpu.memory_space<vmem>>) attributes {dimension_semantics = [#tpu.dimension_semantics<parallel>, #tpu.dimension_semantics<parallel>, #tpu.dimension_semantics<arbitrary>], iteration_bounds = array<i64: 1, 1, 3>, scalar_prefetch = 0 : i64, scratch_operands = 1 : i64, tpu.core_type = #tpu.core_type<tc>, window_params = [{transform_indices = @transform_0, window_bounds = array<i64: 32, 384>}, {transform_indices = @transform_1, window_bounds = array<i64: 384, 128>}, {transform_indices = @transform_2, window_bounds = array<i64: 1, 128>}, {transform_indices = @transform_3, window_bounds = array<i64: 32, 128>}]} {
    %c0_i32 = arith.constant 0 : i32
    %0 = arith.cmpi eq, %arg2, %c0_i32 : i32
    %1 = arith.extui %0 : i1 to i32
    %c0_i32_0 = arith.constant 0 : i32
    %2 = arith.cmpi ne, %1, %c0_i32_0 : i32
    scf.if %2 {
      %cst_9 = arith.constant 0.000000e+00 : f32
      %12 = vector.broadcast %cst_9 : f32 to vector<32x128xf32>
      %c0_10 = arith.constant 0 : index
      %c0_11 = arith.constant 0 : index
      %13 = vector.load %arg7[%c0_10, %c0_11] : memref<32x128xf32, #tpu.memory_space<vmem>>, vector<32x128xf32>
      tpu.vector_store %arg7[%c0_10, %c0_11], %12 {strides = array<i32>} : memref<32x128xf32, #tpu.memory_space<vmem>>, vector<32x128xf32>,
    } else {
    }
    %c0 = arith.constant 0 : index
    %c0_1 = arith.constant 0 : index
    %3 = vector.load %arg7[%c0, %c0_1] : memref<32x128xf32, #tpu.memory_space<vmem>>, vector<32x128xf32>
    %c0_2 = arith.constant 0 : index
    %c0_3 = arith.constant 0 : index
    %4 = vector.load %arg3[%c0_2, %c0_3] : memref<32x384xbf16, #tpu.memory_space<vmem>>, vector<32x384xbf16>
    %c0_4 = arith.constant 0 : index
    %c0_5 = arith.constant 0 : index
    %5 = vector.load %arg4[%c0_4, %c0_5] : memref<384x128xbf16, #tpu.memory_space<vmem>>, vector<384x128xbf16>
    %cst = arith.constant dense<0.000000e+00> : vector<32x128xf32>
    %6 = tpu.matmul %4, %5, %cst {dimension_numbers = #tpu.dot_dimension_numbers<[1], [0], [0], [1], [0, 0, 1, 1], [], []>} : vector<32x384xbf16>, vector<384x128xbf16>, vector<32x128xf32> -> vector<32x128xf32>
    %7 = arith.addf %3, %6 : vector<32x128xf32>
    %c0_6 = arith.constant 0 : index
    %c0_7 = arith.constant 0 : index
    %8 = vector.load %arg7[%c0_6, %c0_7] : memref<32x128xf32, #tpu.memory_space<vmem>>, vector<32x128xf32>
    tpu.vector_store %arg7[%c0_6, %c0_7], %7 {strides = array<i32>} : memref<32x128xf32, #tpu.memory_space<vmem>>, vector<32x128xf32>,
    %c2_i32 = arith.constant 2 : i32
    %9 = arith.cmpi eq, %arg2, %c2_i32 : i32
    %10 = arith.extui %9 : i1 to i32
    %c0_i32_8 = arith.constant 0 : i32
    %11 = arith.cmpi ne, %10, %c0_i32_8 : i32
    scf.if %11 {
      %c0_9 = arith.constant 0 : index
      %c0_10 = arith.constant 0 : index
      %12 = vector.load %arg7[%c0_9, %c0_10] : memref<32x128xf32, #tpu.memory_space<vmem>>, vector<32x128xf32>
      %c0_11 = arith.constant 0 : index
      %c0_12 = arith.constant 0 : index
      %13 = vector.load %arg5[%c0_11, %c0_12] : memref<1x128xf32, #tpu.memory_space<vmem>>, vector<1x128xf32>
      %14 = vector.broadcast %13 : vector<1x128xf32> to vector<32x128xf32>
      %15 = arith.addf %12, %14 : vector<32x128xf32>
      %cst_13 = arith.constant 0.000000e+00 : f32
      %16 = vector.broadcast %cst_13 : f32 to vector<32x128xf32>
      %17 = arith.maximumf %15, %16 : vector<32x128xf32>
      %c0_14 = arith.constant 0 : index
      %c0_15 = arith.constant 0 : index
      %18 = vector.load %arg6[%c0_14, %c0_15] : memref<32x128xf32, #tpu.memory_space<vmem>>, vector<32x128xf32>
      tpu.vector_store %arg6[%c0_14, %c0_15], %17 {strides = array<i32>} : memref<32x128xf32, #tpu.memory_space<vmem>>, vector<32x128xf32>,
    } else {
    }
    return
  }
  func.func @transform_0(%arg0: i32, %arg1: i32, %arg2: i32) -> (i32, i32) {
    %c0_i32 = arith.constant 0 : i32
    return %arg0, %arg2 : i32, i32
  }
  func.func @transform_1(%arg0: i32, %arg1: i32, %arg2: i32) -> (i32, i32) {
    %c0_i32 = arith.constant 0 : i32
    return %arg2, %arg1 : i32, i32
  }
  func.func @transform_2(%arg0: i32, %arg1: i32, %arg2: i32) -> (i32, i32) {
    %c0_i32 = arith.constant 0 : i32
    %c0_i32_0 = arith.constant 0 : i32
    return %c0_i32, %arg1 : i32, i32
  }
  func.func @transform_3(%arg0: i32, %arg1: i32, %arg2: i32) -> (i32, i32) {
    %c0_i32 = arith.constant 0 : i32
    return %arg0, %arg1 : i32, i32
  }
}

module attributes {stable_mosaic.version = 11 : i64} {
  func.func @_mm_kernel(%arg0: i32, %arg1: i32, %arg2: i32, %arg3: memref<32x256xbf16, #tpu.memory_space<vmem>>, %arg4: memref<256x256xbf16, #tpu.memory_space<vmem>>, %arg5: memref<1x256xf32, #tpu.memory_space<vmem>>, %arg6: memref<32x256xf32, #tpu.memory_space<vmem>>, %arg7: memref<32x256xf32, #tpu.memory_space<vmem>>) attributes {dimension_semantics = [#tpu.dimension_semantics<parallel>, #tpu.dimension_semantics<parallel>, #tpu.dimension_semantics<arbitrary>], iteration_bounds = array<i64: 1, 2, 1>, scalar_prefetch = 0 : i64, scratch_operands = 1 : i64, tpu.core_type = #tpu.core_type<tc>, window_params = [{transform_indices = @transform_0, window_bounds = array<i64: 32, 256>}, {transform_indices = @transform_1, window_bounds = array<i64: 256, 256>}, {transform_indices = @transform_2, window_bounds = array<i64: 1, 256>}, {transform_indices = @transform_3, window_bounds = array<i64: 32, 256>}]} {
    %c0_i32 = arith.constant 0 : i32
    %0 = arith.cmpi eq, %arg2, %c0_i32 : i32
    %1 = arith.extui %0 : i1 to i32
    %c0_i32_0 = arith.constant 0 : i32
    %2 = arith.cmpi ne, %1, %c0_i32_0 : i32
    scf.if %2 {
      %cst_10 = arith.constant 0.000000e+00 : f32
      %12 = vector.broadcast %cst_10 : f32 to vector<32x256xf32>
      %c0_11 = arith.constant 0 : index
      %c0_12 = arith.constant 0 : index
      %13 = vector.load %arg7[%c0_11, %c0_12] : memref<32x256xf32, #tpu.memory_space<vmem>>, vector<32x256xf32>
      tpu.vector_store %arg7[%c0_11, %c0_12], %12 {strides = array<i32>} : memref<32x256xf32, #tpu.memory_space<vmem>>, vector<32x256xf32>,
    } else {
    }
    %c0 = arith.constant 0 : index
    %c0_1 = arith.constant 0 : index
    %3 = vector.load %arg7[%c0, %c0_1] : memref<32x256xf32, #tpu.memory_space<vmem>>, vector<32x256xf32>
    %c0_2 = arith.constant 0 : index
    %c0_3 = arith.constant 0 : index
    %4 = vector.load %arg3[%c0_2, %c0_3] : memref<32x256xbf16, #tpu.memory_space<vmem>>, vector<32x256xbf16>
    %c0_4 = arith.constant 0 : index
    %c0_5 = arith.constant 0 : index
    %5 = vector.load %arg4[%c0_4, %c0_5] : memref<256x256xbf16, #tpu.memory_space<vmem>>, vector<256x256xbf16>
    %cst = arith.constant dense<0.000000e+00> : vector<32x256xf32>
    %6 = tpu.matmul %4, %5, %cst {dimension_numbers = #tpu.dot_dimension_numbers<[1], [0], [0], [1], [0, 0, 1, 1], [], []>} : vector<32x256xbf16>, vector<256x256xbf16>, vector<32x256xf32> -> vector<32x256xf32>
    %7 = arith.addf %3, %6 : vector<32x256xf32>
    %c0_6 = arith.constant 0 : index
    %c0_7 = arith.constant 0 : index
    %8 = vector.load %arg7[%c0_6, %c0_7] : memref<32x256xf32, #tpu.memory_space<vmem>>, vector<32x256xf32>
    tpu.vector_store %arg7[%c0_6, %c0_7], %7 {strides = array<i32>} : memref<32x256xf32, #tpu.memory_space<vmem>>, vector<32x256xf32>,
    %c0_i32_8 = arith.constant 0 : i32
    %9 = arith.cmpi eq, %arg2, %c0_i32_8 : i32
    %10 = arith.extui %9 : i1 to i32
    %c0_i32_9 = arith.constant 0 : i32
    %11 = arith.cmpi ne, %10, %c0_i32_9 : i32
    scf.if %11 {
      %c0_10 = arith.constant 0 : index
      %c0_11 = arith.constant 0 : index
      %12 = vector.load %arg7[%c0_10, %c0_11] : memref<32x256xf32, #tpu.memory_space<vmem>>, vector<32x256xf32>
      %c0_12 = arith.constant 0 : index
      %c0_13 = arith.constant 0 : index
      %13 = vector.load %arg5[%c0_12, %c0_13] : memref<1x256xf32, #tpu.memory_space<vmem>>, vector<1x256xf32>
      %14 = vector.broadcast %13 : vector<1x256xf32> to vector<32x256xf32>
      %15 = arith.addf %12, %14 : vector<32x256xf32>
      %c0_14 = arith.constant 0 : index
      %c0_15 = arith.constant 0 : index
      %16 = vector.load %arg6[%c0_14, %c0_15] : memref<32x256xf32, #tpu.memory_space<vmem>>, vector<32x256xf32>
      tpu.vector_store %arg6[%c0_14, %c0_15], %15 {strides = array<i32>} : memref<32x256xf32, #tpu.memory_space<vmem>>, vector<32x256xf32>,
    } else {
    }
    return
  }
  func.func @transform_0(%arg0: i32, %arg1: i32, %arg2: i32) -> (i32, i32) {
    %c0_i32 = arith.constant 0 : i32
    return %arg0, %arg2 : i32, i32
  }
  func.func @transform_1(%arg0: i32, %arg1: i32, %arg2: i32) -> (i32, i32) {
    %c0_i32 = arith.constant 0 : i32
    return %arg2, %arg1 : i32, i32
  }
  func.func @transform_2(%arg0: i32, %arg1: i32, %arg2: i32) -> (i32, i32) {
    %c0_i32 = arith.constant 0 : i32
    %c0_i32_0 = arith.constant 0 : i32
    return %c0_i32, %arg1 : i32, i32
  }
  func.func @transform_3(%arg0: i32, %arg1: i32, %arg2: i32) -> (i32, i32) {
    %c0_i32 = arith.constant 0 : i32
    return %arg0, %arg1 : i32, i32
  }
}

module attributes {stable_mosaic.version = 11 : i64} {
  func.func @_mm_res_kernel(%arg0: i32, %arg1: i32, %arg2: i32, %arg3: memref<32x128xbf16, #tpu.memory_space<vmem>>, %arg4: memref<128x256xbf16, #tpu.memory_space<vmem>>, %arg5: memref<1x256xf32, #tpu.memory_space<vmem>>, %arg6: memref<32x256xf32, #tpu.memory_space<vmem>>, %arg7: memref<32x256xf32, #tpu.memory_space<vmem>>, %arg8: memref<32x256xf32, #tpu.memory_space<vmem>>) attributes {dimension_semantics = [#tpu.dimension_semantics<parallel>, #tpu.dimension_semantics<parallel>, #tpu.dimension_semantics<arbitrary>], iteration_bounds = array<i64: 1, 2, 1>, scalar_prefetch = 0 : i64, scratch_operands = 1 : i64, tpu.core_type = #tpu.core_type<tc>, window_params = [{transform_indices = @transform_0, window_bounds = array<i64: 32, 128>}, {transform_indices = @transform_1, window_bounds = array<i64: 128, 256>}, {transform_indices = @transform_2, window_bounds = array<i64: 1, 256>}, {transform_indices = @transform_3, window_bounds = array<i64: 32, 256>}, {transform_indices = @transform_4, window_bounds = array<i64: 32, 256>}]} {
    %c0_i32 = arith.constant 0 : i32
    %0 = arith.cmpi eq, %arg2, %c0_i32 : i32
    %1 = arith.extui %0 : i1 to i32
    %c0_i32_0 = arith.constant 0 : i32
    %2 = arith.cmpi ne, %1, %c0_i32_0 : i32
    scf.if %2 {
      %cst_10 = arith.constant 0.000000e+00 : f32
      %12 = vector.broadcast %cst_10 : f32 to vector<32x256xf32>
      %c0_11 = arith.constant 0 : index
      %c0_12 = arith.constant 0 : index
      %13 = vector.load %arg8[%c0_11, %c0_12] : memref<32x256xf32, #tpu.memory_space<vmem>>, vector<32x256xf32>
      tpu.vector_store %arg8[%c0_11, %c0_12], %12 {strides = array<i32>} : memref<32x256xf32, #tpu.memory_space<vmem>>, vector<32x256xf32>,
    } else {
    }
    %c0 = arith.constant 0 : index
    %c0_1 = arith.constant 0 : index
    %3 = vector.load %arg8[%c0, %c0_1] : memref<32x256xf32, #tpu.memory_space<vmem>>, vector<32x256xf32>
    %c0_2 = arith.constant 0 : index
    %c0_3 = arith.constant 0 : index
    %4 = vector.load %arg3[%c0_2, %c0_3] : memref<32x128xbf16, #tpu.memory_space<vmem>>, vector<32x128xbf16>
    %c0_4 = arith.constant 0 : index
    %c0_5 = arith.constant 0 : index
    %5 = vector.load %arg4[%c0_4, %c0_5] : memref<128x256xbf16, #tpu.memory_space<vmem>>, vector<128x256xbf16>
    %cst = arith.constant dense<0.000000e+00> : vector<32x256xf32>
    %6 = tpu.matmul %4, %5, %cst {dimension_numbers = #tpu.dot_dimension_numbers<[1], [0], [0], [1], [0, 0, 1, 1], [], []>} : vector<32x128xbf16>, vector<128x256xbf16>, vector<32x256xf32> -> vector<32x256xf32>
    %7 = arith.addf %3, %6 : vector<32x256xf32>
    %c0_6 = arith.constant 0 : index
    %c0_7 = arith.constant 0 : index
    %8 = vector.load %arg8[%c0_6, %c0_7] : memref<32x256xf32, #tpu.memory_space<vmem>>, vector<32x256xf32>
    tpu.vector_store %arg8[%c0_6, %c0_7], %7 {strides = array<i32>} : memref<32x256xf32, #tpu.memory_space<vmem>>, vector<32x256xf32>,
    %c0_i32_8 = arith.constant 0 : i32
    %9 = arith.cmpi eq, %arg2, %c0_i32_8 : i32
    %10 = arith.extui %9 : i1 to i32
    %c0_i32_9 = arith.constant 0 : i32
    %11 = arith.cmpi ne, %10, %c0_i32_9 : i32
    scf.if %11 {
      %c0_10 = arith.constant 0 : index
      %c0_11 = arith.constant 0 : index
      %12 = vector.load %arg8[%c0_10, %c0_11] : memref<32x256xf32, #tpu.memory_space<vmem>>, vector<32x256xf32>
      %c0_12 = arith.constant 0 : index
      %c0_13 = arith.constant 0 : index
      %13 = vector.load %arg5[%c0_12, %c0_13] : memref<1x256xf32, #tpu.memory_space<vmem>>, vector<1x256xf32>
      %14 = vector.broadcast %13 : vector<1x256xf32> to vector<32x256xf32>
      %15 = arith.addf %12, %14 : vector<32x256xf32>
      %c0_14 = arith.constant 0 : index
      %c0_15 = arith.constant 0 : index
      %16 = vector.load %arg6[%c0_14, %c0_15] : memref<32x256xf32, #tpu.memory_space<vmem>>, vector<32x256xf32>
      %17 = arith.addf %15, %16 : vector<32x256xf32>
      %cst_16 = arith.constant 0.000000e+00 : f32
      %18 = vector.broadcast %cst_16 : f32 to vector<32x256xf32>
      %19 = arith.maximumf %17, %18 : vector<32x256xf32>
      %c0_17 = arith.constant 0 : index
      %c0_18 = arith.constant 0 : index
      %20 = vector.load %arg7[%c0_17, %c0_18] : memref<32x256xf32, #tpu.memory_space<vmem>>, vector<32x256xf32>
      tpu.vector_store %arg7[%c0_17, %c0_18], %19 {strides = array<i32>} : memref<32x256xf32, #tpu.memory_space<vmem>>, vector<32x256xf32>,
    } else {
    }
    return
  }
  func.func @transform_0(%arg0: i32, %arg1: i32, %arg2: i32) -> (i32, i32) {
    %c0_i32 = arith.constant 0 : i32
    return %arg0, %arg2 : i32, i32
  }
  func.func @transform_1(%arg0: i32, %arg1: i32, %arg2: i32) -> (i32, i32) {
    %c0_i32 = arith.constant 0 : i32
    return %arg2, %arg1 : i32, i32
  }
  func.func @transform_2(%arg0: i32, %arg1: i32, %arg2: i32) -> (i32, i32) {
    %c0_i32 = arith.constant 0 : i32
    %c0_i32_0 = arith.constant 0 : i32
    return %c0_i32, %arg1 : i32, i32
  }
  func.func @transform_3(%arg0: i32, %arg1: i32, %arg2: i32) -> (i32, i32) {
    %c0_i32 = arith.constant 0 : i32
    return %arg0, %arg1 : i32, i32
  }
  func.func @transform_4(%arg0: i32, %arg1: i32, %arg2: i32) -> (i32, i32) {
    %c0_i32 = arith.constant 0 : i32
    return %arg0, %arg1 : i32, i32
  }
}

module attributes {stable_mosaic.version = 11 : i64} {
  func.func @_mm_kernel(%arg0: i32, %arg1: i32, %arg2: i32, %arg3: memref<32x512xbf16, #tpu.memory_space<vmem>>, %arg4: memref<512x128xbf16, #tpu.memory_space<vmem>>, %arg5: memref<1x128xf32, #tpu.memory_space<vmem>>, %arg6: memref<32x128xf32, #tpu.memory_space<vmem>>, %arg7: memref<32x128xf32, #tpu.memory_space<vmem>>) attributes {dimension_semantics = [#tpu.dimension_semantics<parallel>, #tpu.dimension_semantics<parallel>, #tpu.dimension_semantics<arbitrary>], iteration_bounds = array<i64: 1, 1, 1>, scalar_prefetch = 0 : i64, scratch_operands = 1 : i64, tpu.core_type = #tpu.core_type<tc>, window_params = [{transform_indices = @transform_0, window_bounds = array<i64: 32, 512>}, {transform_indices = @transform_1, window_bounds = array<i64: 512, 128>}, {transform_indices = @transform_2, window_bounds = array<i64: 1, 128>}, {transform_indices = @transform_3, window_bounds = array<i64: 32, 128>}]} {
    %c0_i32 = arith.constant 0 : i32
    %0 = arith.cmpi eq, %arg2, %c0_i32 : i32
    %1 = arith.extui %0 : i1 to i32
    %c0_i32_0 = arith.constant 0 : i32
    %2 = arith.cmpi ne, %1, %c0_i32_0 : i32
    scf.if %2 {
      %cst_10 = arith.constant 0.000000e+00 : f32
      %12 = vector.broadcast %cst_10 : f32 to vector<32x128xf32>
      %c0_11 = arith.constant 0 : index
      %c0_12 = arith.constant 0 : index
      %13 = vector.load %arg7[%c0_11, %c0_12] : memref<32x128xf32, #tpu.memory_space<vmem>>, vector<32x128xf32>
      tpu.vector_store %arg7[%c0_11, %c0_12], %12 {strides = array<i32>} : memref<32x128xf32, #tpu.memory_space<vmem>>, vector<32x128xf32>,
    } else {
    }
    %c0 = arith.constant 0 : index
    %c0_1 = arith.constant 0 : index
    %3 = vector.load %arg7[%c0, %c0_1] : memref<32x128xf32, #tpu.memory_space<vmem>>, vector<32x128xf32>
    %c0_2 = arith.constant 0 : index
    %c0_3 = arith.constant 0 : index
    %4 = vector.load %arg3[%c0_2, %c0_3] : memref<32x512xbf16, #tpu.memory_space<vmem>>, vector<32x512xbf16>
    %c0_4 = arith.constant 0 : index
    %c0_5 = arith.constant 0 : index
    %5 = vector.load %arg4[%c0_4, %c0_5] : memref<512x128xbf16, #tpu.memory_space<vmem>>, vector<512x128xbf16>
    %cst = arith.constant dense<0.000000e+00> : vector<32x128xf32>
    %6 = tpu.matmul %4, %5, %cst {dimension_numbers = #tpu.dot_dimension_numbers<[1], [0], [0], [1], [0, 0, 1, 1], [], []>} : vector<32x512xbf16>, vector<512x128xbf16>, vector<32x128xf32> -> vector<32x128xf32>
    %7 = arith.addf %3, %6 : vector<32x128xf32>
    %c0_6 = arith.constant 0 : index
    %c0_7 = arith.constant 0 : index
    %8 = vector.load %arg7[%c0_6, %c0_7] : memref<32x128xf32, #tpu.memory_space<vmem>>, vector<32x128xf32>
    tpu.vector_store %arg7[%c0_6, %c0_7], %7 {strides = array<i32>} : memref<32x128xf32, #tpu.memory_space<vmem>>, vector<32x128xf32>,
    %c0_i32_8 = arith.constant 0 : i32
    %9 = arith.cmpi eq, %arg2, %c0_i32_8 : i32
    %10 = arith.extui %9 : i1 to i32
    %c0_i32_9 = arith.constant 0 : i32
    %11 = arith.cmpi ne, %10, %c0_i32_9 : i32
    scf.if %11 {
      %c0_10 = arith.constant 0 : index
      %c0_11 = arith.constant 0 : index
      %12 = vector.load %arg7[%c0_10, %c0_11] : memref<32x128xf32, #tpu.memory_space<vmem>>, vector<32x128xf32>
      %c0_12 = arith.constant 0 : index
      %c0_13 = arith.constant 0 : index
      %13 = vector.load %arg5[%c0_12, %c0_13] : memref<1x128xf32, #tpu.memory_space<vmem>>, vector<1x128xf32>
      %14 = vector.broadcast %13 : vector<1x128xf32> to vector<32x128xf32>
      %15 = arith.addf %12, %14 : vector<32x128xf32>
      %cst_14 = arith.constant 0.000000e+00 : f32
      %16 = vector.broadcast %cst_14 : f32 to vector<32x128xf32>
      %17 = arith.maximumf %15, %16 : vector<32x128xf32>
      %c0_15 = arith.constant 0 : index
      %c0_16 = arith.constant 0 : index
      %18 = vector.load %arg6[%c0_15, %c0_16] : memref<32x128xf32, #tpu.memory_space<vmem>>, vector<32x128xf32>
      tpu.vector_store %arg6[%c0_15, %c0_16], %17 {strides = array<i32>} : memref<32x128xf32, #tpu.memory_space<vmem>>, vector<32x128xf32>,
    } else {
    }
    return
  }
  func.func @transform_0(%arg0: i32, %arg1: i32, %arg2: i32) -> (i32, i32) {
    %c0_i32 = arith.constant 0 : i32
    return %arg0, %arg2 : i32, i32
  }
  func.func @transform_1(%arg0: i32, %arg1: i32, %arg2: i32) -> (i32, i32) {
    %c0_i32 = arith.constant 0 : i32
    return %arg2, %arg1 : i32, i32
  }
  func.func @transform_2(%arg0: i32, %arg1: i32, %arg2: i32) -> (i32, i32) {
    %c0_i32 = arith.constant 0 : i32
    %c0_i32_0 = arith.constant 0 : i32
    return %c0_i32, %arg1 : i32, i32
  }
  func.func @transform_3(%arg0: i32, %arg1: i32, %arg2: i32) -> (i32, i32) {
    %c0_i32 = arith.constant 0 : i32
    return %arg0, %arg1 : i32, i32
  }
}

module attributes {stable_mosaic.version = 11 : i64} {
  func.func @_mm_kernel(%arg0: i32, %arg1: i32, %arg2: i32, %arg3: memref<32x512xbf16, #tpu.memory_space<vmem>>, %arg4: memref<512x256xbf16, #tpu.memory_space<vmem>>, %arg5: memref<1x256xf32, #tpu.memory_space<vmem>>, %arg6: memref<32x256xf32, #tpu.memory_space<vmem>>, %arg7: memref<32x256xf32, #tpu.memory_space<vmem>>) attributes {dimension_semantics = [#tpu.dimension_semantics<parallel>, #tpu.dimension_semantics<parallel>, #tpu.dimension_semantics<arbitrary>], iteration_bounds = array<i64: 1, 1, 1>, scalar_prefetch = 0 : i64, scratch_operands = 1 : i64, tpu.core_type = #tpu.core_type<tc>, window_params = [{transform_indices = @transform_0, window_bounds = array<i64: 32, 512>}, {transform_indices = @transform_1, window_bounds = array<i64: 512, 256>}, {transform_indices = @transform_2, window_bounds = array<i64: 1, 256>}, {transform_indices = @transform_3, window_bounds = array<i64: 32, 256>}]} {
    %c0_i32 = arith.constant 0 : i32
    %0 = arith.cmpi eq, %arg2, %c0_i32 : i32
    %1 = arith.extui %0 : i1 to i32
    %c0_i32_0 = arith.constant 0 : i32
    %2 = arith.cmpi ne, %1, %c0_i32_0 : i32
    scf.if %2 {
      %cst_10 = arith.constant 0.000000e+00 : f32
      %12 = vector.broadcast %cst_10 : f32 to vector<32x256xf32>
      %c0_11 = arith.constant 0 : index
      %c0_12 = arith.constant 0 : index
      %13 = vector.load %arg7[%c0_11, %c0_12] : memref<32x256xf32, #tpu.memory_space<vmem>>, vector<32x256xf32>
      tpu.vector_store %arg7[%c0_11, %c0_12], %12 {strides = array<i32>} : memref<32x256xf32, #tpu.memory_space<vmem>>, vector<32x256xf32>,
    } else {
    }
    %c0 = arith.constant 0 : index
    %c0_1 = arith.constant 0 : index
    %3 = vector.load %arg7[%c0, %c0_1] : memref<32x256xf32, #tpu.memory_space<vmem>>, vector<32x256xf32>
    %c0_2 = arith.constant 0 : index
    %c0_3 = arith.constant 0 : index
    %4 = vector.load %arg3[%c0_2, %c0_3] : memref<32x512xbf16, #tpu.memory_space<vmem>>, vector<32x512xbf16>
    %c0_4 = arith.constant 0 : index
    %c0_5 = arith.constant 0 : index
    %5 = vector.load %arg4[%c0_4, %c0_5] : memref<512x256xbf16, #tpu.memory_space<vmem>>, vector<512x256xbf16>
    %cst = arith.constant dense<0.000000e+00> : vector<32x256xf32>
    %6 = tpu.matmul %4, %5, %cst {dimension_numbers = #tpu.dot_dimension_numbers<[1], [0], [0], [1], [0, 0, 1, 1], [], []>} : vector<32x512xbf16>, vector<512x256xbf16>, vector<32x256xf32> -> vector<32x256xf32>
    %7 = arith.addf %3, %6 : vector<32x256xf32>
    %c0_6 = arith.constant 0 : index
    %c0_7 = arith.constant 0 : index
    %8 = vector.load %arg7[%c0_6, %c0_7] : memref<32x256xf32, #tpu.memory_space<vmem>>, vector<32x256xf32>
    tpu.vector_store %arg7[%c0_6, %c0_7], %7 {strides = array<i32>} : memref<32x256xf32, #tpu.memory_space<vmem>>, vector<32x256xf32>,
    %c0_i32_8 = arith.constant 0 : i32
    %9 = arith.cmpi eq, %arg2, %c0_i32_8 : i32
    %10 = arith.extui %9 : i1 to i32
    %c0_i32_9 = arith.constant 0 : i32
    %11 = arith.cmpi ne, %10, %c0_i32_9 : i32
    scf.if %11 {
      %c0_10 = arith.constant 0 : index
      %c0_11 = arith.constant 0 : index
      %12 = vector.load %arg7[%c0_10, %c0_11] : memref<32x256xf32, #tpu.memory_space<vmem>>, vector<32x256xf32>
      %c0_12 = arith.constant 0 : index
      %c0_13 = arith.constant 0 : index
      %13 = vector.load %arg5[%c0_12, %c0_13] : memref<1x256xf32, #tpu.memory_space<vmem>>, vector<1x256xf32>
      %14 = vector.broadcast %13 : vector<1x256xf32> to vector<32x256xf32>
      %15 = arith.addf %12, %14 : vector<32x256xf32>
      %cst_14 = arith.constant 0.000000e+00 : f32
      %16 = vector.broadcast %cst_14 : f32 to vector<32x256xf32>
      %17 = arith.maximumf %15, %16 : vector<32x256xf32>
      %c0_15 = arith.constant 0 : index
      %c0_16 = arith.constant 0 : index
      %18 = vector.load %arg6[%c0_15, %c0_16] : memref<32x256xf32, #tpu.memory_space<vmem>>, vector<32x256xf32>
      tpu.vector_store %arg6[%c0_15, %c0_16], %17 {strides = array<i32>} : memref<32x256xf32, #tpu.memory_space<vmem>>, vector<32x256xf32>,
    } else {
    }
    return
  }
  func.func @transform_0(%arg0: i32, %arg1: i32, %arg2: i32) -> (i32, i32) {
    %c0_i32 = arith.constant 0 : i32
    return %arg0, %arg2 : i32, i32
  }
  func.func @transform_1(%arg0: i32, %arg1: i32, %arg2: i32) -> (i32, i32) {
    %c0_i32 = arith.constant 0 : i32
    return %arg2, %arg1 : i32, i32
  }
  func.func @transform_2(%arg0: i32, %arg1: i32, %arg2: i32) -> (i32, i32) {
    %c0_i32 = arith.constant 0 : i32
    %c0_i32_0 = arith.constant 0 : i32
    return %c0_i32, %arg1 : i32, i32
  }
  func.func @transform_3(%arg0: i32, %arg1: i32, %arg2: i32) -> (i32, i32) {
    %c0_i32 = arith.constant 0 : i32
    return %arg0, %arg1 : i32, i32
  }
}

module attributes {stable_mosaic.version = 11 : i64} {
  func.func @_mm_kernel(%arg0: i32, %arg1: i32, %arg2: i32, %arg3: memref<8x384xbf16, #tpu.memory_space<vmem>>, %arg4: memref<384x256xbf16, #tpu.memory_space<vmem>>, %arg5: memref<1x256xf32, #tpu.memory_space<vmem>>, %arg6: memref<8x256xf32, #tpu.memory_space<vmem>>, %arg7: memref<8x256xf32, #tpu.memory_space<vmem>>) attributes {dimension_semantics = [#tpu.dimension_semantics<parallel>, #tpu.dimension_semantics<parallel>, #tpu.dimension_semantics<arbitrary>], iteration_bounds = array<i64: 1, 1, 6>, scalar_prefetch = 0 : i64, scratch_operands = 1 : i64, tpu.core_type = #tpu.core_type<tc>, window_params = [{transform_indices = @transform_0, window_bounds = array<i64: 8, 384>}, {transform_indices = @transform_1, window_bounds = array<i64: 384, 256>}, {transform_indices = @transform_2, window_bounds = array<i64: 1, 256>}, {transform_indices = @transform_3, window_bounds = array<i64: 8, 256>}]} {
    %c0_i32 = arith.constant 0 : i32
    %0 = arith.cmpi eq, %arg2, %c0_i32 : i32
    %1 = arith.extui %0 : i1 to i32
    %c0_i32_0 = arith.constant 0 : i32
    %2 = arith.cmpi ne, %1, %c0_i32_0 : i32
    scf.if %2 {
      %cst_9 = arith.constant 0.000000e+00 : f32
      %12 = vector.broadcast %cst_9 : f32 to vector<8x256xf32>
      %c0_10 = arith.constant 0 : index
      %c0_11 = arith.constant 0 : index
      %13 = vector.load %arg7[%c0_10, %c0_11] : memref<8x256xf32, #tpu.memory_space<vmem>>, vector<8x256xf32>
      tpu.vector_store %arg7[%c0_10, %c0_11], %12 {strides = array<i32>} : memref<8x256xf32, #tpu.memory_space<vmem>>, vector<8x256xf32>,
    } else {
    }
    %c0 = arith.constant 0 : index
    %c0_1 = arith.constant 0 : index
    %3 = vector.load %arg7[%c0, %c0_1] : memref<8x256xf32, #tpu.memory_space<vmem>>, vector<8x256xf32>
    %c0_2 = arith.constant 0 : index
    %c0_3 = arith.constant 0 : index
    %4 = vector.load %arg3[%c0_2, %c0_3] : memref<8x384xbf16, #tpu.memory_space<vmem>>, vector<8x384xbf16>
    %c0_4 = arith.constant 0 : index
    %c0_5 = arith.constant 0 : index
    %5 = vector.load %arg4[%c0_4, %c0_5] : memref<384x256xbf16, #tpu.memory_space<vmem>>, vector<384x256xbf16>
    %cst = arith.constant dense<0.000000e+00> : vector<8x256xf32>
    %6 = tpu.matmul %4, %5, %cst {dimension_numbers = #tpu.dot_dimension_numbers<[1], [0], [0], [1], [0, 0, 1, 1], [], []>} : vector<8x384xbf16>, vector<384x256xbf16>, vector<8x256xf32> -> vector<8x256xf32>
    %7 = arith.addf %3, %6 : vector<8x256xf32>
    %c0_6 = arith.constant 0 : index
    %c0_7 = arith.constant 0 : index
    %8 = vector.load %arg7[%c0_6, %c0_7] : memref<8x256xf32, #tpu.memory_space<vmem>>, vector<8x256xf32>
    tpu.vector_store %arg7[%c0_6, %c0_7], %7 {strides = array<i32>} : memref<8x256xf32, #tpu.memory_space<vmem>>, vector<8x256xf32>,
    %c5_i32 = arith.constant 5 : i32
    %9 = arith.cmpi eq, %arg2, %c5_i32 : i32
    %10 = arith.extui %9 : i1 to i32
    %c0_i32_8 = arith.constant 0 : i32
    %11 = arith.cmpi ne, %10, %c0_i32_8 : i32
    scf.if %11 {
      %c0_9 = arith.constant 0 : index
      %c0_10 = arith.constant 0 : index
      %12 = vector.load %arg7[%c0_9, %c0_10] : memref<8x256xf32, #tpu.memory_space<vmem>>, vector<8x256xf32>
      %c0_11 = arith.constant 0 : index
      %c0_12 = arith.constant 0 : index
      %13 = vector.load %arg5[%c0_11, %c0_12] : memref<1x256xf32, #tpu.memory_space<vmem>>, vector<1x256xf32>
      %14 = vector.broadcast %13 : vector<1x256xf32> to vector<8x256xf32>
      %15 = arith.addf %12, %14 : vector<8x256xf32>
      %cst_13 = arith.constant 0.000000e+00 : f32
      %16 = vector.broadcast %cst_13 : f32 to vector<8x256xf32>
      %17 = arith.maximumf %15, %16 : vector<8x256xf32>
      %c0_14 = arith.constant 0 : index
      %c0_15 = arith.constant 0 : index
      %18 = vector.load %arg6[%c0_14, %c0_15] : memref<8x256xf32, #tpu.memory_space<vmem>>, vector<8x256xf32>
      tpu.vector_store %arg6[%c0_14, %c0_15], %17 {strides = array<i32>} : memref<8x256xf32, #tpu.memory_space<vmem>>, vector<8x256xf32>,
    } else {
    }
    return
  }
  func.func @transform_0(%arg0: i32, %arg1: i32, %arg2: i32) -> (i32, i32) {
    %c0_i32 = arith.constant 0 : i32
    return %arg0, %arg2 : i32, i32
  }
  func.func @transform_1(%arg0: i32, %arg1: i32, %arg2: i32) -> (i32, i32) {
    %c0_i32 = arith.constant 0 : i32
    return %arg2, %arg1 : i32, i32
  }
  func.func @transform_2(%arg0: i32, %arg1: i32, %arg2: i32) -> (i32, i32) {
    %c0_i32 = arith.constant 0 : i32
    %c0_i32_0 = arith.constant 0 : i32
    return %c0_i32, %arg1 : i32, i32
  }
  func.func @transform_3(%arg0: i32, %arg1: i32, %arg2: i32) -> (i32, i32) {
    %c0_i32 = arith.constant 0 : i32
    return %arg0, %arg1 : i32, i32
  }
}

module attributes {stable_mosaic.version = 11 : i64} {
  func.func @_mm_kernel(%arg0: i32, %arg1: i32, %arg2: i32, %arg3: memref<8x512xbf16, #tpu.memory_space<vmem>>, %arg4: memref<512x256xbf16, #tpu.memory_space<vmem>>, %arg5: memref<1x256xf32, #tpu.memory_space<vmem>>, %arg6: memref<8x256xf32, #tpu.memory_space<vmem>>, %arg7: memref<8x256xf32, #tpu.memory_space<vmem>>) attributes {dimension_semantics = [#tpu.dimension_semantics<parallel>, #tpu.dimension_semantics<parallel>, #tpu.dimension_semantics<arbitrary>], iteration_bounds = array<i64: 1, 4, 1>, scalar_prefetch = 0 : i64, scratch_operands = 1 : i64, tpu.core_type = #tpu.core_type<tc>, window_params = [{transform_indices = @transform_0, window_bounds = array<i64: 8, 512>}, {transform_indices = @transform_1, window_bounds = array<i64: 512, 256>}, {transform_indices = @transform_2, window_bounds = array<i64: 1, 256>}, {transform_indices = @transform_3, window_bounds = array<i64: 8, 256>}]} {
    %c0_i32 = arith.constant 0 : i32
    %0 = arith.cmpi eq, %arg2, %c0_i32 : i32
    %1 = arith.extui %0 : i1 to i32
    %c0_i32_0 = arith.constant 0 : i32
    %2 = arith.cmpi ne, %1, %c0_i32_0 : i32
    scf.if %2 {
      %cst_10 = arith.constant 0.000000e+00 : f32
      %12 = vector.broadcast %cst_10 : f32 to vector<8x256xf32>
      %c0_11 = arith.constant 0 : index
      %c0_12 = arith.constant 0 : index
      %13 = vector.load %arg7[%c0_11, %c0_12] : memref<8x256xf32, #tpu.memory_space<vmem>>, vector<8x256xf32>
      tpu.vector_store %arg7[%c0_11, %c0_12], %12 {strides = array<i32>} : memref<8x256xf32, #tpu.memory_space<vmem>>, vector<8x256xf32>,
    } else {
    }
    %c0 = arith.constant 0 : index
    %c0_1 = arith.constant 0 : index
    %3 = vector.load %arg7[%c0, %c0_1] : memref<8x256xf32, #tpu.memory_space<vmem>>, vector<8x256xf32>
    %c0_2 = arith.constant 0 : index
    %c0_3 = arith.constant 0 : index
    %4 = vector.load %arg3[%c0_2, %c0_3] : memref<8x512xbf16, #tpu.memory_space<vmem>>, vector<8x512xbf16>
    %c0_4 = arith.constant 0 : index
    %c0_5 = arith.constant 0 : index
    %5 = vector.load %arg4[%c0_4, %c0_5] : memref<512x256xbf16, #tpu.memory_space<vmem>>, vector<512x256xbf16>
    %cst = arith.constant dense<0.000000e+00> : vector<8x256xf32>
    %6 = tpu.matmul %4, %5, %cst {dimension_numbers = #tpu.dot_dimension_numbers<[1], [0], [0], [1], [0, 0, 1, 1], [], []>} : vector<8x512xbf16>, vector<512x256xbf16>, vector<8x256xf32> -> vector<8x256xf32>
    %7 = arith.addf %3, %6 : vector<8x256xf32>
    %c0_6 = arith.constant 0 : index
    %c0_7 = arith.constant 0 : index
    %8 = vector.load %arg7[%c0_6, %c0_7] : memref<8x256xf32, #tpu.memory_space<vmem>>, vector<8x256xf32>
    tpu.vector_store %arg7[%c0_6, %c0_7], %7 {strides = array<i32>} : memref<8x256xf32, #tpu.memory_space<vmem>>, vector<8x256xf32>,
    %c0_i32_8 = arith.constant 0 : i32
    %9 = arith.cmpi eq, %arg2, %c0_i32_8 : i32
    %10 = arith.extui %9 : i1 to i32
    %c0_i32_9 = arith.constant 0 : i32
    %11 = arith.cmpi ne, %10, %c0_i32_9 : i32
    scf.if %11 {
      %c0_10 = arith.constant 0 : index
      %c0_11 = arith.constant 0 : index
      %12 = vector.load %arg7[%c0_10, %c0_11] : memref<8x256xf32, #tpu.memory_space<vmem>>, vector<8x256xf32>
      %c0_12 = arith.constant 0 : index
      %c0_13 = arith.constant 0 : index
      %13 = vector.load %arg5[%c0_12, %c0_13] : memref<1x256xf32, #tpu.memory_space<vmem>>, vector<1x256xf32>
      %14 = vector.broadcast %13 : vector<1x256xf32> to vector<8x256xf32>
      %15 = arith.addf %12, %14 : vector<8x256xf32>
      %c0_14 = arith.constant 0 : index
      %c0_15 = arith.constant 0 : index
      %16 = vector.load %arg6[%c0_14, %c0_15] : memref<8x256xf32, #tpu.memory_space<vmem>>, vector<8x256xf32>
      tpu.vector_store %arg6[%c0_14, %c0_15], %15 {strides = array<i32>} : memref<8x256xf32, #tpu.memory_space<vmem>>, vector<8x256xf32>,
    } else {
    }
    return
  }
  func.func @transform_0(%arg0: i32, %arg1: i32, %arg2: i32) -> (i32, i32) {
    %c0_i32 = arith.constant 0 : i32
    return %arg0, %arg2 : i32, i32
  }
  func.func @transform_1(%arg0: i32, %arg1: i32, %arg2: i32) -> (i32, i32) {
    %c0_i32 = arith.constant 0 : i32
    return %arg2, %arg1 : i32, i32
  }
  func.func @transform_2(%arg0: i32, %arg1: i32, %arg2: i32) -> (i32, i32) {
    %c0_i32 = arith.constant 0 : i32
    %c0_i32_0 = arith.constant 0 : i32
    return %c0_i32, %arg1 : i32, i32
  }
  func.func @transform_3(%arg0: i32, %arg1: i32, %arg2: i32) -> (i32, i32) {
    %c0_i32 = arith.constant 0 : i32
    return %arg0, %arg1 : i32, i32
  }
}

module attributes {stable_mosaic.version = 11 : i64} {
  func.func @_mm_res_kernel(%arg0: i32, %arg1: i32, %arg2: i32, %arg3: memref<8x256xbf16, #tpu.memory_space<vmem>>, %arg4: memref<256x256xbf16, #tpu.memory_space<vmem>>, %arg5: memref<1x256xf32, #tpu.memory_space<vmem>>, %arg6: memref<8x256xf32, #tpu.memory_space<vmem>>, %arg7: memref<8x256xf32, #tpu.memory_space<vmem>>, %arg8: memref<8x256xf32, #tpu.memory_space<vmem>>) attributes {dimension_semantics = [#tpu.dimension_semantics<parallel>, #tpu.dimension_semantics<parallel>, #tpu.dimension_semantics<arbitrary>], iteration_bounds = array<i64: 1, 4, 1>, scalar_prefetch = 0 : i64, scratch_operands = 1 : i64, tpu.core_type = #tpu.core_type<tc>, window_params = [{transform_indices = @transform_0, window_bounds = array<i64: 8, 256>}, {transform_indices = @transform_1, window_bounds = array<i64: 256, 256>}, {transform_indices = @transform_2, window_bounds = array<i64: 1, 256>}, {transform_indices = @transform_3, window_bounds = array<i64: 8, 256>}, {transform_indices = @transform_4, window_bounds = array<i64: 8, 256>}]} {
    %c0_i32 = arith.constant 0 : i32
    %0 = arith.cmpi eq, %arg2, %c0_i32 : i32
    %1 = arith.extui %0 : i1 to i32
    %c0_i32_0 = arith.constant 0 : i32
    %2 = arith.cmpi ne, %1, %c0_i32_0 : i32
    scf.if %2 {
      %cst_10 = arith.constant 0.000000e+00 : f32
      %12 = vector.broadcast %cst_10 : f32 to vector<8x256xf32>
      %c0_11 = arith.constant 0 : index
      %c0_12 = arith.constant 0 : index
      %13 = vector.load %arg8[%c0_11, %c0_12] : memref<8x256xf32, #tpu.memory_space<vmem>>, vector<8x256xf32>
      tpu.vector_store %arg8[%c0_11, %c0_12], %12 {strides = array<i32>} : memref<8x256xf32, #tpu.memory_space<vmem>>, vector<8x256xf32>,
    } else {
    }
    %c0 = arith.constant 0 : index
    %c0_1 = arith.constant 0 : index
    %3 = vector.load %arg8[%c0, %c0_1] : memref<8x256xf32, #tpu.memory_space<vmem>>, vector<8x256xf32>
    %c0_2 = arith.constant 0 : index
    %c0_3 = arith.constant 0 : index
    %4 = vector.load %arg3[%c0_2, %c0_3] : memref<8x256xbf16, #tpu.memory_space<vmem>>, vector<8x256xbf16>
    %c0_4 = arith.constant 0 : index
    %c0_5 = arith.constant 0 : index
    %5 = vector.load %arg4[%c0_4, %c0_5] : memref<256x256xbf16, #tpu.memory_space<vmem>>, vector<256x256xbf16>
    %cst = arith.constant dense<0.000000e+00> : vector<8x256xf32>
    %6 = tpu.matmul %4, %5, %cst {dimension_numbers = #tpu.dot_dimension_numbers<[1], [0], [0], [1], [0, 0, 1, 1], [], []>} : vector<8x256xbf16>, vector<256x256xbf16>, vector<8x256xf32> -> vector<8x256xf32>
    %7 = arith.addf %3, %6 : vector<8x256xf32>
    %c0_6 = arith.constant 0 : index
    %c0_7 = arith.constant 0 : index
    %8 = vector.load %arg8[%c0_6, %c0_7] : memref<8x256xf32, #tpu.memory_space<vmem>>, vector<8x256xf32>
    tpu.vector_store %arg8[%c0_6, %c0_7], %7 {strides = array<i32>} : memref<8x256xf32, #tpu.memory_space<vmem>>, vector<8x256xf32>,
    %c0_i32_8 = arith.constant 0 : i32
    %9 = arith.cmpi eq, %arg2, %c0_i32_8 : i32
    %10 = arith.extui %9 : i1 to i32
    %c0_i32_9 = arith.constant 0 : i32
    %11 = arith.cmpi ne, %10, %c0_i32_9 : i32
    scf.if %11 {
      %c0_10 = arith.constant 0 : index
      %c0_11 = arith.constant 0 : index
      %12 = vector.load %arg8[%c0_10, %c0_11] : memref<8x256xf32, #tpu.memory_space<vmem>>, vector<8x256xf32>
      %c0_12 = arith.constant 0 : index
      %c0_13 = arith.constant 0 : index
      %13 = vector.load %arg5[%c0_12, %c0_13] : memref<1x256xf32, #tpu.memory_space<vmem>>, vector<1x256xf32>
      %14 = vector.broadcast %13 : vector<1x256xf32> to vector<8x256xf32>
      %15 = arith.addf %12, %14 : vector<8x256xf32>
      %c0_14 = arith.constant 0 : index
      %c0_15 = arith.constant 0 : index
      %16 = vector.load %arg6[%c0_14, %c0_15] : memref<8x256xf32, #tpu.memory_space<vmem>>, vector<8x256xf32>
      %17 = arith.addf %15, %16 : vector<8x256xf32>
      %cst_16 = arith.constant 0.000000e+00 : f32
      %18 = vector.broadcast %cst_16 : f32 to vector<8x256xf32>
      %19 = arith.maximumf %17, %18 : vector<8x256xf32>
      %c0_17 = arith.constant 0 : index
      %c0_18 = arith.constant 0 : index
      %20 = vector.load %arg7[%c0_17, %c0_18] : memref<8x256xf32, #tpu.memory_space<vmem>>, vector<8x256xf32>
      tpu.vector_store %arg7[%c0_17, %c0_18], %19 {strides = array<i32>} : memref<8x256xf32, #tpu.memory_space<vmem>>, vector<8x256xf32>,
    } else {
    }
    return
  }
  func.func @transform_0(%arg0: i32, %arg1: i32, %arg2: i32) -> (i32, i32) {
    %c0_i32 = arith.constant 0 : i32
    return %arg0, %arg2 : i32, i32
  }
  func.func @transform_1(%arg0: i32, %arg1: i32, %arg2: i32) -> (i32, i32) {
    %c0_i32 = arith.constant 0 : i32
    return %arg2, %arg1 : i32, i32
  }
  func.func @transform_2(%arg0: i32, %arg1: i32, %arg2: i32) -> (i32, i32) {
    %c0_i32 = arith.constant 0 : i32
    %c0_i32_0 = arith.constant 0 : i32
    return %c0_i32, %arg1 : i32, i32
  }
  func.func @transform_3(%arg0: i32, %arg1: i32, %arg2: i32) -> (i32, i32) {
    %c0_i32 = arith.constant 0 : i32
    return %arg0, %arg1 : i32, i32
  }
  func.func @transform_4(%arg0: i32, %arg1: i32, %arg2: i32) -> (i32, i32) {
    %c0_i32 = arith.constant 0 : i32
    return %arg0, %arg1 : i32, i32
  }
}

module attributes {stable_mosaic.version = 11 : i64} {
  func.func @_mm_kernel(%arg0: i32, %arg1: i32, %arg2: i32, %arg3: memref<8x512xbf16, #tpu.memory_space<vmem>>, %arg4: memref<512x256xbf16, #tpu.memory_space<vmem>>, %arg5: memref<1x256xf32, #tpu.memory_space<vmem>>, %arg6: memref<8x256xf32, #tpu.memory_space<vmem>>, %arg7: memref<8x256xf32, #tpu.memory_space<vmem>>) attributes {dimension_semantics = [#tpu.dimension_semantics<parallel>, #tpu.dimension_semantics<parallel>, #tpu.dimension_semantics<arbitrary>], iteration_bounds = array<i64: 1, 1, 2>, scalar_prefetch = 0 : i64, scratch_operands = 1 : i64, tpu.core_type = #tpu.core_type<tc>, window_params = [{transform_indices = @transform_0, window_bounds = array<i64: 8, 512>}, {transform_indices = @transform_1, window_bounds = array<i64: 512, 256>}, {transform_indices = @transform_2, window_bounds = array<i64: 1, 256>}, {transform_indices = @transform_3, window_bounds = array<i64: 8, 256>}]} {
    %c0_i32 = arith.constant 0 : i32
    %0 = arith.cmpi eq, %arg2, %c0_i32 : i32
    %1 = arith.extui %0 : i1 to i32
    %c0_i32_0 = arith.constant 0 : i32
    %2 = arith.cmpi ne, %1, %c0_i32_0 : i32
    scf.if %2 {
      %cst_9 = arith.constant 0.000000e+00 : f32
      %12 = vector.broadcast %cst_9 : f32 to vector<8x256xf32>
      %c0_10 = arith.constant 0 : index
      %c0_11 = arith.constant 0 : index
      %13 = vector.load %arg7[%c0_10, %c0_11] : memref<8x256xf32, #tpu.memory_space<vmem>>, vector<8x256xf32>
      tpu.vector_store %arg7[%c0_10, %c0_11], %12 {strides = array<i32>} : memref<8x256xf32, #tpu.memory_space<vmem>>, vector<8x256xf32>,
    } else {
    }
    %c0 = arith.constant 0 : index
    %c0_1 = arith.constant 0 : index
    %3 = vector.load %arg7[%c0, %c0_1] : memref<8x256xf32, #tpu.memory_space<vmem>>, vector<8x256xf32>
    %c0_2 = arith.constant 0 : index
    %c0_3 = arith.constant 0 : index
    %4 = vector.load %arg3[%c0_2, %c0_3] : memref<8x512xbf16, #tpu.memory_space<vmem>>, vector<8x512xbf16>
    %c0_4 = arith.constant 0 : index
    %c0_5 = arith.constant 0 : index
    %5 = vector.load %arg4[%c0_4, %c0_5] : memref<512x256xbf16, #tpu.memory_space<vmem>>, vector<512x256xbf16>
    %cst = arith.constant dense<0.000000e+00> : vector<8x256xf32>
    %6 = tpu.matmul %4, %5, %cst {dimension_numbers = #tpu.dot_dimension_numbers<[1], [0], [0], [1], [0, 0, 1, 1], [], []>} : vector<8x512xbf16>, vector<512x256xbf16>, vector<8x256xf32> -> vector<8x256xf32>
    %7 = arith.addf %3, %6 : vector<8x256xf32>
    %c0_6 = arith.constant 0 : index
    %c0_7 = arith.constant 0 : index
    %8 = vector.load %arg7[%c0_6, %c0_7] : memref<8x256xf32, #tpu.memory_space<vmem>>, vector<8x256xf32>
    tpu.vector_store %arg7[%c0_6, %c0_7], %7 {strides = array<i32>} : memref<8x256xf32, #tpu.memory_space<vmem>>, vector<8x256xf32>,
    %c1_i32 = arith.constant 1 : i32
    %9 = arith.cmpi eq, %arg2, %c1_i32 : i32
    %10 = arith.extui %9 : i1 to i32
    %c0_i32_8 = arith.constant 0 : i32
    %11 = arith.cmpi ne, %10, %c0_i32_8 : i32
    scf.if %11 {
      %c0_9 = arith.constant 0 : index
      %c0_10 = arith.constant 0 : index
      %12 = vector.load %arg7[%c0_9, %c0_10] : memref<8x256xf32, #tpu.memory_space<vmem>>, vector<8x256xf32>
      %c0_11 = arith.constant 0 : index
      %c0_12 = arith.constant 0 : index
      %13 = vector.load %arg5[%c0_11, %c0_12] : memref<1x256xf32, #tpu.memory_space<vmem>>, vector<1x256xf32>
      %14 = vector.broadcast %13 : vector<1x256xf32> to vector<8x256xf32>
      %15 = arith.addf %12, %14 : vector<8x256xf32>
      %cst_13 = arith.constant 0.000000e+00 : f32
      %16 = vector.broadcast %cst_13 : f32 to vector<8x256xf32>
      %17 = arith.maximumf %15, %16 : vector<8x256xf32>
      %c0_14 = arith.constant 0 : index
      %c0_15 = arith.constant 0 : index
      %18 = vector.load %arg6[%c0_14, %c0_15] : memref<8x256xf32, #tpu.memory_space<vmem>>, vector<8x256xf32>
      tpu.vector_store %arg6[%c0_14, %c0_15], %17 {strides = array<i32>} : memref<8x256xf32, #tpu.memory_space<vmem>>, vector<8x256xf32>,
    } else {
    }
    return
  }
  func.func @transform_0(%arg0: i32, %arg1: i32, %arg2: i32) -> (i32, i32) {
    %c0_i32 = arith.constant 0 : i32
    return %arg0, %arg2 : i32, i32
  }
  func.func @transform_1(%arg0: i32, %arg1: i32, %arg2: i32) -> (i32, i32) {
    %c0_i32 = arith.constant 0 : i32
    return %arg2, %arg1 : i32, i32
  }
  func.func @transform_2(%arg0: i32, %arg1: i32, %arg2: i32) -> (i32, i32) {
    %c0_i32 = arith.constant 0 : i32
    %c0_i32_0 = arith.constant 0 : i32
    return %c0_i32, %arg1 : i32, i32
  }
  func.func @transform_3(%arg0: i32, %arg1: i32, %arg2: i32) -> (i32, i32) {
    %c0_i32 = arith.constant 0 : i32
    return %arg0, %arg1 : i32, i32
  }
}

module attributes {stable_mosaic.version = 11 : i64} {
  func.func @_mm_kernel(%arg0: i32, %arg1: i32, %arg2: i32, %arg3: memref<8x512xbf16, #tpu.memory_space<vmem>>, %arg4: memref<512x256xbf16, #tpu.memory_space<vmem>>, %arg5: memref<1x256xf32, #tpu.memory_space<vmem>>, %arg6: memref<8x256xf32, #tpu.memory_space<vmem>>, %arg7: memref<8x256xf32, #tpu.memory_space<vmem>>) attributes {dimension_semantics = [#tpu.dimension_semantics<parallel>, #tpu.dimension_semantics<parallel>, #tpu.dimension_semantics<arbitrary>], iteration_bounds = array<i64: 1, 1, 18>, scalar_prefetch = 0 : i64, scratch_operands = 1 : i64, tpu.core_type = #tpu.core_type<tc>, window_params = [{transform_indices = @transform_0, window_bounds = array<i64: 8, 512>}, {transform_indices = @transform_1, window_bounds = array<i64: 512, 256>}, {transform_indices = @transform_2, window_bounds = array<i64: 1, 256>}, {transform_indices = @transform_3, window_bounds = array<i64: 8, 256>}]} {
    %c0_i32 = arith.constant 0 : i32
    %0 = arith.cmpi eq, %arg2, %c0_i32 : i32
    %1 = arith.extui %0 : i1 to i32
    %c0_i32_0 = arith.constant 0 : i32
    %2 = arith.cmpi ne, %1, %c0_i32_0 : i32
    scf.if %2 {
      %cst_9 = arith.constant 0.000000e+00 : f32
      %12 = vector.broadcast %cst_9 : f32 to vector<8x256xf32>
      %c0_10 = arith.constant 0 : index
      %c0_11 = arith.constant 0 : index
      %13 = vector.load %arg7[%c0_10, %c0_11] : memref<8x256xf32, #tpu.memory_space<vmem>>, vector<8x256xf32>
      tpu.vector_store %arg7[%c0_10, %c0_11], %12 {strides = array<i32>} : memref<8x256xf32, #tpu.memory_space<vmem>>, vector<8x256xf32>,
    } else {
    }
    %c0 = arith.constant 0 : index
    %c0_1 = arith.constant 0 : index
    %3 = vector.load %arg7[%c0, %c0_1] : memref<8x256xf32, #tpu.memory_space<vmem>>, vector<8x256xf32>
    %c0_2 = arith.constant 0 : index
    %c0_3 = arith.constant 0 : index
    %4 = vector.load %arg3[%c0_2, %c0_3] : memref<8x512xbf16, #tpu.memory_space<vmem>>, vector<8x512xbf16>
    %c0_4 = arith.constant 0 : index
    %c0_5 = arith.constant 0 : index
    %5 = vector.load %arg4[%c0_4, %c0_5] : memref<512x256xbf16, #tpu.memory_space<vmem>>, vector<512x256xbf16>
    %cst = arith.constant dense<0.000000e+00> : vector<8x256xf32>
    %6 = tpu.matmul %4, %5, %cst {dimension_numbers = #tpu.dot_dimension_numbers<[1], [0], [0], [1], [0, 0, 1, 1], [], []>} : vector<8x512xbf16>, vector<512x256xbf16>, vector<8x256xf32> -> vector<8x256xf32>
    %7 = arith.addf %3, %6 : vector<8x256xf32>
    %c0_6 = arith.constant 0 : index
    %c0_7 = arith.constant 0 : index
    %8 = vector.load %arg7[%c0_6, %c0_7] : memref<8x256xf32, #tpu.memory_space<vmem>>, vector<8x256xf32>
    tpu.vector_store %arg7[%c0_6, %c0_7], %7 {strides = array<i32>} : memref<8x256xf32, #tpu.memory_space<vmem>>, vector<8x256xf32>,
    %c17_i32 = arith.constant 17 : i32
    %9 = arith.cmpi eq, %arg2, %c17_i32 : i32
    %10 = arith.extui %9 : i1 to i32
    %c0_i32_8 = arith.constant 0 : i32
    %11 = arith.cmpi ne, %10, %c0_i32_8 : i32
    scf.if %11 {
      %c0_9 = arith.constant 0 : index
      %c0_10 = arith.constant 0 : index
      %12 = vector.load %arg7[%c0_9, %c0_10] : memref<8x256xf32, #tpu.memory_space<vmem>>, vector<8x256xf32>
      %c0_11 = arith.constant 0 : index
      %c0_12 = arith.constant 0 : index
      %13 = vector.load %arg5[%c0_11, %c0_12] : memref<1x256xf32, #tpu.memory_space<vmem>>, vector<1x256xf32>
      %14 = vector.broadcast %13 : vector<1x256xf32> to vector<8x256xf32>
      %15 = arith.addf %12, %14 : vector<8x256xf32>
      %c0_13 = arith.constant 0 : index
      %c0_14 = arith.constant 0 : index
      %16 = vector.load %arg6[%c0_13, %c0_14] : memref<8x256xf32, #tpu.memory_space<vmem>>, vector<8x256xf32>
      tpu.vector_store %arg6[%c0_13, %c0_14], %15 {strides = array<i32>} : memref<8x256xf32, #tpu.memory_space<vmem>>, vector<8x256xf32>,
    } else {
    }
    return
  }
  func.func @transform_0(%arg0: i32, %arg1: i32, %arg2: i32) -> (i32, i32) {
    %c0_i32 = arith.constant 0 : i32
    return %arg0, %arg2 : i32, i32
  }
  func.func @transform_1(%arg0: i32, %arg1: i32, %arg2: i32) -> (i32, i32) {
    %c0_i32 = arith.constant 0 : i32
    return %arg2, %arg1 : i32, i32
  }
  func.func @transform_2(%arg0: i32, %arg1: i32, %arg2: i32) -> (i32, i32) {
    %c0_i32 = arith.constant 0 : i32
    %c0_i32_0 = arith.constant 0 : i32
    return %c0_i32, %arg1 : i32, i32
  }
  func.func @transform_3(%arg0: i32, %arg1: i32, %arg2: i32) -> (i32, i32) {
    %c0_i32 = arith.constant 0 : i32
    return %arg0, %arg1 : i32, i32
  }
}

module attributes {stable_mosaic.version = 11 : i64} {
  func.func @_mm_kernel(%arg0: i32, %arg1: i32, %arg2: i32, %arg3: memref<8x384xbf16, #tpu.memory_space<vmem>>, %arg4: memref<384x128xbf16, #tpu.memory_space<vmem>>, %arg5: memref<1x128xf32, #tpu.memory_space<vmem>>, %arg6: memref<8x128xf32, #tpu.memory_space<vmem>>, %arg7: memref<8x128xf32, #tpu.memory_space<vmem>>) attributes {dimension_semantics = [#tpu.dimension_semantics<parallel>, #tpu.dimension_semantics<parallel>, #tpu.dimension_semantics<arbitrary>], iteration_bounds = array<i64: 1, 1, 6>, scalar_prefetch = 0 : i64, scratch_operands = 1 : i64, tpu.core_type = #tpu.core_type<tc>, window_params = [{transform_indices = @transform_0, window_bounds = array<i64: 8, 384>}, {transform_indices = @transform_1, window_bounds = array<i64: 384, 128>}, {transform_indices = @transform_2, window_bounds = array<i64: 1, 128>}, {transform_indices = @transform_3, window_bounds = array<i64: 8, 128>}]} {
    %c0_i32 = arith.constant 0 : i32
    %0 = arith.cmpi eq, %arg2, %c0_i32 : i32
    %1 = arith.extui %0 : i1 to i32
    %c0_i32_0 = arith.constant 0 : i32
    %2 = arith.cmpi ne, %1, %c0_i32_0 : i32
    scf.if %2 {
      %cst_9 = arith.constant 0.000000e+00 : f32
      %12 = vector.broadcast %cst_9 : f32 to vector<8x128xf32>
      %c0_10 = arith.constant 0 : index
      %c0_11 = arith.constant 0 : index
      %13 = vector.load %arg7[%c0_10, %c0_11] : memref<8x128xf32, #tpu.memory_space<vmem>>, vector<8x128xf32>
      tpu.vector_store %arg7[%c0_10, %c0_11], %12 {strides = array<i32>} : memref<8x128xf32, #tpu.memory_space<vmem>>, vector<8x128xf32>,
    } else {
    }
    %c0 = arith.constant 0 : index
    %c0_1 = arith.constant 0 : index
    %3 = vector.load %arg7[%c0, %c0_1] : memref<8x128xf32, #tpu.memory_space<vmem>>, vector<8x128xf32>
    %c0_2 = arith.constant 0 : index
    %c0_3 = arith.constant 0 : index
    %4 = vector.load %arg3[%c0_2, %c0_3] : memref<8x384xbf16, #tpu.memory_space<vmem>>, vector<8x384xbf16>
    %c0_4 = arith.constant 0 : index
    %c0_5 = arith.constant 0 : index
    %5 = vector.load %arg4[%c0_4, %c0_5] : memref<384x128xbf16, #tpu.memory_space<vmem>>, vector<384x128xbf16>
    %cst = arith.constant dense<0.000000e+00> : vector<8x128xf32>
    %6 = tpu.matmul %4, %5, %cst {dimension_numbers = #tpu.dot_dimension_numbers<[1], [0], [0], [1], [0, 0, 1, 1], [], []>} : vector<8x384xbf16>, vector<384x128xbf16>, vector<8x128xf32> -> vector<8x128xf32>
    %7 = arith.addf %3, %6 : vector<8x128xf32>
    %c0_6 = arith.constant 0 : index
    %c0_7 = arith.constant 0 : index
    %8 = vector.load %arg7[%c0_6, %c0_7] : memref<8x128xf32, #tpu.memory_space<vmem>>, vector<8x128xf32>
    tpu.vector_store %arg7[%c0_6, %c0_7], %7 {strides = array<i32>} : memref<8x128xf32, #tpu.memory_space<vmem>>, vector<8x128xf32>,
    %c5_i32 = arith.constant 5 : i32
    %9 = arith.cmpi eq, %arg2, %c5_i32 : i32
    %10 = arith.extui %9 : i1 to i32
    %c0_i32_8 = arith.constant 0 : i32
    %11 = arith.cmpi ne, %10, %c0_i32_8 : i32
    scf.if %11 {
      %c0_9 = arith.constant 0 : index
      %c0_10 = arith.constant 0 : index
      %12 = vector.load %arg7[%c0_9, %c0_10] : memref<8x128xf32, #tpu.memory_space<vmem>>, vector<8x128xf32>
      %c0_11 = arith.constant 0 : index
      %c0_12 = arith.constant 0 : index
      %13 = vector.load %arg5[%c0_11, %c0_12] : memref<1x128xf32, #tpu.memory_space<vmem>>, vector<1x128xf32>
      %14 = vector.broadcast %13 : vector<1x128xf32> to vector<8x128xf32>
      %15 = arith.addf %12, %14 : vector<8x128xf32>
      %cst_13 = arith.constant 0.000000e+00 : f32
      %16 = vector.broadcast %cst_13 : f32 to vector<8x128xf32>
      %17 = arith.maximumf %15, %16 : vector<8x128xf32>
      %c0_14 = arith.constant 0 : index
      %c0_15 = arith.constant 0 : index
      %18 = vector.load %arg6[%c0_14, %c0_15] : memref<8x128xf32, #tpu.memory_space<vmem>>, vector<8x128xf32>
      tpu.vector_store %arg6[%c0_14, %c0_15], %17 {strides = array<i32>} : memref<8x128xf32, #tpu.memory_space<vmem>>, vector<8x128xf32>,
    } else {
    }
    return
  }
  func.func @transform_0(%arg0: i32, %arg1: i32, %arg2: i32) -> (i32, i32) {
    %c0_i32 = arith.constant 0 : i32
    return %arg0, %arg2 : i32, i32
  }
  func.func @transform_1(%arg0: i32, %arg1: i32, %arg2: i32) -> (i32, i32) {
    %c0_i32 = arith.constant 0 : i32
    return %arg2, %arg1 : i32, i32
  }
  func.func @transform_2(%arg0: i32, %arg1: i32, %arg2: i32) -> (i32, i32) {
    %c0_i32 = arith.constant 0 : i32
    %c0_i32_0 = arith.constant 0 : i32
    return %c0_i32, %arg1 : i32, i32
  }
  func.func @transform_3(%arg0: i32, %arg1: i32, %arg2: i32) -> (i32, i32) {
    %c0_i32 = arith.constant 0 : i32
    return %arg0, %arg1 : i32, i32
  }
}

module attributes {stable_mosaic.version = 11 : i64} {
  func.func @_mm_kernel(%arg0: i32, %arg1: i32, %arg2: i32, %arg3: memref<8x384xbf16, #tpu.memory_space<vmem>>, %arg4: memref<384x128xbf16, #tpu.memory_space<vmem>>, %arg5: memref<1x128xf32, #tpu.memory_space<vmem>>, %arg6: memref<8x128xf32, #tpu.memory_space<vmem>>, %arg7: memref<8x128xf32, #tpu.memory_space<vmem>>) attributes {dimension_semantics = [#tpu.dimension_semantics<parallel>, #tpu.dimension_semantics<parallel>, #tpu.dimension_semantics<arbitrary>], iteration_bounds = array<i64: 1, 1, 3>, scalar_prefetch = 0 : i64, scratch_operands = 1 : i64, tpu.core_type = #tpu.core_type<tc>, window_params = [{transform_indices = @transform_0, window_bounds = array<i64: 8, 384>}, {transform_indices = @transform_1, window_bounds = array<i64: 384, 128>}, {transform_indices = @transform_2, window_bounds = array<i64: 1, 128>}, {transform_indices = @transform_3, window_bounds = array<i64: 8, 128>}]} {
    %c0_i32 = arith.constant 0 : i32
    %0 = arith.cmpi eq, %arg2, %c0_i32 : i32
    %1 = arith.extui %0 : i1 to i32
    %c0_i32_0 = arith.constant 0 : i32
    %2 = arith.cmpi ne, %1, %c0_i32_0 : i32
    scf.if %2 {
      %cst_9 = arith.constant 0.000000e+00 : f32
      %12 = vector.broadcast %cst_9 : f32 to vector<8x128xf32>
      %c0_10 = arith.constant 0 : index
      %c0_11 = arith.constant 0 : index
      %13 = vector.load %arg7[%c0_10, %c0_11] : memref<8x128xf32, #tpu.memory_space<vmem>>, vector<8x128xf32>
      tpu.vector_store %arg7[%c0_10, %c0_11], %12 {strides = array<i32>} : memref<8x128xf32, #tpu.memory_space<vmem>>, vector<8x128xf32>,
    } else {
    }
    %c0 = arith.constant 0 : index
    %c0_1 = arith.constant 0 : index
    %3 = vector.load %arg7[%c0, %c0_1] : memref<8x128xf32, #tpu.memory_space<vmem>>, vector<8x128xf32>
    %c0_2 = arith.constant 0 : index
    %c0_3 = arith.constant 0 : index
    %4 = vector.load %arg3[%c0_2, %c0_3] : memref<8x384xbf16, #tpu.memory_space<vmem>>, vector<8x384xbf16>
    %c0_4 = arith.constant 0 : index
    %c0_5 = arith.constant 0 : index
    %5 = vector.load %arg4[%c0_4, %c0_5] : memref<384x128xbf16, #tpu.memory_space<vmem>>, vector<384x128xbf16>
    %cst = arith.constant dense<0.000000e+00> : vector<8x128xf32>
    %6 = tpu.matmul %4, %5, %cst {dimension_numbers = #tpu.dot_dimension_numbers<[1], [0], [0], [1], [0, 0, 1, 1], [], []>} : vector<8x384xbf16>, vector<384x128xbf16>, vector<8x128xf32> -> vector<8x128xf32>
    %7 = arith.addf %3, %6 : vector<8x128xf32>
    %c0_6 = arith.constant 0 : index
    %c0_7 = arith.constant 0 : index
    %8 = vector.load %arg7[%c0_6, %c0_7] : memref<8x128xf32, #tpu.memory_space<vmem>>, vector<8x128xf32>
    tpu.vector_store %arg7[%c0_6, %c0_7], %7 {strides = array<i32>} : memref<8x128xf32, #tpu.memory_space<vmem>>, vector<8x128xf32>,
    %c2_i32 = arith.constant 2 : i32
    %9 = arith.cmpi eq, %arg2, %c2_i32 : i32
    %10 = arith.extui %9 : i1 to i32
    %c0_i32_8 = arith.constant 0 : i32
    %11 = arith.cmpi ne, %10, %c0_i32_8 : i32
    scf.if %11 {
      %c0_9 = arith.constant 0 : index
      %c0_10 = arith.constant 0 : index
      %12 = vector.load %arg7[%c0_9, %c0_10] : memref<8x128xf32, #tpu.memory_space<vmem>>, vector<8x128xf32>
      %c0_11 = arith.constant 0 : index
      %c0_12 = arith.constant 0 : index
      %13 = vector.load %arg5[%c0_11, %c0_12] : memref<1x128xf32, #tpu.memory_space<vmem>>, vector<1x128xf32>
      %14 = vector.broadcast %13 : vector<1x128xf32> to vector<8x128xf32>
      %15 = arith.addf %12, %14 : vector<8x128xf32>
      %cst_13 = arith.constant 0.000000e+00 : f32
      %16 = vector.broadcast %cst_13 : f32 to vector<8x128xf32>
      %17 = arith.maximumf %15, %16 : vector<8x128xf32>
      %c0_14 = arith.constant 0 : index
      %c0_15 = arith.constant 0 : index
      %18 = vector.load %arg6[%c0_14, %c0_15] : memref<8x128xf32, #tpu.memory_space<vmem>>, vector<8x128xf32>
      tpu.vector_store %arg6[%c0_14, %c0_15], %17 {strides = array<i32>} : memref<8x128xf32, #tpu.memory_space<vmem>>, vector<8x128xf32>,
    } else {
    }
    return
  }
  func.func @transform_0(%arg0: i32, %arg1: i32, %arg2: i32) -> (i32, i32) {
    %c0_i32 = arith.constant 0 : i32
    return %arg0, %arg2 : i32, i32
  }
  func.func @transform_1(%arg0: i32, %arg1: i32, %arg2: i32) -> (i32, i32) {
    %c0_i32 = arith.constant 0 : i32
    return %arg2, %arg1 : i32, i32
  }
  func.func @transform_2(%arg0: i32, %arg1: i32, %arg2: i32) -> (i32, i32) {
    %c0_i32 = arith.constant 0 : i32
    %c0_i32_0 = arith.constant 0 : i32
    return %c0_i32, %arg1 : i32, i32
  }
  func.func @transform_3(%arg0: i32, %arg1: i32, %arg2: i32) -> (i32, i32) {
    %c0_i32 = arith.constant 0 : i32
    return %arg0, %arg1 : i32, i32
  }
}

module attributes {stable_mosaic.version = 11 : i64} {
  func.func @_mm_res_kernel(%arg0: i32, %arg1: i32, %arg2: i32, %arg3: memref<8x384xbf16, #tpu.memory_space<vmem>>, %arg4: memref<384x256xbf16, #tpu.memory_space<vmem>>, %arg5: memref<1x256xf32, #tpu.memory_space<vmem>>, %arg6: memref<8x256xf32, #tpu.memory_space<vmem>>, %arg7: memref<8x256xf32, #tpu.memory_space<vmem>>, %arg8: memref<8x256xf32, #tpu.memory_space<vmem>>) attributes {dimension_semantics = [#tpu.dimension_semantics<parallel>, #tpu.dimension_semantics<parallel>, #tpu.dimension_semantics<arbitrary>], iteration_bounds = array<i64: 1, 1, 3>, scalar_prefetch = 0 : i64, scratch_operands = 1 : i64, tpu.core_type = #tpu.core_type<tc>, window_params = [{transform_indices = @transform_0, window_bounds = array<i64: 8, 384>}, {transform_indices = @transform_1, window_bounds = array<i64: 384, 256>}, {transform_indices = @transform_2, window_bounds = array<i64: 1, 256>}, {transform_indices = @transform_3, window_bounds = array<i64: 8, 256>}, {transform_indices = @transform_4, window_bounds = array<i64: 8, 256>}]} {
    %c0_i32 = arith.constant 0 : i32
    %0 = arith.cmpi eq, %arg2, %c0_i32 : i32
    %1 = arith.extui %0 : i1 to i32
    %c0_i32_0 = arith.constant 0 : i32
    %2 = arith.cmpi ne, %1, %c0_i32_0 : i32
    scf.if %2 {
      %cst_9 = arith.constant 0.000000e+00 : f32
      %12 = vector.broadcast %cst_9 : f32 to vector<8x256xf32>
      %c0_10 = arith.constant 0 : index
      %c0_11 = arith.constant 0 : index
      %13 = vector.load %arg8[%c0_10, %c0_11] : memref<8x256xf32, #tpu.memory_space<vmem>>, vector<8x256xf32>
      tpu.vector_store %arg8[%c0_10, %c0_11], %12 {strides = array<i32>} : memref<8x256xf32, #tpu.memory_space<vmem>>, vector<8x256xf32>,
    } else {
    }
    %c0 = arith.constant 0 : index
    %c0_1 = arith.constant 0 : index
    %3 = vector.load %arg8[%c0, %c0_1] : memref<8x256xf32, #tpu.memory_space<vmem>>, vector<8x256xf32>
    %c0_2 = arith.constant 0 : index
    %c0_3 = arith.constant 0 : index
    %4 = vector.load %arg3[%c0_2, %c0_3] : memref<8x384xbf16, #tpu.memory_space<vmem>>, vector<8x384xbf16>
    %c0_4 = arith.constant 0 : index
    %c0_5 = arith.constant 0 : index
    %5 = vector.load %arg4[%c0_4, %c0_5] : memref<384x256xbf16, #tpu.memory_space<vmem>>, vector<384x256xbf16>
    %cst = arith.constant dense<0.000000e+00> : vector<8x256xf32>
    %6 = tpu.matmul %4, %5, %cst {dimension_numbers = #tpu.dot_dimension_numbers<[1], [0], [0], [1], [0, 0, 1, 1], [], []>} : vector<8x384xbf16>, vector<384x256xbf16>, vector<8x256xf32> -> vector<8x256xf32>
    %7 = arith.addf %3, %6 : vector<8x256xf32>
    %c0_6 = arith.constant 0 : index
    %c0_7 = arith.constant 0 : index
    %8 = vector.load %arg8[%c0_6, %c0_7] : memref<8x256xf32, #tpu.memory_space<vmem>>, vector<8x256xf32>
    tpu.vector_store %arg8[%c0_6, %c0_7], %7 {strides = array<i32>} : memref<8x256xf32, #tpu.memory_space<vmem>>, vector<8x256xf32>,
    %c2_i32 = arith.constant 2 : i32
    %9 = arith.cmpi eq, %arg2, %c2_i32 : i32
    %10 = arith.extui %9 : i1 to i32
    %c0_i32_8 = arith.constant 0 : i32
    %11 = arith.cmpi ne, %10, %c0_i32_8 : i32
    scf.if %11 {
      %c0_9 = arith.constant 0 : index
      %c0_10 = arith.constant 0 : index
      %12 = vector.load %arg8[%c0_9, %c0_10] : memref<8x256xf32, #tpu.memory_space<vmem>>, vector<8x256xf32>
      %c0_11 = arith.constant 0 : index
      %c0_12 = arith.constant 0 : index
      %13 = vector.load %arg5[%c0_11, %c0_12] : memref<1x256xf32, #tpu.memory_space<vmem>>, vector<1x256xf32>
      %14 = vector.broadcast %13 : vector<1x256xf32> to vector<8x256xf32>
      %15 = arith.addf %12, %14 : vector<8x256xf32>
      %c0_13 = arith.constant 0 : index
      %c0_14 = arith.constant 0 : index
      %16 = vector.load %arg6[%c0_13, %c0_14] : memref<8x256xf32, #tpu.memory_space<vmem>>, vector<8x256xf32>
      %17 = arith.addf %15, %16 : vector<8x256xf32>
      %c0_15 = arith.constant 0 : index
      %c0_16 = arith.constant 0 : index
      %18 = vector.load %arg7[%c0_15, %c0_16] : memref<8x256xf32, #tpu.memory_space<vmem>>, vector<8x256xf32>
      tpu.vector_store %arg7[%c0_15, %c0_16], %17 {strides = array<i32>} : memref<8x256xf32, #tpu.memory_space<vmem>>, vector<8x256xf32>,
    } else {
    }
    return
  }
  func.func @transform_0(%arg0: i32, %arg1: i32, %arg2: i32) -> (i32, i32) {
    %c0_i32 = arith.constant 0 : i32
    return %arg0, %arg2 : i32, i32
  }
  func.func @transform_1(%arg0: i32, %arg1: i32, %arg2: i32) -> (i32, i32) {
    %c0_i32 = arith.constant 0 : i32
    return %arg2, %arg1 : i32, i32
  }
  func.func @transform_2(%arg0: i32, %arg1: i32, %arg2: i32) -> (i32, i32) {
    %c0_i32 = arith.constant 0 : i32
    %c0_i32_0 = arith.constant 0 : i32
    return %c0_i32, %arg1 : i32, i32
  }
  func.func @transform_3(%arg0: i32, %arg1: i32, %arg2: i32) -> (i32, i32) {
    %c0_i32 = arith.constant 0 : i32
    return %arg0, %arg1 : i32, i32
  }
  func.func @transform_4(%arg0: i32, %arg1: i32, %arg2: i32) -> (i32, i32) {
    %c0_i32 = arith.constant 0 : i32
    return %arg0, %arg1 : i32, i32
  }
}

module attributes {stable_mosaic.version = 11 : i64} {
  func.func @_head_kernel(%arg0: i32, %arg1: memref<2x4x256xf32, #tpu.memory_space<vmem>>, %arg2: memref<256x4xf32, #tpu.memory_space<vmem>>, %arg3: memref<1x4xf32, #tpu.memory_space<vmem>>, %arg4: memref<2x4xf32, #tpu.memory_space<vmem>>) attributes {dimension_semantics = [#tpu.dimension_semantics<arbitrary>], iteration_bounds = array<i64: 1>, scalar_prefetch = 0 : i64, scratch_operands = 0 : i64, tpu.core_type = #tpu.core_type<tc>, window_params = [{pipeline_mode = #tpu.pipeline_mode<synchronous>, transform_indices = @transform_0, window_bounds = array<i64: 2, 4, 256>}, {pipeline_mode = #tpu.pipeline_mode<synchronous>, transform_indices = @transform_1, window_bounds = array<i64: 256, 4>}, {pipeline_mode = #tpu.pipeline_mode<synchronous>, transform_indices = @transform_2, window_bounds = array<i64: 1, 4>}, {pipeline_mode = #tpu.pipeline_mode<synchronous>, transform_indices = @transform_3, window_bounds = array<i64: 2, 4>}]} {
    %c0 = arith.constant 0 : index
    %c0_0 = arith.constant 0 : index
    %c0_1 = arith.constant 0 : index
    %0 = vector.load %arg1[%c0, %c0_0, %c0_1] : memref<2x4x256xf32, #tpu.memory_space<vmem>>, vector<2x4x256xf32>
    %cst = arith.constant dense<0.000000e+00> : vector<2x256xf32>
    %1 = vector.multi_reduction <add>, %0, %cst [1] : vector<2x4x256xf32> to vector<2x256xf32>
    %cst_2 = arith.constant 4.000000e+00 : f32
    %2 = vector.broadcast %cst_2 : f32 to vector<2x256xf32>
    %3 = arith.divf %1, %2 : vector<2x256xf32>
    %c0_3 = arith.constant 0 : index
    %c0_4 = arith.constant 0 : index
    %4 = vector.load %arg2[%c0_3, %c0_4] : memref<256x4xf32, #tpu.memory_space<vmem>>, vector<256x4xf32>
    %cst_5 = arith.constant dense<0.000000e+00> : vector<2x4xf32>
    %5 = tpu.matmul %3, %4, %cst_5 {dimension_numbers = #tpu.dot_dimension_numbers<[1], [0], [0], [1], [0, 0, 1, 1], [], []>} : vector<2x256xf32>, vector<256x4xf32>, vector<2x4xf32> -> vector<2x4xf32>
    %c0_6 = arith.constant 0 : index
    %c0_7 = arith.constant 0 : index
    %6 = vector.load %arg3[%c0_6, %c0_7] : memref<1x4xf32, #tpu.memory_space<vmem>>, vector<1x4xf32>
    %7 = vector.broadcast %6 : vector<1x4xf32> to vector<2x4xf32>
    %8 = arith.addf %5, %7 : vector<2x4xf32>
    %c0_8 = arith.constant 0 : index
    %c0_9 = arith.constant 0 : index
    %9 = vector.load %arg4[%c0_8, %c0_9] : memref<2x4xf32, #tpu.memory_space<vmem>>, vector<2x4xf32>
    tpu.vector_store %arg4[%c0_8, %c0_9], %8 {strides = array<i32>} : memref<2x4xf32, #tpu.memory_space<vmem>>, vector<2x4xf32>,
    return
  }
  func.func @transform_0(%arg0: i32) -> (i32, i32, i32) {
    %c0_i32 = arith.constant 0 : i32
    %c0_i32_0 = arith.constant 0 : i32
    %c0_i32_1 = arith.constant 0 : i32
    %c0_i32_2 = arith.constant 0 : i32
    return %c0_i32, %c0_i32_0, %c0_i32_1 : i32, i32, i32
  }
  func.func @transform_1(%arg0: i32) -> (i32, i32) {
    %c0_i32 = arith.constant 0 : i32
    %c0_i32_0 = arith.constant 0 : i32
    %c0_i32_1 = arith.constant 0 : i32
    return %c0_i32, %c0_i32_0 : i32, i32
  }
  func.func @transform_2(%arg0: i32) -> (i32, i32) {
    %c0_i32 = arith.constant 0 : i32
    %c0_i32_0 = arith.constant 0 : i32
    %c0_i32_1 = arith.constant 0 : i32
    return %c0_i32, %c0_i32_0 : i32, i32
  }
  func.func @transform_3(%arg0: i32) -> (i32, i32) {
    %c0_i32 = arith.constant 0 : i32
    %c0_i32_0 = arith.constant 0 : i32
    %c0_i32_1 = arith.constant 0 : i32
    return %c0_i32, %c0_i32_0 : i32, i32
  }
}

</mosaic_0001>

<bundles_post_ra>
// kernel: cnn_res3_forward.48
= control target key start
LH: loop header
LB: loop body
LE: loop exit
PB: predicated region body
PF: predicated region fallthrough
CT: control target
= control target key end

     0   :  { %s1457_s12 = smov 0   ;;  %s1459_s13 = smov 0   ;;  %s1650_s0 = inlined_call_operand.vmem [shape: bf16[512,256], index: 0, kind: input, shape index: {}]   ;;  %s1651_s1 = inlined_call_operand.vmem [shape: bf16[256,128], index: 1, kind: input, shape index: {}]   ;;  %s1652_s2 = inlined_call_operand.vmem [shape: f32[1,128], index: 2, kind: input, shape index: {}]   ;;  %s1653_s3 = inlined_call_operand.vmem [shape: f32[512,128], index: 3, kind: output, shape index: {}]  }
   0x1   :  { %s1461_s14 = smov 0  }
   0x2 LB: > { %s32_s15 = sadd.s32 1, %s1431_s13  ;;  %p1139_p0 = scmp.ge.s32.totalorder %s1435_s14, 1  ;;  %s1435_s14 = sphi %s1461_s14, %s13_s14   ;;  %s1431_s13 = sphi %s1459_s13, %s1655_s13   ;;  %s1427_s12 = sphi %s1457_s12, %s1654_s12  }
   0x3   : > { %p34_p1 = scmp.ge.s32.totalorder %s32_s15, 2  ;;  %p191_p2 = scmp.lt.s32.totalorder %s1435_s14, 3 }
   0x5   : > { %s1657_s15 = smov (%p34_p1, %s32_s15), 0  ;;  %p192_p3 = pnand %p1139_p0, %p191_p2 }
   0x6   : > { %s1140_s18 = sshll.u32 (!%p192_p3), %s1427_s12, 5 }
   0x7   : > { %195 = sbr.rel (%p192_p3) target bundleno = 307 (0x133), region = 32  ;;  %p236_p4 = scmp.lt.s32.totalorder (!%p192_p3), %s1140_s18, 63 }
   0xc   : > { %v1349_v0 = vld [vmem:[%s1651_s1 + $0x78] sm:$0xff]   ;;  %v1351_v2 = vld [vmem:[%s1651_s1 + $0x70] sm:$0xff]   ;;  %v1353_v4 = vld [vmem:[%s1651_s1 + $0x68] sm:$0xff]   ;;  %s1659_s18 = smov (!%p236_p4, %s1140_s18), 63 }
   0xd   : > { %v1350_v1 = vld [vmem:[%s1651_s1 + $0x38] sm:$0xff]   ;;  %1197 = vmatprep.subr.bf16.mxu0 %v1349_v0  ;;  %1309 = vmatprep.subr.bf16.mxu1 %v1349_v0  ;;  %v1352_v3 = vld [vmem:[%s1651_s1 + $0x30] sm:$0xff]   ;;  %v1354_v5 = vld [vmem:[%s1651_s1 + $0x28] sm:$0xff]   ;;  %s1196_s6 = sshll.u32 %s1659_s18, 3 }
   0xe   : > { %1198 = vmatpush3.bf16.msra.mxu0 %v1350_v1  ;;  %1317 = vmatpush3.bf16.msra.mxu1 %v1350_v1  ;;  %v1355_v6 = vld [vmem:[%s1651_s1 + $0x60] sm:$0xff]   ;;  %v1357_v8 = vld [vmem:[%s1651_s1 + $0x58] sm:$0xff]   ;;  %s1510_s11 = scalar_lea.vmem %s1650_s0, %s1196_s6  ;;  %v1359_v10 = vld [vmem:[%s1651_s1 + $0x50] sm:$0xff]   ;;  %s1577_s8 = scalar_lea.vmem %s1653_s3, %s1196_s6 }
   0xf   : > { %1199 = vmatprep.subr.bf16.mxu0 %v1351_v2  ;;  %1310 = vmatprep.subr.bf16.mxu1 %v1351_v2  ;;  %v1356_v7 = vld [vmem:[%s1651_s1 + $0x20] sm:$0xff]   ;;  %v1358_v9 = vld [vmem:[%s1651_s1 + $0x18] sm:$0xff]   ;;  %v1360_v13 = vld [vmem:[%s1651_s1 + $0x10] sm:$0xff]  }
  0x10   : > { %v1367_v11 = vld [vmem:[%s1510_s11 + $0x4] ss:$8 sps:$4 sm:$0xff]   ;;  %v1365_v18 = vld [vmem:[%s1510_s11] ss:$8 sps:$4 sm:$0xff]   ;;  %v1371_v20 = vld [vmem:[%s1510_s11 + $0x14] ss:$8 sps:$4 sm:$0xff]  }
  0x11   : > { %v1370_v12 = vld [vmem:[%s1510_s11 + $0x84] ss:$8 sps:$4 sm:$0xff]   ;;  %688 = vmatprep.mubr.bf16.mxu0 %v1367_v11  ;;  %v1368_v19 = vld [vmem:[%s1510_s11 + $0x80] ss:$8 sps:$4 sm:$0xff]   ;;  %v1373_v21 = vld [vmem:[%s1510_s11 + $0x94] ss:$8 sps:$4 sm:$0xff]  }
  0x12   : > { %1200 = vmatpush3.bf16.msra.mxu0 %v1352_v3  ;;  %1318 = vmatpush3.bf16.msra.mxu1 %v1352_v3  ;;  %v1361_v14 = vld [vmem:[%s1651_s1 + $0x48] sm:$0xff]   ;;  %v1363_v16 = vld [vmem:[%s1651_s1 + $0x40] sm:$0xff]   ;;  %v1375_v22 = vld [vmem:[%s1510_s11 + $0x10] ss:$8 sps:$4 sm:$0xff]  }
  0x13   : > { %1201 = vmatprep.subr.bf16.mxu0 %v1353_v4  ;;  %1311 = vmatprep.subr.bf16.mxu1 %v1353_v4  ;;  %v1362_v15 = vld [vmem:[%s1651_s1 + $0x8] sm:$0xff]   ;;  %v1364_v17 = vld [vmem:[%s1651_s1] sm:$0xff]   ;;  %v1376_v23 = vld [vmem:[%s1510_s11 + $0x90] ss:$8 sps:$4 sm:$0xff]  }
  0x14   : > { %752 = vmatprep.mubr.bf16.mxu1 %v1370_v12  ;;  %v1377_v24 = vld [vmem:[%s1510_s11 + $0x24] ss:$8 sps:$4 sm:$0xff]   ;;  %v1381_v26 = vld [vmem:[%s1510_s11 + $0x20] ss:$8 sps:$4 sm:$0xff]   ;;  %v1383_v28 = vld [vmem:[%s1510_s11 + $0x34] ss:$8 sps:$4 sm:$0xff]  }
  0x15   : > { %v1379_v25 = vld [vmem:[%s1510_s11 + $0xa4] ss:$8 sps:$4 sm:$0xff]   ;;  %v1382_v27 = vld [vmem:[%s1510_s11 + $0xa0] ss:$8 sps:$4 sm:$0xff]   ;;  %v1385_v29 = vld [vmem:[%s1510_s11 + $0xb4] ss:$8 sps:$4 sm:$0xff]  }
  0x16   : > { %1202 = vmatpush3.bf16.msra.mxu0 %v1354_v5  ;;  %1319 = vmatpush3.bf16.msra.mxu1 %v1354_v5  ;;  %v1387_v30 = vld [vmem:[%s1510_s11 + $0x30] ss:$8 sps:$4 sm:$0xff]   ;;  %v1389_v32 = vld [vmem:[%s1510_s11 + $0x44] ss:$8 sps:$4 sm:$0xff]   ;;  %v1393_v34 = vld [vmem:[%s1510_s11 + $0x40] ss:$8 sps:$4 sm:$0xff]  }
  0x17   : > { %1203 = vmatprep.subr.bf16.mxu0 %v1355_v6  ;;  %1312 = vmatprep.subr.bf16.mxu1 %v1355_v6  ;;  %v1388_v31 = vld [vmem:[%s1510_s11 + $0xb0] ss:$8 sps:$4 sm:$0xff]   ;;  %v1391_v33 = vld [vmem:[%s1510_s11 + $0xc4] ss:$8 sps:$4 sm:$0xff]   ;;  %v1394_v35 = vld [vmem:[%s1510_s11 + $0xc0] ss:$8 sps:$4 sm:$0xff]  }
  0x18   : > { %v1395_v36 = vld [vmem:[%s1510_s11 + $0x54] ss:$8 sps:$4 sm:$0xff]   ;;  %v1399_v38 = vld [vmem:[%s1510_s11 + $0x50] ss:$8 sps:$4 sm:$0xff]   ;;  %v1401_v40 = vld [vmem:[%s1510_s11 + $0x64] ss:$8 sps:$4 sm:$0xff]  }
  0x19   : > { %v1397_v37 = vld [vmem:[%s1510_s11 + $0xd4] ss:$8 sps:$4 sm:$0xff]   ;;  %v1400_v39 = vld [vmem:[%s1510_s11 + $0xd0] ss:$8 sps:$4 sm:$0xff]   ;;  %v1403_v41 = vld [vmem:[%s1510_s11 + $0xe4] ss:$8 sps:$4 sm:$0xff]  }
  0x1a   : > { %1204 = vmatpush3.bf16.msra.mxu0 %v1356_v7  ;;  %1320 = vmatpush3.bf16.msra.mxu1 %v1356_v7  ;;  %v1405_v42 = vld [vmem:[%s1510_s11 + $0x60] ss:$8 sps:$4 sm:$0xff]   ;;  %v1407_v44 = vld [vmem:[%s1510_s11 + $0x74] ss:$8 sps:$4 sm:$0xff]   ;;  %v1411_v46 = vld [vmem:[%s1510_s11 + $0x70] ss:$8 sps:$4 sm:$0xff]  }
  0x1b   : > { %1205 = vmatprep.subr.bf16.mxu0 %v1357_v8  ;;  %1313 = vmatprep.subr.bf16.mxu1 %v1357_v8  ;;  %v1406_v43 = vld [vmem:[%s1510_s11 + $0xe0] ss:$8 sps:$4 sm:$0xff]   ;;  %v1409_v45 = vld [vmem:[%s1510_s11 + $0xf4] ss:$8 sps:$4 sm:$0xff]   ;;  %v1412_v47 = vld [vmem:[%s1510_s11 + $0xf0] ss:$8 sps:$4 sm:$0xff]  }
  0x1c   : > { %v1568_v51 = vld [vmem:[%s1652_s2] ss:$0 sm:$0xff] }
  0x1e   : > { %1206 = vmatpush3.bf16.msra.mxu0 %v1358_v9  ;;  %1321 = vmatpush3.bf16.msra.mxu1 %v1358_v9 }
  0x1f   : > { %1207 = vmatprep.subr.bf16.mxu0 %v1359_v10  ;;  %1314 = vmatprep.subr.bf16.mxu1 %v1359_v10 }
  0x22   : > { %1208 = vmatpush3.bf16.msra.mxu0 %v1360_v13  ;;  %1322 = vmatpush3.bf16.msra.mxu1 %v1360_v13 }
  0x23   : > { %1209 = vmatprep.subr.bf16.mxu0 %v1361_v14  ;;  %1315 = vmatprep.subr.bf16.mxu1 %v1361_v14 }
  0x26   : > { %1210 = vmatpush3.bf16.msra.mxu0 %v1362_v15  ;;  %1323 = vmatpush3.bf16.msra.mxu1 %v1362_v15 }
  0x27   : > { %1211 = vmatprep.subr.bf16.mxu0 %v1363_v16  ;;  %1316 = vmatprep.subr.bf16.mxu1 %v1363_v16 }
  0x2a   : > { %1212 = vmatpush3.bf16.msra.mxu0 %v1364_v17  ;;  %1324 = vmatpush3.bf16.msra.mxu1 %v1364_v17 }
  0x2d   : > { %689 = vmatmul.mubr.bf16.vlgmr.msra.gmra.mxu0 %v1365_v18  ;;  %753 = vmatmul.mubr.bf16.vlgmr.msra.gmra.mxu1 %v1368_v19 }
  0x2e   : > { %696 = vmatprep.mubr.bf16.mxu0 %v1371_v20  ;;  %760 = vmatprep.mubr.bf16.mxu1 %v1373_v21 }
  0x35   : > { %697 = vmatmul.mubr.bf16.gmra.mxu0 %v1375_v22  ;;  %761 = vmatmul.mubr.bf16.gmra.mxu1 %v1376_v23 }
  0x36   : > { %704 = vmatprep.mubr.bf16.mxu0 %v1377_v24  ;;  %768 = vmatprep.mubr.bf16.mxu1 %v1379_v25 }
  0x3d   : > { %705 = vmatmul.mubr.bf16.gmra.mxu0 %v1381_v26  ;;  %769 = vmatmul.mubr.bf16.gmra.mxu1 %v1382_v27 }
  0x3e   : > { %712 = vmatprep.mubr.bf16.mxu0 %v1383_v28  ;;  %776 = vmatprep.mubr.bf16.mxu1 %v1385_v29 }
  0x45   : > { %713 = vmatmul.mubr.bf16.gmra.mxu0 %v1387_v30  ;;  %777 = vmatmul.mubr.bf16.gmra.mxu1 %v1388_v31 }
  0x46   : > { %720 = vmatprep.mubr.bf16.mxu0 %v1389_v32  ;;  %784 = vmatprep.mubr.bf16.mxu1 %v1391_v33 }
  0x4d   : > { %721 = vmatmul.mubr.bf16.gmra.mxu0 %v1393_v34  ;;  %785 = vmatmul.mubr.bf16.gmra.mxu1 %v1394_v35 }
  0x4e   : > { %728 = vmatprep.mubr.bf16.mxu0 %v1395_v36  ;;  %792 = vmatprep.mubr.bf16.mxu1 %v1397_v37 }
  0x55   : > { %729 = vmatmul.mubr.bf16.gmra.mxu0 %v1399_v38  ;;  %793 = vmatmul.mubr.bf16.gmra.mxu1 %v1400_v39 }
  0x56   : > { %736 = vmatprep.mubr.bf16.mxu0 %v1401_v40  ;;  %800 = vmatprep.mubr.bf16.mxu1 %v1403_v41 }
  0x5d   : > { %737 = vmatmul.mubr.bf16.gmra.mxu0 %v1405_v42  ;;  %801 = vmatmul.mubr.bf16.gmra.mxu1 %v1406_v43 }
  0x5e   : > { %744 = vmatprep.mubr.bf16.mxu0 %v1407_v44  ;;  %808 = vmatprep.mubr.bf16.mxu1 %v1409_v45 }
  0x65   : > { %745 = vmatmul.mubr.bf16.gmra.mxu0 %v1411_v46  ;;  %809 = vmatmul.mubr.bf16.gmra.mxu1 %v1412_v47 }
  0xed   : > { %v1213_v48 = vpop.f32.mrf.mxu0  ;;  %v1261_v49 = vpop.f32.mrf.mxu1 }
  0xef   : > { %v1214_v50 = vpop.f32.mrf.mxu0  ;;  %v1262_v52 = vpop.f32.mrf.mxu1 }
  0xf0   : > { %v1215_v53 = vadd.f32 %v1214_v50, %v1213_v48  ;;  %v1263_v54 = vadd.f32 %v1262_v52, %v1261_v49 }
  0xf1   : > { %v1216_v55 = vpop.f32.mrf.mxu0  ;;  %v1264_v56 = vpop.f32.mrf.mxu1 }
  0xf2   : > { %v923_v57 = vadd.f32 %v1215_v53, %v1568_v51  ;;  %v939_v58 = vadd.f32 %v1263_v54, %v1568_v51 }
  0xf3   : > { %v1217_v59 = vpop.f32.mrf.mxu0  ;;  %v1265_v60 = vpop.f32.mrf.mxu1 }
  0xf4   : > { %v955_v61 = vmax.f32 %v923_v57, 0.0  ;;  %v971_v62 = vmax.f32 %v939_v58, 0.0  ;;  %v1218_v63 = vadd.f32 %v1217_v59, %v1216_v55  ;;  %v1266_v0 = vadd.f32 %v1265_v60, %v1264_v56 }
  0xf5   : > { %v1219_v1 = vpop.f32.mrf.mxu0  ;;  %v1267_v2 = vpop.f32.mrf.mxu1 }
  0xf6   : > { %987 = vst [vmem:[%s1577_s8] sm:$0xff] %v955_v61  ;;  %1003 = vst [vmem:[%s1577_s8 + $0x80] sm:$0xff] %v971_v62  ;;  %v924_v3 = vadd.f32 %v1218_v63, %v1568_v51  ;;  %v940_v4 = vadd.f32 %v1266_v0, %v1568_v51 }
  0xf7   : > { %v1220_v5 = vpop.f32.mrf.mxu0  ;;  %v1268_v6 = vpop.f32.mrf.mxu1 }
  0xf8   : > { %v956_v7 = vmax.f32 %v924_v3, 0.0  ;;  %v972_v8 = vmax.f32 %v940_v4, 0.0  ;;  %v1221_v9 = vadd.f32 %v1220_v5, %v1219_v1  ;;  %v1269_v10 = vadd.f32 %v1268_v6, %v1267_v2 }
  0xf9   : > { %v1222_v11 = vpop.f32.mrf.mxu0  ;;  %v1270_v12 = vpop.f32.mrf.mxu1 }
  0xfa   : > { %988 = vst [vmem:[%s1577_s8 + $0x8] sm:$0xff] %v956_v7  ;;  %1004 = vst [vmem:[%s1577_s8 + $0x88] sm:$0xff] %v972_v8  ;;  %v925_v13 = vadd.f32 %v1221_v9, %v1568_v51  ;;  %v941_v14 = vadd.f32 %v1269_v10, %v1568_v51 }
  0xfb   : > { %v1223_v15 = vpop.f32.mrf.mxu0  ;;  %v1271_v16 = vpop.f32.mrf.mxu1 }
  0xfc   : > { %v957_v17 = vmax.f32 %v925_v13, 0.0  ;;  %v973_v18 = vmax.f32 %v941_v14, 0.0  ;;  %v1224_v19 = vadd.f32 %v1223_v15, %v1222_v11  ;;  %v1272_v20 = vadd.f32 %v1271_v16, %v1270_v12 }
  0xfd   : > { %v1225_v21 = vpop.f32.mrf.mxu0  ;;  %v1273_v22 = vpop.f32.mrf.mxu1 }
  0xfe   : > { %989 = vst [vmem:[%s1577_s8 + $0x10] sm:$0xff] %v957_v17  ;;  %1005 = vst [vmem:[%s1577_s8 + $0x90] sm:$0xff] %v973_v18  ;;  %v926_v23 = vadd.f32 %v1224_v19, %v1568_v51  ;;  %v942_v24 = vadd.f32 %v1272_v20, %v1568_v51 }
  0xff   : > { %v1226_v25 = vpop.f32.mrf.mxu0  ;;  %v1274_v26 = vpop.f32.mrf.mxu1 }
 0x100   : > { %v958_v27 = vmax.f32 %v926_v23, 0.0  ;;  %v974_v28 = vmax.f32 %v942_v24, 0.0  ;;  %v1227_v29 = vadd.f32 %v1226_v25, %v1225_v21  ;;  %v1275_v30 = vadd.f32 %v1274_v26, %v1273_v22 }
 0x101   : > { %v1228_v31 = vpop.f32.mrf.mxu0  ;;  %v1276_v32 = vpop.f32.mrf.mxu1 }
 0x102   : > { %990 = vst [vmem:[%s1577_s8 + $0x18] sm:$0xff] %v958_v27  ;;  %1006 = vst [vmem:[%s1577_s8 + $0x98] sm:$0xff] %v974_v28  ;;  %v927_v33 = vadd.f32 %v1227_v29, %v1568_v51  ;;  %v943_v34 = vadd.f32 %v1275_v30, %v1568_v51 }
 0x103   : > { %v1229_v35 = vpop.f32.mrf.mxu0  ;;  %v1277_v36 = vpop.f32.mrf.mxu1 }
 0x104   : > { %v959_v37 = vmax.f32 %v927_v33, 0.0  ;;  %v975_v38 = vmax.f32 %v943_v34, 0.0  ;;  %v1230_v39 = vadd.f32 %v1229_v35, %v1228_v31  ;;  %v1278_v40 = vadd.f32 %v1277_v36, %v1276_v32 }
 0x105   : > { %v1231_v41 = vpop.f32.mrf.mxu0  ;;  %v1279_v42 = vpop.f32.mrf.mxu1 }
 0x106   : > { %991 = vst [vmem:[%s1577_s8 + $0x20] sm:$0xff] %v959_v37  ;;  %1007 = vst [vmem:[%s1577_s8 + $0xa0] sm:$0xff] %v975_v38  ;;  %v928_v43 = vadd.f32 %v1230_v39, %v1568_v51  ;;  %v944_v44 = vadd.f32 %v1278_v40, %v1568_v51 }
 0x107   : > { %v1232_v45 = vpop.f32.mrf.mxu0  ;;  %v1280_v46 = vpop.f32.mrf.mxu1 }
 0x108   : > { %v960_v47 = vmax.f32 %v928_v43, 0.0  ;;  %v976_v48 = vmax.f32 %v944_v44, 0.0  ;;  %v1233_v49 = vadd.f32 %v1232_v45, %v1231_v41  ;;  %v1281_v50 = vadd.f32 %v1280_v46, %v1279_v42 }
 0x109   : > { %v1234_v52 = vpop.f32.mrf.mxu0  ;;  %v1282_v53 = vpop.f32.mrf.mxu1 }
 0x10a   : > { %992 = vst [vmem:[%s1577_s8 + $0x28] sm:$0xff] %v960_v47  ;;  %1008 = vst [vmem:[%s1577_s8 + $0xa8] sm:$0xff] %v976_v48  ;;  %v929_v54 = vadd.f32 %v1233_v49, %v1568_v51  ;;  %v945_v55 = vadd.f32 %v1281_v50, %v1568_v51 }
 0x10b   : > { %v1235_v56 = vpop.f32.mrf.mxu0  ;;  %v1283_v57 = vpop.f32.mrf.mxu1 }
 0x10c   : > { %v961_v58 = vmax.f32 %v929_v54, 0.0  ;;  %v977_v59 = vmax.f32 %v945_v55, 0.0  ;;  %v1236_v60 = vadd.f32 %v1235_v56, %v1234_v52  ;;  %v1284_v61 = vadd.f32 %v1283_v57, %v1282_v53 }
 0x10d   : > { %v1237_v62 = vpop.f32.mrf.mxu0  ;;  %v1285_v63 = vpop.f32.mrf.mxu1 }
 0x10e   : > { %993 = vst [vmem:[%s1577_s8 + $0x30] sm:$0xff] %v961_v58  ;;  %1009 = vst [vmem:[%s1577_s8 + $0xb0] sm:$0xff] %v977_v59  ;;  %v930_v0 = vadd.f32 %v1236_v60, %v1568_v51  ;;  %v946_v1 = vadd.f32 %v1284_v61, %v1568_v51 }
 0x10f   : > { %v1238_v2 = vpop.f32.mrf.mxu0  ;;  %v1286_v3 = vpop.f32.mrf.mxu1 }
 0x110   : > { %v962_v4 = vmax.f32 %v930_v0, 0.0  ;;  %v978_v5 = vmax.f32 %v946_v1, 0.0  ;;  %v1239_v6 = vadd.f32 %v1238_v2, %v1237_v62  ;;  %v1287_v7 = vadd.f32 %v1286_v3, %v1285_v63 }
 0x111   : > { %v1240_v8 = vpop.f32.mrf.mxu0  ;;  %v1288_v9 = vpop.f32.mrf.mxu1 }
 0x112   : > { %994 = vst [vmem:[%s1577_s8 + $0x38] sm:$0xff] %v962_v4  ;;  %1010 = vst [vmem:[%s1577_s8 + $0xb8] sm:$0xff] %v978_v5  ;;  %v931_v10 = vadd.f32 %v1239_v6, %v1568_v51  ;;  %v947_v11 = vadd.f32 %v1287_v7, %v1568_v51 }
 0x113   : > { %v1241_v12 = vpop.f32.mrf.mxu0  ;;  %v1289_v13 = vpop.f32.mrf.mxu1 }
 0x114   : > { %v963_v14 = vmax.f32 %v931_v10, 0.0  ;;  %v979_v15 = vmax.f32 %v947_v11, 0.0  ;;  %v1242_v16 = vadd.f32 %v1241_v12, %v1240_v8  ;;  %v1290_v17 = vadd.f32 %v1289_v13, %v1288_v9 }
 0x115   : > { %v1243_v18 = vpop.f32.mrf.mxu0  ;;  %v1291_v19 = vpop.f32.mrf.mxu1 }
 0x116   : > { %995 = vst [vmem:[%s1577_s8 + $0x40] sm:$0xff] %v963_v14  ;;  %1011 = vst [vmem:[%s1577_s8 + $0xc0] sm:$0xff] %v979_v15  ;;  %v932_v20 = vadd.f32 %v1242_v16, %v1568_v51  ;;  %v948_v21 = vadd.f32 %v1290_v17, %v1568_v51 }
 0x117   : > { %v1244_v22 = vpop.f32.mrf.mxu0  ;;  %v1292_v23 = vpop.f32.mrf.mxu1 }
 0x118   : > { %v964_v24 = vmax.f32 %v932_v20, 0.0  ;;  %v980_v25 = vmax.f32 %v948_v21, 0.0  ;;  %v1245_v26 = vadd.f32 %v1244_v22, %v1243_v18  ;;  %v1293_v27 = vadd.f32 %v1292_v23, %v1291_v19 }
 0x119   : > { %v1246_v28 = vpop.f32.mrf.mxu0  ;;  %v1294_v29 = vpop.f32.mrf.mxu1 }
 0x11a   : > { %996 = vst [vmem:[%s1577_s8 + $0x48] sm:$0xff] %v964_v24  ;;  %1012 = vst [vmem:[%s1577_s8 + $0xc8] sm:$0xff] %v980_v25  ;;  %v933_v30 = vadd.f32 %v1245_v26, %v1568_v51  ;;  %v949_v31 = vadd.f32 %v1293_v27, %v1568_v51 }
 0x11b   : > { %v1247_v32 = vpop.f32.mrf.mxu0  ;;  %v1295_v33 = vpop.f32.mrf.mxu1 }
 0x11c   : > { %v965_v34 = vmax.f32 %v933_v30, 0.0  ;;  %v981_v35 = vmax.f32 %v949_v31, 0.0  ;;  %v1248_v36 = vadd.f32 %v1247_v32, %v1246_v28  ;;  %v1296_v37 = vadd.f32 %v1295_v33, %v1294_v29 }
 0x11d   : > { %v1249_v38 = vpop.f32.mrf.mxu0  ;;  %v1297_v39 = vpop.f32.mrf.mxu1 }
 0x11e   : > { %997 = vst [vmem:[%s1577_s8 + $0x50] sm:$0xff] %v965_v34  ;;  %1013 = vst [vmem:[%s1577_s8 + $0xd0] sm:$0xff] %v981_v35  ;;  %v934_v40 = vadd.f32 %v1248_v36, %v1568_v51  ;;  %v950_v41 = vadd.f32 %v1296_v37, %v1568_v51 }
 0x11f   : > { %v1250_v42 = vpop.f32.mrf.mxu0  ;;  %v1298_v43 = vpop.f32.mrf.mxu1 }
 0x120   : > { %v966_v44 = vmax.f32 %v934_v40, 0.0  ;;  %v982_v45 = vmax.f32 %v950_v41, 0.0  ;;  %v1251_v46 = vadd.f32 %v1250_v42, %v1249_v38  ;;  %v1299_v47 = vadd.f32 %v1298_v43, %v1297_v39 }
 0x121   : > { %v1252_v48 = vpop.f32.mrf.mxu0  ;;  %v1300_v49 = vpop.f32.mrf.mxu1 }
 0x122   : > { %998 = vst [vmem:[%s1577_s8 + $0x58] sm:$0xff] %v966_v44  ;;  %1014 = vst [vmem:[%s1577_s8 + $0xd8] sm:$0xff] %v982_v45  ;;  %v935_v50 = vadd.f32 %v1251_v46, %v1568_v51  ;;  %v951_v52 = vadd.f32 %v1299_v47, %v1568_v51 }
 0x123   : > { %v1253_v53 = vpop.f32.mrf.mxu0  ;;  %v1301_v54 = vpop.f32.mrf.mxu1 }
 0x124   : > { %v967_v55 = vmax.f32 %v935_v50, 0.0  ;;  %v983_v56 = vmax.f32 %v951_v52, 0.0  ;;  %v1254_v57 = vadd.f32 %v1253_v53, %v1252_v48  ;;  %v1302_v58 = vadd.f32 %v1301_v54, %v1300_v49 }
 0x125   : > { %v1255_v59 = vpop.f32.mrf.mxu0  ;;  %v1303_v60 = vpop.f32.mrf.mxu1 }
 0x126   : > { %999 = vst [vmem:[%s1577_s8 + $0x60] sm:$0xff] %v967_v55  ;;  %1015 = vst [vmem:[%s1577_s8 + $0xe0] sm:$0xff] %v983_v56  ;;  %v936_v61 = vadd.f32 %v1254_v57, %v1568_v51  ;;  %v952_v62 = vadd.f32 %v1302_v58, %v1568_v51 }
 0x127   : > { %v1256_v63 = vpop.f32.mrf.mxu0  ;;  %v1304_v0 = vpop.f32.mrf.mxu1 }
 0x128   : > { %v968_v1 = vmax.f32 %v936_v61, 0.0  ;;  %v984_v2 = vmax.f32 %v952_v62, 0.0  ;;  %v1257_v3 = vadd.f32 %v1256_v63, %v1255_v59  ;;  %v1305_v4 = vadd.f32 %v1304_v0, %v1303_v60 }
 0x129   : > { %v1258_v5 = vpop.f32.mrf.mxu0  ;;  %v1306_v6 = vpop.f32.mrf.mxu1 }
 0x12a   : > { %1000 = vst [vmem:[%s1577_s8 + $0x68] sm:$0xff] %v968_v1  ;;  %1016 = vst [vmem:[%s1577_s8 + $0xe8] sm:$0xff] %v984_v2  ;;  %v937_v7 = vadd.f32 %v1257_v3, %v1568_v51  ;;  %v953_v8 = vadd.f32 %v1305_v4, %v1568_v51 }
 0x12b   : > { %v1259_v9 = vpop.f32.mrf.mxu0  ;;  %v1307_v10 = vpop.f32.mrf.mxu1 }
 0x12c   : > { %v969_v11 = vmax.f32 %v937_v7, 0.0  ;;  %v985_v12 = vmax.f32 %v953_v8, 0.0  ;;  %v1260_v13 = vadd.f32 %v1259_v9, %v1258_v5  ;;  %v1308_v14 = vadd.f32 %v1307_v10, %v1306_v6 }
 0x12e   : > { %1001 = vst [vmem:[%s1577_s8 + $0x70] sm:$0xff] %v969_v11  ;;  %1017 = vst [vmem:[%s1577_s8 + $0xf0] sm:$0xff] %v985_v12  ;;  %v938_v15 = vadd.f32 %v1260_v13, %v1568_v51  ;;  %v954_v16 = vadd.f32 %v1308_v14, %v1568_v51 }
 0x130   : > { %v970_v17 = vmax.f32 %v938_v15, 0.0  ;;  %v986_v18 = vmax.f32 %v954_v16, 0.0 }
 0x132   : > { %1002 = vst [vmem:[%s1577_s8 + $0x78] sm:$0xff] %v970_v17  ;;  %1018 = vst [vmem:[%s1577_s8 + $0xf8] sm:$0xff] %v986_v18 }
 0x133 PF: > { %s13_s14 = sadd.s32 1, %s1435_s14   ;;  %s1654_s12 = smov %s1431_s13 }
 0x134   : > { %p10_p5 = scmp.ge.s32.totalorder %s13_s14, 4   ;;  %s1655_s13 = smov %s1657_s15 }
 0x136   :  { %12 = sbr.rel (!%p10_p5) target bundleno = 2 (0x2), region = 76 }

// kernel: cnn_res3_forward.49
= control target key start
LH: loop header
LB: loop body
LE: loop exit
PB: predicated region body
PF: predicated region fallthrough
CT: control target
= control target key end

     0   :  { %s602_s1 = inlined_call_operand.vmem [shape: bf16[128,128], index: 1, kind: input, shape index: {}]   ;;  %s603_s0 = inlined_call_operand.vmem [shape: bf16[128,128], index: 0, kind: input, shape index: {}]   ;;  %s604_s2 = inlined_call_operand.vmem [shape: f32[1,128], index: 2, kind: input, shape index: {}]   ;;  %s605_s3 = inlined_call_operand.vmem [shape: f32[128,128], index: 3, kind: output, shape index: {}]  }
   0x1   :  { %v467_v0 = vld [vmem:[%s602_s1 + $0x38] sm:$0xff]   ;;  %v468_v1 = vld [vmem:[%s602_s1 + $0x30] sm:$0xff]   ;;  %v469_v2 = vld [vmem:[%s602_s1 + $0x28] sm:$0xff]  }
   0x2   :  { %419 = vmatprep.subr.bf16.mxu0 %v467_v0  ;;  %451 = vmatprep.subr.bf16.mxu1 %v467_v0  ;;  %v470_v3 = vld [vmem:[%s602_s1 + $0x20] sm:$0xff]   ;;  %v471_v6 = vld [vmem:[%s602_s1 + $0x18] sm:$0xff]   ;;  %v472_v7 = vld [vmem:[%s602_s1 + $0x10] sm:$0xff]  }
   0x3   :  { %420 = vmatpush3.bf16.msra.mxu0 %v467_v0  ;;  %459 = vmatpush3.bf16.msra.mxu1 %v467_v0  ;;  %v475_v4 = vld [vmem:[%s603_s0] sm:$0xff]   ;;  %v473_v8 = vld [vmem:[%s602_s1 + $0x8] sm:$0xff]   ;;  %v479_v12 = vld [vmem:[%s603_s0 + $0x10] sm:$0xff]  }
   0x4   :  { %421 = vmatprep.subr.bf16.mxu0 %v468_v1  ;;  %452 = vmatprep.subr.bf16.mxu1 %v468_v1  ;;  %v476_v5 = vld [vmem:[%s603_s0 + $0x20] sm:$0xff]   ;;  %v477_v10 = vld [vmem:[%s603_s0 + $0x8] sm:$0xff]   ;;  %v480_v13 = vld [vmem:[%s603_s0 + $0x30] sm:$0xff]  }
   0x5   :  { %435 = vmatprep.mubr.bf16.mxu0 %v475_v4  ;;  %443 = vmatprep.mubr.bf16.mxu1 %v476_v5  ;;  %v474_v9 = vld [vmem:[%s602_s1] sm:$0xff]   ;;  %v478_v11 = vld [vmem:[%s603_s0 + $0x28] sm:$0xff]   ;;  %v481_v14 = vld [vmem:[%s603_s0 + $0x18] sm:$0xff]  }
   0x6   :  { %v482_v15 = vld [vmem:[%s603_s0 + $0x38] sm:$0xff]   ;;  %v402_v16 = vld [vmem:[%s604_s2] ss:$0 sm:$0xff] }
   0x7   :  { %422 = vmatpush3.bf16.msra.mxu0 %v468_v1  ;;  %460 = vmatpush3.bf16.msra.mxu1 %v468_v1 }
   0x8   :  { %423 = vmatprep.subr.bf16.mxu0 %v469_v2  ;;  %453 = vmatprep.subr.bf16.mxu1 %v469_v2 }
   0xb   :  { %424 = vmatpush3.bf16.msra.mxu0 %v469_v2  ;;  %461 = vmatpush3.bf16.msra.mxu1 %v469_v2 }
   0xc   :  { %425 = vmatprep.subr.bf16.mxu0 %v470_v3  ;;  %454 = vmatprep.subr.bf16.mxu1 %v470_v3 }
   0xf   :  { %426 = vmatpush3.bf16.msra.mxu0 %v470_v3  ;;  %462 = vmatpush3.bf16.msra.mxu1 %v470_v3 }
  0x10   :  { %427 = vmatprep.subr.bf16.mxu0 %v471_v6  ;;  %455 = vmatprep.subr.bf16.mxu1 %v471_v6 }
  0x13   :  { %428 = vmatpush3.bf16.msra.mxu0 %v471_v6  ;;  %463 = vmatpush3.bf16.msra.mxu1 %v471_v6 }
  0x14   :  { %429 = vmatprep.subr.bf16.mxu0 %v472_v7  ;;  %456 = vmatprep.subr.bf16.mxu1 %v472_v7 }
  0x17   :  { %430 = vmatpush3.bf16.msra.mxu0 %v472_v7  ;;  %464 = vmatpush3.bf16.msra.mxu1 %v472_v7 }
  0x18   :  { %431 = vmatprep.subr.bf16.mxu0 %v473_v8  ;;  %457 = vmatprep.subr.bf16.mxu1 %v473_v8 }
  0x1b   :  { %432 = vmatpush3.bf16.msra.mxu0 %v473_v8  ;;  %465 = vmatpush3.bf16.msra.mxu1 %v473_v8 }
  0x1c   :  { %433 = vmatprep.subr.bf16.mxu0 %v474_v9  ;;  %458 = vmatprep.subr.bf16.mxu1 %v474_v9 }
  0x1f   :  { %434 = vmatpush3.bf16.msra.mxu0 %v474_v9  ;;  %466 = vmatpush3.bf16.msra.mxu1 %v474_v9 }
  0x22   :  { %436 = vmatmul.mubr.bf16.vlgmr.msra.gmra.mxu0 %v477_v10  ;;  %444 = vmatmul.mubr.bf16.vlgmr.msra.gmra.mxu1 %v478_v11 }
  0x23   :  { %439 = vmatprep.mubr.bf16.mxu0 %v479_v12  ;;  %447 = vmatprep.mubr.bf16.mxu1 %v480_v13 }
  0x2a   :  { %440 = vmatmul.mubr.bf16.gmra.mxu0 %v481_v14  ;;  %448 = vmatmul.mubr.bf16.gmra.mxu1 %v482_v15 }
  0xe2   :  { %v437_v17 = vpop.f32.mrf.mxu0  ;;  %v445_v18 = vpop.f32.mrf.mxu1 }
  0xe3   :  { %v336_v19 = vadd.f32 %v437_v17, %v402_v16  ;;  %v344_v20 = vadd.f32 %v445_v18, %v402_v16 }
  0xe4   :  { %v213_v21 = vpop.f32.mrf.mxu0  ;;  %v245_v22 = vpop.f32.mrf.mxu1 }
  0xe5   :  { %v352_v23 = vmax.f32 %v336_v19, 0.0  ;;  %v360_v24 = vmax.f32 %v344_v20, 0.0  ;;  %v334_v25 = vadd.f32 %v402_v16, %v213_v21  ;;  %v342_v26 = vadd.f32 %v402_v16, %v245_v22 }
  0xe6   :  { %v438_v27 = vpop.f32.mrf.mxu0  ;;  %v446_v28 = vpop.f32.mrf.mxu1 }
  0xe7   :  { %368 = vst [vmem:[%s605_s3 + $0x10] sm:$0xff] %v352_v23  ;;  %376 = vst [vmem:[%s605_s3 + $0x50] sm:$0xff] %v360_v24  ;;  %v350_v29 = vmax.f32 %v334_v25, 0.0  ;;  %v358_v30 = vmax.f32 %v342_v26, 0.0  ;;  %v337_v31 = vadd.f32 %v438_v27, %v402_v16  ;;  %v345_v32 = vadd.f32 %v446_v28, %v402_v16 }
  0xe8   :  { %v216_v33 = vpop.f32.mrf.mxu0  ;;  %v248_v34 = vpop.f32.mrf.mxu1 }
  0xe9   :  { %366 = vst [vmem:[%s605_s3] sm:$0xff] %v350_v29  ;;  %374 = vst [vmem:[%s605_s3 + $0x40] sm:$0xff] %v358_v30  ;;  %v353_v35 = vmax.f32 %v337_v31, 0.0  ;;  %v361_v36 = vmax.f32 %v345_v32, 0.0  ;;  %v335_v37 = vadd.f32 %v402_v16, %v216_v33  ;;  %v343_v38 = vadd.f32 %v402_v16, %v248_v34 }
  0xea   :  { %v441_v39 = vpop.f32.mrf.mxu0  ;;  %v449_v40 = vpop.f32.mrf.mxu1 }
  0xeb   :  { %369 = vst [vmem:[%s605_s3 + $0x18] sm:$0xff] %v353_v35  ;;  %377 = vst [vmem:[%s605_s3 + $0x58] sm:$0xff] %v361_v36  ;;  %v351_v41 = vmax.f32 %v335_v37, 0.0  ;;  %v359_v42 = vmax.f32 %v343_v38, 0.0  ;;  %v340_v43 = vadd.f32 %v441_v39, %v402_v16  ;;  %v348_v44 = vadd.f32 %v449_v40, %v402_v16 }
  0xec   :  { %v229_v45 = vpop.f32.mrf.mxu0  ;;  %v261_v46 = vpop.f32.mrf.mxu1 }
  0xed   :  { %367 = vst [vmem:[%s605_s3 + $0x8] sm:$0xff] %v351_v41  ;;  %375 = vst [vmem:[%s605_s3 + $0x48] sm:$0xff] %v359_v42  ;;  %v356_v47 = vmax.f32 %v340_v43, 0.0  ;;  %v364_v48 = vmax.f32 %v348_v44, 0.0  ;;  %v338_v49 = vadd.f32 %v402_v16, %v229_v45  ;;  %v346_v50 = vadd.f32 %v402_v16, %v261_v46 }
  0xee   :  { %v442_v51 = vpop.f32.mrf.mxu0  ;;  %v450_v52 = vpop.f32.mrf.mxu1 }
  0xef   :  { %372 = vst [vmem:[%s605_s3 + $0x30] sm:$0xff] %v356_v47  ;;  %380 = vst [vmem:[%s605_s3 + $0x70] sm:$0xff] %v364_v48  ;;  %v354_v53 = vmax.f32 %v338_v49, 0.0  ;;  %v362_v54 = vmax.f32 %v346_v50, 0.0  ;;  %v341_v55 = vadd.f32 %v442_v51, %v402_v16  ;;  %v349_v56 = vadd.f32 %v450_v52, %v402_v16 }
  0xf0   :  { %v232_v57 = vpop.f32.mrf.mxu0  ;;  %v264_v58 = vpop.f32.mrf.mxu1 }
  0xf1   :  { %370 = vst [vmem:[%s605_s3 + $0x20] sm:$0xff] %v354_v53  ;;  %378 = vst [vmem:[%s605_s3 + $0x60] sm:$0xff] %v362_v54  ;;  %v357_v59 = vmax.f32 %v341_v55, 0.0  ;;  %v365_v60 = vmax.f32 %v349_v56, 0.0  ;;  %v339_v61 = vadd.f32 %v402_v16, %v232_v57  ;;  %v347_v62 = vadd.f32 %v402_v16, %v264_v58 }
  0xf3   :  { %373 = vst [vmem:[%s605_s3 + $0x38] sm:$0xff] %v357_v59  ;;  %381 = vst [vmem:[%s605_s3 + $0x78] sm:$0xff] %v365_v60  ;;  %v355_v63 = vmax.f32 %v339_v61, 0.0  ;;  %v363_v0 = vmax.f32 %v347_v62, 0.0 }
  0xf5   :  { %371 = vst [vmem:[%s605_s3 + $0x28] sm:$0xff] %v355_v63  ;;  %379 = vst [vmem:[%s605_s3 + $0x68] sm:$0xff] %v363_v0 }

// kernel: cnn_res3_forward.50
= control target key start
LH: loop header
LB: loop body
LE: loop exit
PB: predicated region body
PF: predicated region fallthrough
CT: control target
= control target key end

     0   :  { %s1049_s12 = smov 0   ;;  %s1051_s13 = smov 0   ;;  %s1205_s0 = inlined_call_operand.vmem [shape: bf16[128,640], index: 0, kind: input, shape index: {}]   ;;  %s1206_s1 = inlined_call_operand.vmem [shape: bf16[640,128], index: 1, kind: input, shape index: {}]   ;;  %s1207_s2 = inlined_call_operand.vmem [shape: f32[1,128], index: 2, kind: input, shape index: {}]   ;;  %s1208_s3 = inlined_call_operand.vmem [shape: f32[128,128], index: 3, kind: output, shape index: {}]  }
   0x1   :  { %s1053_s14 = smov 0   ;;  %s1055_s15 = smov 0  }
   0x2   :  { %s1057_s16 = smov 0  }
   0x3 LB: > { %s25_s17 = sadd.s32 1, %s1022_s15  ;;  %p48_p1 = scmp.ne.s32.totalorder %s1014_s13, %s1010_s12  ;;  %s1026_s16 = sphi %s1057_s16, %s13_s16   ;;  %s1022_s15 = sphi %s1055_s15, %s1212_s15   ;;  %s1018_s14 = sphi %s1053_s14, %s1211_s14   ;;  %s1014_s13 = sphi %s1051_s13, %s1210_s13   ;;  %s1010_s12 = sphi %s1049_s12, %s1209_s12  }
   0x4   : > { %p26_p0 = scmp.ge.s32.totalorder %s25_s17, 5  ;;  %p49_p2 = scmp.eq.s32.totalorder %s1026_s16, 0 }
   0x5   : > { %s41_s19 = sadd.s32 1, %s1014_s13  ;;  %p837_p5 = scmp.ge.s32.totalorder %s1026_s16, 5 }
   0x6   : > { %s1214_s17 = smov (%p26_p0, %s25_s17), 0  ;;  %p50_p3 = por %p49_p2, %p48_p1 }
   0x7   : > { %s37_s18 = ssub.s32 %s1022_s15, %s1214_s17  ;;  %162 = sbr.rel (%p837_p5) target bundleno = 26 (0x1a), region = 20 }
   0x8   : > { %p39_p4 = scmp.eq.s32.totalorder %s37_s18, 0 }
   0xa   : > { %s1084_s20 = scalar_select %p39_p4, %s1014_s13, %s41_s19  }
   0xc   : > { %165 = sbr.rel (!%p50_p3) target bundleno = 26 (0x1a), region = 24  ;;  %s167_s21 = sand.u32 (%p50_p3), 1, %s1014_s13  }
   0xd   : > { %s839_s22 = sshll.u32 (%p50_p3), %s1022_s15, 2  ;;  %s838_s23 = sshll.u32 (%p50_p3), %s167_s21, 6 }
   0xe   : > { %s1092_s26 = scalar_lea.vmem (%p50_p3), %s1205_s0, %s839_s22  ;;  %s169_s27 = scalar_lea.vmem (%p50_p3), [#allocation3], %s838_s23 }
   0xf   : > { %v191_v0 = vld [vmem:[%s1092_s26] sm:$0xf] (%p50_p3)  ;;  %v193_v1 = vld [vmem:[%s1092_s26 + $0x14] sm:$0xf] (%p50_p3)  ;;  %v195_v2 = vld [vmem:[%s1092_s26 + $0x28] sm:$0xf] (%p50_p3) }
  0x10   : > { %192 = vst [vmem:[%s169_s27] sm:$0xf] (%p50_p3), %v191_v0  ;;  %194 = vst [vmem:[%s169_s27 + $0x4] sm:$0xf] (%p50_p3), %v193_v1  ;;  %v197_v3 = vld [vmem:[%s1092_s26 + $0x3c] sm:$0xf] (%p50_p3) }
  0x11   : > { %v199_v4 = vld [vmem:[%s1092_s26 + $0x50] sm:$0xf]  ;;  %196 = vst [vmem:[%s169_s27 + $0x8] sm:$0xf] %v195_v2  ;;  %198 = vst [vmem:[%s169_s27 + $0xc] sm:$0xf] %v197_v3 }
  0x12   : > { %200 = vst [vmem:[%s169_s27 + $0x10] sm:$0xf] %v199_v4  ;;  %v201_v5 = vld [vmem:[%s1092_s26 + $0x64] sm:$0xf]  ;;  %v203_v6 = vld [vmem:[%s1092_s26 + $0x78] sm:$0xf] }
  0x13   : > { %v205_v7 = vld [vmem:[%s1092_s26 + $0x8c] sm:$0xf]  ;;  %202 = vst [vmem:[%s169_s27 + $0x14] sm:$0xf] %v201_v5  ;;  %204 = vst [vmem:[%s169_s27 + $0x18] sm:$0xf] %v203_v6 }
  0x14   : > { %206 = vst [vmem:[%s169_s27 + $0x1c] sm:$0xf] %v205_v7  ;;  %v207_v8 = vld [vmem:[%s1092_s26 + $0xa0] sm:$0xf]  ;;  %v209_v9 = vld [vmem:[%s1092_s26 + $0xb4] sm:$0xf] }
  0x15   : > { %v211_v10 = vld [vmem:[%s1092_s26 + $0xc8] sm:$0xf]  ;;  %208 = vst [vmem:[%s169_s27 + $0x20] sm:$0xf] %v207_v8  ;;  %210 = vst [vmem:[%s169_s27 + $0x24] sm:$0xf] %v209_v9 }
  0x16   : > { %212 = vst [vmem:[%s169_s27 + $0x28] sm:$0xf] %v211_v10  ;;  %v213_v11 = vld [vmem:[%s1092_s26 + $0xdc] sm:$0xf]  ;;  %v215_v12 = vld [vmem:[%s1092_s26 + $0xf0] sm:$0xf] }
  0x17   : > { %v217_v13 = vld [vmem:[%s1092_s26 + $0x104] sm:$0xf]  ;;  %214 = vst [vmem:[%s169_s27 + $0x2c] sm:$0xf] %v213_v11  ;;  %216 = vst [vmem:[%s169_s27 + $0x30] sm:$0xf] %v215_v12 }
  0x18   : > { %218 = vst [vmem:[%s169_s27 + $0x34] sm:$0xf] %v217_v13  ;;  %v219_v14 = vld [vmem:[%s1092_s26 + $0x118] sm:$0xf]  ;;  %v221_v15 = vld [vmem:[%s1092_s26 + $0x12c] sm:$0xf] }
  0x19   : > { %220 = vst [vmem:[%s169_s27 + $0x38] sm:$0xf] %v219_v14  ;;  %222 = vst [vmem:[%s169_s27 + $0x3c] sm:$0xf] %v221_v15 }
  0x1a PF: > { %p840_p6 = scmp.ge.s32.totalorder %s1026_s16, 1  ;;  %p289_p7 = scmp.lt.s32.totalorder %s1026_s16, 6 }
  0x1c   : > { %p290_p8 = pnand %p840_p6, %p289_p7 }
  0x1d   : > { %s296_s28 = sand.u32 (!%p290_p8), 1, %s1010_s12   ;;  %s842_s29 = sshll.u32 (!%p290_p8), %s1018_s14, 4 }
  0x1e   : > { %293 = sbr.rel (%p290_p8) target bundleno = 305 (0x131), region = 69  ;;  %s841_s30 = sshll.u32 (!%p290_p8), %s296_s28, 6 }
  0x1f   : > { %p335_p9 = scmp.lt.s32.totalorder (!%p290_p8), %s842_s29, 79  ;;  %s1119_s8 = scalar_lea.vmem (!%p290_p8), [#allocation3], %s841_s30 }
  0x20   : > { %p844_p10 = scmp.ne.s32.totalorder (!%p290_p8), %s1018_s14, 0 }
  0x23   : > { %s1216_s29 = smov (!%p335_p9, %s842_s29), 79  ;;  %359 = sbr.rel (%p844_p10) target bundleno = 49 (0x31), region = 77 }
  0x24   : > { %s843_s4 = sshll.u32 %s1216_s29, 2 }
  0x25   : > { %s1117_s7 = scalar_lea.vmem %s1206_s1, %s843_s4 }
  0x28   : > { %v1028_v16 = vmov 0.0  }
  0x29   : > { %360 = vst [vmem:[#allocation2 + $0x30] sm:$0xff] %v1028_v16  ;;  %361 = vst [vmem:[#allocation2] sm:$0xff] %v1028_v16 }
  0x2a   : > { %362 = vst [vmem:[#allocation2 + $0x58] sm:$0xff] %v1028_v16  ;;  %363 = vst [vmem:[#allocation2 + $0x18] sm:$0xff] %v1028_v16 }
  0x2b   : > { %364 = vst [vmem:[#allocation2 + $0x50] sm:$0xff] %v1028_v16  ;;  %365 = vst [vmem:[#allocation2 + $0x68] sm:$0xff] %v1028_v16 }
  0x2c   : > { %366 = vst [vmem:[#allocation2 + $0x8] sm:$0xff] %v1028_v16  ;;  %367 = vst [vmem:[#allocation2 + $0x48] sm:$0xff] %v1028_v16 }
  0x2d   : > { %368 = vst [vmem:[#allocation2 + $0x40] sm:$0xff] %v1028_v16  ;;  %369 = vst [vmem:[#allocation2 + $0x20] sm:$0xff] %v1028_v16 }
  0x2e   : > { %370 = vst [vmem:[#allocation2 + $0x10] sm:$0xff] %v1028_v16  ;;  %371 = vst [vmem:[#allocation2 + $0x38] sm:$0xff] %v1028_v16 }
  0x2f   : > { %372 = vst [vmem:[#allocation2 + $0x60] sm:$0xff] %v1028_v16  ;;  %373 = vst [vmem:[#allocation2 + $0x70] sm:$0xff] %v1028_v16 }
  0x30   : > { %374 = vst [vmem:[#allocation2 + $0x78] sm:$0xff] %v1028_v16  ;;  %375 = vst [vmem:[#allocation2 + $0x28] sm:$0xff] %v1028_v16 }
  0x31 PF: > { %v972_v17 = vld [vmem:[%s1117_s7 + $0x38] sm:$0xff]   ;;  %v973_v18 = vld [vmem:[%s1117_s7 + $0x30] sm:$0xff]   ;;  %v974_v19 = vld [vmem:[%s1117_s7 + $0x28] sm:$0xff]   ;;  %p861_p11 = scmp.ne.s32.totalorder %s1018_s14, 4 }
  0x32   : > { %883 = vmatprep.subr.bf16.mxu0 %v972_v17  ;;  %915 = vmatprep.subr.bf16.mxu1 %v972_v17  ;;  %v975_v20 = vld [vmem:[%s1117_s7 + $0x20] sm:$0xff]   ;;  %v980_v21 = vld [vmem:[%s1119_s8] sm:$0xff]   ;;  %v976_v23 = vld [vmem:[%s1117_s7 + $0x18] sm:$0xff]  }
  0x33   : > { %884 = vmatpush3.bf16.msra.mxu0 %v972_v17  ;;  %923 = vmatpush3.bf16.msra.mxu1 %v972_v17  ;;  %v981_v22 = vld [vmem:[%s1119_s8 + $0x20] sm:$0xff]   ;;  %v977_v24 = vld [vmem:[%s1117_s7 + $0x10] sm:$0xff]   ;;  %v979_v26 = vld [vmem:[%s1117_s7] sm:$0xff]  }
  0x34   : > { %885 = vmatprep.subr.bf16.mxu0 %v973_v18  ;;  %916 = vmatprep.subr.bf16.mxu1 %v973_v18  ;;  %v978_v25 = vld [vmem:[%s1117_s7 + $0x8] sm:$0xff]   ;;  %v982_v27 = vld [vmem:[%s1119_s8 + $0x8] sm:$0xff]   ;;  %v984_v29 = vld [vmem:[%s1119_s8 + $0x10] sm:$0xff]  }
  0x35   : > { %899 = vmatprep.mubr.bf16.mxu0 %v980_v21  ;;  %907 = vmatprep.mubr.bf16.mxu1 %v981_v22  ;;  %v983_v28 = vld [vmem:[%s1119_s8 + $0x28] sm:$0xff]   ;;  %v985_v30 = vld [vmem:[%s1119_s8 + $0x30] sm:$0xff]   ;;  %v986_v31 = vld [vmem:[%s1119_s8 + $0x18] sm:$0xff]  }
  0x36   : > { %v987_v32 = vld [vmem:[%s1119_s8 + $0x38] sm:$0xff]   ;;  %v386_v34 = vld [vmem:[#allocation2 + $0x10] sm:$0xff]  ;;  %v384_v38 = vld [vmem:[#allocation2 + $0x40] sm:$0xff] }
  0x37   : > { %886 = vmatpush3.bf16.msra.mxu0 %v973_v18  ;;  %924 = vmatpush3.bf16.msra.mxu1 %v973_v18  ;;  %v378_v33 = vld [vmem:[#allocation2 + $0x58] sm:$0xff]  ;;  %v376_v37 = vld [vmem:[#allocation2 + $0x30] sm:$0xff]  ;;  %v377_v49 = vld [vmem:[#allocation2] sm:$0xff] }
  0x38   : > { %887 = vmatprep.subr.bf16.mxu0 %v974_v19  ;;  %917 = vmatprep.subr.bf16.mxu1 %v974_v19  ;;  %v379_v43 = vld [vmem:[#allocation2 + $0x18] sm:$0xff]  ;;  %v385_v50 = vld [vmem:[#allocation2 + $0x20] sm:$0xff]  ;;  %v382_v55 = vld [vmem:[#allocation2 + $0x8] sm:$0xff] }
  0x39   : > { %v387_v44 = vld [vmem:[#allocation2 + $0x38] sm:$0xff]  ;;  %v380_v61 = vld [vmem:[#allocation2 + $0x50] sm:$0xff]  ;;  %v388_v62 = vld [vmem:[#allocation2 + $0x60] sm:$0xff] }
  0x3a   : > { %v390_v56 = vld [vmem:[#allocation2 + $0x78] sm:$0xff]  ;;  %v383_v3 = vld [vmem:[#allocation2 + $0x48] sm:$0xff]  ;;  %v389_v10 = vld [vmem:[#allocation2 + $0x70] sm:$0xff] }
  0x3b   : > { %888 = vmatpush3.bf16.msra.mxu0 %v974_v19  ;;  %925 = vmatpush3.bf16.msra.mxu1 %v974_v19  ;;  %v391_v4 = vld [vmem:[#allocation2 + $0x28] sm:$0xff] }
  0x3c   : > { %889 = vmatprep.subr.bf16.mxu0 %v975_v20  ;;  %918 = vmatprep.subr.bf16.mxu1 %v975_v20  ;;  %v381_v9 = vld [vmem:[#allocation2 + $0x68] sm:$0xff] }
  0x3f   : > { %890 = vmatpush3.bf16.msra.mxu0 %v975_v20  ;;  %926 = vmatpush3.bf16.msra.mxu1 %v975_v20 }
  0x40   : > { %891 = vmatprep.subr.bf16.mxu0 %v976_v23  ;;  %919 = vmatprep.subr.bf16.mxu1 %v976_v23 }
  0x43   : > { %892 = vmatpush3.bf16.msra.mxu0 %v976_v23  ;;  %927 = vmatpush3.bf16.msra.mxu1 %v976_v23 }
  0x44   : > { %893 = vmatprep.subr.bf16.mxu0 %v977_v24  ;;  %920 = vmatprep.subr.bf16.mxu1 %v977_v24 }
  0x47   : > { %894 = vmatpush3.bf16.msra.mxu0 %v977_v24  ;;  %928 = vmatpush3.bf16.msra.mxu1 %v977_v24 }
  0x48   : > { %895 = vmatprep.subr.bf16.mxu0 %v978_v25  ;;  %921 = vmatprep.subr.bf16.mxu1 %v978_v25 }
  0x4b   : > { %896 = vmatpush3.bf16.msra.mxu0 %v978_v25  ;;  %929 = vmatpush3.bf16.msra.mxu1 %v978_v25 }
  0x4c   : > { %897 = vmatprep.subr.bf16.mxu0 %v979_v26  ;;  %922 = vmatprep.subr.bf16.mxu1 %v979_v26 }
  0x4f   : > { %898 = vmatpush3.bf16.msra.mxu0 %v979_v26  ;;  %930 = vmatpush3.bf16.msra.mxu1 %v979_v26 }
  0x52   : > { %900 = vmatmul.mubr.bf16.vlgmr.msra.gmra.mxu0 %v982_v27  ;;  %908 = vmatmul.mubr.bf16.vlgmr.msra.gmra.mxu1 %v983_v28 }
  0x53   : > { %903 = vmatprep.mubr.bf16.mxu0 %v984_v29  ;;  %911 = vmatprep.mubr.bf16.mxu1 %v985_v30 }
  0x5a   : > { %904 = vmatmul.mubr.bf16.gmra.mxu0 %v986_v31  ;;  %912 = vmatmul.mubr.bf16.gmra.mxu1 %v987_v32 }
 0x112   : > { %v901_v35 = vpop.f32.mrf.mxu0  ;;  %v909_v36 = vpop.f32.mrf.mxu1 }
 0x113   : > { %v619_v39 = vadd.f32 %v901_v35, %v378_v33  ;;  %v627_v40 = vadd.f32 %v909_v36, %v386_v34 }
 0x114   : > { %v554_v41 = vpop.f32.mrf.mxu0  ;;  %v586_v42 = vpop.f32.mrf.mxu1 }
 0x115   : > { %635 = vst [vmem:[#allocation2 + $0x58] sm:$0xff] %v619_v39  ;;  %643 = vst [vmem:[#allocation2 + $0x10] sm:$0xff] %v627_v40  ;;  %v617_v45 = vadd.f32 %v554_v41, %v376_v37  ;;  %v625_v46 = vadd.f32 %v586_v42, %v384_v38 }
 0x116   : > { %v902_v47 = vpop.f32.mrf.mxu0  ;;  %v910_v48 = vpop.f32.mrf.mxu1 }
 0x117   : > { %633 = vst [vmem:[#allocation2 + $0x30] sm:$0xff] %v617_v45  ;;  %641 = vst [vmem:[#allocation2 + $0x40] sm:$0xff] %v625_v46  ;;  %v620_v51 = vadd.f32 %v902_v47, %v379_v43  ;;  %v628_v52 = vadd.f32 %v910_v48, %v387_v44 }
 0x118   : > { %v557_v53 = vpop.f32.mrf.mxu0  ;;  %v589_v54 = vpop.f32.mrf.mxu1 }
 0x119   : > { %636 = vst [vmem:[#allocation2 + $0x18] sm:$0xff] %v620_v51  ;;  %644 = vst [vmem:[#allocation2 + $0x38] sm:$0xff] %v628_v52  ;;  %v618_v57 = vadd.f32 %v557_v53, %v377_v49  ;;  %v626_v58 = vadd.f32 %v589_v54, %v385_v50 }
 0x11a   : > { %v905_v59 = vpop.f32.mrf.mxu0  ;;  %v913_v60 = vpop.f32.mrf.mxu1 }
 0x11b   : > { %634 = vst [vmem:[#allocation2] sm:$0xff] %v618_v57  ;;  %642 = vst [vmem:[#allocation2 + $0x20] sm:$0xff] %v626_v58  ;;  %v623_v63 = vadd.f32 %v905_v59, %v382_v55  ;;  %v631_v0 = vadd.f32 %v913_v60, %v390_v56 }
 0x11c   : > { %v570_v1 = vpop.f32.mrf.mxu0  ;;  %v602_v2 = vpop.f32.mrf.mxu1 }
 0x11d   : > { %639 = vst [vmem:[#allocation2 + $0x8] sm:$0xff] %v623_v63  ;;  %647 = vst [vmem:[#allocation2 + $0x78] sm:$0xff] %v631_v0  ;;  %v621_v5 = vadd.f32 %v570_v1, %v380_v61  ;;  %v629_v6 = vadd.f32 %v602_v2, %v388_v62 }
 0x11e   : > { %v906_v7 = vpop.f32.mrf.mxu0  ;;  %v914_v8 = vpop.f32.mrf.mxu1 }
 0x11f   : > { %637 = vst [vmem:[#allocation2 + $0x50] sm:$0xff] %v621_v5  ;;  %645 = vst [vmem:[#allocation2 + $0x60] sm:$0xff] %v629_v6  ;;  %v624_v11 = vadd.f32 %v906_v7, %v383_v3  ;;  %v632_v12 = vadd.f32 %v914_v8, %v391_v4  ;;  %652 = sbr.rel (%p861_p11) target bundleno = 305 (0x131), region = 81 }
 0x120   : > { %v573_v13 = vpop.f32.mrf.mxu0  ;;  %v605_v14 = vpop.f32.mrf.mxu1 }
 0x121   : > { %640 = vst [vmem:[#allocation2 + $0x48] sm:$0xff] %v624_v11  ;;  %648 = vst [vmem:[#allocation2 + $0x28] sm:$0xff] %v632_v12  ;;  %v622_v15 = vadd.f32 %v573_v13, %v381_v9  ;;  %v630_v16 = vadd.f32 %v605_v14, %v389_v10 }
 0x123   : > { %638 = vst [vmem:[#allocation2 + $0x68] sm:$0xff] %v622_v15  ;;  %646 = vst [vmem:[#allocation2 + $0x70] sm:$0xff] %v630_v16 }
 0x124   : > { %v653_v17 = vld [vmem:[#allocation2 + $0x30] sm:$0xff]  ;;  %v862_v18 = vld [vmem:[%s1207_s2] ss:$0 sm:$0xff]  ;;  %v654_v19 = vld [vmem:[#allocation2] sm:$0xff] }
 0x125   : > { %v676_v20 = vadd.f32 %v862_v18, %v653_v17  ;;  %v677_v21 = vadd.f32 %v862_v18, %v654_v19  ;;  %v655_v22 = vld [vmem:[#allocation2 + $0x58] sm:$0xff]  ;;  %v659_v29 = vld [vmem:[#allocation2 + $0x8] sm:$0xff]  ;;  %v661_v35 = vld [vmem:[#allocation2 + $0x40] sm:$0xff] }
 0x126   : > { %v656_v23 = vld [vmem:[#allocation2 + $0x18] sm:$0xff]  ;;  %v657_v24 = vld [vmem:[#allocation2 + $0x50] sm:$0xff]  ;;  %v678_v25 = vadd.f32 %v862_v18, %v655_v22  ;;  %v682_v34 = vadd.f32 %v862_v18, %v659_v29  ;;  %v662_v36 = vld [vmem:[#allocation2 + $0x20] sm:$0xff]  ;;  %v684_v47 = vadd.f32 %v862_v18, %v661_v35 }
 0x127   : > { %v679_v26 = vadd.f32 %v862_v18, %v656_v23  ;;  %v680_v27 = vadd.f32 %v862_v18, %v657_v24  ;;  %v692_v31 = vmax.f32 %v676_v20, 0.0  ;;  %v693_v32 = vmax.f32 %v677_v21, 0.0  ;;  %v663_v37 = vld [vmem:[#allocation2 + $0x10] sm:$0xff]  ;;  %v664_v42 = vld [vmem:[#allocation2 + $0x38] sm:$0xff]  ;;  %v665_v43 = vld [vmem:[#allocation2 + $0x60] sm:$0xff] }
 0x128   : > { %v660_v30 = vld [vmem:[#allocation2 + $0x48] sm:$0xff]  ;;  %v694_v38 = vmax.f32 %v678_v25, 0.0  ;;  %v698_v46 = vmax.f32 %v682_v34, 0.0  ;;  %v685_v48 = vadd.f32 %v862_v18, %v662_v36  ;;  %v667_v49 = vld [vmem:[#allocation2 + $0x78] sm:$0xff]  ;;  %v686_v52 = vadd.f32 %v862_v18, %v663_v37 }
 0x129   : > { %v695_v39 = vmax.f32 %v679_v26, 0.0  ;;  %v696_v40 = vmax.f32 %v680_v27, 0.0  ;;  %v683_v41 = vadd.f32 %v862_v18, %v660_v30  ;;  %708 = vst [vmem:[%s1208_s3] sm:$0xff] %v692_v31  ;;  %709 = vst [vmem:[%s1208_s3 + $0x8] sm:$0xff] %v693_v32  ;;  %v668_v50 = vld [vmem:[#allocation2 + $0x28] sm:$0xff]  ;;  %v687_v53 = vadd.f32 %v862_v18, %v664_v42 }
 0x12a   : > { %v658_v28 = vld [vmem:[#allocation2 + $0x68] sm:$0xff]  ;;  %v666_v44 = vld [vmem:[#allocation2 + $0x70] sm:$0xff]  ;;  %710 = vst [vmem:[%s1208_s3 + $0x10] sm:$0xff] %v694_v38  ;;  %v688_v54 = vadd.f32 %v862_v18, %v665_v43  ;;  %714 = vst [vmem:[%s1208_s3 + $0x30] sm:$0xff] %v698_v46  ;;  %v700_v55 = vmax.f32 %v684_v47, 0.0  ;;  %v701_v56 = vmax.f32 %v685_v48, 0.0  ;;  %v690_v58 = vadd.f32 %v862_v18, %v667_v49 }
 0x12b   : > { %v681_v33 = vadd.f32 %v862_v18, %v658_v28  ;;  %711 = vst [vmem:[%s1208_s3 + $0x18] sm:$0xff] %v695_v39  ;;  %712 = vst [vmem:[%s1208_s3 + $0x20] sm:$0xff] %v696_v40  ;;  %v699_v51 = vmax.f32 %v683_v41, 0.0  ;;  %v689_v57 = vadd.f32 %v862_v18, %v666_v44  ;;  %v702_v59 = vmax.f32 %v686_v52, 0.0 }
 0x12c   : > { %v703_v60 = vmax.f32 %v687_v53, 0.0  ;;  %v704_v61 = vmax.f32 %v688_v54, 0.0  ;;  %v691_v62 = vadd.f32 %v862_v18, %v668_v50  ;;  %716 = vst [vmem:[%s1208_s3 + $0x40] sm:$0xff] %v700_v55  ;;  %717 = vst [vmem:[%s1208_s3 + $0x48] sm:$0xff] %v701_v56  ;;  %v706_v0 = vmax.f32 %v690_v58, 0.0 }
 0x12d   : > { %v697_v45 = vmax.f32 %v681_v33, 0.0  ;;  %715 = vst [vmem:[%s1208_s3 + $0x38] sm:$0xff] %v699_v51  ;;  %v705_v63 = vmax.f32 %v689_v57, 0.0  ;;  %718 = vst [vmem:[%s1208_s3 + $0x50] sm:$0xff] %v702_v59 }
 0x12e   : > { %719 = vst [vmem:[%s1208_s3 + $0x58] sm:$0xff] %v703_v60  ;;  %720 = vst [vmem:[%s1208_s3 + $0x60] sm:$0xff] %v704_v61  ;;  %v707_v1 = vmax.f32 %v691_v62, 0.0 }
 0x12f   : > { %713 = vst [vmem:[%s1208_s3 + $0x28] sm:$0xff] %v697_v45  ;;  %721 = vst [vmem:[%s1208_s3 + $0x68] sm:$0xff] %v705_v63 }
 0x130   : > { %722 = vst [vmem:[%s1208_s3 + $0x70] sm:$0xff] %v706_v0  ;;  %723 = vst [vmem:[%s1208_s3 + $0x78] sm:$0xff] %v707_v1 }
 0x131 PF: > { %s13_s16 = sadd.s32 1, %s1026_s16   ;;  %s1209_s12 = smov %s1014_s13 }
 0x132   : > { %p10_p12 = scmp.ge.s32.totalorder %s13_s16, 7   ;;  %s1210_s13 = smov %s1084_s20 }
 0x133   : > { %s1211_s14 = smov %s1022_s15  ;;  %s1212_s15 = smov %s1214_s17 }
 0x134   :  { %12 = sbr.rel (!%p10_p12) target bundleno = 3 (0x3), region = 122 }

// kernel: cnn_res3_forward.51
= control target key start
LH: loop header
LB: loop body
LE: loop exit
PB: predicated region body
PF: predicated region fallthrough
CT: control target
= control target key end

     0   :  { %v608_v1 = vmov 0   ;;  %v457_v25 = vlaneseq  ;;  %s844_s1 = inlined_call_operand.vmem [shape: bf16[128,256], index: 1, kind: input, shape index: {}]   ;;  %s845_s0 = inlined_call_operand.vmem [shape: bf16[128,128], index: 0, kind: input, shape index: {}]   ;;  %s846_s2 = inlined_call_operand.vmem [shape: f32[1,256], index: 2, kind: input, shape index: {}]   ;;  %s847_s3 = inlined_call_operand.vmem [shape: f32[128,256], index: 3, kind: output, shape index: {}]  }
   0x1   :  { %v576_v0 = vld [vmem:[%s844_s1 + $0x74] ss:$8 sps:$4 sm:$0xff]   ;;  %275 = vmatprep.mubr.bf16.mxu0 %v608_v1  ;;  %315 = vmatprep.mubr.bf16.mxu1 %v608_v1  ;;  %v578_v2 = vld [vmem:[%s844_s1 + $0x70] ss:$8 sps:$4 sm:$0xff]   ;;  %v579_v3 = vld [vmem:[%s844_s1 + $0x64] ss:$8 sps:$4 sm:$0xff]  }
   0x2   :  { %243 = vmatprep.subr.bf16.mxu0 %v576_v0  ;;  %559 = vmatprep.subr.bf16.mxu1 %v576_v0  ;;  %v581_v4 = vld [vmem:[%s844_s1 + $0x60] ss:$8 sps:$4 sm:$0xff]   ;;  %v582_v5 = vld [vmem:[%s844_s1 + $0x54] ss:$8 sps:$4 sm:$0xff]   ;;  %v584_v6 = vld [vmem:[%s844_s1 + $0x50] ss:$8 sps:$4 sm:$0xff]  }
   0x3   :  { %244 = vmatpush1.bf16.msra.mxu0 %v578_v2  ;;  %567 = vmatpush1.bf16.msra.mxu1 %v578_v2  ;;  %v585_v7 = vld [vmem:[%s844_s1 + $0x44] ss:$8 sps:$4 sm:$0xff]   ;;  %v587_v8 = vld [vmem:[%s844_s1 + $0x40] ss:$8 sps:$4 sm:$0xff]   ;;  %v588_v9 = vld [vmem:[%s844_s1 + $0x34] ss:$8 sps:$4 sm:$0xff]  }
   0x4   :  { %245 = vmatprep.subr.bf16.mxu0 %v579_v3  ;;  %560 = vmatprep.subr.bf16.mxu1 %v579_v3  ;;  %v590_v10 = vld [vmem:[%s844_s1 + $0x30] ss:$8 sps:$4 sm:$0xff]   ;;  %v591_v11 = vld [vmem:[%s844_s1 + $0x24] ss:$8 sps:$4 sm:$0xff]   ;;  %v593_v12 = vld [vmem:[%s844_s1 + $0x20] ss:$8 sps:$4 sm:$0xff]  }
   0x5   :  { %v594_v13 = vld [vmem:[%s844_s1 + $0x14] ss:$8 sps:$4 sm:$0xff]   ;;  %v596_v14 = vld [vmem:[%s844_s1 + $0x10] ss:$8 sps:$4 sm:$0xff]   ;;  %v597_v15 = vld [vmem:[%s844_s1 + $0x4] ss:$8 sps:$4 sm:$0xff]  }
   0x6   :  { %v599_v16 = vld [vmem:[%s844_s1] ss:$8 sps:$4 sm:$0xff]   ;;  %v604_v21 = vld [vmem:[%s845_s0 + $0x10] sm:$0xff]   ;;  %v606_v23 = vld [vmem:[%s845_s0 + $0x18] sm:$0xff]   ;;  %v458_v26 = vshrl.u32 %v457_v25, 7 }
   0x7   :  { %246 = vmatpush1.bf16.msra.mxu0 %v581_v4  ;;  %568 = vmatpush1.bf16.msra.mxu1 %v581_v4  ;;  %v600_v17 = vld [vmem:[%s845_s0] sm:$0xff]   ;;  %v602_v19 = vld [vmem:[%s845_s0 + $0x8] sm:$0xff]   ;;  %v605_v22 = vld [vmem:[%s845_s0 + $0x30] sm:$0xff]  }
   0x8   :  { %247 = vmatprep.subr.bf16.mxu0 %v582_v5  ;;  %561 = vmatprep.subr.bf16.mxu1 %v582_v5  ;;  %v601_v18 = vld [vmem:[%s845_s0 + $0x20] sm:$0xff]   ;;  %v603_v20 = vld [vmem:[%s845_s0 + $0x28] sm:$0xff]   ;;  %v607_v24 = vld [vmem:[%s845_s0 + $0x38] sm:$0xff]   ;;  %v459_v27 = vsub.s32 0, %v458_v26  ;;  %v463_v29 = vsub.s32 1, %v458_v26 }
   0x9   :  { %v455_v28 = vld [vmem:[%s846_s2] sm:$0x3] }
   0xa   :  { %v712_v30 = vrot.slane %v455_v28, %v459_v27  ;;  %v714_v31 = vrot.slane %v455_v28, %v463_v29 }
   0xb   :  { %248 = vmatpush1.bf16.msra.mxu0 %v584_v6  ;;  %569 = vmatpush1.bf16.msra.mxu1 %v584_v6 }
   0xc   :  { %249 = vmatprep.subr.bf16.mxu0 %v585_v7  ;;  %562 = vmatprep.subr.bf16.mxu1 %v585_v7 }
   0xf   :  { %250 = vmatpush1.bf16.msra.mxu0 %v587_v8  ;;  %570 = vmatpush1.bf16.msra.mxu1 %v587_v8 }
  0x10   :  { %251 = vmatprep.subr.bf16.mxu0 %v588_v9  ;;  %563 = vmatprep.subr.bf16.mxu1 %v588_v9 }
  0x13   :  { %252 = vmatpush1.bf16.msra.mxu0 %v590_v10  ;;  %571 = vmatpush1.bf16.msra.mxu1 %v590_v10 }
  0x14   :  { %253 = vmatprep.subr.bf16.mxu0 %v591_v11  ;;  %564 = vmatprep.subr.bf16.mxu1 %v591_v11 }
  0x17   :  { %254 = vmatpush1.bf16.msra.mxu0 %v593_v12  ;;  %572 = vmatpush1.bf16.msra.mxu1 %v593_v12 }
  0x18   :  { %255 = vmatprep.subr.bf16.mxu0 %v594_v13  ;;  %565 = vmatprep.subr.bf16.mxu1 %v594_v13 }
  0x1b   :  { %256 = vmatpush1.bf16.msra.mxu0 %v596_v14  ;;  %573 = vmatpush1.bf16.msra.mxu1 %v596_v14 }
  0x1c   :  { %257 = vmatprep.subr.bf16.mxu0 %v597_v15  ;;  %566 = vmatprep.subr.bf16.mxu1 %v597_v15 }
  0x1f   :  { %258 = vmatpush1.bf16.msra.mxu0 %v599_v16  ;;  %574 = vmatpush1.bf16.msra.mxu1 %v599_v16 }
  0x22   :  { %276 = vmatmul.mubr.bf16.vlgmr.msra.gmra.mxu0 %v600_v17  ;;  %316 = vmatmul.mubr.bf16.vlgmr.msra.gmra.mxu1 %v601_v18 }
  0x23   :  { %285 = vmatprep.mubr.bf16.mxu0 %v608_v1  ;;  %325 = vmatprep.mubr.bf16.mxu1 %v608_v1 }
  0x2a   :  { %286 = vmatmul.mubr.bf16.gmra.mxu0 %v602_v19  ;;  %326 = vmatmul.mubr.bf16.gmra.mxu1 %v603_v20 }
  0x2b   :  { %295 = vmatprep.mubr.bf16.mxu0 %v608_v1  ;;  %335 = vmatprep.mubr.bf16.mxu1 %v608_v1 }
  0x32   :  { %296 = vmatmul.mubr.bf16.gmra.mxu0 %v604_v21  ;;  %336 = vmatmul.mubr.bf16.gmra.mxu1 %v605_v22 }
  0x33   :  { %305 = vmatprep.mubr.bf16.mxu0 %v608_v1  ;;  %345 = vmatprep.mubr.bf16.mxu1 %v608_v1 }
  0x3a   :  { %306 = vmatmul.mubr.bf16.gmra.mxu0 %v606_v23  ;;  %346 = vmatmul.mubr.bf16.gmra.mxu1 %v607_v24 }
  0xe2   :  { %v277_v32 = vpop.f32.mrf.mxu0  ;;  %v317_v33 = vpop.f32.mrf.mxu1 }
  0xe3   :  { %v467_v34 = vadd.f32 %v712_v30, %v277_v32  ;;  %v483_v35 = vadd.f32 %v712_v30, %v317_v33 }
  0xe4   :  { %v279_v36 = vpop.f32.mrf.mxu0  ;;  %v319_v37 = vpop.f32.mrf.mxu1 }
  0xe5   :  { %499 = vst [vmem:[%s847_s3] sm:$0xff] %v467_v34  ;;  %515 = vst [vmem:[%s847_s3 + $0x80] sm:$0xff] %v483_v35  ;;  %v468_v38 = vadd.f32 %v714_v31, %v279_v36  ;;  %v484_v39 = vadd.f32 %v714_v31, %v319_v37 }
  0xe6   :  { %v281_v40 = vpop.f32.mrf.mxu0  ;;  %v321_v41 = vpop.f32.mrf.mxu1 }
  0xe7   :  { %500 = vst [vmem:[%s847_s3 + $0x8] sm:$0xff] %v468_v38  ;;  %516 = vst [vmem:[%s847_s3 + $0x88] sm:$0xff] %v484_v39  ;;  %v469_v42 = vadd.f32 %v712_v30, %v281_v40  ;;  %v485_v43 = vadd.f32 %v712_v30, %v321_v41 }
  0xe8   :  { %v283_v44 = vpop.f32.mrf.mxu0  ;;  %v323_v45 = vpop.f32.mrf.mxu1 }
  0xe9   :  { %501 = vst [vmem:[%s847_s3 + $0x10] sm:$0xff] %v469_v42  ;;  %517 = vst [vmem:[%s847_s3 + $0x90] sm:$0xff] %v485_v43  ;;  %v470_v46 = vadd.f32 %v714_v31, %v283_v44  ;;  %v486_v47 = vadd.f32 %v714_v31, %v323_v45 }
  0xea   :  { %v287_v48 = vpop.f32.mrf.mxu0  ;;  %v327_v49 = vpop.f32.mrf.mxu1 }
  0xeb   :  { %502 = vst [vmem:[%s847_s3 + $0x18] sm:$0xff] %v470_v46  ;;  %518 = vst [vmem:[%s847_s3 + $0x98] sm:$0xff] %v486_v47  ;;  %v471_v50 = vadd.f32 %v712_v30, %v287_v48  ;;  %v487_v51 = vadd.f32 %v712_v30, %v327_v49 }
  0xec   :  { %v289_v52 = vpop.f32.mrf.mxu0  ;;  %v329_v53 = vpop.f32.mrf.mxu1 }
  0xed   :  { %503 = vst [vmem:[%s847_s3 + $0x20] sm:$0xff] %v471_v50  ;;  %519 = vst [vmem:[%s847_s3 + $0xa0] sm:$0xff] %v487_v51  ;;  %v472_v54 = vadd.f32 %v714_v31, %v289_v52  ;;  %v488_v55 = vadd.f32 %v714_v31, %v329_v53 }
  0xee   :  { %v291_v56 = vpop.f32.mrf.mxu0  ;;  %v331_v57 = vpop.f32.mrf.mxu1 }
  0xef   :  { %504 = vst [vmem:[%s847_s3 + $0x28] sm:$0xff] %v472_v54  ;;  %520 = vst [vmem:[%s847_s3 + $0xa8] sm:$0xff] %v488_v55  ;;  %v473_v58 = vadd.f32 %v712_v30, %v291_v56  ;;  %v489_v59 = vadd.f32 %v712_v30, %v331_v57 }
  0xf0   :  { %v293_v60 = vpop.f32.mrf.mxu0  ;;  %v333_v61 = vpop.f32.mrf.mxu1 }
  0xf1   :  { %505 = vst [vmem:[%s847_s3 + $0x30] sm:$0xff] %v473_v58  ;;  %521 = vst [vmem:[%s847_s3 + $0xb0] sm:$0xff] %v489_v59  ;;  %v474_v62 = vadd.f32 %v714_v31, %v293_v60  ;;  %v490_v63 = vadd.f32 %v714_v31, %v333_v61 }
  0xf2   :  { %v297_v0 = vpop.f32.mrf.mxu0  ;;  %v337_v1 = vpop.f32.mrf.mxu1 }
  0xf3   :  { %506 = vst [vmem:[%s847_s3 + $0x38] sm:$0xff] %v474_v62  ;;  %522 = vst [vmem:[%s847_s3 + $0xb8] sm:$0xff] %v490_v63  ;;  %v475_v2 = vadd.f32 %v712_v30, %v297_v0  ;;  %v491_v3 = vadd.f32 %v712_v30, %v337_v1 }
  0xf4   :  { %v299_v4 = vpop.f32.mrf.mxu0  ;;  %v339_v5 = vpop.f32.mrf.mxu1 }
  0xf5   :  { %507 = vst [vmem:[%s847_s3 + $0x40] sm:$0xff] %v475_v2  ;;  %523 = vst [vmem:[%s847_s3 + $0xc0] sm:$0xff] %v491_v3  ;;  %v476_v6 = vadd.f32 %v714_v31, %v299_v4  ;;  %v492_v7 = vadd.f32 %v714_v31, %v339_v5 }
  0xf6   :  { %v301_v8 = vpop.f32.mrf.mxu0  ;;  %v341_v9 = vpop.f32.mrf.mxu1 }
  0xf7   :  { %508 = vst [vmem:[%s847_s3 + $0x48] sm:$0xff] %v476_v6  ;;  %524 = vst [vmem:[%s847_s3 + $0xc8] sm:$0xff] %v492_v7  ;;  %v477_v10 = vadd.f32 %v712_v30, %v301_v8  ;;  %v493_v11 = vadd.f32 %v712_v30, %v341_v9 }
  0xf8   :  { %v303_v12 = vpop.f32.mrf.mxu0  ;;  %v343_v13 = vpop.f32.mrf.mxu1 }
  0xf9   :  { %509 = vst [vmem:[%s847_s3 + $0x50] sm:$0xff] %v477_v10  ;;  %525 = vst [vmem:[%s847_s3 + $0xd0] sm:$0xff] %v493_v11  ;;  %v478_v14 = vadd.f32 %v714_v31, %v303_v12  ;;  %v494_v15 = vadd.f32 %v714_v31, %v343_v13 }
  0xfa   :  { %v307_v16 = vpop.f32.mrf.mxu0  ;;  %v347_v17 = vpop.f32.mrf.mxu1 }
  0xfb   :  { %510 = vst [vmem:[%s847_s3 + $0x58] sm:$0xff] %v478_v14  ;;  %526 = vst [vmem:[%s847_s3 + $0xd8] sm:$0xff] %v494_v15  ;;  %v479_v18 = vadd.f32 %v712_v30, %v307_v16  ;;  %v495_v19 = vadd.f32 %v712_v30, %v347_v17 }
  0xfc   :  { %v309_v20 = vpop.f32.mrf.mxu0  ;;  %v349_v21 = vpop.f32.mrf.mxu1 }
  0xfd   :  { %511 = vst [vmem:[%s847_s3 + $0x60] sm:$0xff] %v479_v18  ;;  %527 = vst [vmem:[%s847_s3 + $0xe0] sm:$0xff] %v495_v19  ;;  %v480_v22 = vadd.f32 %v714_v31, %v309_v20  ;;  %v496_v23 = vadd.f32 %v714_v31, %v349_v21 }
  0xfe   :  { %v311_v24 = vpop.f32.mrf.mxu0  ;;  %v351_v25 = vpop.f32.mrf.mxu1 }
  0xff   :  { %512 = vst [vmem:[%s847_s3 + $0x68] sm:$0xff] %v480_v22  ;;  %528 = vst [vmem:[%s847_s3 + $0xe8] sm:$0xff] %v496_v23  ;;  %v481_v26 = vadd.f32 %v712_v30, %v311_v24  ;;  %v497_v27 = vadd.f32 %v712_v30, %v351_v25 }
 0x100   :  { %v313_v28 = vpop.f32.mrf.mxu0  ;;  %v353_v29 = vpop.f32.mrf.mxu1 }
 0x101   :  { %513 = vst [vmem:[%s847_s3 + $0x70] sm:$0xff] %v481_v26  ;;  %529 = vst [vmem:[%s847_s3 + $0xf0] sm:$0xff] %v497_v27  ;;  %v482_v32 = vadd.f32 %v714_v31, %v313_v28  ;;  %v498_v33 = vadd.f32 %v714_v31, %v353_v29 }
 0x103   :  { %514 = vst [vmem:[%s847_s3 + $0x78] sm:$0xff] %v482_v32  ;;  %530 = vst [vmem:[%s847_s3 + $0xf8] sm:$0xff] %v498_v33 }

// kernel: cnn_res3_forward.52
= control target key start
LH: loop header
LB: loop body
LE: loop exit
PB: predicated region body
PF: predicated region fallthrough
CT: control target
= control target key end

     0   :  { %v707_v1 = vmov 0   ;;  %v460_v25 = vlaneseq  ;;  %s1044_s1 = inlined_call_operand.vmem [shape: bf16[128,256], index: 1, kind: input, shape index: {}]   ;;  %s1045_s0 = inlined_call_operand.vmem [shape: bf16[128,128], index: 0, kind: input, shape index: {}]   ;;  %s1046_s2 = inlined_call_operand.vmem [shape: f32[1,256], index: 2, kind: input, shape index: {}]   ;;  %s1047_s3 = inlined_call_operand.vmem [shape: f32[128,256], index: 3, kind: input, shape index: {}]   ;;  %s1048_s4 = inlined_call_operand.vmem [shape: f32[128,256], index: 4, kind: output, shape index: {}]  }
   0x1   :  { %v675_v0 = vld [vmem:[%s1044_s1 + $0x74] ss:$8 sps:$4 sm:$0xff]   ;;  %278 = vmatprep.mubr.bf16.mxu0 %v707_v1  ;;  %318 = vmatprep.mubr.bf16.mxu1 %v707_v1  ;;  %v677_v2 = vld [vmem:[%s1044_s1 + $0x70] ss:$8 sps:$4 sm:$0xff]   ;;  %v678_v3 = vld [vmem:[%s1044_s1 + $0x64] ss:$8 sps:$4 sm:$0xff]  }
   0x2   :  { %246 = vmatprep.subr.bf16.mxu0 %v675_v0  ;;  %658 = vmatprep.subr.bf16.mxu1 %v675_v0  ;;  %v680_v4 = vld [vmem:[%s1044_s1 + $0x60] ss:$8 sps:$4 sm:$0xff]   ;;  %v681_v5 = vld [vmem:[%s1044_s1 + $0x54] ss:$8 sps:$4 sm:$0xff]   ;;  %v683_v6 = vld [vmem:[%s1044_s1 + $0x50] ss:$8 sps:$4 sm:$0xff]  }
   0x3   :  { %247 = vmatpush1.bf16.msra.mxu0 %v677_v2  ;;  %666 = vmatpush1.bf16.msra.mxu1 %v677_v2  ;;  %v684_v7 = vld [vmem:[%s1044_s1 + $0x44] ss:$8 sps:$4 sm:$0xff]   ;;  %v686_v8 = vld [vmem:[%s1044_s1 + $0x40] ss:$8 sps:$4 sm:$0xff]   ;;  %v687_v9 = vld [vmem:[%s1044_s1 + $0x34] ss:$8 sps:$4 sm:$0xff]  }
   0x4   :  { %248 = vmatprep.subr.bf16.mxu0 %v678_v3  ;;  %659 = vmatprep.subr.bf16.mxu1 %v678_v3  ;;  %v689_v10 = vld [vmem:[%s1044_s1 + $0x30] ss:$8 sps:$4 sm:$0xff]   ;;  %v690_v11 = vld [vmem:[%s1044_s1 + $0x24] ss:$8 sps:$4 sm:$0xff]   ;;  %v692_v12 = vld [vmem:[%s1044_s1 + $0x20] ss:$8 sps:$4 sm:$0xff]  }
   0x5   :  { %v693_v13 = vld [vmem:[%s1044_s1 + $0x14] ss:$8 sps:$4 sm:$0xff]   ;;  %v695_v14 = vld [vmem:[%s1044_s1 + $0x10] ss:$8 sps:$4 sm:$0xff]   ;;  %v696_v15 = vld [vmem:[%s1044_s1 + $0x4] ss:$8 sps:$4 sm:$0xff]  }
   0x6   :  { %v698_v16 = vld [vmem:[%s1044_s1] ss:$8 sps:$4 sm:$0xff]   ;;  %v703_v21 = vld [vmem:[%s1045_s0 + $0x10] sm:$0xff]   ;;  %v705_v23 = vld [vmem:[%s1045_s0 + $0x18] sm:$0xff]   ;;  %v461_v26 = vshrl.u32 %v460_v25, 7 }
   0x7   :  { %249 = vmatpush1.bf16.msra.mxu0 %v680_v4  ;;  %667 = vmatpush1.bf16.msra.mxu1 %v680_v4  ;;  %v699_v17 = vld [vmem:[%s1045_s0] sm:$0xff]   ;;  %v701_v19 = vld [vmem:[%s1045_s0 + $0x8] sm:$0xff]   ;;  %v704_v22 = vld [vmem:[%s1045_s0 + $0x30] sm:$0xff]  }
   0x8   :  { %250 = vmatprep.subr.bf16.mxu0 %v681_v5  ;;  %660 = vmatprep.subr.bf16.mxu1 %v681_v5  ;;  %v700_v18 = vld [vmem:[%s1045_s0 + $0x20] sm:$0xff]   ;;  %v702_v20 = vld [vmem:[%s1045_s0 + $0x28] sm:$0xff]   ;;  %v706_v24 = vld [vmem:[%s1045_s0 + $0x38] sm:$0xff]   ;;  %v462_v27 = vsub.s32 0, %v461_v26  ;;  %v466_v29 = vsub.s32 1, %v461_v26 }
   0x9   :  { %v458_v28 = vld [vmem:[%s1046_s2] sm:$0x3]  ;;  %v503_v39 = vld [vmem:[%s1047_s3 + $0x8] sm:$0xff]  ;;  %v504_v52 = vld [vmem:[%s1047_s3 + $0x10] sm:$0xff] }
   0xa   :  { %v816_v30 = vrot.slane %v458_v28, %v462_v27  ;;  %v818_v31 = vrot.slane %v458_v28, %v466_v29  ;;  %v502_v33 = vld [vmem:[%s1047_s3] sm:$0xff]  ;;  %v519_v41 = vld [vmem:[%s1047_s3 + $0x88] sm:$0xff]  ;;  %v520_v53 = vld [vmem:[%s1047_s3 + $0x90] sm:$0xff] }
   0xb   :  { %251 = vmatpush1.bf16.msra.mxu0 %v683_v6  ;;  %668 = vmatpush1.bf16.msra.mxu1 %v683_v6  ;;  %v518_v35 = vld [vmem:[%s1047_s3 + $0x80] sm:$0xff]  ;;  %v505_v57 = vld [vmem:[%s1047_s3 + $0x18] sm:$0xff]  ;;  %v524_v25 = vld [vmem:[%s1047_s3 + $0xb0] sm:$0xff] }
   0xc   :  { %252 = vmatprep.subr.bf16.mxu0 %v684_v7  ;;  %661 = vmatprep.subr.bf16.mxu1 %v684_v7  ;;  %v521_v59 = vld [vmem:[%s1047_s3 + $0x98] sm:$0xff]  ;;  %v506_v3 = vld [vmem:[%s1047_s3 + $0x20] sm:$0xff] }
   0xd   :  { %v522_v5 = vld [vmem:[%s1047_s3 + $0xa0] sm:$0xff] }
   0xf   :  { %253 = vmatpush1.bf16.msra.mxu0 %v686_v8  ;;  %669 = vmatpush1.bf16.msra.mxu1 %v686_v8 }
  0x10   :  { %254 = vmatprep.subr.bf16.mxu0 %v687_v9  ;;  %662 = vmatprep.subr.bf16.mxu1 %v687_v9 }
  0x13   :  { %255 = vmatpush1.bf16.msra.mxu0 %v689_v10  ;;  %670 = vmatpush1.bf16.msra.mxu1 %v689_v10 }
  0x14   :  { %256 = vmatprep.subr.bf16.mxu0 %v690_v11  ;;  %663 = vmatprep.subr.bf16.mxu1 %v690_v11 }
  0x17   :  { %257 = vmatpush1.bf16.msra.mxu0 %v692_v12  ;;  %671 = vmatpush1.bf16.msra.mxu1 %v692_v12 }
  0x18   :  { %258 = vmatprep.subr.bf16.mxu0 %v693_v13  ;;  %664 = vmatprep.subr.bf16.mxu1 %v693_v13 }
  0x1b   :  { %259 = vmatpush1.bf16.msra.mxu0 %v695_v14  ;;  %672 = vmatpush1.bf16.msra.mxu1 %v695_v14 }
  0x1c   :  { %260 = vmatprep.subr.bf16.mxu0 %v696_v15  ;;  %665 = vmatprep.subr.bf16.mxu1 %v696_v15 }
  0x1f   :  { %261 = vmatpush1.bf16.msra.mxu0 %v698_v16  ;;  %673 = vmatpush1.bf16.msra.mxu1 %v698_v16 }
  0x22   :  { %279 = vmatmul.mubr.bf16.vlgmr.msra.gmra.mxu0 %v699_v17  ;;  %319 = vmatmul.mubr.bf16.vlgmr.msra.gmra.mxu1 %v700_v18  ;;  %v507_v18 = vld [vmem:[%s1047_s3 + $0x28] sm:$0xff] }
  0x23   :  { %288 = vmatprep.mubr.bf16.mxu0 %v707_v1  ;;  %328 = vmatprep.mubr.bf16.mxu1 %v707_v1 }
  0x2a   :  { %289 = vmatmul.mubr.bf16.gmra.mxu0 %v701_v19  ;;  %329 = vmatmul.mubr.bf16.gmra.mxu1 %v702_v20  ;;  %v523_v19 = vld [vmem:[%s1047_s3 + $0xa8] sm:$0xff] }
  0x2b   :  { %298 = vmatprep.mubr.bf16.mxu0 %v707_v1  ;;  %338 = vmatprep.mubr.bf16.mxu1 %v707_v1 }
  0x32   :  { %299 = vmatmul.mubr.bf16.gmra.mxu0 %v703_v21  ;;  %339 = vmatmul.mubr.bf16.gmra.mxu1 %v704_v22 }
  0x33   :  { %308 = vmatprep.mubr.bf16.mxu0 %v707_v1  ;;  %348 = vmatprep.mubr.bf16.mxu1 %v707_v1 }
  0x3a   :  { %309 = vmatmul.mubr.bf16.gmra.mxu0 %v705_v23  ;;  %349 = vmatmul.mubr.bf16.gmra.mxu1 %v706_v24  ;;  %v508_v23 = vld [vmem:[%s1047_s3 + $0x30] sm:$0xff] }
  0xe2   :  { %v280_v32 = vpop.f32.mrf.mxu0  ;;  %v320_v34 = vpop.f32.mrf.mxu1 }
  0xe3   :  { %v470_v36 = vadd.f32 %v816_v30, %v280_v32  ;;  %v486_v37 = vadd.f32 %v816_v30, %v320_v34 }
  0xe4   :  { %v282_v38 = vpop.f32.mrf.mxu0  ;;  %v322_v40 = vpop.f32.mrf.mxu1 }
  0xe5   :  { %v534_v42 = vadd.f32 %v502_v33, %v470_v36  ;;  %v550_v43 = vadd.f32 %v518_v35, %v486_v37  ;;  %v471_v44 = vadd.f32 %v818_v31, %v282_v38  ;;  %v487_v45 = vadd.f32 %v818_v31, %v322_v40  ;;  %v509_v35 = vld [vmem:[%s1047_s3 + $0x38] sm:$0xff] }
  0xe6   :  { %v284_v46 = vpop.f32.mrf.mxu0  ;;  %v324_v47 = vpop.f32.mrf.mxu1  ;;  %v525_v37 = vld [vmem:[%s1047_s3 + $0xb8] sm:$0xff] }
  0xe7   :  { %v566_v48 = vmax.f32 %v534_v42, 0.0  ;;  %v582_v49 = vmax.f32 %v550_v43, 0.0  ;;  %v535_v50 = vadd.f32 %v503_v39, %v471_v44  ;;  %v551_v51 = vadd.f32 %v519_v41, %v487_v45 }
  0xe8   :  { %v472_v54 = vadd.f32 %v816_v30, %v284_v46  ;;  %v488_v55 = vadd.f32 %v816_v30, %v324_v47  ;;  %v286_v56 = vpop.f32.mrf.mxu0  ;;  %v326_v58 = vpop.f32.mrf.mxu1 }
  0xe9   :  { %598 = vst [vmem:[%s1048_s4] sm:$0xff] %v566_v48  ;;  %614 = vst [vmem:[%s1048_s4 + $0x80] sm:$0xff] %v582_v49  ;;  %v567_v60 = vmax.f32 %v535_v50, 0.0  ;;  %v583_v61 = vmax.f32 %v551_v51, 0.0  ;;  %v473_v62 = vadd.f32 %v818_v31, %v286_v56  ;;  %v489_v63 = vadd.f32 %v818_v31, %v326_v58  ;;  %v510_v50 = vld [vmem:[%s1047_s3 + $0x40] sm:$0xff] }
  0xea   :  { %v536_v0 = vadd.f32 %v504_v52, %v472_v54  ;;  %v552_v1 = vadd.f32 %v520_v53, %v488_v55  ;;  %v290_v2 = vpop.f32.mrf.mxu0  ;;  %v330_v4 = vpop.f32.mrf.mxu1  ;;  %v526_v51 = vld [vmem:[%s1047_s3 + $0xc0] sm:$0xff]  ;;  %v511_v55 = vld [vmem:[%s1047_s3 + $0x48] sm:$0xff] }
  0xeb   :  { %599 = vst [vmem:[%s1048_s4 + $0x8] sm:$0xff] %v567_v60  ;;  %615 = vst [vmem:[%s1048_s4 + $0x88] sm:$0xff] %v583_v61  ;;  %v537_v6 = vadd.f32 %v505_v57, %v473_v62  ;;  %v553_v7 = vadd.f32 %v521_v59, %v489_v63  ;;  %v474_v8 = vadd.f32 %v816_v30, %v290_v2  ;;  %v527_v57 = vld [vmem:[%s1047_s3 + $0xc8] sm:$0xff] }
  0xec   :  { %v490_v9 = vadd.f32 %v816_v30, %v330_v4  ;;  %v568_v10 = vmax.f32 %v536_v0, 0.0  ;;  %v584_v11 = vmax.f32 %v552_v1, 0.0  ;;  %v292_v12 = vpop.f32.mrf.mxu0  ;;  %v332_v13 = vpop.f32.mrf.mxu1  ;;  %v512_v1 = vld [vmem:[%s1047_s3 + $0x50] sm:$0xff] }
  0xed   :  { %v569_v14 = vmax.f32 %v537_v6, 0.0  ;;  %v585_v15 = vmax.f32 %v553_v7, 0.0  ;;  %v538_v16 = vadd.f32 %v506_v3, %v474_v8  ;;  %v475_v20 = vadd.f32 %v818_v31, %v292_v12  ;;  %v528_v3 = vld [vmem:[%s1047_s3 + $0xd0] sm:$0xff] }
  0xee   :  { %v554_v17 = vadd.f32 %v522_v5, %v490_v9  ;;  %600 = vst [vmem:[%s1048_s4 + $0x10] sm:$0xff] %v568_v10  ;;  %616 = vst [vmem:[%s1048_s4 + $0x90] sm:$0xff] %v584_v11  ;;  %v491_v21 = vadd.f32 %v818_v31, %v332_v13  ;;  %v294_v22 = vpop.f32.mrf.mxu0  ;;  %v334_v24 = vpop.f32.mrf.mxu1 }
  0xef   :  { %601 = vst [vmem:[%s1048_s4 + $0x18] sm:$0xff] %v569_v14  ;;  %617 = vst [vmem:[%s1048_s4 + $0x98] sm:$0xff] %v585_v15  ;;  %v570_v26 = vmax.f32 %v538_v16, 0.0  ;;  %v476_v28 = vadd.f32 %v816_v30, %v294_v22  ;;  %v492_v29 = vadd.f32 %v816_v30, %v334_v24  ;;  %v539_v32 = vadd.f32 %v507_v18, %v475_v20  ;;  %v513_v16 = vld [vmem:[%s1047_s3 + $0x58] sm:$0xff] }
  0xf0   :  { %v586_v27 = vmax.f32 %v554_v17, 0.0  ;;  %v555_v33 = vadd.f32 %v523_v19, %v491_v21  ;;  %v296_v34 = vpop.f32.mrf.mxu0  ;;  %v336_v36 = vpop.f32.mrf.mxu1  ;;  %v529_v17 = vld [vmem:[%s1047_s3 + $0xd8] sm:$0xff]  ;;  %v514_v21 = vld [vmem:[%s1047_s3 + $0x60] sm:$0xff] }
  0xf1   :  { %602 = vst [vmem:[%s1048_s4 + $0x20] sm:$0xff] %v570_v26  ;;  %v540_v38 = vadd.f32 %v508_v23, %v476_v28  ;;  %v556_v39 = vadd.f32 %v524_v25, %v492_v29  ;;  %v477_v40 = vadd.f32 %v818_v31, %v296_v34  ;;  %v493_v41 = vadd.f32 %v818_v31, %v336_v36  ;;  %v530_v23 = vld [vmem:[%s1047_s3 + $0xe0] sm:$0xff] }
  0xf2   :  { %618 = vst [vmem:[%s1048_s4 + $0xa0] sm:$0xff] %v586_v27  ;;  %v571_v42 = vmax.f32 %v539_v32, 0.0  ;;  %v587_v43 = vmax.f32 %v555_v33, 0.0  ;;  %v300_v44 = vpop.f32.mrf.mxu0  ;;  %v340_v45 = vpop.f32.mrf.mxu1  ;;  %v515_v33 = vld [vmem:[%s1047_s3 + $0x68] sm:$0xff] }
  0xf3   :  { %v572_v46 = vmax.f32 %v540_v38, 0.0  ;;  %v588_v47 = vmax.f32 %v556_v39, 0.0  ;;  %v541_v48 = vadd.f32 %v509_v35, %v477_v40  ;;  %v557_v49 = vadd.f32 %v525_v37, %v493_v41  ;;  %v531_v35 = vld [vmem:[%s1047_s3 + $0xe8] sm:$0xff] }
  0xf4   :  { %603 = vst [vmem:[%s1048_s4 + $0x28] sm:$0xff] %v571_v42  ;;  %619 = vst [vmem:[%s1048_s4 + $0xa8] sm:$0xff] %v587_v43  ;;  %v478_v52 = vadd.f32 %v816_v30, %v300_v44  ;;  %v494_v53 = vadd.f32 %v816_v30, %v340_v45  ;;  %v302_v54 = vpop.f32.mrf.mxu0  ;;  %v342_v56 = vpop.f32.mrf.mxu1 }
  0xf5   :  { %604 = vst [vmem:[%s1048_s4 + $0x30] sm:$0xff] %v572_v46  ;;  %620 = vst [vmem:[%s1048_s4 + $0xb0] sm:$0xff] %v588_v47  ;;  %v573_v58 = vmax.f32 %v541_v48, 0.0  ;;  %v589_v59 = vmax.f32 %v557_v49, 0.0  ;;  %v479_v60 = vadd.f32 %v818_v31, %v302_v54  ;;  %v495_v61 = vadd.f32 %v818_v31, %v342_v56  ;;  %v516_v48 = vld [vmem:[%s1047_s3 + $0x70] sm:$0xff] }
  0xf6   :  { %v542_v62 = vadd.f32 %v510_v50, %v478_v52  ;;  %v558_v63 = vadd.f32 %v526_v51, %v494_v53  ;;  %v304_v0 = vpop.f32.mrf.mxu0  ;;  %v344_v2 = vpop.f32.mrf.mxu1  ;;  %v532_v49 = vld [vmem:[%s1047_s3 + $0xf0] sm:$0xff]  ;;  %v517_v53 = vld [vmem:[%s1047_s3 + $0x78] sm:$0xff] }
  0xf7   :  { %605 = vst [vmem:[%s1048_s4 + $0x38] sm:$0xff] %v573_v58  ;;  %621 = vst [vmem:[%s1048_s4 + $0xb8] sm:$0xff] %v589_v59  ;;  %v543_v4 = vadd.f32 %v511_v55, %v479_v60  ;;  %v559_v5 = vadd.f32 %v527_v57, %v495_v61  ;;  %v480_v6 = vadd.f32 %v816_v30, %v304_v0  ;;  %v533_v55 = vld [vmem:[%s1047_s3 + $0xf8] sm:$0xff] }
  0xf8   :  { %v496_v7 = vadd.f32 %v816_v30, %v344_v2  ;;  %v574_v8 = vmax.f32 %v542_v62, 0.0  ;;  %v590_v9 = vmax.f32 %v558_v63, 0.0  ;;  %v306_v10 = vpop.f32.mrf.mxu0  ;;  %v346_v11 = vpop.f32.mrf.mxu1 }
  0xf9   :  { %v575_v12 = vmax.f32 %v543_v4, 0.0  ;;  %v591_v13 = vmax.f32 %v559_v5, 0.0  ;;  %v544_v14 = vadd.f32 %v512_v1, %v480_v6  ;;  %v481_v18 = vadd.f32 %v818_v31, %v306_v10 }
  0xfa   :  { %v560_v15 = vadd.f32 %v528_v3, %v496_v7  ;;  %606 = vst [vmem:[%s1048_s4 + $0x40] sm:$0xff] %v574_v8  ;;  %622 = vst [vmem:[%s1048_s4 + $0xc0] sm:$0xff] %v590_v9  ;;  %v497_v19 = vadd.f32 %v818_v31, %v346_v11  ;;  %v310_v20 = vpop.f32.mrf.mxu0  ;;  %v350_v22 = vpop.f32.mrf.mxu1 }
  0xfb   :  { %607 = vst [vmem:[%s1048_s4 + $0x48] sm:$0xff] %v575_v12  ;;  %623 = vst [vmem:[%s1048_s4 + $0xc8] sm:$0xff] %v591_v13  ;;  %v576_v24 = vmax.f32 %v544_v14, 0.0  ;;  %v482_v26 = vadd.f32 %v816_v30, %v310_v20  ;;  %v498_v27 = vadd.f32 %v816_v30, %v350_v22  ;;  %v545_v28 = vadd.f32 %v513_v16, %v481_v18 }
  0xfc   :  { %v592_v25 = vmax.f32 %v560_v15, 0.0  ;;  %v561_v29 = vadd.f32 %v529_v17, %v497_v19  ;;  %v312_v32 = vpop.f32.mrf.mxu0  ;;  %v352_v34 = vpop.f32.mrf.mxu1 }
  0xfd   :  { %608 = vst [vmem:[%s1048_s4 + $0x50] sm:$0xff] %v576_v24  ;;  %v546_v36 = vadd.f32 %v514_v21, %v482_v26  ;;  %v562_v37 = vadd.f32 %v530_v23, %v498_v27  ;;  %v483_v38 = vadd.f32 %v818_v31, %v312_v32  ;;  %v499_v39 = vadd.f32 %v818_v31, %v352_v34 }
  0xfe   :  { %624 = vst [vmem:[%s1048_s4 + $0xd0] sm:$0xff] %v592_v25  ;;  %v577_v40 = vmax.f32 %v545_v28, 0.0  ;;  %v593_v41 = vmax.f32 %v561_v29, 0.0  ;;  %v314_v42 = vpop.f32.mrf.mxu0  ;;  %v354_v43 = vpop.f32.mrf.mxu1 }
  0xff   :  { %v578_v44 = vmax.f32 %v546_v36, 0.0  ;;  %v594_v45 = vmax.f32 %v562_v37, 0.0  ;;  %v547_v46 = vadd.f32 %v515_v33, %v483_v38  ;;  %v563_v47 = vadd.f32 %v531_v35, %v499_v39 }
 0x100   :  { %609 = vst [vmem:[%s1048_s4 + $0x58] sm:$0xff] %v577_v40  ;;  %625 = vst [vmem:[%s1048_s4 + $0xd8] sm:$0xff] %v593_v41  ;;  %v484_v50 = vadd.f32 %v816_v30, %v314_v42  ;;  %v500_v51 = vadd.f32 %v816_v30, %v354_v43  ;;  %v316_v52 = vpop.f32.mrf.mxu0  ;;  %v356_v54 = vpop.f32.mrf.mxu1 }
 0x101   :  { %610 = vst [vmem:[%s1048_s4 + $0x60] sm:$0xff] %v578_v44  ;;  %626 = vst [vmem:[%s1048_s4 + $0xe0] sm:$0xff] %v594_v45  ;;  %v579_v56 = vmax.f32 %v547_v46, 0.0  ;;  %v595_v30 = vmax.f32 %v563_v47, 0.0  ;;  %v485_v57 = vadd.f32 %v818_v31, %v316_v52  ;;  %v501_v58 = vadd.f32 %v818_v31, %v356_v54 }
 0x102   :  { %v548_v59 = vadd.f32 %v516_v48, %v484_v50  ;;  %v564_v60 = vadd.f32 %v532_v49, %v500_v51 }
 0x103   :  { %611 = vst [vmem:[%s1048_s4 + $0x68] sm:$0xff] %v579_v56  ;;  %627 = vst [vmem:[%s1048_s4 + $0xe8] sm:$0xff] %v595_v30  ;;  %v549_v61 = vadd.f32 %v517_v53, %v485_v57  ;;  %v565_v62 = vadd.f32 %v533_v55, %v501_v58 }
 0x104   :  { %v580_v63 = vmax.f32 %v548_v59, 0.0  ;;  %v596_v0 = vmax.f32 %v564_v60, 0.0 }
 0x105   :  { %v581_v1 = vmax.f32 %v549_v61, 0.0  ;;  %v597_v2 = vmax.f32 %v565_v62, 0.0 }
 0x106   :  { %612 = vst [vmem:[%s1048_s4 + $0x70] sm:$0xff] %v580_v63  ;;  %628 = vst [vmem:[%s1048_s4 + $0xf0] sm:$0xff] %v596_v0 }
 0x107   :  { %613 = vst [vmem:[%s1048_s4 + $0x78] sm:$0xff] %v581_v1  ;;  %629 = vst [vmem:[%s1048_s4 + $0xf8] sm:$0xff] %v597_v2 }

// kernel: cnn_res3_forward.53
= control target key start
LH: loop header
LB: loop body
LE: loop exit
PB: predicated region body
PF: predicated region fallthrough
CT: control target
= control target key end

     0   :  { %s820_s1 = inlined_call_operand.vmem [shape: bf16[256,128], index: 1, kind: input, shape index: {}]   ;;  %s821_s0 = inlined_call_operand.vmem [shape: bf16[128,256], index: 0, kind: input, shape index: {}]   ;;  %s822_s2 = inlined_call_operand.vmem [shape: f32[1,128], index: 2, kind: input, shape index: {}]   ;;  %s823_s3 = inlined_call_operand.vmem [shape: f32[128,128], index: 3, kind: output, shape index: {}]  }
   0x1   :  { %v595_v0 = vld [vmem:[%s820_s1 + $0x78] sm:$0xff]   ;;  %v597_v2 = vld [vmem:[%s820_s1 + $0x70] sm:$0xff]   ;;  %v599_v4 = vld [vmem:[%s820_s1 + $0x68] sm:$0xff]  }
   0x2   :  { %v596_v1 = vld [vmem:[%s820_s1 + $0x38] sm:$0xff]   ;;  %515 = vmatprep.subr.bf16.mxu0 %v595_v0  ;;  %579 = vmatprep.subr.bf16.mxu1 %v595_v0  ;;  %v598_v3 = vld [vmem:[%s820_s1 + $0x30] sm:$0xff]   ;;  %v600_v5 = vld [vmem:[%s820_s1 + $0x28] sm:$0xff]  }
   0x3   :  { %516 = vmatpush3.bf16.msra.mxu0 %v596_v1  ;;  %587 = vmatpush3.bf16.msra.mxu1 %v596_v1  ;;  %v601_v6 = vld [vmem:[%s820_s1 + $0x60] sm:$0xff]   ;;  %v603_v8 = vld [vmem:[%s820_s1 + $0x58] sm:$0xff]   ;;  %v605_v10 = vld [vmem:[%s820_s1 + $0x50] sm:$0xff]  }
   0x4   :  { %517 = vmatprep.subr.bf16.mxu0 %v597_v2  ;;  %580 = vmatprep.subr.bf16.mxu1 %v597_v2  ;;  %v602_v7 = vld [vmem:[%s820_s1 + $0x20] sm:$0xff]   ;;  %v604_v9 = vld [vmem:[%s820_s1 + $0x18] sm:$0xff]   ;;  %v606_v13 = vld [vmem:[%s820_s1 + $0x10] sm:$0xff]  }
   0x5   :  { %v613_v11 = vld [vmem:[%s821_s0 + $0x4] ss:$8 sps:$4 sm:$0xff]   ;;  %v611_v18 = vld [vmem:[%s821_s0] ss:$8 sps:$4 sm:$0xff]   ;;  %v617_v20 = vld [vmem:[%s821_s0 + $0x14] ss:$8 sps:$4 sm:$0xff]  }
   0x6   :  { %v616_v12 = vld [vmem:[%s821_s0 + $0x44] ss:$8 sps:$4 sm:$0xff]   ;;  %307 = vmatprep.mubr.bf16.mxu0 %v613_v11  ;;  %v614_v19 = vld [vmem:[%s821_s0 + $0x40] ss:$8 sps:$4 sm:$0xff]   ;;  %v619_v21 = vld [vmem:[%s821_s0 + $0x54] ss:$8 sps:$4 sm:$0xff]  }
   0x7   :  { %518 = vmatpush3.bf16.msra.mxu0 %v598_v3  ;;  %588 = vmatpush3.bf16.msra.mxu1 %v598_v3  ;;  %v607_v14 = vld [vmem:[%s820_s1 + $0x48] sm:$0xff]   ;;  %v609_v16 = vld [vmem:[%s820_s1 + $0x40] sm:$0xff]   ;;  %v621_v22 = vld [vmem:[%s821_s0 + $0x10] ss:$8 sps:$4 sm:$0xff]  }
   0x8   :  { %519 = vmatprep.subr.bf16.mxu0 %v599_v4  ;;  %581 = vmatprep.subr.bf16.mxu1 %v599_v4  ;;  %v608_v15 = vld [vmem:[%s820_s1 + $0x8] sm:$0xff]   ;;  %v610_v17 = vld [vmem:[%s820_s1] sm:$0xff]   ;;  %v622_v23 = vld [vmem:[%s821_s0 + $0x50] ss:$8 sps:$4 sm:$0xff]  }
   0x9   :  { %339 = vmatprep.mubr.bf16.mxu1 %v616_v12  ;;  %v623_v24 = vld [vmem:[%s821_s0 + $0x24] ss:$8 sps:$4 sm:$0xff]   ;;  %v627_v26 = vld [vmem:[%s821_s0 + $0x20] ss:$8 sps:$4 sm:$0xff]   ;;  %v629_v28 = vld [vmem:[%s821_s0 + $0x34] ss:$8 sps:$4 sm:$0xff]  }
   0xa   :  { %v625_v25 = vld [vmem:[%s821_s0 + $0x64] ss:$8 sps:$4 sm:$0xff]   ;;  %v628_v27 = vld [vmem:[%s821_s0 + $0x60] ss:$8 sps:$4 sm:$0xff]   ;;  %v631_v29 = vld [vmem:[%s821_s0 + $0x74] ss:$8 sps:$4 sm:$0xff]  }
   0xb   :  { %520 = vmatpush3.bf16.msra.mxu0 %v600_v5  ;;  %589 = vmatpush3.bf16.msra.mxu1 %v600_v5  ;;  %v633_v30 = vld [vmem:[%s821_s0 + $0x30] ss:$8 sps:$4 sm:$0xff]   ;;  %v754_v35 = vld [vmem:[%s822_s2] ss:$0 sm:$0xff] }
   0xc   :  { %521 = vmatprep.subr.bf16.mxu0 %v601_v6  ;;  %582 = vmatprep.subr.bf16.mxu1 %v601_v6  ;;  %v634_v31 = vld [vmem:[%s821_s0 + $0x70] ss:$8 sps:$4 sm:$0xff]  }
   0xf   :  { %522 = vmatpush3.bf16.msra.mxu0 %v602_v7  ;;  %590 = vmatpush3.bf16.msra.mxu1 %v602_v7 }
  0x10   :  { %523 = vmatprep.subr.bf16.mxu0 %v603_v8  ;;  %583 = vmatprep.subr.bf16.mxu1 %v603_v8 }
  0x13   :  { %524 = vmatpush3.bf16.msra.mxu0 %v604_v9  ;;  %591 = vmatpush3.bf16.msra.mxu1 %v604_v9 }
  0x14   :  { %525 = vmatprep.subr.bf16.mxu0 %v605_v10  ;;  %584 = vmatprep.subr.bf16.mxu1 %v605_v10 }
  0x17   :  { %526 = vmatpush3.bf16.msra.mxu0 %v606_v13  ;;  %592 = vmatpush3.bf16.msra.mxu1 %v606_v13 }
  0x18   :  { %527 = vmatprep.subr.bf16.mxu0 %v607_v14  ;;  %585 = vmatprep.subr.bf16.mxu1 %v607_v14 }
  0x1b   :  { %528 = vmatpush3.bf16.msra.mxu0 %v608_v15  ;;  %593 = vmatpush3.bf16.msra.mxu1 %v608_v15 }
  0x1c   :  { %529 = vmatprep.subr.bf16.mxu0 %v609_v16  ;;  %586 = vmatprep.subr.bf16.mxu1 %v609_v16 }
  0x1f   :  { %530 = vmatpush3.bf16.msra.mxu0 %v610_v17  ;;  %594 = vmatpush3.bf16.msra.mxu1 %v610_v17 }
  0x22   :  { %308 = vmatmul.mubr.bf16.vlgmr.msra.gmra.mxu0 %v611_v18  ;;  %340 = vmatmul.mubr.bf16.vlgmr.msra.gmra.mxu1 %v614_v19 }
  0x23   :  { %315 = vmatprep.mubr.bf16.mxu0 %v617_v20  ;;  %347 = vmatprep.mubr.bf16.mxu1 %v619_v21 }
  0x2a   :  { %316 = vmatmul.mubr.bf16.gmra.mxu0 %v621_v22  ;;  %348 = vmatmul.mubr.bf16.gmra.mxu1 %v622_v23 }
  0x2b   :  { %323 = vmatprep.mubr.bf16.mxu0 %v623_v24  ;;  %355 = vmatprep.mubr.bf16.mxu1 %v625_v25 }
  0x32   :  { %324 = vmatmul.mubr.bf16.gmra.mxu0 %v627_v26  ;;  %356 = vmatmul.mubr.bf16.gmra.mxu1 %v628_v27 }
  0x33   :  { %331 = vmatprep.mubr.bf16.mxu0 %v629_v28  ;;  %363 = vmatprep.mubr.bf16.mxu1 %v631_v29 }
  0x3a   :  { %332 = vmatmul.mubr.bf16.gmra.mxu0 %v633_v30  ;;  %364 = vmatmul.mubr.bf16.gmra.mxu1 %v634_v31 }
  0xe2   :  { %v531_v32 = vpop.f32.mrf.mxu0  ;;  %v555_v33 = vpop.f32.mrf.mxu1 }
  0xe4   :  { %v532_v34 = vpop.f32.mrf.mxu0  ;;  %v556_v36 = vpop.f32.mrf.mxu1 }
  0xe5   :  { %v533_v37 = vadd.f32 %v532_v34, %v531_v32  ;;  %v557_v38 = vadd.f32 %v556_v36, %v555_v33 }
  0xe6   :  { %v534_v39 = vpop.f32.mrf.mxu0  ;;  %v558_v40 = vpop.f32.mrf.mxu1 }
  0xe7   :  { %v430_v41 = vadd.f32 %v533_v37, %v754_v35  ;;  %v438_v42 = vadd.f32 %v557_v38, %v754_v35 }
  0xe8   :  { %v535_v43 = vpop.f32.mrf.mxu0  ;;  %v559_v44 = vpop.f32.mrf.mxu1 }
  0xe9   :  { %v446_v45 = vmax.f32 %v430_v41, 0.0  ;;  %v454_v46 = vmax.f32 %v438_v42, 0.0  ;;  %v536_v47 = vadd.f32 %v535_v43, %v534_v39  ;;  %v560_v48 = vadd.f32 %v559_v44, %v558_v40 }
  0xea   :  { %v537_v49 = vpop.f32.mrf.mxu0  ;;  %v561_v50 = vpop.f32.mrf.mxu1 }
  0xeb   :  { %462 = vst [vmem:[%s823_s3] sm:$0xff] %v446_v45  ;;  %470 = vst [vmem:[%s823_s3 + $0x40] sm:$0xff] %v454_v46  ;;  %v431_v51 = vadd.f32 %v536_v47, %v754_v35  ;;  %v439_v52 = vadd.f32 %v560_v48, %v754_v35 }
  0xec   :  { %v538_v53 = vpop.f32.mrf.mxu0  ;;  %v562_v54 = vpop.f32.mrf.mxu1 }
  0xed   :  { %v447_v55 = vmax.f32 %v431_v51, 0.0  ;;  %v455_v56 = vmax.f32 %v439_v52, 0.0  ;;  %v539_v57 = vadd.f32 %v538_v53, %v537_v49  ;;  %v563_v58 = vadd.f32 %v562_v54, %v561_v50 }
  0xee   :  { %v540_v59 = vpop.f32.mrf.mxu0  ;;  %v564_v60 = vpop.f32.mrf.mxu1 }
  0xef   :  { %463 = vst [vmem:[%s823_s3 + $0x8] sm:$0xff] %v447_v55  ;;  %471 = vst [vmem:[%s823_s3 + $0x48] sm:$0xff] %v455_v56  ;;  %v432_v61 = vadd.f32 %v539_v57, %v754_v35  ;;  %v440_v62 = vadd.f32 %v563_v58, %v754_v35 }
  0xf0   :  { %v541_v63 = vpop.f32.mrf.mxu0  ;;  %v565_v0 = vpop.f32.mrf.mxu1 }
  0xf1   :  { %v448_v1 = vmax.f32 %v432_v61, 0.0  ;;  %v456_v2 = vmax.f32 %v440_v62, 0.0  ;;  %v542_v3 = vadd.f32 %v541_v63, %v540_v59  ;;  %v566_v4 = vadd.f32 %v565_v0, %v564_v60 }
  0xf2   :  { %v543_v5 = vpop.f32.mrf.mxu0  ;;  %v567_v6 = vpop.f32.mrf.mxu1 }
  0xf3   :  { %464 = vst [vmem:[%s823_s3 + $0x10] sm:$0xff] %v448_v1  ;;  %472 = vst [vmem:[%s823_s3 + $0x50] sm:$0xff] %v456_v2  ;;  %v433_v7 = vadd.f32 %v542_v3, %v754_v35  ;;  %v441_v8 = vadd.f32 %v566_v4, %v754_v35 }
  0xf4   :  { %v544_v9 = vpop.f32.mrf.mxu0  ;;  %v568_v10 = vpop.f32.mrf.mxu1 }
  0xf5   :  { %v449_v11 = vmax.f32 %v433_v7, 0.0  ;;  %v457_v12 = vmax.f32 %v441_v8, 0.0  ;;  %v545_v13 = vadd.f32 %v544_v9, %v543_v5  ;;  %v569_v14 = vadd.f32 %v568_v10, %v567_v6 }
  0xf6   :  { %v546_v15 = vpop.f32.mrf.mxu0  ;;  %v570_v16 = vpop.f32.mrf.mxu1 }
  0xf7   :  { %465 = vst [vmem:[%s823_s3 + $0x18] sm:$0xff] %v449_v11  ;;  %473 = vst [vmem:[%s823_s3 + $0x58] sm:$0xff] %v457_v12  ;;  %v434_v17 = vadd.f32 %v545_v13, %v754_v35  ;;  %v442_v18 = vadd.f32 %v569_v14, %v754_v35 }
  0xf8   :  { %v547_v19 = vpop.f32.mrf.mxu0  ;;  %v571_v20 = vpop.f32.mrf.mxu1 }
  0xf9   :  { %v450_v21 = vmax.f32 %v434_v17, 0.0  ;;  %v458_v22 = vmax.f32 %v442_v18, 0.0  ;;  %v548_v23 = vadd.f32 %v547_v19, %v546_v15  ;;  %v572_v24 = vadd.f32 %v571_v20, %v570_v16 }
  0xfa   :  { %v549_v25 = vpop.f32.mrf.mxu0  ;;  %v573_v26 = vpop.f32.mrf.mxu1 }
  0xfb   :  { %466 = vst [vmem:[%s823_s3 + $0x20] sm:$0xff] %v450_v21  ;;  %474 = vst [vmem:[%s823_s3 + $0x60] sm:$0xff] %v458_v22  ;;  %v435_v27 = vadd.f32 %v548_v23, %v754_v35  ;;  %v443_v28 = vadd.f32 %v572_v24, %v754_v35 }
  0xfc   :  { %v550_v29 = vpop.f32.mrf.mxu0  ;;  %v574_v30 = vpop.f32.mrf.mxu1 }
  0xfd   :  { %v451_v31 = vmax.f32 %v435_v27, 0.0  ;;  %v459_v32 = vmax.f32 %v443_v28, 0.0  ;;  %v551_v33 = vadd.f32 %v550_v29, %v549_v25  ;;  %v575_v34 = vadd.f32 %v574_v30, %v573_v26 }
  0xfe   :  { %v552_v36 = vpop.f32.mrf.mxu0  ;;  %v576_v37 = vpop.f32.mrf.mxu1 }
  0xff   :  { %467 = vst [vmem:[%s823_s3 + $0x28] sm:$0xff] %v451_v31  ;;  %475 = vst [vmem:[%s823_s3 + $0x68] sm:$0xff] %v459_v32  ;;  %v436_v38 = vadd.f32 %v551_v33, %v754_v35  ;;  %v444_v39 = vadd.f32 %v575_v34, %v754_v35 }
 0x100   :  { %v553_v40 = vpop.f32.mrf.mxu0  ;;  %v577_v41 = vpop.f32.mrf.mxu1 }
 0x101   :  { %v452_v42 = vmax.f32 %v436_v38, 0.0  ;;  %v460_v43 = vmax.f32 %v444_v39, 0.0  ;;  %v554_v44 = vadd.f32 %v553_v40, %v552_v36  ;;  %v578_v45 = vadd.f32 %v577_v41, %v576_v37 }
 0x103   :  { %468 = vst [vmem:[%s823_s3 + $0x30] sm:$0xff] %v452_v42  ;;  %476 = vst [vmem:[%s823_s3 + $0x70] sm:$0xff] %v460_v43  ;;  %v437_v46 = vadd.f32 %v554_v44, %v754_v35  ;;  %v445_v47 = vadd.f32 %v578_v45, %v754_v35 }
 0x105   :  { %v453_v48 = vmax.f32 %v437_v46, 0.0  ;;  %v461_v49 = vmax.f32 %v445_v47, 0.0 }
 0x107   :  { %469 = vst [vmem:[%s823_s3 + $0x38] sm:$0xff] %v453_v48  ;;  %477 = vst [vmem:[%s823_s3 + $0x78] sm:$0xff] %v461_v49 }

// kernel: cnn_res3_forward.60
= control target key start
LH: loop header
LB: loop body
LE: loop exit
PB: predicated region body
PF: predicated region fallthrough
CT: control target
= control target key end

     0   :  { %s1037_s12 = smov 0   ;;  %s1039_s13 = smov 0   ;;  %s1153_s0 = inlined_call_operand.vmem [shape: bf16[32,1152], index: 0, kind: input, shape index: {}]   ;;  %s1154_s1 = inlined_call_operand.vmem [shape: bf16[1152,128], index: 1, kind: input, shape index: {}]   ;;  %s1155_s2 = inlined_call_operand.vmem [shape: f32[1,128], index: 2, kind: input, shape index: {}]   ;;  %s1156_s3 = inlined_call_operand.vmem [shape: f32[32,128], index: 3, kind: output, shape index: {}]  }
   0x1   :  { %s1041_s14 = smov 0   ;;  %s1043_s15 = smov 0  }
   0x2   :  { %s1045_s16 = smov 0  }
   0x3 LB: > { %s25_s17 = sadd.s32 1, %s1010_s15  ;;  %p48_p1 = scmp.ne.s32.totalorder %s1002_s13, %s998_s12  ;;  %s1014_s16 = sphi %s1045_s16, %s13_s16   ;;  %s1010_s15 = sphi %s1043_s15, %s1160_s15   ;;  %s1006_s14 = sphi %s1041_s14, %s1159_s14   ;;  %s1002_s13 = sphi %s1039_s13, %s1158_s13   ;;  %s998_s12 = sphi %s1037_s12, %s1157_s12  }
   0x4   : > { %p26_p0 = scmp.ge.s32.totalorder %s25_s17, 3  ;;  %p49_p2 = scmp.eq.s32.totalorder %s1014_s16, 0 }
   0x5   : > { %s41_s19 = sadd.s32 1, %s1002_s13  ;;  %p793_p5 = scmp.ge.s32.totalorder %s1014_s16, 3 }
   0x6   : > { %s1162_s17 = smov (%p26_p0, %s25_s17), 0  ;;  %p50_p3 = por %p49_p2, %p48_p1 }
   0x7   : > { %s37_s18 = ssub.s32 %s1010_s15, %s1162_s17  ;;  %162 = sbr.rel (%p793_p5) target bundleno = 21 (0x15), region = 20 }
   0x8   : > { %p39_p4 = scmp.eq.s32.totalorder %s37_s18, 0 }
   0xa   : > { %s1072_s20 = scalar_select %p39_p4, %s1002_s13, %s41_s19  }
   0xc   : > { %165 = sbr.rel (!%p50_p3) target bundleno = 21 (0x15), region = 24  ;;  %s167_s21 = sand.u32 (%p50_p3), 1, %s1002_s13  }
   0xd   : > { %s842_s22 = smul.u32 (%p50_p3), 12, %s1010_s15 }
   0xe   : > { %s901_s23 = smul.u32 (%p50_p3), 48, %s167_s21 }
   0xf   : > { %s175_s26 = scalar_lea.vmem (%p50_p3), %s1153_s0, %s842_s22 }
  0x10   : > { %v190_v0 = vld [vmem:[%s175_s26] sm:$0xff] (%p50_p3)  ;;  %v194_v2 = vld [vmem:[%s175_s26 + $0x48] sm:$0xff] (%p50_p3)  ;;  %s169_s27 = scalar_lea.vmem (%p50_p3), [#allocation3], %s901_s23  ;;  %v799_v6 = vld [vmem:[%s175_s26 + $0x50] sm:$0xf] (%p50_p3) }
  0x11   : > { %v192_v1 = vld [vmem:[%s175_s26 + $0x24] sm:$0xff]  ;;  %191 = vst [vmem:[%s169_s27] sm:$0xff] %v190_v0  ;;  %195 = vst [vmem:[%s169_s27 + $0x18] sm:$0xff] %v194_v2  ;;  %v196_v3 = vld [vmem:[%s175_s26 + $0x6c] sm:$0xff] }
  0x12   : > { %193 = vst [vmem:[%s169_s27 + $0xc] sm:$0xff] %v192_v1  ;;  %v795_v4 = vld [vmem:[%s175_s26 + $0x8] sm:$0xf]  ;;  %v797_v5 = vld [vmem:[%s175_s26 + $0x2c] sm:$0xf]  ;;  %197 = vst [vmem:[%s169_s27 + $0x24] sm:$0xff] %v196_v3 }
  0x13   : > { %796 = vst [vmem:[%s169_s27 + $0x8] sm:$0xf] %v795_v4  ;;  %798 = vst [vmem:[%s169_s27 + $0x14] sm:$0xf] %v797_v5  ;;  %v801_v7 = vld [vmem:[%s175_s26 + $0x74] sm:$0xf] }
  0x14   : > { %800 = vst [vmem:[%s169_s27 + $0x20] sm:$0xf] %v799_v6  ;;  %802 = vst [vmem:[%s169_s27 + $0x2c] sm:$0xf] %v801_v7 }
  0x15 PF: > { %p803_p6 = scmp.ge.s32.totalorder %s1014_s16, 1  ;;  %p230_p7 = scmp.lt.s32.totalorder %s1014_s16, 4 }
  0x17   : > { %p231_p8 = pnand %p803_p6, %p230_p7 }
  0x18   : > { %s237_s28 = sand.u32 (!%p231_p8), 1, %s998_s12   ;;  %s276_s29 = smul.u32 (!%p231_p8), 48, %s1006_s14 }
  0x19   : > { %234 = sbr.rel (%p231_p8) target bundleno = 297 (0x129), region = 54  ;;  %p805_p10 = scmp.ne.s32.totalorder (!%p231_p8), %s1006_s14, 0 }
  0x1a   : > { %s902_s30 = smul.u32 (!%p231_p8), 48, %s237_s28  ;;  %p277_p9 = scmp.lt.s32.totalorder (!%p231_p8), %s276_s29, 143 }
  0x1c   : > { %s1089_s8 = scalar_lea.vmem (!%p231_p8), [#allocation3], %s902_s30 }
  0x1e   : > { %s1164_s29 = smov (!%p277_p9, %s276_s29), 143  ;;  %301 = sbr.rel (%p805_p10) target bundleno = 38 (0x26), region = 62 }
  0x1f   : > { %s804_s4 = sshll.u32 %s1164_s29, 2 }
  0x20   : > { %s1087_s7 = scalar_lea.vmem %s1154_s1, %s804_s4 }
  0x23   : > { %v1016_v8 = vmov 0.0  }
  0x24   : > { %302 = vst [vmem:[#allocation2 + $0x10] sm:$0xff] %v1016_v8  ;;  %303 = vst [vmem:[#allocation2] sm:$0xff] %v1016_v8 }
  0x25   : > { %304 = vst [vmem:[#allocation2 + $0x18] sm:$0xff] %v1016_v8  ;;  %305 = vst [vmem:[#allocation2 + $0x8] sm:$0xff] %v1016_v8 }
  0x26 PF: > { %v944_v9 = vld [vmem:[%s1087_s7 + $0x78] sm:$0xff]   ;;  %v947_v12 = vld [vmem:[%s1087_s7 + $0x70] sm:$0xff]   ;;  %v950_v15 = vld [vmem:[%s1087_s7 + $0x68] sm:$0xff]   ;;  %p836_p11 = scmp.ne.s32.totalorder %s1006_s14, 2 }
  0x27   : > { %v945_v10 = vld [vmem:[%s1087_s7 + $0x38] sm:$0xff]   ;;  %843 = vmatprep.subr.bf16.mxu0 %v944_v9  ;;  %v948_v13 = vld [vmem:[%s1087_s7 + $0x30] sm:$0xff]   ;;  %v951_v16 = vld [vmem:[%s1087_s7 + $0x28] sm:$0xff]  }
  0x28   : > { %v946_v11 = vld [vmem:[%s1087_s7 + $0xb8] sm:$0xff]   ;;  %844 = vmatpush3.bf16.msra.mxu0 %v945_v10  ;;  %v949_v14 = vld [vmem:[%s1087_s7 + $0xb0] sm:$0xff]   ;;  %v952_v17 = vld [vmem:[%s1087_s7 + $0xa8] sm:$0xff]  }
  0x29   : > { %881 = vmatprep.subr.bf16.mxu1 %v946_v11  ;;  %845 = vmatprep.subr.bf16.mxu0 %v947_v12  ;;  %v953_v18 = vld [vmem:[%s1087_s7 + $0x60] sm:$0xff]   ;;  %v956_v21 = vld [vmem:[%s1087_s7 + $0x58] sm:$0xff]   ;;  %v959_v24 = vld [vmem:[%s1087_s7 + $0x50] sm:$0xff]  }
  0x2a   : > { %882 = vmatpush3.bf16.msra.mxu1 %v946_v11  ;;  %v954_v19 = vld [vmem:[%s1087_s7 + $0x20] sm:$0xff]   ;;  %v958_v22 = vld [vmem:[%s1087_s7 + $0x98] sm:$0xff]   ;;  %v961_v25 = vld [vmem:[%s1087_s7 + $0x90] sm:$0xff]  }
  0x2b   : > { %883 = vmatprep.subr.bf16.mxu1 %v949_v14  ;;  %v955_v20 = vld [vmem:[%s1087_s7 + $0xa0] sm:$0xff]   ;;  %v957_v23 = vld [vmem:[%s1087_s7 + $0x18] sm:$0xff]   ;;  %v960_v26 = vld [vmem:[%s1087_s7 + $0x10] sm:$0xff]  }
  0x2c   : > { %846 = vmatpush3.bf16.msra.mxu0 %v948_v13  ;;  %v962_v27 = vld [vmem:[%s1087_s7 + $0x48] sm:$0xff]   ;;  %v965_v30 = vld [vmem:[%s1087_s7 + $0x40] sm:$0xff]   ;;  %v306_v44 = vld [vmem:[#allocation2 + $0x10] sm:$0xff] }
  0x2d   : > { %847 = vmatprep.subr.bf16.mxu0 %v950_v15  ;;  %v963_v28 = vld [vmem:[%s1087_s7 + $0x8] sm:$0xff]   ;;  %v967_v31 = vld [vmem:[%s1087_s7 + $0x80] sm:$0xff]   ;;  %v309_v0 = vld [vmem:[#allocation2 + $0x8] sm:$0xff] }
  0x2e   : > { %884 = vmatpush3.bf16.msra.mxu1 %v949_v14  ;;  %v964_v29 = vld [vmem:[%s1087_s7 + $0x88] sm:$0xff]   ;;  %v966_v34 = vld [vmem:[%s1087_s7] sm:$0xff]  }
  0x2f   : > { %885 = vmatprep.subr.bf16.mxu1 %v952_v17  ;;  %v970_v32 = vld [vmem:[%s1089_s8 + $0x4] ss:$12 sps:$4 sm:$0xff]   ;;  %v971_v33 = vld [vmem:[%s1089_s8 + $0x8] ss:$12 sps:$4 sm:$0xff]   ;;  %v968_v35 = vld [vmem:[%s1089_s8] ss:$12 sps:$4 sm:$0xff]  }
  0x30   : > { %848 = vmatpush3.bf16.msra.mxu0 %v951_v16  ;;  %574 = vmatprep.mubr.bf16.mxu0 %v970_v32  ;;  %v973_v36 = vld [vmem:[%s1089_s8 + $0x1c] ss:$12 sps:$4 sm:$0xff]   ;;  %v972_v37 = vld [vmem:[%s1089_s8 + $0x20] ss:$12 sps:$4 sm:$0xff]   ;;  %v975_v38 = vld [vmem:[%s1089_s8 + $0x18] ss:$12 sps:$4 sm:$0xff]  }
  0x31   : > { %849 = vmatprep.subr.bf16.mxu0 %v953_v18  ;;  %897 = vmatprep.mubr.bf16.mxu1 %v971_v33  ;;  %v307_v52 = vld [vmem:[#allocation2] sm:$0xff]  ;;  %v308_v58 = vld [vmem:[#allocation2 + $0x18] sm:$0xff] }
  0x32   : > { %886 = vmatpush3.bf16.msra.mxu1 %v952_v17 }
  0x33   : > { %887 = vmatprep.subr.bf16.mxu1 %v955_v20 }
  0x34   : > { %850 = vmatpush3.bf16.msra.mxu0 %v954_v19 }
  0x35   : > { %851 = vmatprep.subr.bf16.mxu0 %v956_v21 }
  0x36   : > { %888 = vmatpush3.bf16.msra.mxu1 %v955_v20 }
  0x37   : > { %889 = vmatprep.subr.bf16.mxu1 %v958_v22 }
  0x38   : > { %852 = vmatpush3.bf16.msra.mxu0 %v957_v23 }
  0x39   : > { %853 = vmatprep.subr.bf16.mxu0 %v959_v24 }
  0x3a   : > { %890 = vmatpush3.bf16.msra.mxu1 %v958_v22 }
  0x3b   : > { %891 = vmatprep.subr.bf16.mxu1 %v961_v25 }
  0x3c   : > { %854 = vmatpush3.bf16.msra.mxu0 %v960_v26 }
  0x3d   : > { %855 = vmatprep.subr.bf16.mxu0 %v962_v27 }
  0x3e   : > { %892 = vmatpush3.bf16.msra.mxu1 %v961_v25 }
  0x3f   : > { %893 = vmatprep.subr.bf16.mxu1 %v964_v29 }
  0x40   : > { %856 = vmatpush3.bf16.msra.mxu0 %v963_v28 }
  0x41   : > { %857 = vmatprep.subr.bf16.mxu0 %v965_v30 }
  0x42   : > { %894 = vmatpush3.bf16.msra.mxu1 %v964_v29 }
  0x43   : > { %895 = vmatprep.subr.bf16.mxu1 %v967_v31 }
  0x44   : > { %858 = vmatpush3.bf16.msra.mxu0 %v966_v34 }
  0x46   : > { %896 = vmatpush3.bf16.msra.mxu1 %v967_v31 }
  0x47   : > { %575 = vmatmul.mubr.bf16.vlgmr.msra.gmra.mxu0 %v968_v35 }
  0x48   : > { %582 = vmatprep.mubr.bf16.mxu0 %v973_v36 }
  0x49   : > { %898 = vmatmul.mubr.bf16.vlgmr.msra.gmra.mxu1 %v972_v37 }
  0x4f   : > { %583 = vmatmul.mubr.bf16.gmra.mxu0 %v975_v38 }
 0x107   : > { %v859_v39 = vpop.f32.mrf.mxu0 }
 0x109   : > { %v860_v40 = vpop.f32.mrf.mxu0  ;;  %v899_v41 = vpop.f32.mrf.mxu1 }
 0x10a   : > { %v861_v42 = vadd.f32 %v860_v40, %v859_v39 }
 0x10b   : > { %v862_v43 = vpop.f32.mrf.mxu0  ;;  %v625_v45 = vpop.f32.mrf.mxu1 }
 0x10c   : > { %v626_v46 = vadd.f32 %v861_v42, %v625_v45 }
 0x10d   : > { %v863_v47 = vpop.f32.mrf.mxu0  ;;  %v900_v48 = vpop.f32.mrf.mxu1 }
 0x10e   : > { %v640_v49 = vadd.f32 %v626_v46, %v306_v44  ;;  %v864_v50 = vadd.f32 %v863_v47, %v862_v43 }
 0x10f   : > { %v865_v51 = vpop.f32.mrf.mxu0  ;;  %v628_v53 = vpop.f32.mrf.mxu1 }
 0x110   : > { %644 = vst [vmem:[#allocation2 + $0x10] sm:$0xff] %v640_v49  ;;  %v629_v54 = vadd.f32 %v864_v50, %v628_v53 }
 0x111   : > { %v866_v55 = vpop.f32.mrf.mxu0 }
 0x112   : > { %v641_v56 = vadd.f32 %v629_v54, %v307_v52  ;;  %v867_v57 = vadd.f32 %v866_v55, %v865_v51 }
 0x113   : > { %v868_v59 = vpop.f32.mrf.mxu0 }
 0x114   : > { %645 = vst [vmem:[#allocation2] sm:$0xff] %v641_v56  ;;  %v634_v60 = vadd.f32 %v899_v41, %v867_v57 }
 0x115   : > { %v869_v61 = vpop.f32.mrf.mxu0 }
 0x116   : > { %v642_v62 = vadd.f32 %v634_v60, %v308_v58  ;;  %v870_v63 = vadd.f32 %v869_v61, %v868_v59 }
 0x118   : > { %646 = vst [vmem:[#allocation2 + $0x18] sm:$0xff] %v642_v62  ;;  %v637_v1 = vadd.f32 %v900_v48, %v870_v63  ;;  %651 = sbr.rel (%p836_p11) target bundleno = 297 (0x129), region = 66 }
 0x11a   : > { %v643_v2 = vadd.f32 %v637_v1, %v309_v0 }
 0x11c   : > { %647 = vst [vmem:[#allocation2 + $0x8] sm:$0xff] %v643_v2 }
 0x11d   : > { %v652_v3 = vld [vmem:[#allocation2 + $0x10] sm:$0xff]  ;;  %v837_v4 = vld [vmem:[%s1155_s2] ss:$0 sm:$0xff]  ;;  %v653_v5 = vld [vmem:[#allocation2] sm:$0xff] }
 0x11e   : > { %v663_v6 = vadd.f32 %v837_v4, %v652_v3  ;;  %v664_v7 = vadd.f32 %v837_v4, %v653_v5 }
 0x11f   : > { %v654_v8 = vld [vmem:[#allocation2 + $0x18] sm:$0xff] }
 0x120   : > { %v665_v10 = vadd.f32 %v837_v4, %v654_v8  ;;  %v667_v12 = vmax.f32 %v663_v6, 0.0  ;;  %v668_v13 = vmax.f32 %v664_v7, 0.0 }
 0x122   : > { %v669_v14 = vmax.f32 %v665_v10, 0.0  ;;  %671 = vst [vmem:[%s1156_s3] sm:$0xff] %v667_v12  ;;  %672 = vst [vmem:[%s1156_s3 + $0x8] sm:$0xff] %v668_v13 }
 0x123   : > { %v655_v9 = vld [vmem:[#allocation2 + $0x8] sm:$0xff] }
 0x124   : > { %v666_v11 = vadd.f32 %v837_v4, %v655_v9  ;;  %673 = vst [vmem:[%s1156_s3 + $0x10] sm:$0xff] %v669_v14 }
 0x126   : > { %v670_v15 = vmax.f32 %v666_v11, 0.0 }
 0x128   : > { %674 = vst [vmem:[%s1156_s3 + $0x18] sm:$0xff] %v670_v15 }
 0x129 PF: > { %s13_s16 = sadd.s32 1, %s1014_s16   ;;  %s1157_s12 = smov %s1002_s13 }
 0x12a   : > { %p10_p12 = scmp.ge.s32.totalorder %s13_s16, 5   ;;  %s1158_s13 = smov %s1072_s20 }
 0x12b   : > { %s1159_s14 = smov %s1010_s15  ;;  %s1160_s15 = smov %s1162_s17 }
 0x12c   :  { %12 = sbr.rel (!%p10_p12) target bundleno = 3 (0x3), region = 113 }

// kernel: cnn_res3_forward.61
= control target key start
LH: loop header
LB: loop body
LE: loop exit
PB: predicated region body
PF: predicated region fallthrough
CT: control target
= control target key end

     0   :  { %s1148_s12 = smov 0   ;;  %s1150_s13 = smov 0   ;;  %s1360_s0 = inlined_call_operand.vmem [shape: bf16[32,256], index: 0, kind: input, shape index: {}]   ;;  %s1361_s1 = inlined_call_operand.vmem [shape: bf16[256,512], index: 1, kind: input, shape index: {}]   ;;  %s1362_s2 = inlined_call_operand.vmem [shape: f32[1,512], index: 2, kind: input, shape index: {}]   ;;  %s1363_s3 = inlined_call_operand.vmem [shape: f32[32,512], index: 3, kind: output, shape index: {}]  }
   0x1   :  { %s1152_s14 = smov 0   ;;  %s1154_s15 = smov 0  }
   0x2   :  { %s1156_s16 = smov 0  }
   0x3 LB: > { %s28_s17 = sadd.s32 1, %s1122_s15  ;;  %s907_s18 = sadd.s32 4294967295, %s1126_s16   ;;  %s1126_s16 = sphi %s1156_s16, %s13_s16   ;;  %s1122_s15 = sphi %s1154_s15, %s1368_s15   ;;  %s1118_s14 = sphi %s1152_s14, %s1367_s14   ;;  %s1114_s13 = sphi %s1150_s13, %s1366_s13   ;;  %s1110_s12 = sphi %s1148_s12, %s1365_s12  }
   0x4   : > { %p30_p0 = scmp.ge.s32.totalorder %s28_s17, 2  ;;  %p76_p1 = scmp.ne.s32.totalorder %s1114_s13, %s1110_s12 }
   0x5   : > { %p77_p2 = scmp.eq.s32.totalorder %s1126_s16, 0  ;;  %p134_p4 = scmp.eq.s32.totalorder %s907_s18, 1 }
   0x6   : > { %s1370_s17 = smov (%p30_p0, %s28_s17), 0  ;;  %s69_s20 = sadd.s32 1, %s1114_s13 }
   0x7   : > { %p78_p3 = por %p77_p2, %p76_p1  ;;  %s65_s19 = ssub.s32 %s1122_s15, %s1370_s17 }
   0x8   : > { %p67_p5 = scmp.eq.s32.totalorder %s65_s19, 0  ;;  %p1183_p6 = por %p134_p4, %p76_p1 }
   0x9   : > { %p911_p7 = scmp.ge.s32.totalorder %s1126_s16, 2 }
   0xa   : > { %s1188_s22 = scalar_select %p67_p5, %s1114_s13, %s69_s20  }
   0xb   : > { %171 = sbr.rel (%p911_p7) target bundleno = 36 (0x24), region = 20 }
  0x10   : > { %174 = sbr.rel (!%p78_p3) target bundleno = 36 (0x24), region = 24  ;;  %s176_s23 = sand.u32 (%p78_p3), 1, %s1114_s13  }
  0x11   : > { %s960_s24 = sshll.u32 (%p78_p3), %s1122_s15, 3  ;;  %s912_s25 = sshll.u32 (%p78_p3), %s176_s23, 8 }
  0x12   : > { %s1196_s28 = scalar_lea.vmem (%p78_p3), %s1361_s1, %s960_s24  ;;  %s1201_s29 = scalar_lea.vmem (%p78_p3), [#allocation3], %s912_s25 }
  0x13   : > { %v275_v0 = vld [vmem:[%s1196_s28] sm:$0xff] (%p78_p3)  ;;  %v277_v1 = vld [vmem:[%s1196_s28 + $0x10] sm:$0xff] (%p78_p3) }
  0x14   : > { %v279_v2 = vld [vmem:[%s1196_s28 + $0x20] sm:$0xff] (%p78_p3)  ;;  %276 = vst [vmem:[%s1201_s29] sm:$0xff] (%p78_p3), %v275_v0  ;;  %278 = vst [vmem:[%s1201_s29 + $0x8] sm:$0xff] (%p78_p3), %v277_v1  ;;  %v281_v3 = vld [vmem:[%s1196_s28 + $0x30] sm:$0xff] (%p78_p3) }
  0x15   : > { %280 = vst [vmem:[%s1201_s29 + $0x10] sm:$0xff] %v279_v2  ;;  %v283_v4 = vld [vmem:[%s1196_s28 + $0x40] sm:$0xff]  ;;  %v285_v5 = vld [vmem:[%s1196_s28 + $0x50] sm:$0xff]  ;;  %282 = vst [vmem:[%s1201_s29 + $0x18] sm:$0xff] %v281_v3 }
  0x16   : > { %284 = vst [vmem:[%s1201_s29 + $0x20] sm:$0xff] %v283_v4  ;;  %286 = vst [vmem:[%s1201_s29 + $0x28] sm:$0xff] %v285_v5  ;;  %v287_v6 = vld [vmem:[%s1196_s28 + $0x60] sm:$0xff]  ;;  %v289_v7 = vld [vmem:[%s1196_s28 + $0x70] sm:$0xff] }
  0x17   : > { %v291_v8 = vld [vmem:[%s1196_s28 + $0x80] sm:$0xff]  ;;  %288 = vst [vmem:[%s1201_s29 + $0x30] sm:$0xff] %v287_v6  ;;  %290 = vst [vmem:[%s1201_s29 + $0x38] sm:$0xff] %v289_v7  ;;  %v293_v9 = vld [vmem:[%s1196_s28 + $0x90] sm:$0xff] }
  0x18   : > { %292 = vst [vmem:[%s1201_s29 + $0x40] sm:$0xff] %v291_v8  ;;  %v295_v10 = vld [vmem:[%s1196_s28 + $0xa0] sm:$0xff]  ;;  %v297_v11 = vld [vmem:[%s1196_s28 + $0xb0] sm:$0xff]  ;;  %294 = vst [vmem:[%s1201_s29 + $0x48] sm:$0xff] %v293_v9 }
  0x19   : > { %296 = vst [vmem:[%s1201_s29 + $0x50] sm:$0xff] %v295_v10  ;;  %298 = vst [vmem:[%s1201_s29 + $0x58] sm:$0xff] %v297_v11  ;;  %v299_v12 = vld [vmem:[%s1196_s28 + $0xc0] sm:$0xff]  ;;  %v301_v13 = vld [vmem:[%s1196_s28 + $0xd0] sm:$0xff] }
  0x1a   : > { %v303_v14 = vld [vmem:[%s1196_s28 + $0xe0] sm:$0xff]  ;;  %300 = vst [vmem:[%s1201_s29 + $0x60] sm:$0xff] %v299_v12  ;;  %302 = vst [vmem:[%s1201_s29 + $0x68] sm:$0xff] %v301_v13  ;;  %v305_v15 = vld [vmem:[%s1196_s28 + $0xf0] sm:$0xff] }
  0x1b   : > { %304 = vst [vmem:[%s1201_s29 + $0x70] sm:$0xff] %v303_v14  ;;  %v307_v16 = vld [vmem:[%s1196_s28 + $0x100] sm:$0xff]  ;;  %v309_v17 = vld [vmem:[%s1196_s28 + $0x110] sm:$0xff]  ;;  %306 = vst [vmem:[%s1201_s29 + $0x78] sm:$0xff] %v305_v15 }
  0x1c   : > { %308 = vst [vmem:[%s1201_s29 + $0x80] sm:$0xff] %v307_v16  ;;  %310 = vst [vmem:[%s1201_s29 + $0x88] sm:$0xff] %v309_v17  ;;  %v311_v18 = vld [vmem:[%s1196_s28 + $0x120] sm:$0xff]  ;;  %v313_v19 = vld [vmem:[%s1196_s28 + $0x130] sm:$0xff] }
  0x1d   : > { %v315_v20 = vld [vmem:[%s1196_s28 + $0x140] sm:$0xff]  ;;  %312 = vst [vmem:[%s1201_s29 + $0x90] sm:$0xff] %v311_v18  ;;  %314 = vst [vmem:[%s1201_s29 + $0x98] sm:$0xff] %v313_v19  ;;  %v317_v21 = vld [vmem:[%s1196_s28 + $0x150] sm:$0xff] }
  0x1e   : > { %316 = vst [vmem:[%s1201_s29 + $0xa0] sm:$0xff] %v315_v20  ;;  %v319_v22 = vld [vmem:[%s1196_s28 + $0x160] sm:$0xff]  ;;  %v321_v23 = vld [vmem:[%s1196_s28 + $0x170] sm:$0xff]  ;;  %318 = vst [vmem:[%s1201_s29 + $0xa8] sm:$0xff] %v317_v21 }
  0x1f   : > { %320 = vst [vmem:[%s1201_s29 + $0xb0] sm:$0xff] %v319_v22  ;;  %322 = vst [vmem:[%s1201_s29 + $0xb8] sm:$0xff] %v321_v23  ;;  %v323_v24 = vld [vmem:[%s1196_s28 + $0x180] sm:$0xff]  ;;  %v325_v25 = vld [vmem:[%s1196_s28 + $0x190] sm:$0xff] }
  0x20   : > { %v327_v26 = vld [vmem:[%s1196_s28 + $0x1a0] sm:$0xff]  ;;  %324 = vst [vmem:[%s1201_s29 + $0xc0] sm:$0xff] %v323_v24  ;;  %326 = vst [vmem:[%s1201_s29 + $0xc8] sm:$0xff] %v325_v25  ;;  %v329_v27 = vld [vmem:[%s1196_s28 + $0x1b0] sm:$0xff] }
  0x21   : > { %328 = vst [vmem:[%s1201_s29 + $0xd0] sm:$0xff] %v327_v26  ;;  %v331_v28 = vld [vmem:[%s1196_s28 + $0x1c0] sm:$0xff]  ;;  %v333_v29 = vld [vmem:[%s1196_s28 + $0x1d0] sm:$0xff]  ;;  %330 = vst [vmem:[%s1201_s29 + $0xd8] sm:$0xff] %v329_v27 }
  0x22   : > { %332 = vst [vmem:[%s1201_s29 + $0xe0] sm:$0xff] %v331_v28  ;;  %334 = vst [vmem:[%s1201_s29 + $0xe8] sm:$0xff] %v333_v29  ;;  %v335_v30 = vld [vmem:[%s1196_s28 + $0x1e0] sm:$0xff]  ;;  %v337_v31 = vld [vmem:[%s1196_s28 + $0x1f0] sm:$0xff] }
  0x23   : > { %336 = vst [vmem:[%s1201_s29 + $0xf0] sm:$0xff] %v335_v30  ;;  %338 = vst [vmem:[%s1201_s29 + $0xf8] sm:$0xff] %v337_v31 }
  0x24 PF: > { %p915_p8 = scmp.ge.s32.totalorder %s1126_s16, 1  ;;  %p351_p9 = scmp.lt.s32.totalorder %s1126_s16, 3 }
  0x26   : > { %p352_p10 = pnand %p915_p8, %p351_p9 }
  0x27   : > { %s358_s30 = sand.u32 (!%p352_p10), 1, %s1110_s12   ;;  %s918_s20 = sshll.u32 (!%p352_p10), %s1118_s14, 1 }
  0x28   : > { %355 = sbr.rel (%p352_p10) target bundleno = 322 (0x142), region = 66  ;;  %s916_s4 = sshll.u32 (!%p352_p10), %s358_s30, 8 }
  0x29   : > { %s1275_s9 = scalar_lea.vmem (!%p352_p10), [#allocation3], %s916_s4  ;;  %p409_p11 = scmp.lt.s32.totalorder (!%p352_p10), %s918_s20, 3 }
  0x2a   : > { %s917_s26 = sshll.u32 (!%p352_p10), %s358_s30, 6 }
  0x2b   : > { %s1321_s27 = scalar_lea.vmem (!%p352_p10), [#allocation4], %s917_s26 }
  0x2d   : > { %v1084_v32 = vld [vmem:[%s1360_s0 + $0x4] ss:$8 sps:$4 sm:$0xff]   ;;  %v1087_v33 = vld [vmem:[%s1360_s0 + $0x14] ss:$8 sps:$4 sm:$0xff]   ;;  %v1036_v35 = vld [vmem:[%s1275_s9 + $0x70] ss:$8 sps:$4 sm:$0xff]   ;;  %v733_v4 = vlaneseq }
  0x2e   : > { %v1034_v34 = vld [vmem:[%s1275_s9 + $0x74] ss:$8 sps:$4 sm:$0xff]   ;;  %683 = vmatprep.mubr.bf16.mxu0 %v1084_v32  ;;  %693 = vmatprep.mubr.bf16.mxu1 %v1087_v33  ;;  %v1037_v36 = vld [vmem:[%s1275_s9 + $0x64] ss:$8 sps:$4 sm:$0xff]   ;;  %v1039_v37 = vld [vmem:[%s1275_s9 + $0x60] ss:$8 sps:$4 sm:$0xff]  }
  0x2f   : > { %651 = vmatprep.subr.bf16.mxu0 %v1034_v34  ;;  %962 = vmatprep.subr.bf16.mxu1 %v1034_v34  ;;  %v1040_v38 = vld [vmem:[%s1275_s9 + $0x54] ss:$8 sps:$4 sm:$0xff]   ;;  %v1042_v39 = vld [vmem:[%s1275_s9 + $0x50] ss:$8 sps:$4 sm:$0xff]   ;;  %v1043_v40 = vld [vmem:[%s1275_s9 + $0x44] ss:$8 sps:$4 sm:$0xff]  }
  0x30   : > { %652 = vmatpush1.bf16.msra.mxu0 %v1036_v35  ;;  %978 = vmatpush1.bf16.msra.mxu1 %v1036_v35  ;;  %v1045_v41 = vld [vmem:[%s1275_s9 + $0x40] ss:$8 sps:$4 sm:$0xff]   ;;  %v1046_v42 = vld [vmem:[%s1275_s9 + $0x34] ss:$8 sps:$4 sm:$0xff]   ;;  %v1048_v43 = vld [vmem:[%s1275_s9 + $0x30] ss:$8 sps:$4 sm:$0xff]  }
  0x31   : > { %653 = vmatprep.subr.bf16.mxu0 %v1037_v36  ;;  %963 = vmatprep.subr.bf16.mxu1 %v1037_v36  ;;  %v1049_v44 = vld [vmem:[%s1275_s9 + $0x24] ss:$8 sps:$4 sm:$0xff]   ;;  %v1051_v45 = vld [vmem:[%s1275_s9 + $0x20] ss:$8 sps:$4 sm:$0xff]   ;;  %v1052_v46 = vld [vmem:[%s1275_s9 + $0x14] ss:$8 sps:$4 sm:$0xff]  }
  0x32   : > { %v1054_v47 = vld [vmem:[%s1275_s9 + $0x10] ss:$8 sps:$4 sm:$0xff]   ;;  %v1055_v48 = vld [vmem:[%s1275_s9 + $0x4] ss:$8 sps:$4 sm:$0xff]   ;;  %v1057_v49 = vld [vmem:[%s1275_s9] ss:$8 sps:$4 sm:$0xff]  }
  0x33   : > { %v1058_v50 = vld [vmem:[%s1275_s9 + $0xf4] ss:$8 sps:$4 sm:$0xff]   ;;  %v1060_v51 = vld [vmem:[%s1275_s9 + $0xf0] ss:$8 sps:$4 sm:$0xff]   ;;  %v1061_v52 = vld [vmem:[%s1275_s9 + $0xe4] ss:$8 sps:$4 sm:$0xff]  }
  0x34   : > { %654 = vmatpush1.bf16.msra.mxu0 %v1039_v37  ;;  %979 = vmatpush1.bf16.msra.mxu1 %v1039_v37  ;;  %v1063_v53 = vld [vmem:[%s1275_s9 + $0xe0] ss:$8 sps:$4 sm:$0xff]   ;;  %v1064_v54 = vld [vmem:[%s1275_s9 + $0xd4] ss:$8 sps:$4 sm:$0xff]   ;;  %v1066_v55 = vld [vmem:[%s1275_s9 + $0xd0] ss:$8 sps:$4 sm:$0xff]  }
  0x35   : > { %655 = vmatprep.subr.bf16.mxu0 %v1040_v38  ;;  %964 = vmatprep.subr.bf16.mxu1 %v1040_v38  ;;  %v1067_v56 = vld [vmem:[%s1275_s9 + $0xc4] ss:$8 sps:$4 sm:$0xff]   ;;  %v1069_v57 = vld [vmem:[%s1275_s9 + $0xc0] ss:$8 sps:$4 sm:$0xff]   ;;  %v1070_v58 = vld [vmem:[%s1275_s9 + $0xb4] ss:$8 sps:$4 sm:$0xff]  }
  0x36   : > { %v1072_v59 = vld [vmem:[%s1275_s9 + $0xb0] ss:$8 sps:$4 sm:$0xff]   ;;  %v1073_v60 = vld [vmem:[%s1275_s9 + $0xa4] ss:$8 sps:$4 sm:$0xff]   ;;  %v1075_v61 = vld [vmem:[%s1275_s9 + $0xa0] ss:$8 sps:$4 sm:$0xff]  }
  0x37   : > { %v1076_v62 = vld [vmem:[%s1275_s9 + $0x94] ss:$8 sps:$4 sm:$0xff]   ;;  %v1078_v63 = vld [vmem:[%s1275_s9 + $0x90] ss:$8 sps:$4 sm:$0xff]   ;;  %v1079_v0 = vld [vmem:[%s1275_s9 + $0x84] ss:$8 sps:$4 sm:$0xff]  }
  0x38   : > { %656 = vmatpush1.bf16.msra.mxu0 %v1042_v39  ;;  %980 = vmatpush1.bf16.msra.mxu1 %v1042_v39  ;;  %v1081_v1 = vld [vmem:[%s1275_s9 + $0x80] ss:$8 sps:$4 sm:$0xff]   ;;  %s1372_s20 = smov (!%p409_p11, %s918_s20), 3  ;;  %v734_v5 = vshrl.u32 %v733_v4, 7  ;;  %s961_s12 = sshll.u32 (%p1183_p6), %s1118_s14, 4 }
  0x39   : > { %657 = vmatprep.subr.bf16.mxu0 %v1043_v40  ;;  %965 = vmatprep.subr.bf16.mxu1 %v1043_v40  ;;  %v1082_v2 = vld [vmem:[%s1360_s0] ss:$8 sps:$4 sm:$0xff]   ;;  %v1085_v3 = vld [vmem:[%s1360_s0 + $0x10] ss:$8 sps:$4 sm:$0xff]   ;;  %s411_s25 = scalar_lea.vmem %s1362_s2, %s1372_s20  ;;  %s771_s30 = scalar_lea.vmem (%p1183_p6), %s1363_s3, %s961_s12 }
  0x3a   : > { %v735_v6 = vsub.s32 0, %v734_v5  ;;  %v731_v7 = vld [vmem:[%s411_s25] sm:$0x3]  ;;  %v739_v8 = vsub.s32 1, %v734_v5 }
  0x3c   : > { %658 = vmatpush1.bf16.msra.mxu0 %v1045_v41  ;;  %981 = vmatpush1.bf16.msra.mxu1 %v1045_v41  ;;  %v736_v9 = vrot.slane %v731_v7, %v735_v6  ;;  %v740_v10 = vrot.slane %v731_v7, %v739_v8 }
  0x3d   : > { %659 = vmatprep.subr.bf16.mxu0 %v1046_v42  ;;  %966 = vmatprep.subr.bf16.mxu1 %v1046_v42 }
  0x40   : > { %660 = vmatpush1.bf16.msra.mxu0 %v1048_v43  ;;  %982 = vmatpush1.bf16.msra.mxu1 %v1048_v43 }
  0x41   : > { %661 = vmatprep.subr.bf16.mxu0 %v1049_v44  ;;  %967 = vmatprep.subr.bf16.mxu1 %v1049_v44 }
  0x44   : > { %662 = vmatpush1.bf16.msra.mxu0 %v1051_v45  ;;  %983 = vmatpush1.bf16.msra.mxu1 %v1051_v45 }
  0x45   : > { %663 = vmatprep.subr.bf16.mxu0 %v1052_v46  ;;  %968 = vmatprep.subr.bf16.mxu1 %v1052_v46 }
  0x48   : > { %664 = vmatpush1.bf16.msra.mxu0 %v1054_v47  ;;  %984 = vmatpush1.bf16.msra.mxu1 %v1054_v47 }
  0x49   : > { %665 = vmatprep.subr.bf16.mxu0 %v1055_v48  ;;  %969 = vmatprep.subr.bf16.mxu1 %v1055_v48 }
  0x4c   : > { %666 = vmatpush1.bf16.msra.mxu0 %v1057_v49  ;;  %985 = vmatpush1.bf16.msra.mxu1 %v1057_v49 }
  0x4d   : > { %667 = vmatprep.subr.bf16.mxu0 %v1058_v50  ;;  %970 = vmatprep.subr.bf16.mxu1 %v1058_v50 }
  0x50   : > { %668 = vmatpush2.bf16.msra.mxu0 %v1060_v51  ;;  %986 = vmatpush2.bf16.msra.mxu1 %v1060_v51 }
  0x51   : > { %669 = vmatprep.subr.bf16.mxu0 %v1061_v52  ;;  %971 = vmatprep.subr.bf16.mxu1 %v1061_v52 }
  0x54   : > { %670 = vmatpush2.bf16.msra.mxu0 %v1063_v53  ;;  %987 = vmatpush2.bf16.msra.mxu1 %v1063_v53 }
  0x55   : > { %671 = vmatprep.subr.bf16.mxu0 %v1064_v54  ;;  %972 = vmatprep.subr.bf16.mxu1 %v1064_v54 }
  0x58   : > { %672 = vmatpush2.bf16.msra.mxu0 %v1066_v55  ;;  %988 = vmatpush2.bf16.msra.mxu1 %v1066_v55 }
  0x59   : > { %673 = vmatprep.subr.bf16.mxu0 %v1067_v56  ;;  %973 = vmatprep.subr.bf16.mxu1 %v1067_v56 }
  0x5c   : > { %674 = vmatpush2.bf16.msra.mxu0 %v1069_v57  ;;  %989 = vmatpush2.bf16.msra.mxu1 %v1069_v57 }
  0x5d   : > { %675 = vmatprep.subr.bf16.mxu0 %v1070_v58  ;;  %974 = vmatprep.subr.bf16.mxu1 %v1070_v58 }
  0x60   : > { %676 = vmatpush2.bf16.msra.mxu0 %v1072_v59  ;;  %990 = vmatpush2.bf16.msra.mxu1 %v1072_v59 }
  0x61   : > { %677 = vmatprep.subr.bf16.mxu0 %v1073_v60  ;;  %975 = vmatprep.subr.bf16.mxu1 %v1073_v60 }
  0x64   : > { %678 = vmatpush2.bf16.msra.mxu0 %v1075_v61  ;;  %991 = vmatpush2.bf16.msra.mxu1 %v1075_v61 }
  0x65   : > { %679 = vmatprep.subr.bf16.mxu0 %v1076_v62  ;;  %976 = vmatprep.subr.bf16.mxu1 %v1076_v62 }
  0x68   : > { %680 = vmatpush2.bf16.msra.mxu0 %v1078_v63  ;;  %992 = vmatpush2.bf16.msra.mxu1 %v1078_v63 }
  0x69   : > { %681 = vmatprep.subr.bf16.mxu0 %v1079_v0  ;;  %977 = vmatprep.subr.bf16.mxu1 %v1079_v0 }
  0x6c   : > { %682 = vmatpush2.bf16.msra.mxu0 %v1081_v1  ;;  %993 = vmatpush2.bf16.msra.mxu1 %v1081_v1 }
  0x6f   : > { %684 = vmatmul.mubr.bf16.vlgmr.msra.gmra.mxu0 %v1082_v2  ;;  %694 = vmatmul.mubr.bf16.vlgmr.msra.gmra.mxu1 %v1085_v3 }
 0x12f   : > { %v685_v11 = vpop.f32.mrf.mxu0  ;;  %v695_v12 = vpop.f32.mrf.mxu1 }
 0x130   : > { %v743_v13 = vadd.f32 %v736_v9, %v685_v11  ;;  %v747_v14 = vadd.f32 %v736_v9, %v695_v12 }
 0x131   : > { %v687_v15 = vpop.f32.mrf.mxu0  ;;  %v697_v16 = vpop.f32.mrf.mxu1 }
 0x132   : > { %751 = vst [vmem:[%s1321_s27] sm:$0xff] %v743_v13  ;;  %755 = vst [vmem:[%s1321_s27 + $0x20] sm:$0xff] %v747_v14  ;;  %v744_v17 = vadd.f32 %v740_v10, %v687_v15  ;;  %v748_v18 = vadd.f32 %v740_v10, %v697_v16 }
 0x133   : > { %v689_v19 = vpop.f32.mrf.mxu0  ;;  %v699_v20 = vpop.f32.mrf.mxu1 }
 0x134   : > { %752 = vst [vmem:[%s1321_s27 + $0x8] sm:$0xff] %v744_v17  ;;  %756 = vst [vmem:[%s1321_s27 + $0x28] sm:$0xff] %v748_v18  ;;  %v745_v21 = vadd.f32 %v736_v9, %v689_v19  ;;  %v749_v22 = vadd.f32 %v736_v9, %v699_v20  ;;  %765 = sbr.rel (!%p1183_p6) target bundleno = 322 (0x142), region = 82 }
 0x135   : > { %v691_v23 = vpop.f32.mrf.mxu0  ;;  %v701_v24 = vpop.f32.mrf.mxu1 }
 0x136   : > { %753 = vst [vmem:[%s1321_s27 + $0x10] sm:$0xff] %v745_v21  ;;  %757 = vst [vmem:[%s1321_s27 + $0x30] sm:$0xff] %v749_v22  ;;  %v746_v25 = vadd.f32 %v740_v10, %v691_v23  ;;  %v750_v26 = vadd.f32 %v740_v10, %v701_v24 }
 0x138   : > { %754 = vst [vmem:[%s1321_s27 + $0x18] sm:$0xff] %v746_v25  ;;  %758 = vst [vmem:[%s1321_s27 + $0x38] sm:$0xff] %v750_v26 }
 0x139   : > { %v784_v27 = vld [vmem:[%s1321_s27] sm:$0xff] }
 0x13a   : > { %v792_v31 = vld [vmem:[%s1321_s27 + $0x20] sm:$0xff]  ;;  %785 = vst [vmem:[%s771_s30] sm:$0xff] %v784_v27 }
 0x13b   : > { %v786_v28 = vld [vmem:[%s1321_s27 + $0x8] sm:$0xff]  ;;  %793 = vst [vmem:[%s771_s30 + $0x40] sm:$0xff] %v792_v31 }
 0x13c   : > { %v794_v32 = vld [vmem:[%s1321_s27 + $0x28] sm:$0xff]  ;;  %787 = vst [vmem:[%s771_s30 + $0x8] sm:$0xff] %v786_v28 }
 0x13d   : > { %v788_v29 = vld [vmem:[%s1321_s27 + $0x10] sm:$0xff]  ;;  %795 = vst [vmem:[%s771_s30 + $0x48] sm:$0xff] %v794_v32 }
 0x13e   : > { %789 = vst [vmem:[%s771_s30 + $0x20] sm:$0xff] %v788_v29  ;;  %v796_v33 = vld [vmem:[%s1321_s27 + $0x30] sm:$0xff] }
 0x13f   : > { %v790_v30 = vld [vmem:[%s1321_s27 + $0x18] sm:$0xff]  ;;  %797 = vst [vmem:[%s771_s30 + $0x60] sm:$0xff] %v796_v33 }
 0x140   : > { %791 = vst [vmem:[%s771_s30 + $0x28] sm:$0xff] %v790_v30  ;;  %v798_v34 = vld [vmem:[%s1321_s27 + $0x38] sm:$0xff] }
 0x141   : > { %799 = vst [vmem:[%s771_s30 + $0x68] sm:$0xff] %v798_v34 }
 0x142 PF: > { %s13_s16 = sadd.s32 1, %s1126_s16   ;;  %s1365_s12 = smov %s1114_s13 }
 0x143   : > { %p10_p12 = scmp.ge.s32.totalorder %s13_s16, 4   ;;  %s1366_s13 = smov %s1188_s22 }
 0x144   : > { %s1367_s14 = smov %s1122_s15  ;;  %s1368_s15 = smov %s1370_s17 }
 0x145   :  { %12 = sbr.rel (!%p10_p12) target bundleno = 3 (0x3), region = 142 }

// kernel: cnn_res3_forward.62
= control target key start
LH: loop header
LB: loop body
LE: loop exit
PB: predicated region body
PF: predicated region fallthrough
CT: control target
= control target key end

     0   :  { %s1053_s15 = smov 0   ;;  %s1055_s16 = smov 0   ;;  %s1210_s0 = inlined_call_operand.vmem [shape: bf16[32,128], index: 0, kind: input, shape index: {}]   ;;  %s1211_s1 = inlined_call_operand.vmem [shape: bf16[128,512], index: 1, kind: input, shape index: {}]   ;;  %s1212_s2 = inlined_call_operand.vmem [shape: f32[1,512], index: 2, kind: input, shape index: {}]   ;;  %s1213_s3 = inlined_call_operand.vmem [shape: f32[32,512], index: 3, kind: input, shape index: {}]   ;;  %s1214_s4 = inlined_call_operand.vmem [shape: f32[32,512], index: 4, kind: output, shape index: {}]  }
   0x1   :  { %s1057_s17 = smov 0   ;;  %s1059_s18 = smov 0  }
   0x2   :  { %s1061_s19 = smov 0  }
   0x3 LB: > { %s29_s20 = sadd.s32 1, %s1021_s18  ;;  %s862_s21 = sadd.s32 4294967295, %s1025_s19   ;;  %s1025_s19 = sphi %s1061_s19, %s14_s19   ;;  %s1021_s18 = sphi %s1059_s18, %s1220_s18   ;;  %s1017_s17 = sphi %s1057_s17, %s1219_s17   ;;  %s1013_s16 = sphi %s1055_s16, %s1218_s16   ;;  %s1009_s15 = sphi %s1053_s15, %s1217_s15  }
   0x4   : > { %p31_p0 = scmp.ge.s32.totalorder %s29_s20, 2  ;;  %p77_p1 = scmp.ne.s32.totalorder %s1013_s16, %s1009_s15 }
   0x5   : > { %p78_p2 = scmp.eq.s32.totalorder %s1025_s19, 0  ;;  %p163_p4 = scmp.eq.s32.totalorder %s862_s21, 1 }
   0x6   : > { %s1222_s20 = smov (%p31_p0, %s29_s20), 0  ;;  %s70_s24 = sadd.s32 1, %s1013_s16 }
   0x7   : > { %p1085_p3 = por %p78_p2, %p77_p1  ;;  %s66_s23 = ssub.s32 %s1021_s18, %s1222_s20 }
   0x8   : > { %p68_p5 = scmp.eq.s32.totalorder %s66_s23, 0  ;;  %p1092_p6 = por %p163_p4, %p77_p1 }
   0x9   : > { %p866_p7 = scmp.ge.s32.totalorder %s1025_s19, 2 }
   0xa   : > { %s1097_s26 = scalar_select %p68_p5, %s1013_s16, %s70_s24  }
   0xb   : > { %197 = sbr.rel (%p866_p7) target bundleno = 36 (0x24), region = 20 }
  0x10   : > { %200 = sbr.rel (!%p1085_p3) target bundleno = 28 (0x1c), region = 24  ;;  %s202_s27 = sand.u32 (%p1085_p3), 1, %s1013_s16  }
  0x11   : > { %s901_s28 = sshll.u32 (%p1085_p3), %s1021_s18, 3  ;;  %s867_s29 = sshll.u32 (%p1085_p3), %s202_s27, 7 }
  0x12   : > { %s1107_s6 = scalar_lea.vmem (%p1085_p3), %s1211_s1, %s901_s28  ;;  %s204_s7 = scalar_lea.vmem (%p1085_p3), [#allocation3], %s867_s29 }
  0x13   : > { %v269_v0 = vld [vmem:[%s1107_s6] sm:$0xff] (%p1085_p3)  ;;  %v271_v1 = vld [vmem:[%s1107_s6 + $0x10] sm:$0xff] (%p1085_p3) }
  0x14   : > { %v273_v2 = vld [vmem:[%s1107_s6 + $0x20] sm:$0xff] (%p1085_p3)  ;;  %270 = vst [vmem:[%s204_s7] sm:$0xff] (%p1085_p3), %v269_v0  ;;  %272 = vst [vmem:[%s204_s7 + $0x8] sm:$0xff] (%p1085_p3), %v271_v1  ;;  %v275_v3 = vld [vmem:[%s1107_s6 + $0x30] sm:$0xff] (%p1085_p3) }
  0x15   : > { %274 = vst [vmem:[%s204_s7 + $0x10] sm:$0xff] %v273_v2  ;;  %v277_v4 = vld [vmem:[%s1107_s6 + $0x40] sm:$0xff]  ;;  %v279_v5 = vld [vmem:[%s1107_s6 + $0x50] sm:$0xff]  ;;  %276 = vst [vmem:[%s204_s7 + $0x18] sm:$0xff] %v275_v3 }
  0x16   : > { %278 = vst [vmem:[%s204_s7 + $0x20] sm:$0xff] %v277_v4  ;;  %280 = vst [vmem:[%s204_s7 + $0x28] sm:$0xff] %v279_v5  ;;  %v281_v6 = vld [vmem:[%s1107_s6 + $0x60] sm:$0xff]  ;;  %v283_v7 = vld [vmem:[%s1107_s6 + $0x70] sm:$0xff] }
  0x17   : > { %v285_v8 = vld [vmem:[%s1107_s6 + $0x80] sm:$0xff]  ;;  %282 = vst [vmem:[%s204_s7 + $0x30] sm:$0xff] %v281_v6  ;;  %284 = vst [vmem:[%s204_s7 + $0x38] sm:$0xff] %v283_v7  ;;  %v287_v9 = vld [vmem:[%s1107_s6 + $0x90] sm:$0xff] }
  0x18   : > { %286 = vst [vmem:[%s204_s7 + $0x40] sm:$0xff] %v285_v8  ;;  %v289_v10 = vld [vmem:[%s1107_s6 + $0xa0] sm:$0xff]  ;;  %v291_v11 = vld [vmem:[%s1107_s6 + $0xb0] sm:$0xff]  ;;  %288 = vst [vmem:[%s204_s7 + $0x48] sm:$0xff] %v287_v9 }
  0x19   : > { %290 = vst [vmem:[%s204_s7 + $0x50] sm:$0xff] %v289_v10  ;;  %292 = vst [vmem:[%s204_s7 + $0x58] sm:$0xff] %v291_v11  ;;  %v293_v12 = vld [vmem:[%s1107_s6 + $0xc0] sm:$0xff]  ;;  %v295_v13 = vld [vmem:[%s1107_s6 + $0xd0] sm:$0xff] }
  0x1a   : > { %v297_v14 = vld [vmem:[%s1107_s6 + $0xe0] sm:$0xff]  ;;  %294 = vst [vmem:[%s204_s7 + $0x60] sm:$0xff] %v293_v12  ;;  %296 = vst [vmem:[%s204_s7 + $0x68] sm:$0xff] %v295_v13  ;;  %v299_v15 = vld [vmem:[%s1107_s6 + $0xf0] sm:$0xff] }
  0x1b   : > { %298 = vst [vmem:[%s204_s7 + $0x70] sm:$0xff] %v297_v14  ;;  %300 = vst [vmem:[%s204_s7 + $0x78] sm:$0xff] %v299_v15 }
  0x1c PF: > { %314 = sbr.rel (!%p1085_p3) target bundleno = 36 (0x24), region = 66  ;;  %s316_s8 = sand.u32 (%p1085_p3), 1, %s1013_s16  }
  0x1d   : > { %s902_s9 = sshll.u32 (%p1085_p3), %s1021_s18, 4  ;;  %s870_s10 = sshll.u32 (%p1085_p3), %s316_s8, 6 }
  0x1e   : > { %s324_s13 = scalar_lea.vmem (%p1085_p3), %s1213_s3, %s902_s9  ;;  %s318_s14 = scalar_lea.vmem (%p1085_p3), [#allocation4], %s870_s10 }
  0x1f   : > { %v337_v16 = vld [vmem:[%s324_s13] sm:$0xff] (%p1085_p3)  ;;  %v339_v17 = vld [vmem:[%s324_s13 + $0x8] sm:$0xff] (%p1085_p3) }
  0x20   : > { %v341_v18 = vld [vmem:[%s324_s13 + $0x20] sm:$0xff] (%p1085_p3)  ;;  %338 = vst [vmem:[%s318_s14] sm:$0xff] (%p1085_p3), %v337_v16  ;;  %340 = vst [vmem:[%s318_s14 + $0x8] sm:$0xff] (%p1085_p3), %v339_v17  ;;  %v343_v19 = vld [vmem:[%s324_s13 + $0x28] sm:$0xff] (%p1085_p3) }
  0x21   : > { %342 = vst [vmem:[%s318_s14 + $0x10] sm:$0xff] %v341_v18  ;;  %v345_v20 = vld [vmem:[%s324_s13 + $0x40] sm:$0xff]  ;;  %v347_v21 = vld [vmem:[%s324_s13 + $0x48] sm:$0xff]  ;;  %344 = vst [vmem:[%s318_s14 + $0x18] sm:$0xff] %v343_v19 }
  0x22   : > { %346 = vst [vmem:[%s318_s14 + $0x20] sm:$0xff] %v345_v20  ;;  %348 = vst [vmem:[%s318_s14 + $0x28] sm:$0xff] %v347_v21  ;;  %v349_v22 = vld [vmem:[%s324_s13 + $0x60] sm:$0xff]  ;;  %v351_v23 = vld [vmem:[%s324_s13 + $0x68] sm:$0xff] }
  0x23   : > { %350 = vst [vmem:[%s318_s14 + $0x30] sm:$0xff] %v349_v22  ;;  %352 = vst [vmem:[%s318_s14 + $0x38] sm:$0xff] %v351_v23 }
  0x24 PF: > { %p873_p8 = scmp.ge.s32.totalorder %s1025_s19, 1  ;;  %p357_p9 = scmp.lt.s32.totalorder %s1025_s19, 3 }
  0x26   : > { %p358_p10 = pnand %p873_p8, %p357_p9 }
  0x27   : > { %s364_s21 = sand.u32 (!%p358_p10), 1, %s1009_s15   ;;  %s877_s30 = sshll.u32 (!%p358_p10), %s1017_s17, 1 }
  0x28   : > { %361 = sbr.rel (%p358_p10) target bundleno = 294 (0x126), region = 89  ;;  %s874_s22 = sshll.u32 (!%p358_p10), %s364_s21, 7 }
  0x29   : > { %s1137_s23 = scalar_lea.vmem (!%p358_p10), [#allocation3], %s874_s22  ;;  %p423_p11 = scmp.lt.s32.totalorder (!%p358_p10), %s877_s30, 3 }
  0x2a   : > { %s1167_s8 = sshll.u32 (!%p358_p10), %s364_s21, 6 }
  0x2b   : > { %s373_s9 = scalar_lea.vmem (!%p358_p10), [#allocation4], %s1167_s8  ;;  %s1171_s15 = scalar_lea.vmem (!%p358_p10), [#allocation5], %s1167_s8 }
  0x2d   : > { %v1027_v24 = vmov 0   ;;  %v961_v25 = vld [vmem:[%s1137_s23 + $0x74] ss:$8 sps:$4 sm:$0xff]   ;;  %v963_v26 = vld [vmem:[%s1137_s23 + $0x70] ss:$8 sps:$4 sm:$0xff]   ;;  %v986_v42 = vld [vmem:[%s1210_s0 + $0x8] sm:$0xff]   ;;  %v646_v43 = vlaneseq }
  0x2e   : > { %596 = vmatprep.mubr.bf16.mxu0 %v1027_v24  ;;  %606 = vmatprep.mubr.bf16.mxu1 %v1027_v24  ;;  %v964_v27 = vld [vmem:[%s1137_s23 + $0x64] ss:$8 sps:$4 sm:$0xff]   ;;  %v966_v28 = vld [vmem:[%s1137_s23 + $0x60] ss:$8 sps:$4 sm:$0xff]   ;;  %v967_v29 = vld [vmem:[%s1137_s23 + $0x54] ss:$8 sps:$4 sm:$0xff]  }
  0x2f   : > { %564 = vmatprep.subr.bf16.mxu0 %v961_v25  ;;  %904 = vmatprep.subr.bf16.mxu1 %v961_v25  ;;  %v969_v30 = vld [vmem:[%s1137_s23 + $0x50] ss:$8 sps:$4 sm:$0xff]   ;;  %v970_v31 = vld [vmem:[%s1137_s23 + $0x44] ss:$8 sps:$4 sm:$0xff]   ;;  %v972_v32 = vld [vmem:[%s1137_s23 + $0x40] ss:$8 sps:$4 sm:$0xff]  }
  0x30   : > { %565 = vmatpush1.bf16.msra.mxu0 %v963_v26  ;;  %912 = vmatpush1.bf16.msra.mxu1 %v963_v26  ;;  %v973_v33 = vld [vmem:[%s1137_s23 + $0x34] ss:$8 sps:$4 sm:$0xff]   ;;  %v975_v34 = vld [vmem:[%s1137_s23 + $0x30] ss:$8 sps:$4 sm:$0xff]   ;;  %v976_v35 = vld [vmem:[%s1137_s23 + $0x24] ss:$8 sps:$4 sm:$0xff]  }
  0x31   : > { %566 = vmatprep.subr.bf16.mxu0 %v964_v27  ;;  %905 = vmatprep.subr.bf16.mxu1 %v964_v27  ;;  %v978_v36 = vld [vmem:[%s1137_s23 + $0x20] ss:$8 sps:$4 sm:$0xff]   ;;  %v979_v37 = vld [vmem:[%s1137_s23 + $0x14] ss:$8 sps:$4 sm:$0xff]   ;;  %v981_v38 = vld [vmem:[%s1137_s23 + $0x10] ss:$8 sps:$4 sm:$0xff]  }
  0x32   : > { %v982_v39 = vld [vmem:[%s1137_s23 + $0x4] ss:$8 sps:$4 sm:$0xff]   ;;  %v984_v40 = vld [vmem:[%s1137_s23] ss:$8 sps:$4 sm:$0xff]   ;;  %v985_v41 = vld [vmem:[%s1210_s0] sm:$0xff]   ;;  %s1224_s30 = smov (!%p423_p11, %s877_s30), 3 }
  0x33   : > { %v647_v44 = vshrl.u32 %v646_v43, 7  ;;  %s425_s7 = scalar_lea.vmem %s1212_s2, %s1224_s30  ;;  %v664_v51 = vld [vmem:[%s373_s9] sm:$0xff]  ;;  %v665_v57 = vld [vmem:[%s373_s9 + $0x8] sm:$0xff]  ;;  %v666_v6 = vld [vmem:[%s373_s9 + $0x10] sm:$0xff]  ;;  %s903_s10 = sshll.u32 (%p1092_p6), %s1017_s17, 4 }
  0x34   : > { %567 = vmatpush1.bf16.msra.mxu0 %v966_v28  ;;  %913 = vmatpush1.bf16.msra.mxu1 %v966_v28  ;;  %v644_v46 = vld [vmem:[%s425_s7] sm:$0x3]  ;;  %v668_v53 = vld [vmem:[%s373_s9 + $0x20] sm:$0xff]  ;;  %v669_v59 = vld [vmem:[%s373_s9 + $0x28] sm:$0xff]  ;;  %s708_s13 = scalar_lea.vmem (%p1092_p6), %s1214_s4, %s903_s10 }
  0x35   : > { %568 = vmatprep.subr.bf16.mxu0 %v967_v29  ;;  %906 = vmatprep.subr.bf16.mxu1 %v967_v29  ;;  %v648_v45 = vsub.s32 0, %v647_v44  ;;  %v652_v47 = vsub.s32 1, %v647_v44  ;;  %v670_v7 = vld [vmem:[%s373_s9 + $0x30] sm:$0xff]  ;;  %v667_v11 = vld [vmem:[%s373_s9 + $0x18] sm:$0xff] }
  0x36   : > { %v671_v13 = vld [vmem:[%s373_s9 + $0x38] sm:$0xff] }
  0x37   : > { %v649_v48 = vrot.slane %v644_v46, %v648_v45  ;;  %v653_v49 = vrot.slane %v644_v46, %v652_v47 }
  0x38   : > { %569 = vmatpush1.bf16.msra.mxu0 %v969_v30  ;;  %914 = vmatpush1.bf16.msra.mxu1 %v969_v30 }
  0x39   : > { %570 = vmatprep.subr.bf16.mxu0 %v970_v31  ;;  %907 = vmatprep.subr.bf16.mxu1 %v970_v31 }
  0x3c   : > { %571 = vmatpush1.bf16.msra.mxu0 %v972_v32  ;;  %915 = vmatpush1.bf16.msra.mxu1 %v972_v32 }
  0x3d   : > { %572 = vmatprep.subr.bf16.mxu0 %v973_v33  ;;  %908 = vmatprep.subr.bf16.mxu1 %v973_v33 }
  0x40   : > { %573 = vmatpush1.bf16.msra.mxu0 %v975_v34  ;;  %916 = vmatpush1.bf16.msra.mxu1 %v975_v34 }
  0x41   : > { %574 = vmatprep.subr.bf16.mxu0 %v976_v35  ;;  %909 = vmatprep.subr.bf16.mxu1 %v976_v35 }
  0x44   : > { %575 = vmatpush1.bf16.msra.mxu0 %v978_v36  ;;  %917 = vmatpush1.bf16.msra.mxu1 %v978_v36 }
  0x45   : > { %576 = vmatprep.subr.bf16.mxu0 %v979_v37  ;;  %910 = vmatprep.subr.bf16.mxu1 %v979_v37 }
  0x48   : > { %577 = vmatpush1.bf16.msra.mxu0 %v981_v38  ;;  %918 = vmatpush1.bf16.msra.mxu1 %v981_v38 }
  0x49   : > { %578 = vmatprep.subr.bf16.mxu0 %v982_v39  ;;  %911 = vmatprep.subr.bf16.mxu1 %v982_v39 }
  0x4c   : > { %579 = vmatpush1.bf16.msra.mxu0 %v984_v40  ;;  %919 = vmatpush1.bf16.msra.mxu1 %v984_v40 }
  0x4f   : > { %597 = vmatmul.mubr.bf16.vlgmr.msra.gmra.mxu0 %v985_v41  ;;  %607 = vmatmul.mubr.bf16.vlgmr.msra.gmra.mxu1 %v986_v42 }
 0x10f   : > { %v598_v50 = vpop.f32.mrf.mxu0  ;;  %v608_v52 = vpop.f32.mrf.mxu1 }
 0x110   : > { %v656_v54 = vadd.f32 %v649_v48, %v598_v50  ;;  %v660_v55 = vadd.f32 %v649_v48, %v608_v52 }
 0x111   : > { %v600_v56 = vpop.f32.mrf.mxu0  ;;  %v610_v58 = vpop.f32.mrf.mxu1 }
 0x112   : > { %v672_v60 = vadd.f32 %v664_v51, %v656_v54  ;;  %v676_v61 = vadd.f32 %v668_v53, %v660_v55  ;;  %v657_v62 = vadd.f32 %v653_v49, %v600_v56  ;;  %v661_v63 = vadd.f32 %v653_v49, %v610_v58 }
 0x113   : > { %v602_v0 = vpop.f32.mrf.mxu0  ;;  %v612_v1 = vpop.f32.mrf.mxu1 }
 0x114   : > { %v680_v2 = vmax.f32 %v672_v60, 0.0  ;;  %v684_v3 = vmax.f32 %v676_v61, 0.0  ;;  %v673_v4 = vadd.f32 %v665_v57, %v657_v62  ;;  %v677_v5 = vadd.f32 %v669_v59, %v661_v63 }
 0x115   : > { %v658_v8 = vadd.f32 %v649_v48, %v602_v0  ;;  %v662_v9 = vadd.f32 %v649_v48, %v612_v1  ;;  %v604_v10 = vpop.f32.mrf.mxu0  ;;  %v614_v12 = vpop.f32.mrf.mxu1 }
 0x116   : > { %688 = vst [vmem:[%s1171_s15] sm:$0xff] %v680_v2  ;;  %692 = vst [vmem:[%s1171_s15 + $0x20] sm:$0xff] %v684_v3  ;;  %v681_v14 = vmax.f32 %v673_v4, 0.0  ;;  %v685_v15 = vmax.f32 %v677_v5, 0.0  ;;  %v659_v16 = vadd.f32 %v653_v49, %v604_v10  ;;  %v663_v17 = vadd.f32 %v653_v49, %v614_v12 }
 0x117   : > { %v674_v18 = vadd.f32 %v666_v6, %v658_v8  ;;  %v678_v19 = vadd.f32 %v670_v7, %v662_v9 }
 0x118   : > { %689 = vst [vmem:[%s1171_s15 + $0x8] sm:$0xff] %v681_v14  ;;  %693 = vst [vmem:[%s1171_s15 + $0x28] sm:$0xff] %v685_v15  ;;  %v675_v20 = vadd.f32 %v667_v11, %v659_v16  ;;  %v679_v21 = vadd.f32 %v671_v13, %v663_v17  ;;  %702 = sbr.rel (!%p1092_p6) target bundleno = 294 (0x126), region = 109 }
 0x119   : > { %v682_v22 = vmax.f32 %v674_v18, 0.0  ;;  %v686_v23 = vmax.f32 %v678_v19, 0.0 }
 0x11a   : > { %v683_v24 = vmax.f32 %v675_v20, 0.0  ;;  %v687_v25 = vmax.f32 %v679_v21, 0.0 }
 0x11b   : > { %690 = vst [vmem:[%s1171_s15 + $0x10] sm:$0xff] %v682_v22  ;;  %694 = vst [vmem:[%s1171_s15 + $0x30] sm:$0xff] %v686_v23 }
 0x11c   : > { %691 = vst [vmem:[%s1171_s15 + $0x18] sm:$0xff] %v683_v24  ;;  %695 = vst [vmem:[%s1171_s15 + $0x38] sm:$0xff] %v687_v25 }
 0x11d   : > { %v721_v26 = vld [vmem:[%s1171_s15] sm:$0xff] }
 0x11e   : > { %v729_v30 = vld [vmem:[%s1171_s15 + $0x20] sm:$0xff]  ;;  %722 = vst [vmem:[%s708_s13] sm:$0xff] %v721_v26 }
 0x11f   : > { %v723_v27 = vld [vmem:[%s1171_s15 + $0x8] sm:$0xff]  ;;  %730 = vst [vmem:[%s708_s13 + $0x40] sm:$0xff] %v729_v30 }
 0x120   : > { %v731_v31 = vld [vmem:[%s1171_s15 + $0x28] sm:$0xff]  ;;  %724 = vst [vmem:[%s708_s13 + $0x8] sm:$0xff] %v723_v27 }
 0x121   : > { %732 = vst [vmem:[%s708_s13 + $0x48] sm:$0xff] %v731_v31 }
 0x122   : > { %v725_v28 = vld [vmem:[%s1171_s15 + $0x10] sm:$0xff] }
 0x123   : > { %v727_v29 = vld [vmem:[%s1171_s15 + $0x18] sm:$0xff]  ;;  %726 = vst [vmem:[%s708_s13 + $0x20] sm:$0xff] %v725_v28  ;;  %v733_v32 = vld [vmem:[%s1171_s15 + $0x30] sm:$0xff] }
 0x124   : > { %728 = vst [vmem:[%s708_s13 + $0x28] sm:$0xff] %v727_v29  ;;  %v735_v33 = vld [vmem:[%s1171_s15 + $0x38] sm:$0xff]  ;;  %734 = vst [vmem:[%s708_s13 + $0x60] sm:$0xff] %v733_v32 }
 0x125   : > { %736 = vst [vmem:[%s708_s13 + $0x68] sm:$0xff] %v735_v33 }
 0x126 PF: > { %s14_s19 = sadd.s32 1, %s1025_s19   ;;  %s1217_s15 = smov %s1013_s16 }
 0x127   : > { %p11_p12 = scmp.ge.s32.totalorder %s14_s19, 4   ;;  %s1218_s16 = smov %s1097_s26 }
 0x128   : > { %s1219_s17 = smov %s1021_s18  ;;  %s1220_s18 = smov %s1222_s20 }
 0x129   :  { %13 = sbr.rel (!%p11_p12) target bundleno = 3 (0x3), region = 177 }

// kernel: cnn_res3_forward.63
= control target key start
LH: loop header
LB: loop body
LE: loop exit
PB: predicated region body
PF: predicated region fallthrough
CT: control target
= control target key end

     0   :  { %s763_s1 = inlined_call_operand.vmem [shape: bf16[512,128], index: 1, kind: input, shape index: {}]   ;;  %s764_s0 = inlined_call_operand.vmem [shape: bf16[32,512], index: 0, kind: input, shape index: {}]   ;;  %s765_s2 = inlined_call_operand.vmem [shape: f32[1,128], index: 2, kind: input, shape index: {}]   ;;  %s766_s3 = inlined_call_operand.vmem [shape: f32[32,128], index: 3, kind: output, shape index: {}]  }
   0x1   :  { %v564_v0 = vld [vmem:[%s763_s1 + $0x78] sm:$0xff]   ;;  %v568_v4 = vld [vmem:[%s763_s1 + $0x70] sm:$0xff]   ;;  %v572_v8 = vld [vmem:[%s763_s1 + $0x68] sm:$0xff]  }
   0x2   :  { %v565_v1 = vld [vmem:[%s763_s1 + $0xf8] sm:$0xff]   ;;  %508 = vmatprep.subr.bf16.mxu0 %v564_v0  ;;  %v569_v5 = vld [vmem:[%s763_s1 + $0xf0] sm:$0xff]   ;;  %v573_v9 = vld [vmem:[%s763_s1 + $0xe8] sm:$0xff]  }
   0x3   :  { %v566_v2 = vld [vmem:[%s763_s1 + $0x38] sm:$0xff]   ;;  %536 = vmatprep.subr.bf16.mxu1 %v565_v1  ;;  %v570_v6 = vld [vmem:[%s763_s1 + $0x30] sm:$0xff]   ;;  %v574_v10 = vld [vmem:[%s763_s1 + $0x28] sm:$0xff]  }
   0x4   :  { %v567_v3 = vld [vmem:[%s763_s1 + $0xb8] sm:$0xff]   ;;  %509 = vmatpush3.bf16.msra.mxu0 %v566_v2  ;;  %v571_v7 = vld [vmem:[%s763_s1 + $0xb0] sm:$0xff]   ;;  %v575_v11 = vld [vmem:[%s763_s1 + $0xa8] sm:$0xff]  }
   0x5   :  { %537 = vmatpush3.bf16.msra.mxu1 %v567_v3  ;;  %510 = vmatprep.subr.bf16.mxu0 %v568_v4  ;;  %v576_v12 = vld [vmem:[%s763_s1 + $0x60] sm:$0xff]   ;;  %v580_v16 = vld [vmem:[%s763_s1 + $0x58] sm:$0xff]   ;;  %v584_v20 = vld [vmem:[%s763_s1 + $0x50] sm:$0xff]  }
   0x6   :  { %538 = vmatprep.subr.bf16.mxu1 %v569_v5  ;;  %v577_v13 = vld [vmem:[%s763_s1 + $0xe0] sm:$0xff]   ;;  %v581_v17 = vld [vmem:[%s763_s1 + $0xd8] sm:$0xff]   ;;  %v585_v21 = vld [vmem:[%s763_s1 + $0xd0] sm:$0xff]  }
   0x7   :  { %v578_v14 = vld [vmem:[%s763_s1 + $0x20] sm:$0xff]   ;;  %v582_v18 = vld [vmem:[%s763_s1 + $0x18] sm:$0xff]   ;;  %v586_v22 = vld [vmem:[%s763_s1 + $0x10] sm:$0xff]  }
   0x8   :  { %511 = vmatpush3.bf16.msra.mxu0 %v570_v6  ;;  %v579_v15 = vld [vmem:[%s763_s1 + $0xa0] sm:$0xff]   ;;  %v583_v19 = vld [vmem:[%s763_s1 + $0x98] sm:$0xff]   ;;  %v587_v23 = vld [vmem:[%s763_s1 + $0x90] sm:$0xff]  }
   0x9   :  { %539 = vmatpush3.bf16.msra.mxu1 %v571_v7  ;;  %512 = vmatprep.subr.bf16.mxu0 %v572_v8  ;;  %v588_v24 = vld [vmem:[%s763_s1 + $0x48] sm:$0xff]   ;;  %v592_v28 = vld [vmem:[%s763_s1 + $0x40] sm:$0xff]  }
   0xa   :  { %540 = vmatprep.subr.bf16.mxu1 %v573_v9  ;;  %v589_v25 = vld [vmem:[%s763_s1 + $0xc8] sm:$0xff]   ;;  %v593_v29 = vld [vmem:[%s763_s1 + $0xc0] sm:$0xff]  }
   0xb   :  { %v590_v26 = vld [vmem:[%s763_s1 + $0x8] sm:$0xff]   ;;  %v594_v30 = vld [vmem:[%s763_s1] sm:$0xff]  }
   0xc   :  { %513 = vmatpush3.bf16.msra.mxu0 %v574_v10  ;;  %v591_v27 = vld [vmem:[%s763_s1 + $0x88] sm:$0xff]   ;;  %v595_v31 = vld [vmem:[%s763_s1 + $0x80] sm:$0xff]  }
   0xd   :  { %541 = vmatpush3.bf16.msra.mxu1 %v575_v11  ;;  %514 = vmatprep.subr.bf16.mxu0 %v576_v12  ;;  %v596_v32 = vld [vmem:[%s764_s0] ss:$16 sps:$4 sm:$0xff]   ;;  %v598_v33 = vld [vmem:[%s764_s0 + $0x4] ss:$16 sps:$4 sm:$0xff]   ;;  %v599_v34 = vld [vmem:[%s764_s0 + $0x8] ss:$16 sps:$4 sm:$0xff]  }
   0xe   :  { %542 = vmatprep.subr.bf16.mxu1 %v577_v13  ;;  %v601_v35 = vld [vmem:[%s764_s0 + $0xc] ss:$16 sps:$4 sm:$0xff]   ;;  %363 = vmatprep.mubr.bf16.mxu0 %v598_v33  ;;  %v602_v36 = vld [vmem:[%s764_s0 + $0x24] ss:$16 sps:$4 sm:$0xff]   ;;  %v606_v38 = vld [vmem:[%s764_s0 + $0x20] ss:$16 sps:$4 sm:$0xff]  }
   0xf   :  { %412 = vmatprep.mubr.bf16.mxu1 %v601_v35  ;;  %v604_v37 = vld [vmem:[%s764_s0 + $0x2c] ss:$16 sps:$4 sm:$0xff]   ;;  %v607_v39 = vld [vmem:[%s764_s0 + $0x28] ss:$16 sps:$4 sm:$0xff]   ;;  %v507_v47 = vld [vmem:[%s765_s2] ss:$0 sm:$0xff] }
  0x10   :  { %515 = vmatpush3.bf16.msra.mxu0 %v578_v14 }
  0x11   :  { %543 = vmatpush3.bf16.msra.mxu1 %v579_v15  ;;  %516 = vmatprep.subr.bf16.mxu0 %v580_v16 }
  0x12   :  { %544 = vmatprep.subr.bf16.mxu1 %v581_v17 }
  0x14   :  { %517 = vmatpush3.bf16.msra.mxu0 %v582_v18 }
  0x15   :  { %545 = vmatpush3.bf16.msra.mxu1 %v583_v19  ;;  %518 = vmatprep.subr.bf16.mxu0 %v584_v20 }
  0x16   :  { %546 = vmatprep.subr.bf16.mxu1 %v585_v21 }
  0x18   :  { %519 = vmatpush3.bf16.msra.mxu0 %v586_v22 }
  0x19   :  { %547 = vmatpush3.bf16.msra.mxu1 %v587_v23  ;;  %520 = vmatprep.subr.bf16.mxu0 %v588_v24 }
  0x1a   :  { %548 = vmatprep.subr.bf16.mxu1 %v589_v25 }
  0x1c   :  { %521 = vmatpush3.bf16.msra.mxu0 %v590_v26 }
  0x1d   :  { %549 = vmatpush3.bf16.msra.mxu1 %v591_v27  ;;  %522 = vmatprep.subr.bf16.mxu0 %v592_v28 }
  0x1e   :  { %550 = vmatprep.subr.bf16.mxu1 %v593_v29 }
  0x20   :  { %523 = vmatpush3.bf16.msra.mxu0 %v594_v30 }
  0x21   :  { %551 = vmatpush3.bf16.msra.mxu1 %v595_v31 }
  0x23   :  { %364 = vmatmul.mubr.bf16.vlgmr.msra.gmra.mxu0 %v596_v32 }
  0x24   :  { %413 = vmatmul.mubr.bf16.vlgmr.msra.gmra.mxu1 %v599_v34  ;;  %371 = vmatprep.mubr.bf16.mxu0 %v602_v36 }
  0x25   :  { %420 = vmatprep.mubr.bf16.mxu1 %v604_v37 }
  0x2b   :  { %372 = vmatmul.mubr.bf16.gmra.mxu0 %v606_v38 }
  0x2c   :  { %421 = vmatmul.mubr.bf16.gmra.mxu1 %v607_v39 }
  0xe3   :  { %v524_v40 = vpop.f32.mrf.mxu0 }
  0xe4   :  { %v552_v41 = vpop.f32.mrf.mxu1 }
  0xe5   :  { %v525_v42 = vpop.f32.mrf.mxu0 }
  0xe6   :  { %v526_v43 = vadd.f32 %v525_v42, %v524_v40  ;;  %v553_v44 = vpop.f32.mrf.mxu1 }
  0xe7   :  { %v554_v45 = vadd.f32 %v553_v44, %v552_v41  ;;  %v527_v46 = vpop.f32.mrf.mxu0 }
  0xe8   :  { %v555_v48 = vpop.f32.mrf.mxu1 }
  0xe9   :  { %v415_v49 = vadd.f32 %v554_v45, %v526_v43  ;;  %v528_v50 = vpop.f32.mrf.mxu0 }
  0xea   :  { %v529_v51 = vadd.f32 %v528_v50, %v527_v46  ;;  %v556_v52 = vpop.f32.mrf.mxu1 }
  0xeb   :  { %v451_v53 = vadd.f32 %v507_v47, %v415_v49  ;;  %v557_v54 = vadd.f32 %v556_v52, %v555_v48  ;;  %v530_v55 = vpop.f32.mrf.mxu0 }
  0xec   :  { %v558_v56 = vpop.f32.mrf.mxu1 }
  0xed   :  { %v455_v57 = vmax.f32 %v451_v53, 0.0  ;;  %v418_v58 = vadd.f32 %v557_v54, %v529_v51  ;;  %v531_v59 = vpop.f32.mrf.mxu0 }
  0xee   :  { %v532_v60 = vadd.f32 %v531_v59, %v530_v55  ;;  %v559_v61 = vpop.f32.mrf.mxu1 }
  0xef   :  { %459 = vst [vmem:[%s766_s3] sm:$0xff] %v455_v57  ;;  %v452_v62 = vadd.f32 %v507_v47, %v418_v58  ;;  %v560_v63 = vadd.f32 %v559_v61, %v558_v56  ;;  %v533_v0 = vpop.f32.mrf.mxu0 }
  0xf0   :  { %v561_v1 = vpop.f32.mrf.mxu1 }
  0xf1   :  { %v456_v2 = vmax.f32 %v452_v62, 0.0  ;;  %v423_v3 = vadd.f32 %v560_v63, %v532_v60  ;;  %v534_v4 = vpop.f32.mrf.mxu0 }
  0xf2   :  { %v535_v5 = vadd.f32 %v534_v4, %v533_v0  ;;  %v562_v6 = vpop.f32.mrf.mxu1 }
  0xf3   :  { %460 = vst [vmem:[%s766_s3 + $0x8] sm:$0xff] %v456_v2  ;;  %v453_v7 = vadd.f32 %v507_v47, %v423_v3  ;;  %v563_v8 = vadd.f32 %v562_v6, %v561_v1 }
  0xf5   :  { %v457_v9 = vmax.f32 %v453_v7, 0.0  ;;  %v426_v10 = vadd.f32 %v563_v8, %v535_v5 }
  0xf7   :  { %461 = vst [vmem:[%s766_s3 + $0x10] sm:$0xff] %v457_v9  ;;  %v454_v11 = vadd.f32 %v507_v47, %v426_v10 }
  0xf9   :  { %v458_v12 = vmax.f32 %v454_v11, 0.0 }
  0xfb   :  { %462 = vst [vmem:[%s766_s3 + $0x18] sm:$0xff] %v458_v12 }

// kernel: cnn_res3_forward.72
= control target key start
LH: loop header
LB: loop body
LE: loop exit
PB: predicated region body
PF: predicated region fallthrough
CT: control target
= control target key end

     0   :  { %s1082_s1 = inlined_call_operand.vmem [shape: bf16[512,256], index: 1, kind: input, shape index: {}]   ;;  %s1083_s0 = inlined_call_operand.vmem [shape: bf16[32,512], index: 0, kind: input, shape index: {}]   ;;  %s1084_s2 = inlined_call_operand.vmem [shape: f32[1,256], index: 2, kind: input, shape index: {}]   ;;  %s1085_s3 = inlined_call_operand.vmem [shape: f32[32,256], index: 3, kind: output, shape index: {}]  }
   0x1   :  { %v711_v0 = vld [vmem:[%s1082_s1 + $0x74] ss:$8 sps:$4 sm:$0xff]   ;;  %v715_v2 = vld [vmem:[%s1082_s1 + $0x70] ss:$8 sps:$4 sm:$0xff]   ;;  %v717_v4 = vld [vmem:[%s1082_s1 + $0x64] ss:$8 sps:$4 sm:$0xff]  }
   0x2   :  { %v713_v1 = vld [vmem:[%s1082_s1 + $0x174] ss:$8 sps:$4 sm:$0xff]   ;;  %466 = vmatprep.subr.bf16.mxu0 %v711_v0  ;;  %v716_v3 = vld [vmem:[%s1082_s1 + $0x170] ss:$8 sps:$4 sm:$0xff]   ;;  %v719_v5 = vld [vmem:[%s1082_s1 + $0x164] ss:$8 sps:$4 sm:$0xff]  }
   0x3   :  { %519 = vmatprep.subr.bf16.mxu1 %v713_v1  ;;  %467 = vmatpush1.bf16.msra.mxu0 %v715_v2  ;;  %v721_v6 = vld [vmem:[%s1082_s1 + $0x60] ss:$8 sps:$4 sm:$0xff]   ;;  %v723_v8 = vld [vmem:[%s1082_s1 + $0x54] ss:$8 sps:$4 sm:$0xff]   ;;  %v727_v10 = vld [vmem:[%s1082_s1 + $0x50] ss:$8 sps:$4 sm:$0xff]  }
   0x4   :  { %520 = vmatpush1.bf16.msra.mxu1 %v716_v3  ;;  %468 = vmatprep.subr.bf16.mxu0 %v717_v4  ;;  %v722_v7 = vld [vmem:[%s1082_s1 + $0x160] ss:$8 sps:$4 sm:$0xff]   ;;  %v725_v9 = vld [vmem:[%s1082_s1 + $0x154] ss:$8 sps:$4 sm:$0xff]   ;;  %v728_v11 = vld [vmem:[%s1082_s1 + $0x150] ss:$8 sps:$4 sm:$0xff]  }
   0x5   :  { %521 = vmatprep.subr.bf16.mxu1 %v719_v5  ;;  %v729_v12 = vld [vmem:[%s1082_s1 + $0x44] ss:$8 sps:$4 sm:$0xff]   ;;  %v733_v14 = vld [vmem:[%s1082_s1 + $0x40] ss:$8 sps:$4 sm:$0xff]   ;;  %v735_v16 = vld [vmem:[%s1082_s1 + $0x34] ss:$8 sps:$4 sm:$0xff]  }
   0x6   :  { %v731_v13 = vld [vmem:[%s1082_s1 + $0x144] ss:$8 sps:$4 sm:$0xff]   ;;  %v734_v15 = vld [vmem:[%s1082_s1 + $0x140] ss:$8 sps:$4 sm:$0xff]   ;;  %v737_v17 = vld [vmem:[%s1082_s1 + $0x134] ss:$8 sps:$4 sm:$0xff]  }
   0x7   :  { %469 = vmatpush1.bf16.msra.mxu0 %v721_v6  ;;  %v739_v18 = vld [vmem:[%s1082_s1 + $0x30] ss:$8 sps:$4 sm:$0xff]   ;;  %v741_v20 = vld [vmem:[%s1082_s1 + $0x24] ss:$8 sps:$4 sm:$0xff]   ;;  %v745_v22 = vld [vmem:[%s1082_s1 + $0x20] ss:$8 sps:$4 sm:$0xff]  }
   0x8   :  { %522 = vmatpush1.bf16.msra.mxu1 %v722_v7  ;;  %470 = vmatprep.subr.bf16.mxu0 %v723_v8  ;;  %v740_v19 = vld [vmem:[%s1082_s1 + $0x130] ss:$8 sps:$4 sm:$0xff]   ;;  %v743_v21 = vld [vmem:[%s1082_s1 + $0x124] ss:$8 sps:$4 sm:$0xff]   ;;  %v746_v23 = vld [vmem:[%s1082_s1 + $0x120] ss:$8 sps:$4 sm:$0xff]   ;;  %v601_v8 = vlaneseq }
   0x9   :  { %523 = vmatprep.subr.bf16.mxu1 %v725_v9  ;;  %v747_v24 = vld [vmem:[%s1082_s1 + $0x14] ss:$8 sps:$4 sm:$0xff]   ;;  %v751_v26 = vld [vmem:[%s1082_s1 + $0x10] ss:$8 sps:$4 sm:$0xff]   ;;  %v753_v28 = vld [vmem:[%s1082_s1 + $0x4] ss:$8 sps:$4 sm:$0xff]  }
   0xa   :  { %v749_v25 = vld [vmem:[%s1082_s1 + $0x114] ss:$8 sps:$4 sm:$0xff]   ;;  %v752_v27 = vld [vmem:[%s1082_s1 + $0x110] ss:$8 sps:$4 sm:$0xff]   ;;  %v755_v29 = vld [vmem:[%s1082_s1 + $0x104] ss:$8 sps:$4 sm:$0xff]  }
   0xb   :  { %471 = vmatpush1.bf16.msra.mxu0 %v727_v10  ;;  %v757_v30 = vld [vmem:[%s1082_s1] ss:$8 sps:$4 sm:$0xff]   ;;  %v759_v32 = vld [vmem:[%s1082_s1 + $0xf4] ss:$8 sps:$4 sm:$0xff]   ;;  %v763_v34 = vld [vmem:[%s1082_s1 + $0xf0] ss:$8 sps:$4 sm:$0xff]  }
   0xc   :  { %524 = vmatpush1.bf16.msra.mxu1 %v728_v11  ;;  %472 = vmatprep.subr.bf16.mxu0 %v729_v12  ;;  %v758_v31 = vld [vmem:[%s1082_s1 + $0x100] ss:$8 sps:$4 sm:$0xff]   ;;  %v761_v33 = vld [vmem:[%s1082_s1 + $0x1f4] ss:$8 sps:$4 sm:$0xff]   ;;  %v764_v35 = vld [vmem:[%s1082_s1 + $0x1f0] ss:$8 sps:$4 sm:$0xff]  }
   0xd   :  { %525 = vmatprep.subr.bf16.mxu1 %v731_v13  ;;  %v765_v36 = vld [vmem:[%s1082_s1 + $0xe4] ss:$8 sps:$4 sm:$0xff]   ;;  %v769_v38 = vld [vmem:[%s1082_s1 + $0xe0] ss:$8 sps:$4 sm:$0xff]   ;;  %v771_v40 = vld [vmem:[%s1082_s1 + $0xd4] ss:$8 sps:$4 sm:$0xff]  }
   0xe   :  { %v767_v37 = vld [vmem:[%s1082_s1 + $0x1e4] ss:$8 sps:$4 sm:$0xff]   ;;  %v770_v39 = vld [vmem:[%s1082_s1 + $0x1e0] ss:$8 sps:$4 sm:$0xff]   ;;  %v773_v41 = vld [vmem:[%s1082_s1 + $0x1d4] ss:$8 sps:$4 sm:$0xff]  }
   0xf   :  { %473 = vmatpush1.bf16.msra.mxu0 %v733_v14  ;;  %v775_v42 = vld [vmem:[%s1082_s1 + $0xd0] ss:$8 sps:$4 sm:$0xff]   ;;  %v777_v44 = vld [vmem:[%s1082_s1 + $0xc4] ss:$8 sps:$4 sm:$0xff]   ;;  %v781_v46 = vld [vmem:[%s1082_s1 + $0xc0] ss:$8 sps:$4 sm:$0xff]  }
  0x10   :  { %526 = vmatpush1.bf16.msra.mxu1 %v734_v15  ;;  %474 = vmatprep.subr.bf16.mxu0 %v735_v16  ;;  %v776_v43 = vld [vmem:[%s1082_s1 + $0x1d0] ss:$8 sps:$4 sm:$0xff]   ;;  %v779_v45 = vld [vmem:[%s1082_s1 + $0x1c4] ss:$8 sps:$4 sm:$0xff]   ;;  %v782_v47 = vld [vmem:[%s1082_s1 + $0x1c0] ss:$8 sps:$4 sm:$0xff]  }
  0x11   :  { %527 = vmatprep.subr.bf16.mxu1 %v737_v17  ;;  %v783_v48 = vld [vmem:[%s1082_s1 + $0xb4] ss:$8 sps:$4 sm:$0xff]   ;;  %v787_v52 = vld [vmem:[%s1082_s1 + $0xb0] ss:$8 sps:$4 sm:$0xff]   ;;  %v789_v54 = vld [vmem:[%s1082_s1 + $0xa4] ss:$8 sps:$4 sm:$0xff]  }
  0x12   :  { %v809_v49 = vld [vmem:[%s1083_s0 + $0x4] ss:$16 sps:$4 sm:$0xff]   ;;  %v812_v51 = vld [vmem:[%s1083_s0 + $0xc] ss:$16 sps:$4 sm:$0xff]   ;;  %v788_v53 = vld [vmem:[%s1082_s1 + $0x1b0] ss:$8 sps:$4 sm:$0xff]  }
  0x13   :  { %475 = vmatpush1.bf16.msra.mxu0 %v739_v18  ;;  %v785_v50 = vld [vmem:[%s1082_s1 + $0x1b4] ss:$8 sps:$4 sm:$0xff]   ;;  %498 = vmatprep.mubr.bf16.mxu0 %v809_v49  ;;  %v791_v55 = vld [vmem:[%s1082_s1 + $0x1a4] ss:$8 sps:$4 sm:$0xff]   ;;  %v793_v56 = vld [vmem:[%s1082_s1 + $0xa0] ss:$8 sps:$4 sm:$0xff]  }
  0x14   :  { %528 = vmatpush1.bf16.msra.mxu1 %v740_v19  ;;  %476 = vmatprep.subr.bf16.mxu0 %v741_v20  ;;  %v794_v57 = vld [vmem:[%s1082_s1 + $0x1a0] ss:$8 sps:$4 sm:$0xff]   ;;  %v795_v58 = vld [vmem:[%s1082_s1 + $0x94] ss:$8 sps:$4 sm:$0xff]   ;;  %v799_v60 = vld [vmem:[%s1082_s1 + $0x90] ss:$8 sps:$4 sm:$0xff]  }
  0x15   :  { %529 = vmatprep.subr.bf16.mxu1 %v743_v21  ;;  %551 = vmatprep.mubr.bf16.mxu1 %v812_v51  ;;  %v797_v59 = vld [vmem:[%s1082_s1 + $0x194] ss:$8 sps:$4 sm:$0xff]   ;;  %v800_v61 = vld [vmem:[%s1082_s1 + $0x190] ss:$8 sps:$4 sm:$0xff]   ;;  %v801_v62 = vld [vmem:[%s1082_s1 + $0x84] ss:$8 sps:$4 sm:$0xff]  }
  0x16   :  { %v803_v63 = vld [vmem:[%s1082_s1 + $0x184] ss:$8 sps:$4 sm:$0xff]   ;;  %v805_v0 = vld [vmem:[%s1082_s1 + $0x80] ss:$8 sps:$4 sm:$0xff]   ;;  %v602_v9 = vshrl.u32 %v601_v8, 7 }
  0x17   :  { %477 = vmatpush1.bf16.msra.mxu0 %v745_v22  ;;  %v806_v1 = vld [vmem:[%s1082_s1 + $0x180] ss:$8 sps:$4 sm:$0xff]   ;;  %v813_v4 = vld [vmem:[%s1083_s0 + $0x24] ss:$16 sps:$4 sm:$0xff]   ;;  %v815_v5 = vld [vmem:[%s1083_s0 + $0x2c] ss:$16 sps:$4 sm:$0xff]  }
  0x18   :  { %530 = vmatpush1.bf16.msra.mxu1 %v746_v23  ;;  %478 = vmatprep.subr.bf16.mxu0 %v747_v24  ;;  %v807_v2 = vld [vmem:[%s1083_s0] ss:$16 sps:$4 sm:$0xff]   ;;  %v810_v3 = vld [vmem:[%s1083_s0 + $0x8] ss:$16 sps:$4 sm:$0xff]   ;;  %v603_v10 = vsub.s32 0, %v602_v9  ;;  %v607_v12 = vsub.s32 1, %v602_v9 }
  0x19   :  { %531 = vmatprep.subr.bf16.mxu1 %v749_v25  ;;  %v817_v6 = vld [vmem:[%s1083_s0 + $0x20] ss:$16 sps:$4 sm:$0xff]   ;;  %v818_v7 = vld [vmem:[%s1083_s0 + $0x28] ss:$16 sps:$4 sm:$0xff]  }
  0x1a   :  { %v599_v11 = vld [vmem:[%s1084_s2] sm:$0x3] }
  0x1b   :  { %479 = vmatpush1.bf16.msra.mxu0 %v751_v26  ;;  %v604_v13 = vrot.slane %v599_v11, %v603_v10  ;;  %v608_v17 = vrot.slane %v599_v11, %v607_v12 }
  0x1c   :  { %532 = vmatpush1.bf16.msra.mxu1 %v752_v27  ;;  %480 = vmatprep.subr.bf16.mxu0 %v753_v28 }
  0x1d   :  { %533 = vmatprep.subr.bf16.mxu1 %v755_v29 }
  0x1f   :  { %481 = vmatpush1.bf16.msra.mxu0 %v757_v30 }
  0x20   :  { %534 = vmatpush1.bf16.msra.mxu1 %v758_v31  ;;  %482 = vmatprep.subr.bf16.mxu0 %v759_v32 }
  0x21   :  { %535 = vmatprep.subr.bf16.mxu1 %v761_v33 }
  0x23   :  { %483 = vmatpush2.bf16.msra.mxu0 %v763_v34 }
  0x24   :  { %536 = vmatpush2.bf16.msra.mxu1 %v764_v35  ;;  %484 = vmatprep.subr.bf16.mxu0 %v765_v36 }
  0x25   :  { %537 = vmatprep.subr.bf16.mxu1 %v767_v37 }
  0x27   :  { %485 = vmatpush2.bf16.msra.mxu0 %v769_v38 }
  0x28   :  { %538 = vmatpush2.bf16.msra.mxu1 %v770_v39  ;;  %486 = vmatprep.subr.bf16.mxu0 %v771_v40 }
  0x29   :  { %539 = vmatprep.subr.bf16.mxu1 %v773_v41 }
  0x2b   :  { %487 = vmatpush2.bf16.msra.mxu0 %v775_v42 }
  0x2c   :  { %540 = vmatpush2.bf16.msra.mxu1 %v776_v43  ;;  %488 = vmatprep.subr.bf16.mxu0 %v777_v44 }
  0x2d   :  { %541 = vmatprep.subr.bf16.mxu1 %v779_v45 }
  0x2f   :  { %489 = vmatpush2.bf16.msra.mxu0 %v781_v46 }
  0x30   :  { %542 = vmatpush2.bf16.msra.mxu1 %v782_v47  ;;  %490 = vmatprep.subr.bf16.mxu0 %v783_v48 }
  0x31   :  { %543 = vmatprep.subr.bf16.mxu1 %v785_v50 }
  0x33   :  { %491 = vmatpush2.bf16.msra.mxu0 %v787_v52 }
  0x34   :  { %544 = vmatpush2.bf16.msra.mxu1 %v788_v53  ;;  %492 = vmatprep.subr.bf16.mxu0 %v789_v54 }
  0x35   :  { %545 = vmatprep.subr.bf16.mxu1 %v791_v55 }
  0x37   :  { %493 = vmatpush2.bf16.msra.mxu0 %v793_v56 }
  0x38   :  { %546 = vmatpush2.bf16.msra.mxu1 %v794_v57  ;;  %494 = vmatprep.subr.bf16.mxu0 %v795_v58 }
  0x39   :  { %547 = vmatprep.subr.bf16.mxu1 %v797_v59 }
  0x3b   :  { %495 = vmatpush2.bf16.msra.mxu0 %v799_v60 }
  0x3c   :  { %548 = vmatpush2.bf16.msra.mxu1 %v800_v61  ;;  %496 = vmatprep.subr.bf16.mxu0 %v801_v62 }
  0x3d   :  { %549 = vmatprep.subr.bf16.mxu1 %v803_v63 }
  0x3f   :  { %497 = vmatpush2.bf16.msra.mxu0 %v805_v0 }
  0x40   :  { %550 = vmatpush2.bf16.msra.mxu1 %v806_v1 }
  0x42   :  { %499 = vmatmul.mubr.bf16.vlgmr.msra.gmra.mxu0 %v807_v2 }
  0x43   :  { %552 = vmatmul.mubr.bf16.vlgmr.msra.gmra.mxu1 %v810_v3  ;;  %508 = vmatprep.mubr.bf16.mxu0 %v813_v4 }
  0x44   :  { %561 = vmatprep.mubr.bf16.mxu1 %v815_v5 }
  0x4a   :  { %509 = vmatmul.mubr.bf16.gmra.mxu0 %v817_v6 }
  0x4b   :  { %562 = vmatmul.mubr.bf16.gmra.mxu1 %v818_v7 }
 0x102   :  { %v500_v14 = vpop.f32.mrf.mxu0 }
 0x103   :  { %v553_v15 = vpop.f32.mrf.mxu1 }
 0x104   :  { %v554_v16 = vadd.f32 %v553_v15, %v500_v14  ;;  %v502_v18 = vpop.f32.mrf.mxu0 }
 0x105   :  { %v555_v19 = vpop.f32.mrf.mxu1 }
 0x106   :  { %v611_v20 = vadd.f32 %v604_v13, %v554_v16  ;;  %v556_v21 = vadd.f32 %v555_v19, %v502_v18  ;;  %v504_v22 = vpop.f32.mrf.mxu0 }
 0x107   :  { %v557_v23 = vpop.f32.mrf.mxu1 }
 0x108   :  { %v619_v24 = vmax.f32 %v611_v20, 0.0  ;;  %v612_v25 = vadd.f32 %v608_v17, %v556_v21  ;;  %v558_v26 = vadd.f32 %v557_v23, %v504_v22  ;;  %v506_v27 = vpop.f32.mrf.mxu0 }
 0x109   :  { %v559_v28 = vpop.f32.mrf.mxu1 }
 0x10a   :  { %627 = vst [vmem:[%s1085_s3] sm:$0xff] %v619_v24  ;;  %v620_v29 = vmax.f32 %v612_v25, 0.0  ;;  %v613_v30 = vadd.f32 %v604_v13, %v558_v26  ;;  %v560_v31 = vadd.f32 %v559_v28, %v506_v27  ;;  %v510_v32 = vpop.f32.mrf.mxu0 }
 0x10b   :  { %v563_v33 = vpop.f32.mrf.mxu1 }
 0x10c   :  { %628 = vst [vmem:[%s1085_s3 + $0x8] sm:$0xff] %v620_v29  ;;  %v621_v34 = vmax.f32 %v613_v30, 0.0  ;;  %v614_v35 = vadd.f32 %v608_v17, %v560_v31  ;;  %v564_v36 = vadd.f32 %v563_v33, %v510_v32  ;;  %v512_v37 = vpop.f32.mrf.mxu0 }
 0x10d   :  { %v565_v38 = vpop.f32.mrf.mxu1 }
 0x10e   :  { %629 = vst [vmem:[%s1085_s3 + $0x10] sm:$0xff] %v621_v34  ;;  %v622_v39 = vmax.f32 %v614_v35, 0.0  ;;  %v615_v40 = vadd.f32 %v604_v13, %v564_v36  ;;  %v566_v41 = vadd.f32 %v565_v38, %v512_v37  ;;  %v514_v42 = vpop.f32.mrf.mxu0 }
 0x10f   :  { %v567_v43 = vpop.f32.mrf.mxu1 }
 0x110   :  { %630 = vst [vmem:[%s1085_s3 + $0x18] sm:$0xff] %v622_v39  ;;  %v623_v44 = vmax.f32 %v615_v40, 0.0  ;;  %v616_v45 = vadd.f32 %v608_v17, %v566_v41  ;;  %v568_v46 = vadd.f32 %v567_v43, %v514_v42  ;;  %v516_v47 = vpop.f32.mrf.mxu0 }
 0x111   :  { %v569_v48 = vpop.f32.mrf.mxu1 }
 0x112   :  { %631 = vst [vmem:[%s1085_s3 + $0x20] sm:$0xff] %v623_v44  ;;  %v624_v49 = vmax.f32 %v616_v45, 0.0  ;;  %v617_v50 = vadd.f32 %v604_v13, %v568_v46  ;;  %v570_v51 = vadd.f32 %v569_v48, %v516_v47 }
 0x114   :  { %632 = vst [vmem:[%s1085_s3 + $0x28] sm:$0xff] %v624_v49  ;;  %v625_v52 = vmax.f32 %v617_v50, 0.0  ;;  %v618_v53 = vadd.f32 %v608_v17, %v570_v51 }
 0x116   :  { %633 = vst [vmem:[%s1085_s3 + $0x30] sm:$0xff] %v625_v52  ;;  %v626_v54 = vmax.f32 %v618_v53, 0.0 }
 0x118   :  { %634 = vst [vmem:[%s1085_s3 + $0x38] sm:$0xff] %v626_v54 }

// kernel: cnn_res3_forward.73
= control target key start
LH: loop header
LB: loop body
LE: loop exit
PB: predicated region body
PF: predicated region fallthrough
CT: control target
= control target key end

     0   :  { %s1027_s12 = smov 0   ;;  %s1029_s13 = smov 0   ;;  %s1129_s0 = inlined_call_operand.vmem [shape: bf16[8,2304], index: 0, kind: input, shape index: {}]   ;;  %s1130_s1 = inlined_call_operand.vmem [shape: bf16[2304,256], index: 1, kind: input, shape index: {}]   ;;  %s1131_s2 = inlined_call_operand.vmem [shape: f32[1,256], index: 2, kind: input, shape index: {}]   ;;  %s1132_s3 = inlined_call_operand.vmem [shape: f32[8,256], index: 3, kind: output, shape index: {}]  }
   0x1   :  { %s1031_s14 = smov 0  }
   0x2 LB: > { %s25_s15 = sadd.s32 1, %s999_s13  ;;  %p818_p0 = scmp.ge.s32.totalorder %s1003_s14, 1  ;;  %s1003_s14 = sphi %s1031_s14, %s13_s14   ;;  %s999_s13 = sphi %s1029_s13, %s1134_s13   ;;  %s995_s12 = sphi %s1027_s12, %s1133_s12  }
   0x3   : > { %p26_p1 = scmp.ge.s32.totalorder %s25_s15, 6  ;;  %p194_p2 = scmp.lt.s32.totalorder %s1003_s14, 7 }
   0x5   : > { %s1136_s15 = smov (%p26_p1, %s25_s15), 0  ;;  %p195_p3 = pnand %p818_p0, %p194_p2 }
   0x6   : > { %s240_s16 = smul.u32 (!%p195_p3), 3, %s995_s12  ;;  %p822_p6 = scmp.ne.s32.totalorder (!%p195_p3), %s995_s12, 0 }
   0x7   : > { %198 = sbr.rel (%p195_p3) target bundleno = 300 (0x12c), region = 32 }
   0x8   : > { %s250_s17 = smul.u32 (!%p195_p3), 48, %s995_s12  ;;  %p243_p4 = scmp.lt.s32.totalorder (!%p195_p3), %s240_s16, 17 }
   0xa   : > { %p252_p5 = scmp.lt.s32.totalorder (!%p195_p3), %s250_s17, 287 }
   0xc   : > { %s1138_s16 = smov (!%p243_p4, %s240_s16), 17  ;;  %s1140_s17 = smov (!%p252_p5, %s250_s17), 287 }
   0xd   : > { %s819_s18 = sshll.u32 %s1138_s16, 2  ;;  %s879_s22 = sshll.u32 %s1140_s17, 3 }
   0xe   : > { %s1052_s21 = scalar_lea.vmem %s1129_s0, %s819_s18  ;;  %s1057_s25 = scalar_lea.vmem %s1130_s1, %s879_s22 }
   0xf   : > { %281 = sbr.rel (%p822_p6) target bundleno = 22 (0x16), region = 36 }
  0x14   : > { %v1005_v0 = vmov 0.0  }
  0x15   : > { %282 = vst [vmem:[#allocation2] sm:$0xff] %v1005_v0  ;;  %283 = vst [vmem:[#allocation2 + $0x8] sm:$0xff] %v1005_v0 }
  0x16 PF: > { %v906_v1 = vld [vmem:[%s1057_s25 + $0x74] ss:$8 sps:$4 sm:$0xff]   ;;  %v908_v2 = vld [vmem:[%s1057_s25 + $0x70] ss:$8 sps:$4 sm:$0xff]   ;;  %v1006_v3 = vmov 0   ;;  %v286_v34 = vld [vmem:[%s1052_s21] sm:$0xff] }
  0x17   : > { %660 = vmatprep.mubr.bf16.mxu1 %v1006_v3  ;;  %587 = vmatprep.subr.bf16.mxu0 %v906_v1  ;;  %v909_v4 = vld [vmem:[%s1057_s25 + $0x64] ss:$8 sps:$4 sm:$0xff]   ;;  %v911_v5 = vld [vmem:[%s1057_s25 + $0x60] ss:$8 sps:$4 sm:$0xff]   ;;  %v912_v6 = vld [vmem:[%s1057_s25 + $0x54] ss:$8 sps:$4 sm:$0xff]   ;;  %v824_v36 = vcombine.high %v286_v34, %v286_v34  ;;  %v823_v53 = vcombine.low %v286_v34, %v286_v34 }
  0x18   : > { %588 = vmatpush1.bf16.msra.mxu0 %v908_v2  ;;  %v914_v7 = vld [vmem:[%s1057_s25 + $0x50] ss:$8 sps:$4 sm:$0xff]   ;;  %v915_v8 = vld [vmem:[%s1057_s25 + $0x44] ss:$8 sps:$4 sm:$0xff]   ;;  %v927_v9 = vld [vmem:[%s1057_s25 + $0x174] ss:$8 sps:$4 sm:$0xff]  }
  0x19   : > { %589 = vmatprep.subr.bf16.mxu0 %v909_v4  ;;  %v929_v10 = vld [vmem:[%s1057_s25 + $0x170] ss:$8 sps:$4 sm:$0xff]   ;;  %v917_v11 = vld [vmem:[%s1057_s25 + $0x40] ss:$8 sps:$4 sm:$0xff]   ;;  %v918_v12 = vld [vmem:[%s1057_s25 + $0x34] ss:$8 sps:$4 sm:$0xff]   ;;  %628 = vmatprep.subr.bf16.mxu1 %v927_v9 }
  0x1a   : > { %v933_v13 = vld [vmem:[%s1057_s25 + $0x164] ss:$8 sps:$4 sm:$0xff]   ;;  %629 = vmatpush1.bf16.msra.mxu1 %v929_v10  ;;  %v935_v14 = vld [vmem:[%s1057_s25 + $0x160] ss:$8 sps:$4 sm:$0xff]   ;;  %v920_v15 = vld [vmem:[%s1057_s25 + $0x30] ss:$8 sps:$4 sm:$0xff]   ;;  %619 = vmatprep.mubr.bf16.mxu0 %v824_v36 }
  0x1b   : > { %630 = vmatprep.subr.bf16.mxu1 %v933_v13  ;;  %v939_v16 = vld [vmem:[%s1057_s25 + $0x154] ss:$8 sps:$4 sm:$0xff]   ;;  %v921_v17 = vld [vmem:[%s1057_s25 + $0x24] ss:$8 sps:$4 sm:$0xff]   ;;  %v941_v18 = vld [vmem:[%s1057_s25 + $0x150] ss:$8 sps:$4 sm:$0xff]  }
  0x1c   : > { %590 = vmatpush1.bf16.msra.mxu0 %v911_v5  ;;  %v945_v19 = vld [vmem:[%s1057_s25 + $0x144] ss:$8 sps:$4 sm:$0xff]   ;;  %v923_v20 = vld [vmem:[%s1057_s25 + $0x20] ss:$8 sps:$4 sm:$0xff]   ;;  %v924_v21 = vld [vmem:[%s1057_s25 + $0x14] ss:$8 sps:$4 sm:$0xff]  }
  0x1d   : > { %591 = vmatprep.subr.bf16.mxu0 %v912_v6  ;;  %v947_v22 = vld [vmem:[%s1057_s25 + $0x140] ss:$8 sps:$4 sm:$0xff]   ;;  %v951_v23 = vld [vmem:[%s1057_s25 + $0x134] ss:$8 sps:$4 sm:$0xff]   ;;  %v926_v24 = vld [vmem:[%s1057_s25 + $0x10] ss:$8 sps:$4 sm:$0xff]  }
  0x1e   : > { %631 = vmatpush1.bf16.msra.mxu1 %v935_v14  ;;  %v930_v25 = vld [vmem:[%s1057_s25 + $0x4] ss:$8 sps:$4 sm:$0xff]   ;;  %v953_v26 = vld [vmem:[%s1057_s25 + $0x130] ss:$8 sps:$4 sm:$0xff]   ;;  %v932_v28 = vld [vmem:[%s1057_s25] ss:$8 sps:$4 sm:$0xff]  }
  0x1f   : > { %632 = vmatprep.subr.bf16.mxu1 %v939_v16  ;;  %v957_v27 = vld [vmem:[%s1057_s25 + $0x124] ss:$8 sps:$4 sm:$0xff]   ;;  %v936_v29 = vld [vmem:[%s1057_s25 + $0xf4] ss:$8 sps:$4 sm:$0xff]   ;;  %v959_v30 = vld [vmem:[%s1057_s25 + $0x120] ss:$8 sps:$4 sm:$0xff]  }
  0x20   : > { %592 = vmatpush1.bf16.msra.mxu0 %v914_v7  ;;  %v963_v31 = vld [vmem:[%s1057_s25 + $0x114] ss:$8 sps:$4 sm:$0xff]   ;;  %v938_v32 = vld [vmem:[%s1057_s25 + $0xf0] ss:$8 sps:$4 sm:$0xff]   ;;  %v942_v33 = vld [vmem:[%s1057_s25 + $0xe4] ss:$8 sps:$4 sm:$0xff]  }
  0x21   : > { %593 = vmatprep.subr.bf16.mxu0 %v915_v8  ;;  %v965_v35 = vld [vmem:[%s1057_s25 + $0x110] ss:$8 sps:$4 sm:$0xff]   ;;  %v969_v37 = vld [vmem:[%s1057_s25 + $0x104] ss:$8 sps:$4 sm:$0xff]   ;;  %v944_v38 = vld [vmem:[%s1057_s25 + $0xe0] ss:$8 sps:$4 sm:$0xff]  }
  0x22   : > { %633 = vmatpush1.bf16.msra.mxu1 %v941_v18  ;;  %v948_v39 = vld [vmem:[%s1057_s25 + $0xd4] ss:$8 sps:$4 sm:$0xff]   ;;  %v971_v40 = vld [vmem:[%s1057_s25 + $0x100] ss:$8 sps:$4 sm:$0xff]   ;;  %v950_v41 = vld [vmem:[%s1057_s25 + $0xd0] ss:$8 sps:$4 sm:$0xff]  }
  0x23   : > { %634 = vmatprep.subr.bf16.mxu1 %v945_v19  ;;  %v954_v42 = vld [vmem:[%s1057_s25 + $0xc4] ss:$8 sps:$4 sm:$0xff]   ;;  %v975_v43 = vld [vmem:[%s1052_s21 + $0x8] ss:$0 sps:$4 sm:$0xff]   ;;  %v960_v45 = vld [vmem:[%s1057_s25 + $0xb4] ss:$8 sps:$4 sm:$0xff]  }
  0x24   : > { %594 = vmatpush1.bf16.msra.mxu0 %v917_v11  ;;  %v956_v44 = vld [vmem:[%s1057_s25 + $0xc0] ss:$8 sps:$4 sm:$0xff]   ;;  %v962_v46 = vld [vmem:[%s1057_s25 + $0xb0] ss:$8 sps:$4 sm:$0xff]   ;;  %v966_v47 = vld [vmem:[%s1057_s25 + $0xa4] ss:$8 sps:$4 sm:$0xff]  }
  0x25   : > { %595 = vmatprep.subr.bf16.mxu0 %v918_v12  ;;  %v968_v48 = vld [vmem:[%s1057_s25 + $0xa0] ss:$8 sps:$4 sm:$0xff]   ;;  %v972_v49 = vld [vmem:[%s1057_s25 + $0x94] ss:$8 sps:$4 sm:$0xff]   ;;  %v974_v50 = vld [vmem:[%s1057_s25 + $0x90] ss:$8 sps:$4 sm:$0xff]  }
  0x26   : > { %635 = vmatpush1.bf16.msra.mxu1 %v947_v22  ;;  %v976_v51 = vld [vmem:[%s1057_s25 + $0x84] ss:$8 sps:$4 sm:$0xff]   ;;  %v978_v52 = vld [vmem:[%s1057_s25 + $0x80] ss:$8 sps:$4 sm:$0xff]   ;;  %v285_v61 = vld [vmem:[#allocation2 + $0x8] sm:$0xff]  ;;  %p874_p7 = scmp.ne.s32.totalorder %s995_s12, 5 }
  0x27   : > { %636 = vmatprep.subr.bf16.mxu1 %v951_v23  ;;  %v284_v58 = vld [vmem:[#allocation2] sm:$0xff] }
  0x28   : > { %596 = vmatpush1.bf16.msra.mxu0 %v920_v15 }
  0x29   : > { %597 = vmatprep.subr.bf16.mxu0 %v921_v17 }
  0x2a   : > { %637 = vmatpush1.bf16.msra.mxu1 %v953_v26 }
  0x2b   : > { %638 = vmatprep.subr.bf16.mxu1 %v957_v27 }
  0x2c   : > { %598 = vmatpush1.bf16.msra.mxu0 %v923_v20 }
  0x2d   : > { %599 = vmatprep.subr.bf16.mxu0 %v924_v21 }
  0x2e   : > { %639 = vmatpush1.bf16.msra.mxu1 %v959_v30 }
  0x2f   : > { %640 = vmatprep.subr.bf16.mxu1 %v963_v31 }
  0x30   : > { %600 = vmatpush1.bf16.msra.mxu0 %v926_v24 }
  0x31   : > { %601 = vmatprep.subr.bf16.mxu0 %v930_v25 }
  0x32   : > { %641 = vmatpush1.bf16.msra.mxu1 %v965_v35 }
  0x33   : > { %642 = vmatprep.subr.bf16.mxu1 %v969_v37 }
  0x34   : > { %602 = vmatpush1.bf16.msra.mxu0 %v932_v28 }
  0x35   : > { %603 = vmatprep.subr.bf16.mxu0 %v936_v29 }
  0x36   : > { %643 = vmatpush1.bf16.msra.mxu1 %v971_v40 }
  0x38   : > { %604 = vmatpush2.bf16.msra.mxu0 %v938_v32 }
  0x39   : > { %605 = vmatprep.subr.bf16.mxu0 %v942_v33  ;;  %661 = vmatmul.mubr.bf16.vlgmr.msra.gmra.mxu1 %v975_v43 }
  0x3c   : > { %606 = vmatpush2.bf16.msra.mxu0 %v944_v38 }
  0x3d   : > { %607 = vmatprep.subr.bf16.mxu0 %v948_v39 }
  0x40   : > { %608 = vmatpush2.bf16.msra.mxu0 %v950_v41 }
  0x41   : > { %609 = vmatprep.subr.bf16.mxu0 %v954_v42 }
  0x44   : > { %610 = vmatpush2.bf16.msra.mxu0 %v956_v44 }
  0x45   : > { %611 = vmatprep.subr.bf16.mxu0 %v960_v45 }
  0x48   : > { %612 = vmatpush2.bf16.msra.mxu0 %v962_v46 }
  0x49   : > { %613 = vmatprep.subr.bf16.mxu0 %v966_v47 }
  0x4c   : > { %614 = vmatpush2.bf16.msra.mxu0 %v968_v48 }
  0x4d   : > { %615 = vmatprep.subr.bf16.mxu0 %v972_v49 }
  0x50   : > { %616 = vmatpush2.bf16.msra.mxu0 %v974_v50 }
  0x51   : > { %617 = vmatprep.subr.bf16.mxu0 %v976_v51 }
  0x54   : > { %618 = vmatpush2.bf16.msra.mxu0 %v978_v52 }
  0x57   : > { %620 = vmatmul.mubr.bf16.vlgmr.msra.gmra.mxu0 %v823_v53 }
  0xf9   : > { %v662_v54 = vpop.f32.mrf.mxu1 }
  0xfb   : > { %v664_v55 = vpop.f32.mrf.mxu1 }
  0xfd   : > { %v666_v56 = vpop.f32.mrf.mxu1 }
  0xff   : > { %v667_v57 = vpop.f32.mrf.mxu1 }
 0x117   : > { %v621_v59 = vpop.f32.mrf.mxu0 }
 0x118   : > { %v663_v60 = vadd.f32 %v662_v54, %v621_v59 }
 0x119   : > { %v623_v62 = vpop.f32.mrf.mxu0 }
 0x11a   : > { %v669_v63 = vadd.f32 %v663_v60, %v284_v58  ;;  %v665_v0 = vadd.f32 %v664_v55, %v623_v62  ;;  %676 = sbr.rel (%p874_p7) target bundleno = 300 (0x12c), region = 40 }
 0x11b   : > { %v625_v1 = vpop.f32.mrf.mxu0 }
 0x11c   : > { %671 = vst [vmem:[#allocation2] sm:$0xff] %v669_v63  ;;  %v670_v2 = vadd.f32 %v665_v0, %v285_v61 }
 0x11d   : > { %v626_v3 = vpop.f32.mrf.mxu0 }
 0x11e   : > { %672 = vst [vmem:[#allocation2 + $0x8] sm:$0xff] %v670_v2 }
 0x11f   : > { %v681_v4 = vlaneseq  ;;  %v679_v6 = vld [vmem:[%s1131_s2] sm:$0x3] }
 0x121   : > { %v682_v5 = vshrl.u32 %v681_v4, 7 }
 0x123   : > { %v683_v7 = vsub.s32 0, %v682_v5  ;;  %v687_v8 = vsub.s32 1, %v682_v5  ;;  %v677_v9 = vld [vmem:[#allocation2] sm:$0xff] }
 0x125   : > { %v678_v10 = vld [vmem:[#allocation2 + $0x8] sm:$0xff]  ;;  %v684_v11 = vrot.slane %v679_v6, %v683_v7  ;;  %v688_v12 = vrot.slane %v679_v6, %v687_v8 }
 0x127   : > { %v691_v13 = vadd.f32 %v684_v11, %v677_v9  ;;  %v692_v14 = vadd.f32 %v688_v12, %v678_v10 }
 0x129   : > { %v693_v15 = vmax.f32 %v691_v13, 0.0  ;;  %v694_v16 = vmax.f32 %v692_v14, 0.0 }
 0x12b   : > { %695 = vst [vmem:[%s1132_s3] sm:$0xff] %v693_v15  ;;  %696 = vst [vmem:[%s1132_s3 + $0x8] sm:$0xff] %v694_v16 }
 0x12c PF: > { %s13_s14 = sadd.s32 1, %s1003_s14   ;;  %s1133_s12 = smov %s999_s13 }
 0x12d   : > { %p10_p8 = scmp.ge.s32.totalorder %s13_s14, 8   ;;  %s1134_s13 = smov %s1136_s15 }
 0x12f   :  { %12 = sbr.rel (!%p10_p8) target bundleno = 2 (0x2), region = 76 }

// kernel: cnn_res3_forward.74
= control target key start
LH: loop header
LB: loop body
LE: loop exit
PB: predicated region body
PF: predicated region fallthrough
CT: control target
= control target key end

     0   :  { %s1473_s12 = smov 0   ;;  %s1475_s13 = smov 0   ;;  %s1757_s0 = inlined_call_operand.vmem [shape: bf16[8,512], index: 0, kind: input, shape index: {}]   ;;  %s1758_s1 = inlined_call_operand.vmem [shape: bf16[512,1024], index: 1, kind: input, shape index: {}]   ;;  %s1759_s2 = inlined_call_operand.vmem [shape: f32[1,1024], index: 2, kind: input, shape index: {}]   ;;  %s1760_s3 = inlined_call_operand.vmem [shape: f32[8,1024], index: 3, kind: output, shape index: {}]  }
   0x1   :  { %s1477_s14 = smov 0   ;;  %s1479_s15 = smov 0  }
   0x2   :  { %s1481_s16 = smov 0  }
   0x3 LB: > { %s28_s17 = sadd.s32 1, %s1447_s15  ;;  %p76_p1 = scmp.ne.s32.totalorder %s1439_s13, %s1435_s12  ;;  %s1451_s16 = sphi %s1481_s16, %s13_s16   ;;  %s1447_s15 = sphi %s1479_s15, %s1764_s15   ;;  %s1443_s14 = sphi %s1477_s14, %s1763_s14   ;;  %s1439_s13 = sphi %s1475_s13, %s1762_s13   ;;  %s1435_s12 = sphi %s1473_s12, %s1761_s12  }
   0x4   : > { %p30_p0 = scmp.ge.s32.totalorder %s28_s17, 4  ;;  %p77_p2 = scmp.eq.s32.totalorder %s1451_s16, 0 }
   0x5   : > { %s69_s19 = sadd.s32 1, %s1439_s13  ;;  %p1193_p5 = scmp.ge.s32.totalorder %s1451_s16, 4 }
   0x6   : > { %s1766_s17 = smov (%p30_p0, %s28_s17), 0  ;;  %p78_p3 = por %p77_p2, %p76_p1 }
   0x7   : > { %s65_s18 = ssub.s32 %s1447_s15, %s1766_s17  ;;  %169 = sbr.rel (%p1193_p5) target bundleno = 80 (0x50), region = 20 }
   0x8   : > { %p67_p4 = scmp.eq.s32.totalorder %s65_s18, 0 }
   0xa   : > { %s1508_s20 = scalar_select %p67_p4, %s1439_s13, %s69_s19  }
   0xc   : > { %172 = sbr.rel (!%p78_p3) target bundleno = 80 (0x50), region = 24  ;;  %s174_s21 = sand.u32 (%p78_p3), 1, %s1439_s13  }
   0xd   : > { %s1272_s22 = sshll.u32 (%p78_p3), %s1447_s15, 3  ;;  %s1194_s23 = sshll.u32 (%p78_p3), %s174_s21, 9 }
   0xe   : > { %s1516_s26 = scalar_lea.vmem (%p78_p3), %s1758_s1, %s1272_s22  ;;  %s1521_s27 = scalar_lea.vmem (%p78_p3), [#allocation3], %s1194_s23 }
   0xf   : > { %v337_v0 = vld [vmem:[%s1516_s26] sm:$0xff] (%p78_p3) }
  0x10   : > { %v339_v1 = vld [vmem:[%s1516_s26 + $0x20] sm:$0xff] (%p78_p3)  ;;  %338 = vst [vmem:[%s1521_s27] sm:$0xff] (%p78_p3), %v337_v0 }
  0x11   : > { %v341_v2 = vld [vmem:[%s1516_s26 + $0x40] sm:$0xff]  ;;  %340 = vst [vmem:[%s1521_s27 + $0x8] sm:$0xff] %v339_v1 }
  0x12   : > { %342 = vst [vmem:[%s1521_s27 + $0x10] sm:$0xff] %v341_v2  ;;  %v343_v3 = vld [vmem:[%s1516_s26 + $0x60] sm:$0xff] }
  0x13   : > { %v345_v4 = vld [vmem:[%s1516_s26 + $0x80] sm:$0xff]  ;;  %344 = vst [vmem:[%s1521_s27 + $0x18] sm:$0xff] %v343_v3 }
  0x14   : > { %v347_v5 = vld [vmem:[%s1516_s26 + $0xa0] sm:$0xff]  ;;  %346 = vst [vmem:[%s1521_s27 + $0x20] sm:$0xff] %v345_v4 }
  0x15   : > { %348 = vst [vmem:[%s1521_s27 + $0x28] sm:$0xff] %v347_v5  ;;  %v349_v6 = vld [vmem:[%s1516_s26 + $0xc0] sm:$0xff] }
  0x16   : > { %v351_v7 = vld [vmem:[%s1516_s26 + $0xe0] sm:$0xff]  ;;  %350 = vst [vmem:[%s1521_s27 + $0x30] sm:$0xff] %v349_v6 }
  0x17   : > { %v353_v8 = vld [vmem:[%s1516_s26 + $0x100] sm:$0xff]  ;;  %352 = vst [vmem:[%s1521_s27 + $0x38] sm:$0xff] %v351_v7 }
  0x18   : > { %354 = vst [vmem:[%s1521_s27 + $0x40] sm:$0xff] %v353_v8  ;;  %v355_v9 = vld [vmem:[%s1516_s26 + $0x120] sm:$0xff] }
  0x19   : > { %v357_v10 = vld [vmem:[%s1516_s26 + $0x140] sm:$0xff]  ;;  %356 = vst [vmem:[%s1521_s27 + $0x48] sm:$0xff] %v355_v9 }
  0x1a   : > { %v359_v11 = vld [vmem:[%s1516_s26 + $0x160] sm:$0xff]  ;;  %358 = vst [vmem:[%s1521_s27 + $0x50] sm:$0xff] %v357_v10 }
  0x1b   : > { %360 = vst [vmem:[%s1521_s27 + $0x58] sm:$0xff] %v359_v11  ;;  %v361_v12 = vld [vmem:[%s1516_s26 + $0x180] sm:$0xff] }
  0x1c   : > { %v363_v13 = vld [vmem:[%s1516_s26 + $0x1a0] sm:$0xff]  ;;  %362 = vst [vmem:[%s1521_s27 + $0x60] sm:$0xff] %v361_v12 }
  0x1d   : > { %v365_v14 = vld [vmem:[%s1516_s26 + $0x1c0] sm:$0xff]  ;;  %364 = vst [vmem:[%s1521_s27 + $0x68] sm:$0xff] %v363_v13 }
  0x1e   : > { %366 = vst [vmem:[%s1521_s27 + $0x70] sm:$0xff] %v365_v14  ;;  %v367_v15 = vld [vmem:[%s1516_s26 + $0x1e0] sm:$0xff] }
  0x1f   : > { %v369_v16 = vld [vmem:[%s1516_s26 + $0x200] sm:$0xff]  ;;  %368 = vst [vmem:[%s1521_s27 + $0x78] sm:$0xff] %v367_v15 }
  0x20   : > { %v371_v17 = vld [vmem:[%s1516_s26 + $0x220] sm:$0xff]  ;;  %370 = vst [vmem:[%s1521_s27 + $0x80] sm:$0xff] %v369_v16 }
  0x21   : > { %372 = vst [vmem:[%s1521_s27 + $0x88] sm:$0xff] %v371_v17  ;;  %v373_v18 = vld [vmem:[%s1516_s26 + $0x240] sm:$0xff] }
  0x22   : > { %v375_v19 = vld [vmem:[%s1516_s26 + $0x260] sm:$0xff]  ;;  %374 = vst [vmem:[%s1521_s27 + $0x90] sm:$0xff] %v373_v18 }
  0x23   : > { %v377_v20 = vld [vmem:[%s1516_s26 + $0x280] sm:$0xff]  ;;  %376 = vst [vmem:[%s1521_s27 + $0x98] sm:$0xff] %v375_v19 }
  0x24   : > { %378 = vst [vmem:[%s1521_s27 + $0xa0] sm:$0xff] %v377_v20  ;;  %v379_v21 = vld [vmem:[%s1516_s26 + $0x2a0] sm:$0xff] }
  0x25   : > { %v381_v22 = vld [vmem:[%s1516_s26 + $0x2c0] sm:$0xff]  ;;  %380 = vst [vmem:[%s1521_s27 + $0xa8] sm:$0xff] %v379_v21 }
  0x26   : > { %v383_v23 = vld [vmem:[%s1516_s26 + $0x2e0] sm:$0xff]  ;;  %382 = vst [vmem:[%s1521_s27 + $0xb0] sm:$0xff] %v381_v22 }
  0x27   : > { %384 = vst [vmem:[%s1521_s27 + $0xb8] sm:$0xff] %v383_v23  ;;  %v385_v24 = vld [vmem:[%s1516_s26 + $0x300] sm:$0xff] }
  0x28   : > { %v387_v25 = vld [vmem:[%s1516_s26 + $0x320] sm:$0xff]  ;;  %386 = vst [vmem:[%s1521_s27 + $0xc0] sm:$0xff] %v385_v24 }
  0x29   : > { %v389_v26 = vld [vmem:[%s1516_s26 + $0x340] sm:$0xff]  ;;  %388 = vst [vmem:[%s1521_s27 + $0xc8] sm:$0xff] %v387_v25 }
  0x2a   : > { %390 = vst [vmem:[%s1521_s27 + $0xd0] sm:$0xff] %v389_v26  ;;  %v391_v27 = vld [vmem:[%s1516_s26 + $0x360] sm:$0xff] }
  0x2b   : > { %v393_v28 = vld [vmem:[%s1516_s26 + $0x380] sm:$0xff]  ;;  %392 = vst [vmem:[%s1521_s27 + $0xd8] sm:$0xff] %v391_v27 }
  0x2c   : > { %v395_v29 = vld [vmem:[%s1516_s26 + $0x3a0] sm:$0xff]  ;;  %394 = vst [vmem:[%s1521_s27 + $0xe0] sm:$0xff] %v393_v28 }
  0x2d   : > { %396 = vst [vmem:[%s1521_s27 + $0xe8] sm:$0xff] %v395_v29  ;;  %v397_v30 = vld [vmem:[%s1516_s26 + $0x3c0] sm:$0xff] }
  0x2e   : > { %v399_v31 = vld [vmem:[%s1516_s26 + $0x3e0] sm:$0xff]  ;;  %398 = vst [vmem:[%s1521_s27 + $0xf0] sm:$0xff] %v397_v30 }
  0x2f   : > { %v401_v32 = vld [vmem:[%s1516_s26 + $0x400] sm:$0xff]  ;;  %400 = vst [vmem:[%s1521_s27 + $0xf8] sm:$0xff] %v399_v31 }
  0x30   : > { %402 = vst [vmem:[%s1521_s27 + $0x100] sm:$0xff] %v401_v32  ;;  %v403_v33 = vld [vmem:[%s1516_s26 + $0x420] sm:$0xff] }
  0x31   : > { %v405_v34 = vld [vmem:[%s1516_s26 + $0x440] sm:$0xff]  ;;  %404 = vst [vmem:[%s1521_s27 + $0x108] sm:$0xff] %v403_v33 }
  0x32   : > { %v407_v35 = vld [vmem:[%s1516_s26 + $0x460] sm:$0xff]  ;;  %406 = vst [vmem:[%s1521_s27 + $0x110] sm:$0xff] %v405_v34 }
  0x33   : > { %408 = vst [vmem:[%s1521_s27 + $0x118] sm:$0xff] %v407_v35  ;;  %v409_v36 = vld [vmem:[%s1516_s26 + $0x480] sm:$0xff] }
  0x34   : > { %v411_v37 = vld [vmem:[%s1516_s26 + $0x4a0] sm:$0xff]  ;;  %410 = vst [vmem:[%s1521_s27 + $0x120] sm:$0xff] %v409_v36 }
  0x35   : > { %v413_v38 = vld [vmem:[%s1516_s26 + $0x4c0] sm:$0xff]  ;;  %412 = vst [vmem:[%s1521_s27 + $0x128] sm:$0xff] %v411_v37 }
  0x36   : > { %414 = vst [vmem:[%s1521_s27 + $0x130] sm:$0xff] %v413_v38  ;;  %v415_v39 = vld [vmem:[%s1516_s26 + $0x4e0] sm:$0xff] }
  0x37   : > { %v417_v40 = vld [vmem:[%s1516_s26 + $0x500] sm:$0xff]  ;;  %416 = vst [vmem:[%s1521_s27 + $0x138] sm:$0xff] %v415_v39 }
  0x38   : > { %v419_v41 = vld [vmem:[%s1516_s26 + $0x520] sm:$0xff]  ;;  %418 = vst [vmem:[%s1521_s27 + $0x140] sm:$0xff] %v417_v40 }
  0x39   : > { %420 = vst [vmem:[%s1521_s27 + $0x148] sm:$0xff] %v419_v41  ;;  %v421_v42 = vld [vmem:[%s1516_s26 + $0x540] sm:$0xff] }
  0x3a   : > { %v423_v43 = vld [vmem:[%s1516_s26 + $0x560] sm:$0xff]  ;;  %422 = vst [vmem:[%s1521_s27 + $0x150] sm:$0xff] %v421_v42 }
  0x3b   : > { %v425_v44 = vld [vmem:[%s1516_s26 + $0x580] sm:$0xff]  ;;  %424 = vst [vmem:[%s1521_s27 + $0x158] sm:$0xff] %v423_v43 }
  0x3c   : > { %426 = vst [vmem:[%s1521_s27 + $0x160] sm:$0xff] %v425_v44  ;;  %v427_v45 = vld [vmem:[%s1516_s26 + $0x5a0] sm:$0xff] }
  0x3d   : > { %v429_v46 = vld [vmem:[%s1516_s26 + $0x5c0] sm:$0xff]  ;;  %428 = vst [vmem:[%s1521_s27 + $0x168] sm:$0xff] %v427_v45 }
  0x3e   : > { %v431_v47 = vld [vmem:[%s1516_s26 + $0x5e0] sm:$0xff]  ;;  %430 = vst [vmem:[%s1521_s27 + $0x170] sm:$0xff] %v429_v46 }
  0x3f   : > { %432 = vst [vmem:[%s1521_s27 + $0x178] sm:$0xff] %v431_v47  ;;  %v433_v48 = vld [vmem:[%s1516_s26 + $0x600] sm:$0xff] }
  0x40   : > { %v435_v49 = vld [vmem:[%s1516_s26 + $0x620] sm:$0xff]  ;;  %434 = vst [vmem:[%s1521_s27 + $0x180] sm:$0xff] %v433_v48 }
  0x41   : > { %v437_v50 = vld [vmem:[%s1516_s26 + $0x640] sm:$0xff]  ;;  %436 = vst [vmem:[%s1521_s27 + $0x188] sm:$0xff] %v435_v49 }
  0x42   : > { %438 = vst [vmem:[%s1521_s27 + $0x190] sm:$0xff] %v437_v50  ;;  %v439_v51 = vld [vmem:[%s1516_s26 + $0x660] sm:$0xff] }
  0x43   : > { %v441_v52 = vld [vmem:[%s1516_s26 + $0x680] sm:$0xff]  ;;  %440 = vst [vmem:[%s1521_s27 + $0x198] sm:$0xff] %v439_v51 }
  0x44   : > { %v443_v53 = vld [vmem:[%s1516_s26 + $0x6a0] sm:$0xff]  ;;  %442 = vst [vmem:[%s1521_s27 + $0x1a0] sm:$0xff] %v441_v52 }
  0x45   : > { %444 = vst [vmem:[%s1521_s27 + $0x1a8] sm:$0xff] %v443_v53  ;;  %v445_v54 = vld [vmem:[%s1516_s26 + $0x6c0] sm:$0xff] }
  0x46   : > { %v447_v55 = vld [vmem:[%s1516_s26 + $0x6e0] sm:$0xff]  ;;  %446 = vst [vmem:[%s1521_s27 + $0x1b0] sm:$0xff] %v445_v54 }
  0x47   : > { %v449_v56 = vld [vmem:[%s1516_s26 + $0x700] sm:$0xff]  ;;  %448 = vst [vmem:[%s1521_s27 + $0x1b8] sm:$0xff] %v447_v55 }
  0x48   : > { %450 = vst [vmem:[%s1521_s27 + $0x1c0] sm:$0xff] %v449_v56  ;;  %v451_v57 = vld [vmem:[%s1516_s26 + $0x720] sm:$0xff] }
  0x49   : > { %v453_v58 = vld [vmem:[%s1516_s26 + $0x740] sm:$0xff]  ;;  %452 = vst [vmem:[%s1521_s27 + $0x1c8] sm:$0xff] %v451_v57 }
  0x4a   : > { %v455_v59 = vld [vmem:[%s1516_s26 + $0x760] sm:$0xff]  ;;  %454 = vst [vmem:[%s1521_s27 + $0x1d0] sm:$0xff] %v453_v58 }
  0x4b   : > { %456 = vst [vmem:[%s1521_s27 + $0x1d8] sm:$0xff] %v455_v59  ;;  %v457_v60 = vld [vmem:[%s1516_s26 + $0x780] sm:$0xff] }
  0x4c   : > { %v459_v61 = vld [vmem:[%s1516_s26 + $0x7a0] sm:$0xff]  ;;  %458 = vst [vmem:[%s1521_s27 + $0x1e0] sm:$0xff] %v457_v60 }
  0x4d   : > { %v461_v62 = vld [vmem:[%s1516_s26 + $0x7c0] sm:$0xff]  ;;  %460 = vst [vmem:[%s1521_s27 + $0x1e8] sm:$0xff] %v459_v61 }
  0x4e   : > { %462 = vst [vmem:[%s1521_s27 + $0x1f0] sm:$0xff] %v461_v62  ;;  %v463_v63 = vld [vmem:[%s1516_s26 + $0x7e0] sm:$0xff] }
  0x4f   : > { %464 = vst [vmem:[%s1521_s27 + $0x1f8] sm:$0xff] %v463_v63 }
  0x50 PF: > { %p1197_p6 = scmp.ge.s32.totalorder %s1451_s16, 1  ;;  %p477_p7 = scmp.lt.s32.totalorder %s1451_s16, 5 }
  0x52   : > { %p478_p8 = pnand %p1197_p6, %p477_p7 }
  0x53   : > { %s484_s28 = sand.u32 (!%p478_p8), 1, %s1435_s12   ;;  %s1199_s8 = sshll.u32 (!%p478_p8), %s1443_s14, 1 }
  0x54   : > { %481 = sbr.rel (%p478_p8) target bundleno = 357 (0x165), region = 66  ;;  %s1198_s6 = sshll.u32 (!%p478_p8), %s484_s28, 9 }
  0x55   : > { %s1665_s7 = scalar_lea.vmem (!%p478_p8), [#allocation3], %s1198_s6  ;;  %p537_p9 = scmp.lt.s32.totalorder (!%p478_p8), %s1199_s8, 7 }
  0x59   : > { %v1654_v0 = vld [vmem:[%s1757_s0] sm:$0xff]  ;;  %v1659_v1 = vld [vmem:[%s1757_s0 + $0x8] sm:$0xff]  ;;  %s1768_s8 = smov (!%p537_p9, %s1199_s8), 7 }
  0x5a   : > { %v1203_v2 = vcombine.high %v1654_v0, %v1654_v0  ;;  %v1205_v3 = vcombine.high %v1659_v1, %v1659_v1  ;;  %v1313_v4 = vld [vmem:[%s1665_s7 + $0x74] ss:$8 sps:$4 sm:$0xff]   ;;  %v1317_v6 = vld [vmem:[%s1665_s7 + $0x70] ss:$8 sps:$4 sm:$0xff]   ;;  %v1319_v8 = vld [vmem:[%s1665_s7 + $0x64] ss:$8 sps:$4 sm:$0xff]   ;;  %s539_s11 = scalar_lea.vmem %s1759_s2, %s1768_s8 }
  0x5b   : > { %v1315_v5 = vld [vmem:[%s1665_s7 + $0x174] ss:$8 sps:$4 sm:$0xff]   ;;  %959 = vmatprep.subr.bf16.mxu0 %v1313_v4  ;;  %v1318_v7 = vld [vmem:[%s1665_s7 + $0x170] ss:$8 sps:$4 sm:$0xff]   ;;  %v1321_v9 = vld [vmem:[%s1665_s7 + $0x164] ss:$8 sps:$4 sm:$0xff]  }
  0x5c   : > { %991 = vmatprep.mubr.bf16.mxu0 %v1203_v2  ;;  %1032 = vmatprep.mubr.bf16.mxu1 %v1205_v3  ;;  %v1323_v10 = vld [vmem:[%s1665_s7 + $0x60] ss:$8 sps:$4 sm:$0xff]   ;;  %v1325_v12 = vld [vmem:[%s1665_s7 + $0x54] ss:$8 sps:$4 sm:$0xff]   ;;  %v1329_v14 = vld [vmem:[%s1665_s7 + $0x50] ss:$8 sps:$4 sm:$0xff]  }
  0x5d   : > { %1000 = vmatprep.subr.bf16.mxu1 %v1315_v5  ;;  %960 = vmatpush1.bf16.msra.mxu0 %v1317_v6  ;;  %v1324_v11 = vld [vmem:[%s1665_s7 + $0x160] ss:$8 sps:$4 sm:$0xff]   ;;  %v1327_v13 = vld [vmem:[%s1665_s7 + $0x154] ss:$8 sps:$4 sm:$0xff]   ;;  %v1330_v15 = vld [vmem:[%s1665_s7 + $0x150] ss:$8 sps:$4 sm:$0xff]   ;;  %v1202_v6 = vcombine.low %v1654_v0, %v1654_v0 }
  0x5e   : > { %1001 = vmatpush1.bf16.msra.mxu1 %v1318_v7  ;;  %961 = vmatprep.subr.bf16.mxu0 %v1319_v8  ;;  %v1331_v16 = vld [vmem:[%s1665_s7 + $0x44] ss:$8 sps:$4 sm:$0xff]   ;;  %v1335_v18 = vld [vmem:[%s1665_s7 + $0x40] ss:$8 sps:$4 sm:$0xff]   ;;  %v1337_v20 = vld [vmem:[%s1665_s7 + $0x34] ss:$8 sps:$4 sm:$0xff]   ;;  %v1204_v7 = vcombine.low %v1659_v1, %v1659_v1  ;;  %v1052_v8 = vlaneseq }
  0x5f   : > { %1002 = vmatprep.subr.bf16.mxu1 %v1321_v9  ;;  %v1333_v17 = vld [vmem:[%s1665_s7 + $0x144] ss:$8 sps:$4 sm:$0xff]   ;;  %v1336_v19 = vld [vmem:[%s1665_s7 + $0x140] ss:$8 sps:$4 sm:$0xff]   ;;  %v1339_v21 = vld [vmem:[%s1665_s7 + $0x134] ss:$8 sps:$4 sm:$0xff]  }
  0x60   : > { %v1341_v22 = vld [vmem:[%s1665_s7 + $0x30] ss:$8 sps:$4 sm:$0xff]   ;;  %v1343_v24 = vld [vmem:[%s1665_s7 + $0x24] ss:$8 sps:$4 sm:$0xff]   ;;  %v1347_v26 = vld [vmem:[%s1665_s7 + $0x20] ss:$8 sps:$4 sm:$0xff]  }
  0x61   : > { %962 = vmatpush1.bf16.msra.mxu0 %v1323_v10  ;;  %v1342_v23 = vld [vmem:[%s1665_s7 + $0x130] ss:$8 sps:$4 sm:$0xff]   ;;  %v1345_v25 = vld [vmem:[%s1665_s7 + $0x124] ss:$8 sps:$4 sm:$0xff]   ;;  %v1348_v27 = vld [vmem:[%s1665_s7 + $0x120] ss:$8 sps:$4 sm:$0xff]  }
  0x62   : > { %1003 = vmatpush1.bf16.msra.mxu1 %v1324_v11  ;;  %963 = vmatprep.subr.bf16.mxu0 %v1325_v12  ;;  %v1349_v28 = vld [vmem:[%s1665_s7 + $0x14] ss:$8 sps:$4 sm:$0xff]   ;;  %v1353_v30 = vld [vmem:[%s1665_s7 + $0x10] ss:$8 sps:$4 sm:$0xff]   ;;  %v1355_v32 = vld [vmem:[%s1665_s7 + $0x4] ss:$8 sps:$4 sm:$0xff]  }
  0x63   : > { %1004 = vmatprep.subr.bf16.mxu1 %v1327_v13  ;;  %v1351_v29 = vld [vmem:[%s1665_s7 + $0x114] ss:$8 sps:$4 sm:$0xff]   ;;  %v1354_v31 = vld [vmem:[%s1665_s7 + $0x110] ss:$8 sps:$4 sm:$0xff]   ;;  %v1357_v33 = vld [vmem:[%s1665_s7 + $0x104] ss:$8 sps:$4 sm:$0xff]  }
  0x64   : > { %v1359_v34 = vld [vmem:[%s1665_s7] ss:$8 sps:$4 sm:$0xff]   ;;  %v1361_v36 = vld [vmem:[%s1665_s7 + $0xf4] ss:$8 sps:$4 sm:$0xff]   ;;  %v1365_v38 = vld [vmem:[%s1665_s7 + $0xf0] ss:$8 sps:$4 sm:$0xff]  }
  0x65   : > { %964 = vmatpush1.bf16.msra.mxu0 %v1329_v14  ;;  %v1360_v35 = vld [vmem:[%s1665_s7 + $0x100] ss:$8 sps:$4 sm:$0xff]   ;;  %v1363_v37 = vld [vmem:[%s1665_s7 + $0x1f4] ss:$8 sps:$4 sm:$0xff]   ;;  %v1366_v39 = vld [vmem:[%s1665_s7 + $0x1f0] ss:$8 sps:$4 sm:$0xff]  }
  0x66   : > { %1005 = vmatpush1.bf16.msra.mxu1 %v1330_v15  ;;  %965 = vmatprep.subr.bf16.mxu0 %v1331_v16  ;;  %v1367_v40 = vld [vmem:[%s1665_s7 + $0xe4] ss:$8 sps:$4 sm:$0xff]   ;;  %v1371_v42 = vld [vmem:[%s1665_s7 + $0xe0] ss:$8 sps:$4 sm:$0xff]   ;;  %v1373_v44 = vld [vmem:[%s1665_s7 + $0xd4] ss:$8 sps:$4 sm:$0xff]  }
  0x67   : > { %1006 = vmatprep.subr.bf16.mxu1 %v1333_v17  ;;  %v1369_v41 = vld [vmem:[%s1665_s7 + $0x1e4] ss:$8 sps:$4 sm:$0xff]   ;;  %v1372_v43 = vld [vmem:[%s1665_s7 + $0x1e0] ss:$8 sps:$4 sm:$0xff]   ;;  %v1375_v45 = vld [vmem:[%s1665_s7 + $0x1d4] ss:$8 sps:$4 sm:$0xff]  }
  0x68   : > { %v1377_v46 = vld [vmem:[%s1665_s7 + $0xd0] ss:$8 sps:$4 sm:$0xff]   ;;  %v1379_v48 = vld [vmem:[%s1665_s7 + $0xc4] ss:$8 sps:$4 sm:$0xff]   ;;  %v1383_v50 = vld [vmem:[%s1665_s7 + $0xc0] ss:$8 sps:$4 sm:$0xff]  }
  0x69   : > { %966 = vmatpush1.bf16.msra.mxu0 %v1335_v18  ;;  %v1378_v47 = vld [vmem:[%s1665_s7 + $0x1d0] ss:$8 sps:$4 sm:$0xff]   ;;  %v1381_v49 = vld [vmem:[%s1665_s7 + $0x1c4] ss:$8 sps:$4 sm:$0xff]   ;;  %v1384_v51 = vld [vmem:[%s1665_s7 + $0x1c0] ss:$8 sps:$4 sm:$0xff]  }
  0x6a   : > { %1007 = vmatpush1.bf16.msra.mxu1 %v1336_v19  ;;  %967 = vmatprep.subr.bf16.mxu0 %v1337_v20  ;;  %v1385_v52 = vld [vmem:[%s1665_s7 + $0xb4] ss:$8 sps:$4 sm:$0xff]   ;;  %v1389_v54 = vld [vmem:[%s1665_s7 + $0xb0] ss:$8 sps:$4 sm:$0xff]   ;;  %v1391_v56 = vld [vmem:[%s1665_s7 + $0xa4] ss:$8 sps:$4 sm:$0xff]  }
  0x6b   : > { %1008 = vmatprep.subr.bf16.mxu1 %v1339_v21  ;;  %v1387_v53 = vld [vmem:[%s1665_s7 + $0x1b4] ss:$8 sps:$4 sm:$0xff]   ;;  %v1390_v55 = vld [vmem:[%s1665_s7 + $0x1b0] ss:$8 sps:$4 sm:$0xff]   ;;  %v1393_v57 = vld [vmem:[%s1665_s7 + $0x1a4] ss:$8 sps:$4 sm:$0xff]  }
  0x6c   : > { %v1395_v58 = vld [vmem:[%s1665_s7 + $0xa0] ss:$8 sps:$4 sm:$0xff]   ;;  %v1397_v60 = vld [vmem:[%s1665_s7 + $0x94] ss:$8 sps:$4 sm:$0xff]   ;;  %v1401_v62 = vld [vmem:[%s1665_s7 + $0x90] ss:$8 sps:$4 sm:$0xff]  }
  0x6d   : > { %968 = vmatpush1.bf16.msra.mxu0 %v1341_v22  ;;  %v1396_v59 = vld [vmem:[%s1665_s7 + $0x1a0] ss:$8 sps:$4 sm:$0xff]   ;;  %v1399_v61 = vld [vmem:[%s1665_s7 + $0x194] ss:$8 sps:$4 sm:$0xff]   ;;  %v1402_v63 = vld [vmem:[%s1665_s7 + $0x190] ss:$8 sps:$4 sm:$0xff]  }
  0x6e   : > { %1009 = vmatpush1.bf16.msra.mxu1 %v1342_v23  ;;  %969 = vmatprep.subr.bf16.mxu0 %v1343_v24  ;;  %v1403_v2 = vld [vmem:[%s1665_s7 + $0x84] ss:$8 sps:$4 sm:$0xff]   ;;  %v1407_v4 = vld [vmem:[%s1665_s7 + $0x80] ss:$8 sps:$4 sm:$0xff]   ;;  %v1053_v9 = vshrl.u32 %v1052_v8, 7  ;;  %s1201_s12 = sshll.u32 %s1768_s8, 3 }
  0x6f   : > { %1010 = vmatprep.subr.bf16.mxu1 %v1345_v25  ;;  %v1405_v3 = vld [vmem:[%s1665_s7 + $0x184] ss:$8 sps:$4 sm:$0xff]   ;;  %v1408_v5 = vld [vmem:[%s1665_s7 + $0x180] ss:$8 sps:$4 sm:$0xff]   ;;  %v1050_v11 = vld [vmem:[%s539_s11] sm:$0x3]  ;;  %s549_s14 = scalar_lea.vmem %s1760_s3, %s1201_s12 }
  0x70   : > { %v1054_v10 = vsub.s32 0, %v1053_v9  ;;  %v1058_v12 = vsub.s32 1, %v1053_v9 }
  0x71   : > { %970 = vmatpush1.bf16.msra.mxu0 %v1347_v26 }
  0x72   : > { %1011 = vmatpush1.bf16.msra.mxu1 %v1348_v27  ;;  %971 = vmatprep.subr.bf16.mxu0 %v1349_v28  ;;  %v1055_v0 = vrot.slane %v1050_v11, %v1054_v10  ;;  %v1059_v15 = vrot.slane %v1050_v11, %v1058_v12 }
  0x73   : > { %1012 = vmatprep.subr.bf16.mxu1 %v1351_v29 }
  0x75   : > { %972 = vmatpush1.bf16.msra.mxu0 %v1353_v30 }
  0x76   : > { %1013 = vmatpush1.bf16.msra.mxu1 %v1354_v31  ;;  %973 = vmatprep.subr.bf16.mxu0 %v1355_v32 }
  0x77   : > { %1014 = vmatprep.subr.bf16.mxu1 %v1357_v33 }
  0x79   : > { %974 = vmatpush1.bf16.msra.mxu0 %v1359_v34 }
  0x7a   : > { %1015 = vmatpush1.bf16.msra.mxu1 %v1360_v35  ;;  %975 = vmatprep.subr.bf16.mxu0 %v1361_v36 }
  0x7b   : > { %1016 = vmatprep.subr.bf16.mxu1 %v1363_v37 }
  0x7d   : > { %976 = vmatpush2.bf16.msra.mxu0 %v1365_v38 }
  0x7e   : > { %1017 = vmatpush2.bf16.msra.mxu1 %v1366_v39  ;;  %977 = vmatprep.subr.bf16.mxu0 %v1367_v40 }
  0x7f   : > { %1018 = vmatprep.subr.bf16.mxu1 %v1369_v41 }
  0x81   : > { %978 = vmatpush2.bf16.msra.mxu0 %v1371_v42 }
  0x82   : > { %1019 = vmatpush2.bf16.msra.mxu1 %v1372_v43  ;;  %979 = vmatprep.subr.bf16.mxu0 %v1373_v44 }
  0x83   : > { %1020 = vmatprep.subr.bf16.mxu1 %v1375_v45 }
  0x85   : > { %980 = vmatpush2.bf16.msra.mxu0 %v1377_v46 }
  0x86   : > { %1021 = vmatpush2.bf16.msra.mxu1 %v1378_v47  ;;  %981 = vmatprep.subr.bf16.mxu0 %v1379_v48 }
  0x87   : > { %1022 = vmatprep.subr.bf16.mxu1 %v1381_v49 }
  0x89   : > { %982 = vmatpush2.bf16.msra.mxu0 %v1383_v50 }
  0x8a   : > { %1023 = vmatpush2.bf16.msra.mxu1 %v1384_v51  ;;  %983 = vmatprep.subr.bf16.mxu0 %v1385_v52 }
  0x8b   : > { %1024 = vmatprep.subr.bf16.mxu1 %v1387_v53 }
  0x8d   : > { %984 = vmatpush2.bf16.msra.mxu0 %v1389_v54 }
  0x8e   : > { %1025 = vmatpush2.bf16.msra.mxu1 %v1390_v55  ;;  %985 = vmatprep.subr.bf16.mxu0 %v1391_v56 }
  0x8f   : > { %1026 = vmatprep.subr.bf16.mxu1 %v1393_v57 }
  0x91   : > { %986 = vmatpush2.bf16.msra.mxu0 %v1395_v58 }
  0x92   : > { %1027 = vmatpush2.bf16.msra.mxu1 %v1396_v59  ;;  %987 = vmatprep.subr.bf16.mxu0 %v1397_v60 }
  0x93   : > { %1028 = vmatprep.subr.bf16.mxu1 %v1399_v61 }
  0x95   : > { %988 = vmatpush2.bf16.msra.mxu0 %v1401_v62 }
  0x96   : > { %1029 = vmatpush2.bf16.msra.mxu1 %v1402_v63  ;;  %989 = vmatprep.subr.bf16.mxu0 %v1403_v2 }
  0x97   : > { %1030 = vmatprep.subr.bf16.mxu1 %v1405_v3 }
  0x99   : > { %990 = vmatpush2.bf16.msra.mxu0 %v1407_v4 }
  0x9a   : > { %1031 = vmatpush2.bf16.msra.mxu1 %v1408_v5 }
  0x9c   : > { %992 = vmatmul.mubr.bf16.vlgmr.msra.gmra.mxu0 %v1202_v6 }
  0x9d   : > { %1033 = vmatmul.mubr.bf16.vlgmr.msra.gmra.mxu1 %v1204_v7 }
 0x15c   : > { %v993_v13 = vpop.f32.mrf.mxu0 }
 0x15d   : > { %v1034_v1 = vpop.f32.mrf.mxu1 }
 0x15e   : > { %v1035_v14 = vadd.f32 %v1034_v1, %v993_v13  ;;  %v995_v16 = vpop.f32.mrf.mxu0 }
 0x15f   : > { %v1036_v17 = vpop.f32.mrf.mxu1 }
 0x160   : > { %v1062_v18 = vadd.f32 %v1055_v0, %v1035_v14  ;;  %v1037_v19 = vadd.f32 %v1036_v17, %v995_v16  ;;  %v997_v20 = vpop.f32.mrf.mxu0 }
 0x161   : > { %v1038_v21 = vpop.f32.mrf.mxu1 }
 0x162   : > { %1064 = vst [vmem:[%s549_s14] sm:$0xff] %v1062_v18  ;;  %v1063_v22 = vadd.f32 %v1059_v15, %v1037_v19  ;;  %v998_v23 = vpop.f32.mrf.mxu0 }
 0x163   : > { %v1039_v24 = vpop.f32.mrf.mxu1 }
 0x164   : > { %1065 = vst [vmem:[%s549_s14 + $0x8] sm:$0xff] %v1063_v22 }
 0x165 PF: > { %s13_s16 = sadd.s32 1, %s1451_s16   ;;  %s1761_s12 = smov %s1439_s13 }
 0x166   : > { %p10_p10 = scmp.ge.s32.totalorder %s13_s16, 6   ;;  %s1762_s13 = smov %s1508_s20 }
 0x167   : > { %s1763_s14 = smov %s1447_s15  ;;  %s1764_s15 = smov %s1766_s17 }
 0x168   :  { %12 = sbr.rel (!%p10_p10) target bundleno = 3 (0x3), region = 119 }

// kernel: cnn_res3_forward.75
= control target key start
LH: loop header
LB: loop body
LE: loop exit
PB: predicated region body
PF: predicated region fallthrough
CT: control target
= control target key end

     0   :  { %s1114_s15 = smov 0   ;;  %s1116_s16 = smov 0   ;;  %s1296_s0 = inlined_call_operand.vmem [shape: bf16[8,256], index: 0, kind: input, shape index: {}]   ;;  %s1297_s1 = inlined_call_operand.vmem [shape: bf16[256,1024], index: 1, kind: input, shape index: {}]   ;;  %s1298_s2 = inlined_call_operand.vmem [shape: f32[1,1024], index: 2, kind: input, shape index: {}]   ;;  %s1299_s3 = inlined_call_operand.vmem [shape: f32[8,1024], index: 3, kind: input, shape index: {}]   ;;  %s1300_s4 = inlined_call_operand.vmem [shape: f32[8,1024], index: 4, kind: output, shape index: {}]  }
   0x1   :  { %s1118_s17 = smov 0   ;;  %s1120_s18 = smov 0  }
   0x2   :  { %s1122_s19 = smov 0  }
   0x3 LB: > { %s29_s20 = sadd.s32 1, %s1083_s18  ;;  %p77_p1 = scmp.ne.s32.totalorder %s1075_s16, %s1071_s15  ;;  %s1087_s19 = sphi %s1122_s19, %s14_s19   ;;  %s1083_s18 = sphi %s1120_s18, %s1304_s18   ;;  %s1079_s17 = sphi %s1118_s17, %s1303_s17   ;;  %s1075_s16 = sphi %s1116_s16, %s1302_s16   ;;  %s1071_s15 = sphi %s1114_s15, %s1301_s15  }
   0x4   : > { %p31_p0 = scmp.ge.s32.totalorder %s29_s20, 4  ;;  %p78_p2 = scmp.eq.s32.totalorder %s1087_s19, 0 }
   0x5   : > { %s70_s22 = sadd.s32 1, %s1075_s16  ;;  %p911_p5 = scmp.ge.s32.totalorder %s1087_s19, 4 }
   0x6   : > { %s1306_s20 = smov (%p31_p0, %s29_s20), 0  ;;  %p79_p3 = por %p78_p2, %p77_p1 }
   0x7   : > { %s66_s21 = ssub.s32 %s1083_s18, %s1306_s20  ;;  %198 = sbr.rel (%p911_p5) target bundleno = 48 (0x30), region = 20 }
   0x8   : > { %p68_p4 = scmp.eq.s32.totalorder %s66_s21, 0 }
   0xa   : > { %s1149_s23 = scalar_select %p68_p4, %s1075_s16, %s70_s22  }
   0xc   : > { %201 = sbr.rel (!%p79_p3) target bundleno = 48 (0x30), region = 24  ;;  %s203_s24 = sand.u32 (%p79_p3), 1, %s1075_s16  }
   0xd   : > { %s958_s25 = sshll.u32 (%p79_p3), %s1083_s18, 3  ;;  %s912_s26 = sshll.u32 (%p79_p3), %s203_s24, 8 }
   0xe   : > { %s1157_s29 = scalar_lea.vmem (%p79_p3), %s1297_s1, %s958_s25  ;;  %s1162_s30 = scalar_lea.vmem (%p79_p3), [#allocation3], %s912_s26 }
   0xf   : > { %v302_v0 = vld [vmem:[%s1157_s29] sm:$0xff] (%p79_p3) }
  0x10   : > { %v304_v1 = vld [vmem:[%s1157_s29 + $0x20] sm:$0xff] (%p79_p3)  ;;  %303 = vst [vmem:[%s1162_s30] sm:$0xff] (%p79_p3), %v302_v0 }
  0x11   : > { %v306_v2 = vld [vmem:[%s1157_s29 + $0x40] sm:$0xff]  ;;  %305 = vst [vmem:[%s1162_s30 + $0x8] sm:$0xff] %v304_v1 }
  0x12   : > { %307 = vst [vmem:[%s1162_s30 + $0x10] sm:$0xff] %v306_v2  ;;  %v308_v3 = vld [vmem:[%s1157_s29 + $0x60] sm:$0xff] }
  0x13   : > { %v310_v4 = vld [vmem:[%s1157_s29 + $0x80] sm:$0xff]  ;;  %309 = vst [vmem:[%s1162_s30 + $0x18] sm:$0xff] %v308_v3 }
  0x14   : > { %v312_v5 = vld [vmem:[%s1157_s29 + $0xa0] sm:$0xff]  ;;  %311 = vst [vmem:[%s1162_s30 + $0x20] sm:$0xff] %v310_v4 }
  0x15   : > { %313 = vst [vmem:[%s1162_s30 + $0x28] sm:$0xff] %v312_v5  ;;  %v314_v6 = vld [vmem:[%s1157_s29 + $0xc0] sm:$0xff] }
  0x16   : > { %v316_v7 = vld [vmem:[%s1157_s29 + $0xe0] sm:$0xff]  ;;  %315 = vst [vmem:[%s1162_s30 + $0x30] sm:$0xff] %v314_v6 }
  0x17   : > { %v318_v8 = vld [vmem:[%s1157_s29 + $0x100] sm:$0xff]  ;;  %317 = vst [vmem:[%s1162_s30 + $0x38] sm:$0xff] %v316_v7 }
  0x18   : > { %319 = vst [vmem:[%s1162_s30 + $0x40] sm:$0xff] %v318_v8  ;;  %v320_v9 = vld [vmem:[%s1157_s29 + $0x120] sm:$0xff] }
  0x19   : > { %v322_v10 = vld [vmem:[%s1157_s29 + $0x140] sm:$0xff]  ;;  %321 = vst [vmem:[%s1162_s30 + $0x48] sm:$0xff] %v320_v9 }
  0x1a   : > { %v324_v11 = vld [vmem:[%s1157_s29 + $0x160] sm:$0xff]  ;;  %323 = vst [vmem:[%s1162_s30 + $0x50] sm:$0xff] %v322_v10 }
  0x1b   : > { %325 = vst [vmem:[%s1162_s30 + $0x58] sm:$0xff] %v324_v11  ;;  %v326_v12 = vld [vmem:[%s1157_s29 + $0x180] sm:$0xff] }
  0x1c   : > { %v328_v13 = vld [vmem:[%s1157_s29 + $0x1a0] sm:$0xff]  ;;  %327 = vst [vmem:[%s1162_s30 + $0x60] sm:$0xff] %v326_v12 }
  0x1d   : > { %v330_v14 = vld [vmem:[%s1157_s29 + $0x1c0] sm:$0xff]  ;;  %329 = vst [vmem:[%s1162_s30 + $0x68] sm:$0xff] %v328_v13 }
  0x1e   : > { %331 = vst [vmem:[%s1162_s30 + $0x70] sm:$0xff] %v330_v14  ;;  %v332_v15 = vld [vmem:[%s1157_s29 + $0x1e0] sm:$0xff] }
  0x1f   : > { %v334_v16 = vld [vmem:[%s1157_s29 + $0x200] sm:$0xff]  ;;  %333 = vst [vmem:[%s1162_s30 + $0x78] sm:$0xff] %v332_v15 }
  0x20   : > { %v336_v17 = vld [vmem:[%s1157_s29 + $0x220] sm:$0xff]  ;;  %335 = vst [vmem:[%s1162_s30 + $0x80] sm:$0xff] %v334_v16 }
  0x21   : > { %337 = vst [vmem:[%s1162_s30 + $0x88] sm:$0xff] %v336_v17  ;;  %v338_v18 = vld [vmem:[%s1157_s29 + $0x240] sm:$0xff] }
  0x22   : > { %v340_v19 = vld [vmem:[%s1157_s29 + $0x260] sm:$0xff]  ;;  %339 = vst [vmem:[%s1162_s30 + $0x90] sm:$0xff] %v338_v18 }
  0x23   : > { %v342_v20 = vld [vmem:[%s1157_s29 + $0x280] sm:$0xff]  ;;  %341 = vst [vmem:[%s1162_s30 + $0x98] sm:$0xff] %v340_v19 }
  0x24   : > { %343 = vst [vmem:[%s1162_s30 + $0xa0] sm:$0xff] %v342_v20  ;;  %v344_v21 = vld [vmem:[%s1157_s29 + $0x2a0] sm:$0xff] }
  0x25   : > { %v346_v22 = vld [vmem:[%s1157_s29 + $0x2c0] sm:$0xff]  ;;  %345 = vst [vmem:[%s1162_s30 + $0xa8] sm:$0xff] %v344_v21 }
  0x26   : > { %v348_v23 = vld [vmem:[%s1157_s29 + $0x2e0] sm:$0xff]  ;;  %347 = vst [vmem:[%s1162_s30 + $0xb0] sm:$0xff] %v346_v22 }
  0x27   : > { %349 = vst [vmem:[%s1162_s30 + $0xb8] sm:$0xff] %v348_v23  ;;  %v350_v24 = vld [vmem:[%s1157_s29 + $0x300] sm:$0xff] }
  0x28   : > { %v352_v25 = vld [vmem:[%s1157_s29 + $0x320] sm:$0xff]  ;;  %351 = vst [vmem:[%s1162_s30 + $0xc0] sm:$0xff] %v350_v24 }
  0x29   : > { %v354_v26 = vld [vmem:[%s1157_s29 + $0x340] sm:$0xff]  ;;  %353 = vst [vmem:[%s1162_s30 + $0xc8] sm:$0xff] %v352_v25 }
  0x2a   : > { %355 = vst [vmem:[%s1162_s30 + $0xd0] sm:$0xff] %v354_v26  ;;  %v356_v27 = vld [vmem:[%s1157_s29 + $0x360] sm:$0xff] }
  0x2b   : > { %v358_v28 = vld [vmem:[%s1157_s29 + $0x380] sm:$0xff]  ;;  %357 = vst [vmem:[%s1162_s30 + $0xd8] sm:$0xff] %v356_v27 }
  0x2c   : > { %v360_v29 = vld [vmem:[%s1157_s29 + $0x3a0] sm:$0xff]  ;;  %359 = vst [vmem:[%s1162_s30 + $0xe0] sm:$0xff] %v358_v28 }
  0x2d   : > { %361 = vst [vmem:[%s1162_s30 + $0xe8] sm:$0xff] %v360_v29  ;;  %v362_v30 = vld [vmem:[%s1157_s29 + $0x3c0] sm:$0xff] }
  0x2e   : > { %v364_v31 = vld [vmem:[%s1157_s29 + $0x3e0] sm:$0xff]  ;;  %363 = vst [vmem:[%s1162_s30 + $0xf0] sm:$0xff] %v362_v30 }
  0x2f   : > { %365 = vst [vmem:[%s1162_s30 + $0xf8] sm:$0xff] %v364_v31 }
  0x30 PF: > { %p915_p6 = scmp.ge.s32.totalorder %s1087_s19, 1  ;;  %p391_p7 = scmp.lt.s32.totalorder %s1087_s19, 5 }
  0x32   : > { %p392_p8 = pnand %p915_p6, %p391_p7 }
  0x33   : > { %s398_s5 = sand.u32 (!%p392_p8), 1, %s1071_s15   ;;  %s917_s10 = sshll.u32 (!%p392_p8), %s1079_s17, 1 }
  0x34   : > { %395 = sbr.rel (%p392_p8) target bundleno = 325 (0x145), region = 70  ;;  %s916_s8 = sshll.u32 (!%p392_p8), %s398_s5, 8 }
  0x35   : > { %s1235_s9 = scalar_lea.vmem (!%p392_p8), [#allocation3], %s916_s8  ;;  %p462_p9 = scmp.lt.s32.totalorder (!%p392_p8), %s917_s10, 7 }
  0x39   : > { %v1231_v32 = vld [vmem:[%s1296_s0] sm:$0xff]  ;;  %v1002_v36 = vld [vmem:[%s1235_s9 + $0x64] ss:$8 sps:$4 sm:$0xff]   ;;  %v1004_v37 = vld [vmem:[%s1235_s9 + $0x60] ss:$8 sps:$4 sm:$0xff]   ;;  %v746_v3 = vlaneseq  ;;  %s1308_s10 = smov (!%p462_p9, %s917_s10), 7 }
  0x3a   : > { %v923_v33 = vcombine.high %v1231_v32, %v1231_v32  ;;  %v999_v34 = vld [vmem:[%s1235_s9 + $0x74] ss:$8 sps:$4 sm:$0xff]   ;;  %v1001_v35 = vld [vmem:[%s1235_s9 + $0x70] ss:$8 sps:$4 sm:$0xff]   ;;  %v1008_v40 = vld [vmem:[%s1235_s9 + $0x44] ss:$8 sps:$4 sm:$0xff]   ;;  %v922_v2 = vcombine.low %v1231_v32, %v1231_v32  ;;  %s464_s13 = scalar_lea.vmem %s1298_s2, %s1308_s10 }
  0x3b   : > { %694 = vmatprep.subr.bf16.mxu0 %v999_v34  ;;  %v1005_v38 = vld [vmem:[%s1235_s9 + $0x54] ss:$8 sps:$4 sm:$0xff]   ;;  %v1007_v39 = vld [vmem:[%s1235_s9 + $0x50] ss:$8 sps:$4 sm:$0xff]   ;;  %v1010_v41 = vld [vmem:[%s1235_s9 + $0x40] ss:$8 sps:$4 sm:$0xff]  }
  0x3c   : > { %726 = vmatprep.mubr.bf16.mxu0 %v923_v33  ;;  %695 = vmatpush1.bf16.msra.mxu0 %v1001_v35  ;;  %v1011_v42 = vld [vmem:[%s1235_s9 + $0x34] ss:$8 sps:$4 sm:$0xff]   ;;  %v1013_v43 = vld [vmem:[%s1235_s9 + $0x30] ss:$8 sps:$4 sm:$0xff]   ;;  %v1014_v44 = vld [vmem:[%s1235_s9 + $0x24] ss:$8 sps:$4 sm:$0xff]  }
  0x3d   : > { %696 = vmatprep.subr.bf16.mxu0 %v1002_v36  ;;  %v1016_v45 = vld [vmem:[%s1235_s9 + $0x20] ss:$8 sps:$4 sm:$0xff]   ;;  %v1017_v46 = vld [vmem:[%s1235_s9 + $0x14] ss:$8 sps:$4 sm:$0xff]   ;;  %v1019_v47 = vld [vmem:[%s1235_s9 + $0x10] ss:$8 sps:$4 sm:$0xff]  }
  0x3e   : > { %v1020_v48 = vld [vmem:[%s1235_s9 + $0x4] ss:$8 sps:$4 sm:$0xff]   ;;  %v1022_v49 = vld [vmem:[%s1235_s9] ss:$8 sps:$4 sm:$0xff]   ;;  %v1023_v50 = vld [vmem:[%s1235_s9 + $0xf4] ss:$8 sps:$4 sm:$0xff]  }
  0x3f   : > { %v1025_v51 = vld [vmem:[%s1235_s9 + $0xf0] ss:$8 sps:$4 sm:$0xff]   ;;  %v1026_v52 = vld [vmem:[%s1235_s9 + $0xe4] ss:$8 sps:$4 sm:$0xff]   ;;  %v1028_v53 = vld [vmem:[%s1235_s9 + $0xe0] ss:$8 sps:$4 sm:$0xff]  }
  0x40   : > { %697 = vmatpush1.bf16.msra.mxu0 %v1004_v37  ;;  %v1029_v54 = vld [vmem:[%s1235_s9 + $0xd4] ss:$8 sps:$4 sm:$0xff]   ;;  %v1031_v55 = vld [vmem:[%s1235_s9 + $0xd0] ss:$8 sps:$4 sm:$0xff]   ;;  %v1032_v56 = vld [vmem:[%s1235_s9 + $0xc4] ss:$8 sps:$4 sm:$0xff]  }
  0x41   : > { %698 = vmatprep.subr.bf16.mxu0 %v1005_v38  ;;  %v1034_v57 = vld [vmem:[%s1235_s9 + $0xc0] ss:$8 sps:$4 sm:$0xff]   ;;  %v1035_v58 = vld [vmem:[%s1235_s9 + $0xb4] ss:$8 sps:$4 sm:$0xff]   ;;  %v1037_v59 = vld [vmem:[%s1235_s9 + $0xb0] ss:$8 sps:$4 sm:$0xff]  }
  0x42   : > { %v1038_v60 = vld [vmem:[%s1235_s9 + $0xa4] ss:$8 sps:$4 sm:$0xff]   ;;  %v1040_v61 = vld [vmem:[%s1235_s9 + $0xa0] ss:$8 sps:$4 sm:$0xff]   ;;  %v1041_v62 = vld [vmem:[%s1235_s9 + $0x94] ss:$8 sps:$4 sm:$0xff]  }
  0x43   : > { %v1043_v63 = vld [vmem:[%s1235_s9 + $0x90] ss:$8 sps:$4 sm:$0xff]   ;;  %v1044_v0 = vld [vmem:[%s1235_s9 + $0x84] ss:$8 sps:$4 sm:$0xff]   ;;  %v1046_v1 = vld [vmem:[%s1235_s9 + $0x80] ss:$8 sps:$4 sm:$0xff]  }
  0x44   : > { %699 = vmatpush1.bf16.msra.mxu0 %v1007_v39  ;;  %v747_v4 = vshrl.u32 %v746_v3, 7  ;;  %s919_s14 = sshll.u32 %s1308_s10, 3  ;;  %v744_v6 = vld [vmem:[%s464_s13] sm:$0x3] }
  0x45   : > { %700 = vmatprep.subr.bf16.mxu0 %v1008_v40  ;;  %s474_s22 = scalar_lea.vmem %s1299_s3, %s919_s14  ;;  %s484_s25 = scalar_lea.vmem %s1300_s4, %s919_s14 }
  0x46   : > { %v748_v5 = vsub.s32 0, %v747_v4  ;;  %v752_v7 = vsub.s32 1, %v747_v4  ;;  %v758_v11 = vld [vmem:[%s474_s22] sm:$0xff]  ;;  %v759_v14 = vld [vmem:[%s474_s22 + $0x8] sm:$0xff] }
  0x48   : > { %701 = vmatpush1.bf16.msra.mxu0 %v1010_v41  ;;  %v749_v8 = vrot.slane %v744_v6, %v748_v5  ;;  %v753_v9 = vrot.slane %v744_v6, %v752_v7 }
  0x49   : > { %702 = vmatprep.subr.bf16.mxu0 %v1011_v42 }
  0x4c   : > { %703 = vmatpush1.bf16.msra.mxu0 %v1013_v43 }
  0x4d   : > { %704 = vmatprep.subr.bf16.mxu0 %v1014_v44 }
  0x50   : > { %705 = vmatpush1.bf16.msra.mxu0 %v1016_v45 }
  0x51   : > { %706 = vmatprep.subr.bf16.mxu0 %v1017_v46 }
  0x54   : > { %707 = vmatpush1.bf16.msra.mxu0 %v1019_v47 }
  0x55   : > { %708 = vmatprep.subr.bf16.mxu0 %v1020_v48 }
  0x58   : > { %709 = vmatpush1.bf16.msra.mxu0 %v1022_v49 }
  0x59   : > { %710 = vmatprep.subr.bf16.mxu0 %v1023_v50 }
  0x5c   : > { %711 = vmatpush2.bf16.msra.mxu0 %v1025_v51 }
  0x5d   : > { %712 = vmatprep.subr.bf16.mxu0 %v1026_v52 }
  0x60   : > { %713 = vmatpush2.bf16.msra.mxu0 %v1028_v53 }
  0x61   : > { %714 = vmatprep.subr.bf16.mxu0 %v1029_v54 }
  0x64   : > { %715 = vmatpush2.bf16.msra.mxu0 %v1031_v55 }
  0x65   : > { %716 = vmatprep.subr.bf16.mxu0 %v1032_v56 }
  0x68   : > { %717 = vmatpush2.bf16.msra.mxu0 %v1034_v57 }
  0x69   : > { %718 = vmatprep.subr.bf16.mxu0 %v1035_v58 }
  0x6c   : > { %719 = vmatpush2.bf16.msra.mxu0 %v1037_v59 }
  0x6d   : > { %720 = vmatprep.subr.bf16.mxu0 %v1038_v60 }
  0x70   : > { %721 = vmatpush2.bf16.msra.mxu0 %v1040_v61 }
  0x71   : > { %722 = vmatprep.subr.bf16.mxu0 %v1041_v62 }
  0x74   : > { %723 = vmatpush2.bf16.msra.mxu0 %v1043_v63 }
  0x75   : > { %724 = vmatprep.subr.bf16.mxu0 %v1044_v0 }
  0x78   : > { %725 = vmatpush2.bf16.msra.mxu0 %v1046_v1 }
  0x7b   : > { %727 = vmatmul.mubr.bf16.vlgmr.msra.gmra.mxu0 %v922_v2 }
 0x13b   : > { %v728_v10 = vpop.f32.mrf.mxu0 }
 0x13c   : > { %v756_v12 = vadd.f32 %v749_v8, %v728_v10 }
 0x13d   : > { %v730_v13 = vpop.f32.mrf.mxu0 }
 0x13e   : > { %v760_v15 = vadd.f32 %v758_v11, %v756_v12  ;;  %v757_v16 = vadd.f32 %v753_v9, %v730_v13 }
 0x13f   : > { %v732_v17 = vpop.f32.mrf.mxu0 }
 0x140   : > { %v762_v18 = vmax.f32 %v760_v15, 0.0  ;;  %v761_v19 = vadd.f32 %v759_v14, %v757_v16 }
 0x141   : > { %v733_v20 = vpop.f32.mrf.mxu0 }
 0x142   : > { %764 = vst [vmem:[%s484_s25] sm:$0xff] %v762_v18  ;;  %v763_v21 = vmax.f32 %v761_v19, 0.0 }
 0x144   : > { %765 = vst [vmem:[%s484_s25 + $0x8] sm:$0xff] %v763_v21 }
 0x145 PF: > { %s14_s19 = sadd.s32 1, %s1087_s19   ;;  %s1301_s15 = smov %s1075_s16 }
 0x146   : > { %p11_p10 = scmp.ge.s32.totalorder %s14_s19, 6   ;;  %s1302_s16 = smov %s1149_s23 }
 0x147   : > { %s1303_s17 = smov %s1083_s18  ;;  %s1304_s18 = smov %s1306_s20 }
 0x148   :  { %13 = sbr.rel (!%p11_p10) target bundleno = 3 (0x3), region = 126 }

// kernel: cnn_res3_forward.76
= control target key start
LH: loop header
LB: loop body
LE: loop exit
PB: predicated region body
PF: predicated region fallthrough
CT: control target
= control target key end

     0   :  { %s1167_s12 = smov 0   ;;  %s1169_s13 = smov 0   ;;  %s1285_s0 = inlined_call_operand.vmem [shape: bf16[8,1024], index: 0, kind: input, shape index: {}]   ;;  %s1286_s1 = inlined_call_operand.vmem [shape: bf16[1024,256], index: 1, kind: input, shape index: {}]   ;;  %s1287_s2 = inlined_call_operand.vmem [shape: f32[1,256], index: 2, kind: input, shape index: {}]   ;;  %s1288_s3 = inlined_call_operand.vmem [shape: f32[8,256], index: 3, kind: output, shape index: {}]  }
   0x1   :  { %s1171_s14 = smov 0  }
   0x2 LB: > { %s25_s15 = sadd.s32 1, %s1140_s13  ;;  %p916_p0 = scmp.ge.s32.totalorder %s1144_s14, 1  ;;  %s1144_s14 = sphi %s1171_s14, %s13_s14   ;;  %s1140_s13 = sphi %s1169_s13, %s1290_s13   ;;  %s1136_s12 = sphi %s1167_s12, %s1289_s12  }
   0x3   : > { %p26_p1 = scmp.ge.s32.totalorder %s25_s15, 2  ;;  %p194_p2 = scmp.lt.s32.totalorder %s1144_s14, 3 }
   0x5   : > { %s1292_s15 = smov (%p26_p1, %s25_s15), 0  ;;  %p195_p3 = pnand %p916_p0, %p194_p2 }
   0x6   : > { %s917_s16 = sshll.u32 (!%p195_p3), %s1136_s12, 2  ;;  %s919_s17 = sshll.u32 (!%p195_p3), %s1136_s12, 6 }
   0x7   : > { %198 = sbr.rel (%p195_p3) target bundleno = 301 (0x12d), region = 32  ;;  %p243_p4 = scmp.lt.s32.totalorder (!%p195_p3), %s917_s16, 7 }
   0x8   : > { %p252_p5 = scmp.lt.s32.totalorder (!%p195_p3), %s919_s17, 127  ;;  %p922_p6 = scmp.ne.s32.totalorder (!%p195_p3), %s1136_s12, 0 }
   0xc   : > { %s1294_s16 = smov (!%p243_p4, %s917_s16), 7  ;;  %s1296_s17 = smov (!%p252_p5, %s919_s17), 127 }
   0xd   : > { %s918_s18 = sshll.u32 %s1294_s16, 2  ;;  %s996_s22 = sshll.u32 %s1296_s17, 3 }
   0xe   : > { %s1192_s21 = scalar_lea.vmem %s1285_s0, %s918_s18  ;;  %s1197_s25 = scalar_lea.vmem %s1286_s1, %s996_s22 }
   0xf   : > { %280 = sbr.rel (%p922_p6) target bundleno = 22 (0x16), region = 36 }
  0x14   : > { %v1146_v0 = vmov 0.0  }
  0x15   : > { %281 = vst [vmem:[#allocation2] sm:$0xff] %v1146_v0  ;;  %282 = vst [vmem:[#allocation2 + $0x8] sm:$0xff] %v1146_v0 }
  0x16 PF: > { %v1022_v1 = vld [vmem:[%s1197_s25 + $0x74] ss:$8 sps:$4 sm:$0xff]   ;;  %v1026_v3 = vld [vmem:[%s1197_s25 + $0x70] ss:$8 sps:$4 sm:$0xff]   ;;  %v1028_v5 = vld [vmem:[%s1197_s25 + $0x64] ss:$8 sps:$4 sm:$0xff]  }
  0x17   : > { %v1024_v2 = vld [vmem:[%s1197_s25 + $0x174] ss:$8 sps:$4 sm:$0xff]   ;;  %685 = vmatprep.subr.bf16.mxu0 %v1022_v1  ;;  %v1027_v4 = vld [vmem:[%s1197_s25 + $0x170] ss:$8 sps:$4 sm:$0xff]   ;;  %v1030_v6 = vld [vmem:[%s1197_s25 + $0x164] ss:$8 sps:$4 sm:$0xff]  }
  0x18   : > { %726 = vmatprep.subr.bf16.mxu1 %v1024_v2  ;;  %686 = vmatpush1.bf16.msra.mxu0 %v1026_v3  ;;  %v1032_v7 = vld [vmem:[%s1197_s25 + $0x60] ss:$8 sps:$4 sm:$0xff]   ;;  %v1034_v9 = vld [vmem:[%s1197_s25 + $0x54] ss:$8 sps:$4 sm:$0xff]   ;;  %v1038_v11 = vld [vmem:[%s1197_s25 + $0x50] ss:$8 sps:$4 sm:$0xff]  }
  0x19   : > { %727 = vmatpush1.bf16.msra.mxu1 %v1027_v4  ;;  %687 = vmatprep.subr.bf16.mxu0 %v1028_v5  ;;  %v1033_v8 = vld [vmem:[%s1197_s25 + $0x160] ss:$8 sps:$4 sm:$0xff]   ;;  %v1036_v10 = vld [vmem:[%s1197_s25 + $0x154] ss:$8 sps:$4 sm:$0xff]   ;;  %v1039_v12 = vld [vmem:[%s1197_s25 + $0x150] ss:$8 sps:$4 sm:$0xff]  }
  0x1a   : > { %728 = vmatprep.subr.bf16.mxu1 %v1030_v6  ;;  %v1040_v13 = vld [vmem:[%s1197_s25 + $0x44] ss:$8 sps:$4 sm:$0xff]   ;;  %v1044_v15 = vld [vmem:[%s1197_s25 + $0x40] ss:$8 sps:$4 sm:$0xff]   ;;  %v1046_v17 = vld [vmem:[%s1197_s25 + $0x34] ss:$8 sps:$4 sm:$0xff]  }
  0x1b   : > { %v1042_v14 = vld [vmem:[%s1197_s25 + $0x144] ss:$8 sps:$4 sm:$0xff]   ;;  %v1045_v16 = vld [vmem:[%s1197_s25 + $0x140] ss:$8 sps:$4 sm:$0xff]   ;;  %v1048_v18 = vld [vmem:[%s1197_s25 + $0x134] ss:$8 sps:$4 sm:$0xff]  }
  0x1c   : > { %688 = vmatpush1.bf16.msra.mxu0 %v1032_v7  ;;  %v1050_v19 = vld [vmem:[%s1197_s25 + $0x30] ss:$8 sps:$4 sm:$0xff]   ;;  %v1052_v21 = vld [vmem:[%s1197_s25 + $0x24] ss:$8 sps:$4 sm:$0xff]   ;;  %v1056_v23 = vld [vmem:[%s1197_s25 + $0x20] ss:$8 sps:$4 sm:$0xff]  }
  0x1d   : > { %729 = vmatpush1.bf16.msra.mxu1 %v1033_v8  ;;  %689 = vmatprep.subr.bf16.mxu0 %v1034_v9  ;;  %v1051_v20 = vld [vmem:[%s1197_s25 + $0x130] ss:$8 sps:$4 sm:$0xff]   ;;  %v1054_v22 = vld [vmem:[%s1197_s25 + $0x124] ss:$8 sps:$4 sm:$0xff]   ;;  %v1057_v24 = vld [vmem:[%s1197_s25 + $0x120] ss:$8 sps:$4 sm:$0xff]  }
  0x1e   : > { %730 = vmatprep.subr.bf16.mxu1 %v1036_v10  ;;  %v1058_v25 = vld [vmem:[%s1197_s25 + $0x14] ss:$8 sps:$4 sm:$0xff]   ;;  %v1062_v27 = vld [vmem:[%s1197_s25 + $0x10] ss:$8 sps:$4 sm:$0xff]   ;;  %v1064_v29 = vld [vmem:[%s1197_s25 + $0x4] ss:$8 sps:$4 sm:$0xff]  }
  0x1f   : > { %v1060_v26 = vld [vmem:[%s1197_s25 + $0x114] ss:$8 sps:$4 sm:$0xff]   ;;  %v1063_v28 = vld [vmem:[%s1197_s25 + $0x110] ss:$8 sps:$4 sm:$0xff]   ;;  %v1066_v30 = vld [vmem:[%s1197_s25 + $0x104] ss:$8 sps:$4 sm:$0xff]  }
  0x20   : > { %690 = vmatpush1.bf16.msra.mxu0 %v1038_v11  ;;  %v1068_v31 = vld [vmem:[%s1197_s25] ss:$8 sps:$4 sm:$0xff]   ;;  %v1070_v33 = vld [vmem:[%s1197_s25 + $0xf4] ss:$8 sps:$4 sm:$0xff]   ;;  %v1074_v35 = vld [vmem:[%s1197_s25 + $0xf0] ss:$8 sps:$4 sm:$0xff]  }
  0x21   : > { %731 = vmatpush1.bf16.msra.mxu1 %v1039_v12  ;;  %691 = vmatprep.subr.bf16.mxu0 %v1040_v13  ;;  %v1069_v32 = vld [vmem:[%s1197_s25 + $0x100] ss:$8 sps:$4 sm:$0xff]   ;;  %v1072_v34 = vld [vmem:[%s1197_s25 + $0x1f4] ss:$8 sps:$4 sm:$0xff]   ;;  %v1075_v36 = vld [vmem:[%s1197_s25 + $0x1f0] ss:$8 sps:$4 sm:$0xff]  }
  0x22   : > { %732 = vmatprep.subr.bf16.mxu1 %v1042_v14  ;;  %v1076_v37 = vld [vmem:[%s1197_s25 + $0xe4] ss:$8 sps:$4 sm:$0xff]   ;;  %v1080_v39 = vld [vmem:[%s1197_s25 + $0xe0] ss:$8 sps:$4 sm:$0xff]   ;;  %v1082_v41 = vld [vmem:[%s1197_s25 + $0xd4] ss:$8 sps:$4 sm:$0xff]  }
  0x23   : > { %v1078_v38 = vld [vmem:[%s1197_s25 + $0x1e4] ss:$8 sps:$4 sm:$0xff]   ;;  %v1081_v40 = vld [vmem:[%s1197_s25 + $0x1e0] ss:$8 sps:$4 sm:$0xff]   ;;  %v1084_v42 = vld [vmem:[%s1197_s25 + $0x1d4] ss:$8 sps:$4 sm:$0xff]  }
  0x24   : > { %692 = vmatpush1.bf16.msra.mxu0 %v1044_v15  ;;  %v1086_v43 = vld [vmem:[%s1197_s25 + $0xd0] ss:$8 sps:$4 sm:$0xff]   ;;  %v1088_v45 = vld [vmem:[%s1197_s25 + $0xc4] ss:$8 sps:$4 sm:$0xff]   ;;  %v1092_v50 = vld [vmem:[%s1197_s25 + $0xc0] ss:$8 sps:$4 sm:$0xff]  }
  0x25   : > { %733 = vmatpush1.bf16.msra.mxu1 %v1045_v16  ;;  %693 = vmatprep.subr.bf16.mxu0 %v1046_v17  ;;  %v1087_v44 = vld [vmem:[%s1197_s25 + $0x1d0] ss:$8 sps:$4 sm:$0xff]   ;;  %v1090_v46 = vld [vmem:[%s1197_s25 + $0x1c4] ss:$8 sps:$4 sm:$0xff]   ;;  %v1093_v51 = vld [vmem:[%s1197_s25 + $0x1c0] ss:$8 sps:$4 sm:$0xff]  }
  0x26   : > { %734 = vmatprep.subr.bf16.mxu1 %v1048_v18  ;;  %v285_v47 = vld [vmem:[%s1192_s21] sm:$0xff]  ;;  %v286_v49 = vld [vmem:[%s1192_s21 + $0x8] sm:$0xff]  ;;  %v1094_v53 = vld [vmem:[%s1197_s25 + $0xb4] ss:$8 sps:$4 sm:$0xff]   ;;  %p991_p7 = scmp.ne.s32.totalorder %s1136_s12, 1 }
  0x27   : > { %v924_v48 = vcombine.high %v285_v47, %v285_v47  ;;  %v926_v52 = vcombine.high %v286_v49, %v286_v49  ;;  %v1096_v54 = vld [vmem:[%s1197_s25 + $0x1b4] ss:$8 sps:$4 sm:$0xff]   ;;  %v1098_v55 = vld [vmem:[%s1197_s25 + $0xb0] ss:$8 sps:$4 sm:$0xff]   ;;  %v1100_v57 = vld [vmem:[%s1197_s25 + $0xa4] ss:$8 sps:$4 sm:$0xff]   ;;  %v923_v5 = vcombine.low %v285_v47, %v285_v47  ;;  %v925_v6 = vcombine.low %v286_v49, %v286_v49 }
  0x28   : > { %694 = vmatpush1.bf16.msra.mxu0 %v1050_v19  ;;  %v1099_v56 = vld [vmem:[%s1197_s25 + $0x1b0] ss:$8 sps:$4 sm:$0xff]   ;;  %v1102_v58 = vld [vmem:[%s1197_s25 + $0x1a4] ss:$8 sps:$4 sm:$0xff]   ;;  %v1104_v59 = vld [vmem:[%s1197_s25 + $0xa0] ss:$8 sps:$4 sm:$0xff]  }
  0x29   : > { %735 = vmatpush1.bf16.msra.mxu1 %v1051_v20  ;;  %695 = vmatprep.subr.bf16.mxu0 %v1052_v21  ;;  %v1105_v60 = vld [vmem:[%s1197_s25 + $0x1a0] ss:$8 sps:$4 sm:$0xff]   ;;  %v1106_v61 = vld [vmem:[%s1197_s25 + $0x94] ss:$8 sps:$4 sm:$0xff]   ;;  %v1110_v63 = vld [vmem:[%s1197_s25 + $0x90] ss:$8 sps:$4 sm:$0xff]  }
  0x2a   : > { %736 = vmatprep.subr.bf16.mxu1 %v1054_v22  ;;  %717 = vmatprep.mubr.bf16.mxu0 %v924_v48  ;;  %v1108_v62 = vld [vmem:[%s1197_s25 + $0x194] ss:$8 sps:$4 sm:$0xff]   ;;  %v1111_v0 = vld [vmem:[%s1197_s25 + $0x190] ss:$8 sps:$4 sm:$0xff]   ;;  %v1112_v1 = vld [vmem:[%s1197_s25 + $0x84] ss:$8 sps:$4 sm:$0xff]  }
  0x2b   : > { %758 = vmatprep.mubr.bf16.mxu1 %v926_v52  ;;  %v1114_v2 = vld [vmem:[%s1197_s25 + $0x184] ss:$8 sps:$4 sm:$0xff]   ;;  %v1116_v3 = vld [vmem:[%s1197_s25 + $0x80] ss:$8 sps:$4 sm:$0xff]   ;;  %v284_v12 = vld [vmem:[#allocation2 + $0x8] sm:$0xff] }
  0x2c   : > { %696 = vmatpush1.bf16.msra.mxu0 %v1056_v23  ;;  %v1117_v4 = vld [vmem:[%s1197_s25 + $0x180] ss:$8 sps:$4 sm:$0xff]  }
  0x2d   : > { %737 = vmatpush1.bf16.msra.mxu1 %v1057_v24  ;;  %697 = vmatprep.subr.bf16.mxu0 %v1058_v25  ;;  %v283_v8 = vld [vmem:[#allocation2] sm:$0xff] }
  0x2e   : > { %738 = vmatprep.subr.bf16.mxu1 %v1060_v26 }
  0x30   : > { %698 = vmatpush1.bf16.msra.mxu0 %v1062_v27 }
  0x31   : > { %739 = vmatpush1.bf16.msra.mxu1 %v1063_v28  ;;  %699 = vmatprep.subr.bf16.mxu0 %v1064_v29 }
  0x32   : > { %740 = vmatprep.subr.bf16.mxu1 %v1066_v30 }
  0x34   : > { %700 = vmatpush1.bf16.msra.mxu0 %v1068_v31 }
  0x35   : > { %741 = vmatpush1.bf16.msra.mxu1 %v1069_v32  ;;  %701 = vmatprep.subr.bf16.mxu0 %v1070_v33 }
  0x36   : > { %742 = vmatprep.subr.bf16.mxu1 %v1072_v34 }
  0x38   : > { %702 = vmatpush2.bf16.msra.mxu0 %v1074_v35 }
  0x39   : > { %743 = vmatpush2.bf16.msra.mxu1 %v1075_v36  ;;  %703 = vmatprep.subr.bf16.mxu0 %v1076_v37 }
  0x3a   : > { %744 = vmatprep.subr.bf16.mxu1 %v1078_v38 }
  0x3c   : > { %704 = vmatpush2.bf16.msra.mxu0 %v1080_v39 }
  0x3d   : > { %745 = vmatpush2.bf16.msra.mxu1 %v1081_v40  ;;  %705 = vmatprep.subr.bf16.mxu0 %v1082_v41 }
  0x3e   : > { %746 = vmatprep.subr.bf16.mxu1 %v1084_v42 }
  0x40   : > { %706 = vmatpush2.bf16.msra.mxu0 %v1086_v43 }
  0x41   : > { %747 = vmatpush2.bf16.msra.mxu1 %v1087_v44  ;;  %707 = vmatprep.subr.bf16.mxu0 %v1088_v45 }
  0x42   : > { %748 = vmatprep.subr.bf16.mxu1 %v1090_v46 }
  0x44   : > { %708 = vmatpush2.bf16.msra.mxu0 %v1092_v50 }
  0x45   : > { %749 = vmatpush2.bf16.msra.mxu1 %v1093_v51  ;;  %709 = vmatprep.subr.bf16.mxu0 %v1094_v53 }
  0x46   : > { %750 = vmatprep.subr.bf16.mxu1 %v1096_v54 }
  0x48   : > { %710 = vmatpush2.bf16.msra.mxu0 %v1098_v55 }
  0x49   : > { %751 = vmatpush2.bf16.msra.mxu1 %v1099_v56  ;;  %711 = vmatprep.subr.bf16.mxu0 %v1100_v57 }
  0x4a   : > { %752 = vmatprep.subr.bf16.mxu1 %v1102_v58 }
  0x4c   : > { %712 = vmatpush2.bf16.msra.mxu0 %v1104_v59 }
  0x4d   : > { %753 = vmatpush2.bf16.msra.mxu1 %v1105_v60  ;;  %713 = vmatprep.subr.bf16.mxu0 %v1106_v61 }
  0x4e   : > { %754 = vmatprep.subr.bf16.mxu1 %v1108_v62 }
  0x50   : > { %714 = vmatpush2.bf16.msra.mxu0 %v1110_v63 }
  0x51   : > { %755 = vmatpush2.bf16.msra.mxu1 %v1111_v0  ;;  %715 = vmatprep.subr.bf16.mxu0 %v1112_v1 }
  0x52   : > { %756 = vmatprep.subr.bf16.mxu1 %v1114_v2 }
  0x54   : > { %716 = vmatpush2.bf16.msra.mxu0 %v1116_v3 }
  0x55   : > { %757 = vmatpush2.bf16.msra.mxu1 %v1117_v4 }
  0x57   : > { %718 = vmatmul.mubr.bf16.vlgmr.msra.gmra.mxu0 %v923_v5 }
  0x58   : > { %759 = vmatmul.mubr.bf16.vlgmr.msra.gmra.mxu1 %v925_v6 }
 0x117   : > { %v719_v7 = vpop.f32.mrf.mxu0 }
 0x118   : > { %v760_v9 = vpop.f32.mrf.mxu1 }
 0x119   : > { %v761_v10 = vadd.f32 %v760_v9, %v719_v7  ;;  %v721_v11 = vpop.f32.mrf.mxu0 }
 0x11a   : > { %v762_v13 = vpop.f32.mrf.mxu1 }
 0x11b   : > { %v767_v14 = vadd.f32 %v761_v10, %v283_v8  ;;  %v763_v15 = vadd.f32 %v762_v13, %v721_v11  ;;  %v723_v16 = vpop.f32.mrf.mxu0  ;;  %774 = sbr.rel (%p991_p7) target bundleno = 301 (0x12d), region = 40 }
 0x11c   : > { %v764_v17 = vpop.f32.mrf.mxu1 }
 0x11d   : > { %769 = vst [vmem:[#allocation2] sm:$0xff] %v767_v14  ;;  %v768_v18 = vadd.f32 %v763_v15, %v284_v12  ;;  %v724_v19 = vpop.f32.mrf.mxu0 }
 0x11e   : > { %v765_v20 = vpop.f32.mrf.mxu1 }
 0x11f   : > { %770 = vst [vmem:[#allocation2 + $0x8] sm:$0xff] %v768_v18 }
 0x120   : > { %v779_v21 = vlaneseq  ;;  %v777_v23 = vld [vmem:[%s1287_s2] sm:$0x3] }
 0x122   : > { %v780_v22 = vshrl.u32 %v779_v21, 7 }
 0x124   : > { %v781_v24 = vsub.s32 0, %v780_v22  ;;  %v785_v25 = vsub.s32 1, %v780_v22  ;;  %v775_v26 = vld [vmem:[#allocation2] sm:$0xff] }
 0x126   : > { %v776_v27 = vld [vmem:[#allocation2 + $0x8] sm:$0xff]  ;;  %v782_v28 = vrot.slane %v777_v23, %v781_v24  ;;  %v786_v29 = vrot.slane %v777_v23, %v785_v25 }
 0x128   : > { %v789_v30 = vadd.f32 %v782_v28, %v775_v26  ;;  %v790_v31 = vadd.f32 %v786_v29, %v776_v27 }
 0x12a   : > { %v791_v32 = vmax.f32 %v789_v30, 0.0  ;;  %v792_v33 = vmax.f32 %v790_v31, 0.0 }
 0x12c   : > { %793 = vst [vmem:[%s1288_s3] sm:$0xff] %v791_v32  ;;  %794 = vst [vmem:[%s1288_s3 + $0x8] sm:$0xff] %v792_v33 }
 0x12d PF: > { %s13_s14 = sadd.s32 1, %s1144_s14   ;;  %s1289_s12 = smov %s1140_s13 }
 0x12e   : > { %p10_p8 = scmp.ge.s32.totalorder %s13_s14, 4   ;;  %s1290_s13 = smov %s1292_s15 }
 0x130   :  { %12 = sbr.rel (!%p10_p8) target bundleno = 2 (0x2), region = 76 }

// kernel: cnn_res3_forward.91
= control target key start
LH: loop header
LB: loop body
LE: loop exit
PB: predicated region body
PF: predicated region fallthrough
CT: control target
= control target key end

     0   :  { %s1165_s12 = smov 0   ;;  %s1167_s13 = smov 0   ;;  %s1283_s0 = inlined_call_operand.vmem [shape: bf16[8,9216], index: 0, kind: input, shape index: {}]   ;;  %s1284_s1 = inlined_call_operand.vmem [shape: bf16[9216,256], index: 1, kind: input, shape index: {}]   ;;  %s1285_s2 = inlined_call_operand.vmem [shape: f32[1,256], index: 2, kind: input, shape index: {}]   ;;  %s1286_s3 = inlined_call_operand.vmem [shape: f32[8,256], index: 3, kind: output, shape index: {}]  }
   0x1   :  { %s1169_s14 = smov 0  }
   0x2 LB: > { %s25_s15 = sadd.s32 1, %s1138_s13  ;;  %p914_p0 = scmp.ge.s32.totalorder %s1142_s14, 1  ;;  %s1142_s14 = sphi %s1169_s14, %s13_s14   ;;  %s1138_s13 = sphi %s1167_s13, %s1288_s13   ;;  %s1134_s12 = sphi %s1165_s12, %s1287_s12  }
   0x3   : > { %p26_p1 = scmp.ge.s32.totalorder %s25_s15, 18  ;;  %p194_p2 = scmp.lt.s32.totalorder %s1142_s14, 19 }
   0x5   : > { %s1290_s15 = smov (%p26_p1, %s25_s15), 0  ;;  %p195_p3 = pnand %p914_p0, %p194_p2 }
   0x6   : > { %s915_s16 = sshll.u32 (!%p195_p3), %s1134_s12, 2  ;;  %s917_s17 = sshll.u32 (!%p195_p3), %s1134_s12, 6 }
   0x7   : > { %198 = sbr.rel (%p195_p3) target bundleno = 299 (0x12b), region = 32  ;;  %p243_p4 = scmp.lt.s32.totalorder (!%p195_p3), %s915_s16, 71 }
   0x8   : > { %p252_p5 = scmp.lt.s32.totalorder (!%p195_p3), %s917_s17, 1151  ;;  %p920_p6 = scmp.ne.s32.totalorder (!%p195_p3), %s1134_s12, 0 }
   0xc   : > { %s1292_s16 = smov (!%p243_p4, %s915_s16), 71  ;;  %s1294_s17 = smov (!%p252_p5, %s917_s17), 1151 }
   0xd   : > { %s916_s18 = sshll.u32 %s1292_s16, 2  ;;  %s994_s22 = sshll.u32 %s1294_s17, 3 }
   0xe   : > { %s1190_s21 = scalar_lea.vmem %s1283_s0, %s916_s18  ;;  %s1195_s25 = scalar_lea.vmem %s1284_s1, %s994_s22 }
   0xf   : > { %280 = sbr.rel (%p920_p6) target bundleno = 22 (0x16), region = 36 }
  0x14   : > { %v1144_v0 = vmov 0.0  }
  0x15   : > { %281 = vst [vmem:[#allocation2] sm:$0xff] %v1144_v0  ;;  %282 = vst [vmem:[#allocation2 + $0x8] sm:$0xff] %v1144_v0 }
  0x16 PF: > { %v1020_v1 = vld [vmem:[%s1195_s25 + $0x74] ss:$8 sps:$4 sm:$0xff]   ;;  %v1024_v3 = vld [vmem:[%s1195_s25 + $0x70] ss:$8 sps:$4 sm:$0xff]   ;;  %v1026_v5 = vld [vmem:[%s1195_s25 + $0x64] ss:$8 sps:$4 sm:$0xff]  }
  0x17   : > { %v1022_v2 = vld [vmem:[%s1195_s25 + $0x174] ss:$8 sps:$4 sm:$0xff]   ;;  %685 = vmatprep.subr.bf16.mxu0 %v1020_v1  ;;  %v1025_v4 = vld [vmem:[%s1195_s25 + $0x170] ss:$8 sps:$4 sm:$0xff]   ;;  %v1028_v6 = vld [vmem:[%s1195_s25 + $0x164] ss:$8 sps:$4 sm:$0xff]  }
  0x18   : > { %726 = vmatprep.subr.bf16.mxu1 %v1022_v2  ;;  %686 = vmatpush1.bf16.msra.mxu0 %v1024_v3  ;;  %v1030_v7 = vld [vmem:[%s1195_s25 + $0x60] ss:$8 sps:$4 sm:$0xff]   ;;  %v1032_v9 = vld [vmem:[%s1195_s25 + $0x54] ss:$8 sps:$4 sm:$0xff]   ;;  %v1036_v11 = vld [vmem:[%s1195_s25 + $0x50] ss:$8 sps:$4 sm:$0xff]  }
  0x19   : > { %727 = vmatpush1.bf16.msra.mxu1 %v1025_v4  ;;  %687 = vmatprep.subr.bf16.mxu0 %v1026_v5  ;;  %v1031_v8 = vld [vmem:[%s1195_s25 + $0x160] ss:$8 sps:$4 sm:$0xff]   ;;  %v1034_v10 = vld [vmem:[%s1195_s25 + $0x154] ss:$8 sps:$4 sm:$0xff]   ;;  %v1037_v12 = vld [vmem:[%s1195_s25 + $0x150] ss:$8 sps:$4 sm:$0xff]  }
  0x1a   : > { %728 = vmatprep.subr.bf16.mxu1 %v1028_v6  ;;  %v1038_v13 = vld [vmem:[%s1195_s25 + $0x44] ss:$8 sps:$4 sm:$0xff]   ;;  %v1042_v15 = vld [vmem:[%s1195_s25 + $0x40] ss:$8 sps:$4 sm:$0xff]   ;;  %v1044_v17 = vld [vmem:[%s1195_s25 + $0x34] ss:$8 sps:$4 sm:$0xff]  }
  0x1b   : > { %v1040_v14 = vld [vmem:[%s1195_s25 + $0x144] ss:$8 sps:$4 sm:$0xff]   ;;  %v1043_v16 = vld [vmem:[%s1195_s25 + $0x140] ss:$8 sps:$4 sm:$0xff]   ;;  %v1046_v18 = vld [vmem:[%s1195_s25 + $0x134] ss:$8 sps:$4 sm:$0xff]  }
  0x1c   : > { %688 = vmatpush1.bf16.msra.mxu0 %v1030_v7  ;;  %v1048_v19 = vld [vmem:[%s1195_s25 + $0x30] ss:$8 sps:$4 sm:$0xff]   ;;  %v1050_v21 = vld [vmem:[%s1195_s25 + $0x24] ss:$8 sps:$4 sm:$0xff]   ;;  %v1054_v23 = vld [vmem:[%s1195_s25 + $0x20] ss:$8 sps:$4 sm:$0xff]  }
  0x1d   : > { %729 = vmatpush1.bf16.msra.mxu1 %v1031_v8  ;;  %689 = vmatprep.subr.bf16.mxu0 %v1032_v9  ;;  %v1049_v20 = vld [vmem:[%s1195_s25 + $0x130] ss:$8 sps:$4 sm:$0xff]   ;;  %v1052_v22 = vld [vmem:[%s1195_s25 + $0x124] ss:$8 sps:$4 sm:$0xff]   ;;  %v1055_v24 = vld [vmem:[%s1195_s25 + $0x120] ss:$8 sps:$4 sm:$0xff]  }
  0x1e   : > { %730 = vmatprep.subr.bf16.mxu1 %v1034_v10  ;;  %v1056_v25 = vld [vmem:[%s1195_s25 + $0x14] ss:$8 sps:$4 sm:$0xff]   ;;  %v1060_v27 = vld [vmem:[%s1195_s25 + $0x10] ss:$8 sps:$4 sm:$0xff]   ;;  %v1062_v29 = vld [vmem:[%s1195_s25 + $0x4] ss:$8 sps:$4 sm:$0xff]  }
  0x1f   : > { %v1058_v26 = vld [vmem:[%s1195_s25 + $0x114] ss:$8 sps:$4 sm:$0xff]   ;;  %v1061_v28 = vld [vmem:[%s1195_s25 + $0x110] ss:$8 sps:$4 sm:$0xff]   ;;  %v1064_v30 = vld [vmem:[%s1195_s25 + $0x104] ss:$8 sps:$4 sm:$0xff]  }
  0x20   : > { %690 = vmatpush1.bf16.msra.mxu0 %v1036_v11  ;;  %v1066_v31 = vld [vmem:[%s1195_s25] ss:$8 sps:$4 sm:$0xff]   ;;  %v1068_v33 = vld [vmem:[%s1195_s25 + $0xf4] ss:$8 sps:$4 sm:$0xff]   ;;  %v1072_v35 = vld [vmem:[%s1195_s25 + $0xf0] ss:$8 sps:$4 sm:$0xff]  }
  0x21   : > { %731 = vmatpush1.bf16.msra.mxu1 %v1037_v12  ;;  %691 = vmatprep.subr.bf16.mxu0 %v1038_v13  ;;  %v1067_v32 = vld [vmem:[%s1195_s25 + $0x100] ss:$8 sps:$4 sm:$0xff]   ;;  %v1070_v34 = vld [vmem:[%s1195_s25 + $0x1f4] ss:$8 sps:$4 sm:$0xff]   ;;  %v1073_v36 = vld [vmem:[%s1195_s25 + $0x1f0] ss:$8 sps:$4 sm:$0xff]  }
  0x22   : > { %732 = vmatprep.subr.bf16.mxu1 %v1040_v14  ;;  %v1074_v37 = vld [vmem:[%s1195_s25 + $0xe4] ss:$8 sps:$4 sm:$0xff]   ;;  %v1078_v39 = vld [vmem:[%s1195_s25 + $0xe0] ss:$8 sps:$4 sm:$0xff]   ;;  %v1080_v41 = vld [vmem:[%s1195_s25 + $0xd4] ss:$8 sps:$4 sm:$0xff]  }
  0x23   : > { %v1076_v38 = vld [vmem:[%s1195_s25 + $0x1e4] ss:$8 sps:$4 sm:$0xff]   ;;  %v1079_v40 = vld [vmem:[%s1195_s25 + $0x1e0] ss:$8 sps:$4 sm:$0xff]   ;;  %v1082_v42 = vld [vmem:[%s1195_s25 + $0x1d4] ss:$8 sps:$4 sm:$0xff]  }
  0x24   : > { %692 = vmatpush1.bf16.msra.mxu0 %v1042_v15  ;;  %v1084_v43 = vld [vmem:[%s1195_s25 + $0xd0] ss:$8 sps:$4 sm:$0xff]   ;;  %v1086_v45 = vld [vmem:[%s1195_s25 + $0xc4] ss:$8 sps:$4 sm:$0xff]   ;;  %v1090_v50 = vld [vmem:[%s1195_s25 + $0xc0] ss:$8 sps:$4 sm:$0xff]  }
  0x25   : > { %733 = vmatpush1.bf16.msra.mxu1 %v1043_v16  ;;  %693 = vmatprep.subr.bf16.mxu0 %v1044_v17  ;;  %v1085_v44 = vld [vmem:[%s1195_s25 + $0x1d0] ss:$8 sps:$4 sm:$0xff]   ;;  %v1088_v46 = vld [vmem:[%s1195_s25 + $0x1c4] ss:$8 sps:$4 sm:$0xff]   ;;  %v1091_v51 = vld [vmem:[%s1195_s25 + $0x1c0] ss:$8 sps:$4 sm:$0xff]  }
  0x26   : > { %734 = vmatprep.subr.bf16.mxu1 %v1046_v18  ;;  %v285_v47 = vld [vmem:[%s1190_s21] sm:$0xff]  ;;  %v286_v49 = vld [vmem:[%s1190_s21 + $0x8] sm:$0xff]  ;;  %v1092_v53 = vld [vmem:[%s1195_s25 + $0xb4] ss:$8 sps:$4 sm:$0xff]   ;;  %p989_p7 = scmp.ne.s32.totalorder %s1134_s12, 17 }
  0x27   : > { %v922_v48 = vcombine.high %v285_v47, %v285_v47  ;;  %v924_v52 = vcombine.high %v286_v49, %v286_v49  ;;  %v1094_v54 = vld [vmem:[%s1195_s25 + $0x1b4] ss:$8 sps:$4 sm:$0xff]   ;;  %v1096_v55 = vld [vmem:[%s1195_s25 + $0xb0] ss:$8 sps:$4 sm:$0xff]   ;;  %v1098_v57 = vld [vmem:[%s1195_s25 + $0xa4] ss:$8 sps:$4 sm:$0xff]   ;;  %v921_v5 = vcombine.low %v285_v47, %v285_v47  ;;  %v923_v6 = vcombine.low %v286_v49, %v286_v49 }
  0x28   : > { %694 = vmatpush1.bf16.msra.mxu0 %v1048_v19  ;;  %v1097_v56 = vld [vmem:[%s1195_s25 + $0x1b0] ss:$8 sps:$4 sm:$0xff]   ;;  %v1100_v58 = vld [vmem:[%s1195_s25 + $0x1a4] ss:$8 sps:$4 sm:$0xff]   ;;  %v1102_v59 = vld [vmem:[%s1195_s25 + $0xa0] ss:$8 sps:$4 sm:$0xff]  }
  0x29   : > { %735 = vmatpush1.bf16.msra.mxu1 %v1049_v20  ;;  %695 = vmatprep.subr.bf16.mxu0 %v1050_v21  ;;  %v1103_v60 = vld [vmem:[%s1195_s25 + $0x1a0] ss:$8 sps:$4 sm:$0xff]   ;;  %v1104_v61 = vld [vmem:[%s1195_s25 + $0x94] ss:$8 sps:$4 sm:$0xff]   ;;  %v1108_v63 = vld [vmem:[%s1195_s25 + $0x90] ss:$8 sps:$4 sm:$0xff]  }
  0x2a   : > { %736 = vmatprep.subr.bf16.mxu1 %v1052_v22  ;;  %717 = vmatprep.mubr.bf16.mxu0 %v922_v48  ;;  %v1106_v62 = vld [vmem:[%s1195_s25 + $0x194] ss:$8 sps:$4 sm:$0xff]   ;;  %v1109_v0 = vld [vmem:[%s1195_s25 + $0x190] ss:$8 sps:$4 sm:$0xff]   ;;  %v1110_v1 = vld [vmem:[%s1195_s25 + $0x84] ss:$8 sps:$4 sm:$0xff]  }
  0x2b   : > { %758 = vmatprep.mubr.bf16.mxu1 %v924_v52  ;;  %v1112_v2 = vld [vmem:[%s1195_s25 + $0x184] ss:$8 sps:$4 sm:$0xff]   ;;  %v1114_v3 = vld [vmem:[%s1195_s25 + $0x80] ss:$8 sps:$4 sm:$0xff]   ;;  %v284_v12 = vld [vmem:[#allocation2 + $0x8] sm:$0xff] }
  0x2c   : > { %696 = vmatpush1.bf16.msra.mxu0 %v1054_v23  ;;  %v1115_v4 = vld [vmem:[%s1195_s25 + $0x180] ss:$8 sps:$4 sm:$0xff]  }
  0x2d   : > { %737 = vmatpush1.bf16.msra.mxu1 %v1055_v24  ;;  %697 = vmatprep.subr.bf16.mxu0 %v1056_v25  ;;  %v283_v8 = vld [vmem:[#allocation2] sm:$0xff] }
  0x2e   : > { %738 = vmatprep.subr.bf16.mxu1 %v1058_v26 }
  0x30   : > { %698 = vmatpush1.bf16.msra.mxu0 %v1060_v27 }
  0x31   : > { %739 = vmatpush1.bf16.msra.mxu1 %v1061_v28  ;;  %699 = vmatprep.subr.bf16.mxu0 %v1062_v29 }
  0x32   : > { %740 = vmatprep.subr.bf16.mxu1 %v1064_v30 }
  0x34   : > { %700 = vmatpush1.bf16.msra.mxu0 %v1066_v31 }
  0x35   : > { %741 = vmatpush1.bf16.msra.mxu1 %v1067_v32  ;;  %701 = vmatprep.subr.bf16.mxu0 %v1068_v33 }
  0x36   : > { %742 = vmatprep.subr.bf16.mxu1 %v1070_v34 }
  0x38   : > { %702 = vmatpush2.bf16.msra.mxu0 %v1072_v35 }
  0x39   : > { %743 = vmatpush2.bf16.msra.mxu1 %v1073_v36  ;;  %703 = vmatprep.subr.bf16.mxu0 %v1074_v37 }
  0x3a   : > { %744 = vmatprep.subr.bf16.mxu1 %v1076_v38 }
  0x3c   : > { %704 = vmatpush2.bf16.msra.mxu0 %v1078_v39 }
  0x3d   : > { %745 = vmatpush2.bf16.msra.mxu1 %v1079_v40  ;;  %705 = vmatprep.subr.bf16.mxu0 %v1080_v41 }
  0x3e   : > { %746 = vmatprep.subr.bf16.mxu1 %v1082_v42 }
  0x40   : > { %706 = vmatpush2.bf16.msra.mxu0 %v1084_v43 }
  0x41   : > { %747 = vmatpush2.bf16.msra.mxu1 %v1085_v44  ;;  %707 = vmatprep.subr.bf16.mxu0 %v1086_v45 }
  0x42   : > { %748 = vmatprep.subr.bf16.mxu1 %v1088_v46 }
  0x44   : > { %708 = vmatpush2.bf16.msra.mxu0 %v1090_v50 }
  0x45   : > { %749 = vmatpush2.bf16.msra.mxu1 %v1091_v51  ;;  %709 = vmatprep.subr.bf16.mxu0 %v1092_v53 }
  0x46   : > { %750 = vmatprep.subr.bf16.mxu1 %v1094_v54 }
  0x48   : > { %710 = vmatpush2.bf16.msra.mxu0 %v1096_v55 }
  0x49   : > { %751 = vmatpush2.bf16.msra.mxu1 %v1097_v56  ;;  %711 = vmatprep.subr.bf16.mxu0 %v1098_v57 }
  0x4a   : > { %752 = vmatprep.subr.bf16.mxu1 %v1100_v58 }
  0x4c   : > { %712 = vmatpush2.bf16.msra.mxu0 %v1102_v59 }
  0x4d   : > { %753 = vmatpush2.bf16.msra.mxu1 %v1103_v60  ;;  %713 = vmatprep.subr.bf16.mxu0 %v1104_v61 }
  0x4e   : > { %754 = vmatprep.subr.bf16.mxu1 %v1106_v62 }
  0x50   : > { %714 = vmatpush2.bf16.msra.mxu0 %v1108_v63 }
  0x51   : > { %755 = vmatpush2.bf16.msra.mxu1 %v1109_v0  ;;  %715 = vmatprep.subr.bf16.mxu0 %v1110_v1 }
  0x52   : > { %756 = vmatprep.subr.bf16.mxu1 %v1112_v2 }
  0x54   : > { %716 = vmatpush2.bf16.msra.mxu0 %v1114_v3 }
  0x55   : > { %757 = vmatpush2.bf16.msra.mxu1 %v1115_v4 }
  0x57   : > { %718 = vmatmul.mubr.bf16.vlgmr.msra.gmra.mxu0 %v921_v5 }
  0x58   : > { %759 = vmatmul.mubr.bf16.vlgmr.msra.gmra.mxu1 %v923_v6 }
 0x117   : > { %v719_v7 = vpop.f32.mrf.mxu0 }
 0x118   : > { %v760_v9 = vpop.f32.mrf.mxu1 }
 0x119   : > { %v761_v10 = vadd.f32 %v760_v9, %v719_v7  ;;  %v721_v11 = vpop.f32.mrf.mxu0 }
 0x11a   : > { %v762_v13 = vpop.f32.mrf.mxu1 }
 0x11b   : > { %v767_v14 = vadd.f32 %v761_v10, %v283_v8  ;;  %v763_v15 = vadd.f32 %v762_v13, %v721_v11  ;;  %v723_v16 = vpop.f32.mrf.mxu0  ;;  %774 = sbr.rel (%p989_p7) target bundleno = 299 (0x12b), region = 40 }
 0x11c   : > { %v764_v17 = vpop.f32.mrf.mxu1 }
 0x11d   : > { %769 = vst [vmem:[#allocation2] sm:$0xff] %v767_v14  ;;  %v768_v18 = vadd.f32 %v763_v15, %v284_v12  ;;  %v724_v19 = vpop.f32.mrf.mxu0 }
 0x11e   : > { %v765_v20 = vpop.f32.mrf.mxu1 }
 0x11f   : > { %770 = vst [vmem:[#allocation2 + $0x8] sm:$0xff] %v768_v18 }
 0x120   : > { %v779_v21 = vlaneseq  ;;  %v777_v23 = vld [vmem:[%s1285_s2] sm:$0x3] }
 0x122   : > { %v780_v22 = vshrl.u32 %v779_v21, 7 }
 0x124   : > { %v781_v24 = vsub.s32 0, %v780_v22  ;;  %v785_v25 = vsub.s32 1, %v780_v22  ;;  %v775_v26 = vld [vmem:[#allocation2] sm:$0xff] }
 0x126   : > { %v776_v27 = vld [vmem:[#allocation2 + $0x8] sm:$0xff]  ;;  %v782_v28 = vrot.slane %v777_v23, %v781_v24  ;;  %v786_v29 = vrot.slane %v777_v23, %v785_v25 }
 0x128   : > { %v789_v30 = vadd.f32 %v782_v28, %v775_v26  ;;  %v790_v31 = vadd.f32 %v786_v29, %v776_v27 }
 0x12a   : > { %791 = vst [vmem:[%s1286_s3] sm:$0xff] %v789_v30  ;;  %792 = vst [vmem:[%s1286_s3 + $0x8] sm:$0xff] %v790_v31 }
 0x12b PF: > { %s13_s14 = sadd.s32 1, %s1142_s14   ;;  %s1287_s12 = smov %s1138_s13 }
 0x12c   : > { %p10_p8 = scmp.ge.s32.totalorder %s13_s14, 20   ;;  %s1288_s13 = smov %s1290_s15 }
 0x12e   :  { %12 = sbr.rel (!%p10_p8) target bundleno = 2 (0x2), region = 76 }

// kernel: cnn_res3_forward.92
= control target key start
LH: loop header
LB: loop body
LE: loop exit
PB: predicated region body
PF: predicated region fallthrough
CT: control target
= control target key end

     0   :  { %s865_s12 = smov 0   ;;  %s867_s13 = smov 0   ;;  %s940_s0 = inlined_call_operand.vmem [shape: bf16[8,2304], index: 0, kind: input, shape index: {}]   ;;  %s941_s1 = inlined_call_operand.vmem [shape: bf16[2304,128], index: 1, kind: input, shape index: {}]   ;;  %s942_s2 = inlined_call_operand.vmem [shape: f32[1,128], index: 2, kind: input, shape index: {}]   ;;  %s943_s3 = inlined_call_operand.vmem [shape: f32[8,128], index: 3, kind: output, shape index: {}]  }
   0x1   :  { %s869_s14 = smov 0  }
   0x2 LB: > { %s25_s15 = sadd.s32 1, %s836_s13  ;;  %p677_p0 = scmp.ge.s32.totalorder %s840_s14, 1  ;;  %s840_s14 = sphi %s869_s14, %s13_s14   ;;  %s836_s13 = sphi %s867_s13, %s945_s13   ;;  %s832_s12 = sphi %s865_s12, %s944_s12  }
   0x3   : > { %p26_p1 = scmp.ge.s32.totalorder %s25_s15, 6  ;;  %p189_p2 = scmp.lt.s32.totalorder %s840_s14, 7 }
   0x5   : > { %s947_s15 = smov (%p26_p1, %s25_s15), 0  ;;  %p190_p3 = pnand %p677_p0, %p189_p2 }
   0x6   : > { %s230_s16 = smul.u32 (!%p190_p3), 3, %s832_s12  ;;  %p680_p6 = scmp.ne.s32.totalorder (!%p190_p3), %s832_s12, 0 }
   0x7   : > { %193 = sbr.rel (%p190_p3) target bundleno = 270 (0x10e), region = 32 }
   0x8   : > { %s240_s17 = smul.u32 (!%p190_p3), 48, %s832_s12  ;;  %p233_p4 = scmp.lt.s32.totalorder (!%p190_p3), %s230_s16, 17 }
   0xa   : > { %p241_p5 = scmp.lt.s32.totalorder (!%p190_p3), %s240_s17, 287 }
   0xc   : > { %s949_s16 = smov (!%p233_p4, %s230_s16), 17  ;;  %s951_s17 = smov (!%p241_p5, %s240_s17), 287 }
   0xd   : > { %s678_s18 = sshll.u32 %s949_s16, 2  ;;  %s679_s22 = sshll.u32 %s951_s17, 2 }
   0xe   : > { %s890_s21 = scalar_lea.vmem %s940_s0, %s678_s18  ;;  %s895_s25 = scalar_lea.vmem %s941_s1, %s679_s22 }
   0xf   : > { %263 = sbr.rel (%p680_p6) target bundleno = 22 (0x16), region = 36 }
  0x14   : > { %v842_v0 = vmov 0.0  }
  0x15   : > { %264 = vst [vmem:[#allocation2] sm:$0xff] %v842_v0 }
  0x16 PF: > { %v791_v1 = vld [vmem:[%s895_s25 + $0x78] sm:$0xff]   ;;  %v843_v2 = vmov 0.0   ;;  %vm844_vm0 = vmmov 0   ;;  %v794_v5 = vld [vmem:[%s895_s25 + $0x70] sm:$0xff]   ;;  %v797_v8 = vld [vmem:[%s895_s25 + $0x68] sm:$0xff]   ;;  %p708_p7 = scmp.ne.s32.totalorder %s832_s12, 5 }
  0x17   : > { %744 = vmatprep.subr.bf16.mxu1 %v843_v2  ;;  %v792_v3 = vld [vmem:[%s895_s25 + $0xb8] sm:$0xff]   ;;  %713 = vmatprep.subr.bf16.mxu0 %v791_v1  ;;  %v795_v6 = vld [vmem:[%s895_s25 + $0xb0] sm:$0xff]   ;;  %v798_v9 = vld [vmem:[%s895_s25 + $0xa8] sm:$0xff]  }
  0x18   : > { %v793_v4 = vld [vmem:[%s895_s25 + $0x38] sm:$0xff]   ;;  %760 = vmatprep.mubr.msk.bf16.mxu1 %vm844_vm0, %v843_v2  ;;  %745 = vmatpush3.bf16.msra.mxu1 %v792_v3  ;;  %v796_v7 = vld [vmem:[%s895_s25 + $0x30] sm:$0xff]   ;;  %v799_v10 = vld [vmem:[%s895_s25 + $0x28] sm:$0xff]  }
  0x19   : > { %714 = vmatpush3.bf16.msra.mxu0 %v793_v4  ;;  %746 = vmatprep.subr.bf16.mxu1 %v843_v2  ;;  %v800_v11 = vld [vmem:[%s895_s25 + $0x60] sm:$0xff]   ;;  %v803_v14 = vld [vmem:[%s895_s25 + $0x58] sm:$0xff]   ;;  %v806_v17 = vld [vmem:[%s895_s25 + $0x50] sm:$0xff]  }
  0x1a   : > { %715 = vmatprep.subr.bf16.mxu0 %v794_v5  ;;  %v801_v12 = vld [vmem:[%s895_s25 + $0xa0] sm:$0xff]   ;;  %v804_v15 = vld [vmem:[%s895_s25 + $0x98] sm:$0xff]   ;;  %v807_v18 = vld [vmem:[%s895_s25 + $0x90] sm:$0xff]  }
  0x1b   : > { %v802_v13 = vld [vmem:[%s895_s25 + $0x20] sm:$0xff]   ;;  %v805_v16 = vld [vmem:[%s895_s25 + $0x18] sm:$0xff]   ;;  %v808_v19 = vld [vmem:[%s895_s25 + $0x10] sm:$0xff]  }
  0x1c   : > { %747 = vmatpush3.bf16.msra.mxu1 %v795_v6  ;;  %v809_v20 = vld [vmem:[%s895_s25 + $0x48] sm:$0xff]   ;;  %v266_v23 = vld [vmem:[%s890_s21] sm:$0xff] }
  0x1d   : > { %716 = vmatpush3.bf16.msra.mxu0 %v796_v7  ;;  %748 = vmatprep.subr.bf16.mxu1 %v843_v2  ;;  %v810_v21 = vld [vmem:[%s895_s25 + $0x88] sm:$0xff]   ;;  %v812_v24 = vld [vmem:[%s895_s25 + $0x40] sm:$0xff]   ;;  %v682_v25 = vcombine.high %v266_v23, %v266_v23  ;;  %v681_v29 = vcombine.low %v266_v23, %v266_v23 }
  0x1e   : > { %717 = vmatprep.subr.bf16.mxu0 %v797_v8  ;;  %v811_v22 = vld [vmem:[%s895_s25 + $0x8] sm:$0xff]   ;;  %v813_v26 = vld [vmem:[%s895_s25 + $0x80] sm:$0xff]  }
  0x1f   : > { %503 = vmatprep.mubr.bf16.mxu0 %v682_v25  ;;  %v814_v27 = vld [vmem:[%s895_s25] sm:$0xff]   ;;  %v817_v28 = vld [vmem:[%s890_s21 + $0x8] ss:$0 sps:$4 sm:$0xff]  }
  0x20   : > { %749 = vmatpush3.bf16.msra.mxu1 %v798_v9  ;;  %v265_v36 = vld [vmem:[#allocation2] sm:$0xff] }
  0x21   : > { %718 = vmatpush3.bf16.msra.mxu0 %v799_v10  ;;  %750 = vmatprep.subr.bf16.mxu1 %v843_v2 }
  0x22   : > { %719 = vmatprep.subr.bf16.mxu0 %v800_v11 }
  0x24   : > { %751 = vmatpush3.bf16.msra.mxu1 %v801_v12 }
  0x25   : > { %720 = vmatpush3.bf16.msra.mxu0 %v802_v13  ;;  %752 = vmatprep.subr.bf16.mxu1 %v843_v2 }
  0x26   : > { %721 = vmatprep.subr.bf16.mxu0 %v803_v14 }
  0x28   : > { %753 = vmatpush3.bf16.msra.mxu1 %v804_v15 }
  0x29   : > { %722 = vmatpush3.bf16.msra.mxu0 %v805_v16  ;;  %754 = vmatprep.subr.bf16.mxu1 %v843_v2 }
  0x2a   : > { %723 = vmatprep.subr.bf16.mxu0 %v806_v17 }
  0x2c   : > { %755 = vmatpush3.bf16.msra.mxu1 %v807_v18 }
  0x2d   : > { %724 = vmatpush3.bf16.msra.mxu0 %v808_v19  ;;  %756 = vmatprep.subr.bf16.mxu1 %v843_v2 }
  0x2e   : > { %725 = vmatprep.subr.bf16.mxu0 %v809_v20 }
  0x30   : > { %757 = vmatpush3.bf16.msra.mxu1 %v810_v21 }
  0x31   : > { %726 = vmatpush3.bf16.msra.mxu0 %v811_v22  ;;  %758 = vmatprep.subr.bf16.mxu1 %v843_v2 }
  0x32   : > { %727 = vmatprep.subr.bf16.mxu0 %v812_v24 }
  0x34   : > { %759 = vmatpush3.bf16.msra.mxu1 %v813_v26 }
  0x35   : > { %728 = vmatpush3.bf16.msra.mxu0 %v814_v27 }
  0x37   : > { %761 = vmatmul.mubr.bf16.vlgmr.msra.gmra.mxu1 %v817_v28 }
  0x38   : > { %504 = vmatmul.mubr.bf16.vlgmr.msra.gmra.mxu0 %v681_v29 }
  0xf7   : > { %v545_v30 = vpop.f32.mrf.mxu1 }
  0xf8   : > { %v729_v31 = vpop.f32.mrf.mxu0 }
  0xf9   : > { %v762_v32 = vpop.f32.mrf.mxu1 }
  0xfa   : > { %v730_v33 = vpop.f32.mrf.mxu0 }
  0xfb   : > { %v731_v34 = vadd.f32 %v730_v33, %v729_v31  ;;  %v548_v35 = vpop.f32.mrf.mxu1 }
  0xfc   : > { %v732_v37 = vpop.f32.mrf.mxu0 }
  0xfd   : > { %v546_v38 = vadd.f32 %v731_v34, %v545_v30  ;;  %v763_v39 = vpop.f32.mrf.mxu1  ;;  %556 = sbr.rel (%p708_p7) target bundleno = 270 (0x10e), region = 40 }
  0xfe   : > { %v733_v40 = vpop.f32.mrf.mxu0 }
  0xff   : > { %v551_v41 = vadd.f32 %v546_v38, %v265_v36 }
 0x101   : > { %552 = vst [vmem:[#allocation2] sm:$0xff] %v551_v41 }
 0x102   : > { %v709_v43 = vld [vmem:[%s942_s2] ss:$0 sm:$0xff] }
 0x108   : > { %v557_v42 = vld [vmem:[#allocation2] sm:$0xff] }
 0x109   : > { %v565_v44 = vadd.f32 %v709_v43, %v557_v42 }
 0x10b   : > { %v566_v45 = vmax.f32 %v565_v44, 0.0 }
 0x10d   : > { %567 = vst [vmem:[%s943_s3] sm:$0xff] %v566_v45 }
 0x10e PF: > { %s13_s14 = sadd.s32 1, %s840_s14   ;;  %s944_s12 = smov %s836_s13 }
 0x10f   : > { %p10_p8 = scmp.ge.s32.totalorder %s13_s14, 8   ;;  %s945_s13 = smov %s947_s15 }
 0x111   :  { %12 = sbr.rel (!%p10_p8) target bundleno = 2 (0x2), region = 76 }

// kernel: cnn_res3_forward.93
= control target key start
LH: loop header
LB: loop body
LE: loop exit
PB: predicated region body
PF: predicated region fallthrough
CT: control target
= control target key end

     0   :  { %s865_s12 = smov 0   ;;  %s867_s13 = smov 0   ;;  %s940_s0 = inlined_call_operand.vmem [shape: bf16[8,1152], index: 0, kind: input, shape index: {}]   ;;  %s941_s1 = inlined_call_operand.vmem [shape: bf16[1152,128], index: 1, kind: input, shape index: {}]   ;;  %s942_s2 = inlined_call_operand.vmem [shape: f32[1,128], index: 2, kind: input, shape index: {}]   ;;  %s943_s3 = inlined_call_operand.vmem [shape: f32[8,128], index: 3, kind: output, shape index: {}]  }
   0x1   :  { %s869_s14 = smov 0  }
   0x2 LB: > { %s25_s15 = sadd.s32 1, %s836_s13  ;;  %p677_p0 = scmp.ge.s32.totalorder %s840_s14, 1  ;;  %s840_s14 = sphi %s869_s14, %s13_s14   ;;  %s836_s13 = sphi %s867_s13, %s945_s13   ;;  %s832_s12 = sphi %s865_s12, %s944_s12  }
   0x3   : > { %p26_p1 = scmp.ge.s32.totalorder %s25_s15, 3  ;;  %p189_p2 = scmp.lt.s32.totalorder %s840_s14, 4 }
   0x5   : > { %s947_s15 = smov (%p26_p1, %s25_s15), 0  ;;  %p190_p3 = pnand %p677_p0, %p189_p2 }
   0x6   : > { %s230_s16 = smul.u32 (!%p190_p3), 3, %s832_s12  ;;  %p680_p6 = scmp.ne.s32.totalorder (!%p190_p3), %s832_s12, 0 }
   0x7   : > { %193 = sbr.rel (%p190_p3) target bundleno = 270 (0x10e), region = 32 }
   0x8   : > { %s240_s17 = smul.u32 (!%p190_p3), 48, %s832_s12  ;;  %p233_p4 = scmp.lt.s32.totalorder (!%p190_p3), %s230_s16, 8 }
   0xa   : > { %p241_p5 = scmp.lt.s32.totalorder (!%p190_p3), %s240_s17, 143 }
   0xc   : > { %s949_s16 = smov (!%p233_p4, %s230_s16), 8  ;;  %s951_s17 = smov (!%p241_p5, %s240_s17), 143 }
   0xd   : > { %s678_s18 = sshll.u32 %s949_s16, 2  ;;  %s679_s22 = sshll.u32 %s951_s17, 2 }
   0xe   : > { %s890_s21 = scalar_lea.vmem %s940_s0, %s678_s18  ;;  %s895_s25 = scalar_lea.vmem %s941_s1, %s679_s22 }
   0xf   : > { %263 = sbr.rel (%p680_p6) target bundleno = 22 (0x16), region = 36 }
  0x14   : > { %v842_v0 = vmov 0.0  }
  0x15   : > { %264 = vst [vmem:[#allocation2] sm:$0xff] %v842_v0 }
  0x16 PF: > { %v791_v1 = vld [vmem:[%s895_s25 + $0x78] sm:$0xff]   ;;  %v843_v2 = vmov 0.0   ;;  %vm844_vm0 = vmmov 0   ;;  %v794_v5 = vld [vmem:[%s895_s25 + $0x70] sm:$0xff]   ;;  %v797_v8 = vld [vmem:[%s895_s25 + $0x68] sm:$0xff]   ;;  %p708_p7 = scmp.ne.s32.totalorder %s832_s12, 2 }
  0x17   : > { %744 = vmatprep.subr.bf16.mxu1 %v843_v2  ;;  %v792_v3 = vld [vmem:[%s895_s25 + $0xb8] sm:$0xff]   ;;  %713 = vmatprep.subr.bf16.mxu0 %v791_v1  ;;  %v795_v6 = vld [vmem:[%s895_s25 + $0xb0] sm:$0xff]   ;;  %v798_v9 = vld [vmem:[%s895_s25 + $0xa8] sm:$0xff]  }
  0x18   : > { %v793_v4 = vld [vmem:[%s895_s25 + $0x38] sm:$0xff]   ;;  %760 = vmatprep.mubr.msk.bf16.mxu1 %vm844_vm0, %v843_v2  ;;  %745 = vmatpush3.bf16.msra.mxu1 %v792_v3  ;;  %v796_v7 = vld [vmem:[%s895_s25 + $0x30] sm:$0xff]   ;;  %v799_v10 = vld [vmem:[%s895_s25 + $0x28] sm:$0xff]  }
  0x19   : > { %714 = vmatpush3.bf16.msra.mxu0 %v793_v4  ;;  %746 = vmatprep.subr.bf16.mxu1 %v843_v2  ;;  %v800_v11 = vld [vmem:[%s895_s25 + $0x60] sm:$0xff]   ;;  %v803_v14 = vld [vmem:[%s895_s25 + $0x58] sm:$0xff]   ;;  %v806_v17 = vld [vmem:[%s895_s25 + $0x50] sm:$0xff]  }
  0x1a   : > { %715 = vmatprep.subr.bf16.mxu0 %v794_v5  ;;  %v801_v12 = vld [vmem:[%s895_s25 + $0xa0] sm:$0xff]   ;;  %v804_v15 = vld [vmem:[%s895_s25 + $0x98] sm:$0xff]   ;;  %v807_v18 = vld [vmem:[%s895_s25 + $0x90] sm:$0xff]  }
  0x1b   : > { %v802_v13 = vld [vmem:[%s895_s25 + $0x20] sm:$0xff]   ;;  %v805_v16 = vld [vmem:[%s895_s25 + $0x18] sm:$0xff]   ;;  %v808_v19 = vld [vmem:[%s895_s25 + $0x10] sm:$0xff]  }
  0x1c   : > { %747 = vmatpush3.bf16.msra.mxu1 %v795_v6  ;;  %v809_v20 = vld [vmem:[%s895_s25 + $0x48] sm:$0xff]   ;;  %v266_v23 = vld [vmem:[%s890_s21] sm:$0xff] }
  0x1d   : > { %716 = vmatpush3.bf16.msra.mxu0 %v796_v7  ;;  %748 = vmatprep.subr.bf16.mxu1 %v843_v2  ;;  %v810_v21 = vld [vmem:[%s895_s25 + $0x88] sm:$0xff]   ;;  %v812_v24 = vld [vmem:[%s895_s25 + $0x40] sm:$0xff]   ;;  %v682_v25 = vcombine.high %v266_v23, %v266_v23  ;;  %v681_v29 = vcombine.low %v266_v23, %v266_v23 }
  0x1e   : > { %717 = vmatprep.subr.bf16.mxu0 %v797_v8  ;;  %v811_v22 = vld [vmem:[%s895_s25 + $0x8] sm:$0xff]   ;;  %v813_v26 = vld [vmem:[%s895_s25 + $0x80] sm:$0xff]  }
  0x1f   : > { %503 = vmatprep.mubr.bf16.mxu0 %v682_v25  ;;  %v814_v27 = vld [vmem:[%s895_s25] sm:$0xff]   ;;  %v817_v28 = vld [vmem:[%s890_s21 + $0x8] ss:$0 sps:$4 sm:$0xff]  }
  0x20   : > { %749 = vmatpush3.bf16.msra.mxu1 %v798_v9  ;;  %v265_v36 = vld [vmem:[#allocation2] sm:$0xff] }
  0x21   : > { %718 = vmatpush3.bf16.msra.mxu0 %v799_v10  ;;  %750 = vmatprep.subr.bf16.mxu1 %v843_v2 }
  0x22   : > { %719 = vmatprep.subr.bf16.mxu0 %v800_v11 }
  0x24   : > { %751 = vmatpush3.bf16.msra.mxu1 %v801_v12 }
  0x25   : > { %720 = vmatpush3.bf16.msra.mxu0 %v802_v13  ;;  %752 = vmatprep.subr.bf16.mxu1 %v843_v2 }
  0x26   : > { %721 = vmatprep.subr.bf16.mxu0 %v803_v14 }
  0x28   : > { %753 = vmatpush3.bf16.msra.mxu1 %v804_v15 }
  0x29   : > { %722 = vmatpush3.bf16.msra.mxu0 %v805_v16  ;;  %754 = vmatprep.subr.bf16.mxu1 %v843_v2 }
  0x2a   : > { %723 = vmatprep.subr.bf16.mxu0 %v806_v17 }
  0x2c   : > { %755 = vmatpush3.bf16.msra.mxu1 %v807_v18 }
  0x2d   : > { %724 = vmatpush3.bf16.msra.mxu0 %v808_v19  ;;  %756 = vmatprep.subr.bf16.mxu1 %v843_v2 }
  0x2e   : > { %725 = vmatprep.subr.bf16.mxu0 %v809_v20 }
  0x30   : > { %757 = vmatpush3.bf16.msra.mxu1 %v810_v21 }
  0x31   : > { %726 = vmatpush3.bf16.msra.mxu0 %v811_v22  ;;  %758 = vmatprep.subr.bf16.mxu1 %v843_v2 }
  0x32   : > { %727 = vmatprep.subr.bf16.mxu0 %v812_v24 }
  0x34   : > { %759 = vmatpush3.bf16.msra.mxu1 %v813_v26 }
  0x35   : > { %728 = vmatpush3.bf16.msra.mxu0 %v814_v27 }
  0x37   : > { %761 = vmatmul.mubr.bf16.vlgmr.msra.gmra.mxu1 %v817_v28 }
  0x38   : > { %504 = vmatmul.mubr.bf16.vlgmr.msra.gmra.mxu0 %v681_v29 }
  0xf7   : > { %v545_v30 = vpop.f32.mrf.mxu1 }
  0xf8   : > { %v729_v31 = vpop.f32.mrf.mxu0 }
  0xf9   : > { %v762_v32 = vpop.f32.mrf.mxu1 }
  0xfa   : > { %v730_v33 = vpop.f32.mrf.mxu0 }
  0xfb   : > { %v731_v34 = vadd.f32 %v730_v33, %v729_v31  ;;  %v548_v35 = vpop.f32.mrf.mxu1 }
  0xfc   : > { %v732_v37 = vpop.f32.mrf.mxu0 }
  0xfd   : > { %v546_v38 = vadd.f32 %v731_v34, %v545_v30  ;;  %v763_v39 = vpop.f32.mrf.mxu1  ;;  %556 = sbr.rel (%p708_p7) target bundleno = 270 (0x10e), region = 40 }
  0xfe   : > { %v733_v40 = vpop.f32.mrf.mxu0 }
  0xff   : > { %v551_v41 = vadd.f32 %v546_v38, %v265_v36 }
 0x101   : > { %552 = vst [vmem:[#allocation2] sm:$0xff] %v551_v41 }
 0x102   : > { %v709_v43 = vld [vmem:[%s942_s2] ss:$0 sm:$0xff] }
 0x108   : > { %v557_v42 = vld [vmem:[#allocation2] sm:$0xff] }
 0x109   : > { %v565_v44 = vadd.f32 %v709_v43, %v557_v42 }
 0x10b   : > { %v566_v45 = vmax.f32 %v565_v44, 0.0 }
 0x10d   : > { %567 = vst [vmem:[%s943_s3] sm:$0xff] %v566_v45 }
 0x10e PF: > { %s13_s14 = sadd.s32 1, %s840_s14   ;;  %s944_s12 = smov %s836_s13 }
 0x10f   : > { %p10_p8 = scmp.ge.s32.totalorder %s13_s14, 5   ;;  %s945_s13 = smov %s947_s15 }
 0x111   :  { %12 = sbr.rel (!%p10_p8) target bundleno = 2 (0x2), region = 76 }

// kernel: cnn_res3_forward.94
= control target key start
LH: loop header
LB: loop body
LE: loop exit
PB: predicated region body
PF: predicated region fallthrough
CT: control target
= control target key end

     0   :  { %s1119_s15 = smov 0   ;;  %s1121_s16 = smov 0   ;;  %s1227_s0 = inlined_call_operand.vmem [shape: bf16[8,1152], index: 0, kind: input, shape index: {}]   ;;  %s1228_s1 = inlined_call_operand.vmem [shape: bf16[1152,256], index: 1, kind: input, shape index: {}]   ;;  %s1229_s2 = inlined_call_operand.vmem [shape: f32[1,256], index: 2, kind: input, shape index: {}]   ;;  %s1230_s3 = inlined_call_operand.vmem [shape: f32[8,256], index: 3, kind: input, shape index: {}]   ;;  %s1231_s4 = inlined_call_operand.vmem [shape: f32[8,256], index: 4, kind: output, shape index: {}]  }
   0x1   :  { %s1123_s17 = smov 0  }
   0x2 LB: > { %s26_s18 = sadd.s32 1, %s1086_s16  ;;  %p905_p0 = scmp.ge.s32.totalorder %s1090_s17, 1  ;;  %s1090_s17 = sphi %s1123_s17, %s14_s17   ;;  %s1086_s16 = sphi %s1121_s16, %s1233_s16   ;;  %s1082_s15 = sphi %s1119_s15, %s1232_s15  }
   0x3   : > { %p27_p1 = scmp.ge.s32.totalorder %s26_s18, 3  ;;  %p236_p2 = scmp.lt.s32.totalorder %s1090_s17, 4 }
   0x5   : > { %s1235_s18 = smov (%p27_p1, %s26_s18), 0  ;;  %p237_p3 = pnand %p905_p0, %p236_p2 }
   0x6   : > { %s293_s19 = smul.u32 (!%p237_p3), 3, %s1082_s15  ;;  %p909_p6 = scmp.ne.s32.totalorder (!%p237_p3), %s1082_s15, 0 }
   0x7   : > { %240 = sbr.rel (%p237_p3) target bundleno = 300 (0x12c), region = 36 }
   0x8   : > { %s303_s20 = smul.u32 (!%p237_p3), 48, %s1082_s15  ;;  %p296_p4 = scmp.lt.s32.totalorder (!%p237_p3), %s293_s19, 8 }
   0xa   : > { %p305_p5 = scmp.lt.s32.totalorder (!%p237_p3), %s303_s20, 143 }
   0xc   : > { %s1237_s19 = smov (!%p296_p4, %s293_s19), 8  ;;  %s1239_s20 = smov (!%p305_p5, %s303_s20), 143 }
   0xd   : > { %s906_s21 = sshll.u32 %s1237_s19, 2  ;;  %s966_s25 = sshll.u32 %s1239_s20, 3 }
   0xe   : > { %s1144_s24 = scalar_lea.vmem %s1227_s0, %s906_s21  ;;  %s1149_s28 = scalar_lea.vmem %s1228_s1, %s966_s25 }
   0xf   : > { %344 = sbr.rel (%p909_p6) target bundleno = 22 (0x16), region = 40 }
  0x14   : > { %v1092_v0 = vmov 0.0  }
  0x15   : > { %345 = vst [vmem:[#allocation2] sm:$0xff] %v1092_v0  ;;  %346 = vst [vmem:[#allocation2 + $0x8] sm:$0xff] %v1092_v0 }
  0x16 PF: > { %v993_v1 = vld [vmem:[%s1149_s28 + $0x74] ss:$8 sps:$4 sm:$0xff]   ;;  %v995_v2 = vld [vmem:[%s1149_s28 + $0x70] ss:$8 sps:$4 sm:$0xff]   ;;  %v1093_v3 = vmov 0   ;;  %v349_v34 = vld [vmem:[%s1144_s24] sm:$0xff] }
  0x17   : > { %723 = vmatprep.mubr.bf16.mxu1 %v1093_v3  ;;  %650 = vmatprep.subr.bf16.mxu0 %v993_v1  ;;  %v996_v4 = vld [vmem:[%s1149_s28 + $0x64] ss:$8 sps:$4 sm:$0xff]   ;;  %v998_v5 = vld [vmem:[%s1149_s28 + $0x60] ss:$8 sps:$4 sm:$0xff]   ;;  %v999_v6 = vld [vmem:[%s1149_s28 + $0x54] ss:$8 sps:$4 sm:$0xff]   ;;  %v911_v36 = vcombine.high %v349_v34, %v349_v34  ;;  %v910_v53 = vcombine.low %v349_v34, %v349_v34 }
  0x18   : > { %651 = vmatpush1.bf16.msra.mxu0 %v995_v2  ;;  %v1001_v7 = vld [vmem:[%s1149_s28 + $0x50] ss:$8 sps:$4 sm:$0xff]   ;;  %v1002_v8 = vld [vmem:[%s1149_s28 + $0x44] ss:$8 sps:$4 sm:$0xff]   ;;  %v1014_v9 = vld [vmem:[%s1149_s28 + $0x174] ss:$8 sps:$4 sm:$0xff]  }
  0x19   : > { %652 = vmatprep.subr.bf16.mxu0 %v996_v4  ;;  %v1016_v10 = vld [vmem:[%s1149_s28 + $0x170] ss:$8 sps:$4 sm:$0xff]   ;;  %v1004_v11 = vld [vmem:[%s1149_s28 + $0x40] ss:$8 sps:$4 sm:$0xff]   ;;  %v1005_v12 = vld [vmem:[%s1149_s28 + $0x34] ss:$8 sps:$4 sm:$0xff]   ;;  %691 = vmatprep.subr.bf16.mxu1 %v1014_v9 }
  0x1a   : > { %v1020_v13 = vld [vmem:[%s1149_s28 + $0x164] ss:$8 sps:$4 sm:$0xff]   ;;  %692 = vmatpush1.bf16.msra.mxu1 %v1016_v10  ;;  %v1022_v14 = vld [vmem:[%s1149_s28 + $0x160] ss:$8 sps:$4 sm:$0xff]   ;;  %v1007_v15 = vld [vmem:[%s1149_s28 + $0x30] ss:$8 sps:$4 sm:$0xff]   ;;  %682 = vmatprep.mubr.bf16.mxu0 %v911_v36 }
  0x1b   : > { %693 = vmatprep.subr.bf16.mxu1 %v1020_v13  ;;  %v1026_v16 = vld [vmem:[%s1149_s28 + $0x154] ss:$8 sps:$4 sm:$0xff]   ;;  %v1008_v17 = vld [vmem:[%s1149_s28 + $0x24] ss:$8 sps:$4 sm:$0xff]   ;;  %v1028_v18 = vld [vmem:[%s1149_s28 + $0x150] ss:$8 sps:$4 sm:$0xff]  }
  0x1c   : > { %653 = vmatpush1.bf16.msra.mxu0 %v998_v5  ;;  %v1032_v19 = vld [vmem:[%s1149_s28 + $0x144] ss:$8 sps:$4 sm:$0xff]   ;;  %v1010_v20 = vld [vmem:[%s1149_s28 + $0x20] ss:$8 sps:$4 sm:$0xff]   ;;  %v1011_v21 = vld [vmem:[%s1149_s28 + $0x14] ss:$8 sps:$4 sm:$0xff]  }
  0x1d   : > { %654 = vmatprep.subr.bf16.mxu0 %v999_v6  ;;  %v1034_v22 = vld [vmem:[%s1149_s28 + $0x140] ss:$8 sps:$4 sm:$0xff]   ;;  %v1038_v23 = vld [vmem:[%s1149_s28 + $0x134] ss:$8 sps:$4 sm:$0xff]   ;;  %v1013_v24 = vld [vmem:[%s1149_s28 + $0x10] ss:$8 sps:$4 sm:$0xff]  }
  0x1e   : > { %694 = vmatpush1.bf16.msra.mxu1 %v1022_v14  ;;  %v1017_v25 = vld [vmem:[%s1149_s28 + $0x4] ss:$8 sps:$4 sm:$0xff]   ;;  %v1040_v26 = vld [vmem:[%s1149_s28 + $0x130] ss:$8 sps:$4 sm:$0xff]   ;;  %v1019_v28 = vld [vmem:[%s1149_s28] ss:$8 sps:$4 sm:$0xff]  }
  0x1f   : > { %695 = vmatprep.subr.bf16.mxu1 %v1026_v16  ;;  %v1044_v27 = vld [vmem:[%s1149_s28 + $0x124] ss:$8 sps:$4 sm:$0xff]   ;;  %v1023_v29 = vld [vmem:[%s1149_s28 + $0xf4] ss:$8 sps:$4 sm:$0xff]   ;;  %v1046_v30 = vld [vmem:[%s1149_s28 + $0x120] ss:$8 sps:$4 sm:$0xff]  }
  0x20   : > { %655 = vmatpush1.bf16.msra.mxu0 %v1001_v7  ;;  %v1050_v31 = vld [vmem:[%s1149_s28 + $0x114] ss:$8 sps:$4 sm:$0xff]   ;;  %v1025_v32 = vld [vmem:[%s1149_s28 + $0xf0] ss:$8 sps:$4 sm:$0xff]   ;;  %v1029_v33 = vld [vmem:[%s1149_s28 + $0xe4] ss:$8 sps:$4 sm:$0xff]  }
  0x21   : > { %656 = vmatprep.subr.bf16.mxu0 %v1002_v8  ;;  %v1052_v35 = vld [vmem:[%s1149_s28 + $0x110] ss:$8 sps:$4 sm:$0xff]   ;;  %v1056_v37 = vld [vmem:[%s1149_s28 + $0x104] ss:$8 sps:$4 sm:$0xff]   ;;  %v1031_v38 = vld [vmem:[%s1149_s28 + $0xe0] ss:$8 sps:$4 sm:$0xff]  }
  0x22   : > { %696 = vmatpush1.bf16.msra.mxu1 %v1028_v18  ;;  %v1035_v39 = vld [vmem:[%s1149_s28 + $0xd4] ss:$8 sps:$4 sm:$0xff]   ;;  %v1058_v40 = vld [vmem:[%s1149_s28 + $0x100] ss:$8 sps:$4 sm:$0xff]   ;;  %v1037_v41 = vld [vmem:[%s1149_s28 + $0xd0] ss:$8 sps:$4 sm:$0xff]  }
  0x23   : > { %697 = vmatprep.subr.bf16.mxu1 %v1032_v19  ;;  %v1041_v42 = vld [vmem:[%s1149_s28 + $0xc4] ss:$8 sps:$4 sm:$0xff]   ;;  %v1062_v43 = vld [vmem:[%s1144_s24 + $0x8] ss:$0 sps:$4 sm:$0xff]   ;;  %v1047_v45 = vld [vmem:[%s1149_s28 + $0xb4] ss:$8 sps:$4 sm:$0xff]  }
  0x24   : > { %657 = vmatpush1.bf16.msra.mxu0 %v1004_v11  ;;  %v1043_v44 = vld [vmem:[%s1149_s28 + $0xc0] ss:$8 sps:$4 sm:$0xff]   ;;  %v1049_v46 = vld [vmem:[%s1149_s28 + $0xb0] ss:$8 sps:$4 sm:$0xff]   ;;  %v1053_v47 = vld [vmem:[%s1149_s28 + $0xa4] ss:$8 sps:$4 sm:$0xff]  }
  0x25   : > { %658 = vmatprep.subr.bf16.mxu0 %v1005_v12  ;;  %v1055_v48 = vld [vmem:[%s1149_s28 + $0xa0] ss:$8 sps:$4 sm:$0xff]   ;;  %v1059_v49 = vld [vmem:[%s1149_s28 + $0x94] ss:$8 sps:$4 sm:$0xff]   ;;  %v1061_v50 = vld [vmem:[%s1149_s28 + $0x90] ss:$8 sps:$4 sm:$0xff]  }
  0x26   : > { %698 = vmatpush1.bf16.msra.mxu1 %v1034_v22  ;;  %v1063_v51 = vld [vmem:[%s1149_s28 + $0x84] ss:$8 sps:$4 sm:$0xff]   ;;  %v1065_v52 = vld [vmem:[%s1149_s28 + $0x80] ss:$8 sps:$4 sm:$0xff]   ;;  %v348_v61 = vld [vmem:[#allocation2 + $0x8] sm:$0xff]  ;;  %p961_p7 = scmp.ne.s32.totalorder %s1082_s15, 2 }
  0x27   : > { %699 = vmatprep.subr.bf16.mxu1 %v1038_v23  ;;  %v347_v58 = vld [vmem:[#allocation2] sm:$0xff] }
  0x28   : > { %659 = vmatpush1.bf16.msra.mxu0 %v1007_v15 }
  0x29   : > { %660 = vmatprep.subr.bf16.mxu0 %v1008_v17 }
  0x2a   : > { %700 = vmatpush1.bf16.msra.mxu1 %v1040_v26 }
  0x2b   : > { %701 = vmatprep.subr.bf16.mxu1 %v1044_v27 }
  0x2c   : > { %661 = vmatpush1.bf16.msra.mxu0 %v1010_v20 }
  0x2d   : > { %662 = vmatprep.subr.bf16.mxu0 %v1011_v21 }
  0x2e   : > { %702 = vmatpush1.bf16.msra.mxu1 %v1046_v30 }
  0x2f   : > { %703 = vmatprep.subr.bf16.mxu1 %v1050_v31 }
  0x30   : > { %663 = vmatpush1.bf16.msra.mxu0 %v1013_v24 }
  0x31   : > { %664 = vmatprep.subr.bf16.mxu0 %v1017_v25 }
  0x32   : > { %704 = vmatpush1.bf16.msra.mxu1 %v1052_v35 }
  0x33   : > { %705 = vmatprep.subr.bf16.mxu1 %v1056_v37 }
  0x34   : > { %665 = vmatpush1.bf16.msra.mxu0 %v1019_v28 }
  0x35   : > { %666 = vmatprep.subr.bf16.mxu0 %v1023_v29 }
  0x36   : > { %706 = vmatpush1.bf16.msra.mxu1 %v1058_v40 }
  0x38   : > { %667 = vmatpush2.bf16.msra.mxu0 %v1025_v32 }
  0x39   : > { %668 = vmatprep.subr.bf16.mxu0 %v1029_v33  ;;  %724 = vmatmul.mubr.bf16.vlgmr.msra.gmra.mxu1 %v1062_v43 }
  0x3c   : > { %669 = vmatpush2.bf16.msra.mxu0 %v1031_v38 }
  0x3d   : > { %670 = vmatprep.subr.bf16.mxu0 %v1035_v39 }
  0x40   : > { %671 = vmatpush2.bf16.msra.mxu0 %v1037_v41 }
  0x41   : > { %672 = vmatprep.subr.bf16.mxu0 %v1041_v42 }
  0x44   : > { %673 = vmatpush2.bf16.msra.mxu0 %v1043_v44 }
  0x45   : > { %674 = vmatprep.subr.bf16.mxu0 %v1047_v45 }
  0x48   : > { %675 = vmatpush2.bf16.msra.mxu0 %v1049_v46 }
  0x49   : > { %676 = vmatprep.subr.bf16.mxu0 %v1053_v47 }
  0x4c   : > { %677 = vmatpush2.bf16.msra.mxu0 %v1055_v48 }
  0x4d   : > { %678 = vmatprep.subr.bf16.mxu0 %v1059_v49 }
  0x50   : > { %679 = vmatpush2.bf16.msra.mxu0 %v1061_v50 }
  0x51   : > { %680 = vmatprep.subr.bf16.mxu0 %v1063_v51 }
  0x54   : > { %681 = vmatpush2.bf16.msra.mxu0 %v1065_v52 }
  0x57   : > { %683 = vmatmul.mubr.bf16.vlgmr.msra.gmra.mxu0 %v910_v53 }
  0xf9   : > { %v725_v54 = vpop.f32.mrf.mxu1 }
  0xfb   : > { %v727_v55 = vpop.f32.mrf.mxu1 }
  0xfd   : > { %v729_v56 = vpop.f32.mrf.mxu1 }
  0xff   : > { %v730_v57 = vpop.f32.mrf.mxu1 }
 0x117   : > { %v684_v59 = vpop.f32.mrf.mxu0 }
 0x118   : > { %v726_v60 = vadd.f32 %v725_v54, %v684_v59 }
 0x119   : > { %v686_v62 = vpop.f32.mrf.mxu0 }
 0x11a   : > { %v732_v63 = vadd.f32 %v726_v60, %v347_v58  ;;  %v728_v0 = vadd.f32 %v727_v55, %v686_v62  ;;  %739 = sbr.rel (%p961_p7) target bundleno = 300 (0x12c), region = 44 }
 0x11b   : > { %v688_v1 = vpop.f32.mrf.mxu0 }
 0x11c   : > { %734 = vst [vmem:[#allocation2] sm:$0xff] %v732_v63  ;;  %v733_v2 = vadd.f32 %v728_v0, %v348_v61 }
 0x11d   : > { %v689_v3 = vpop.f32.mrf.mxu0 }
 0x11e   : > { %735 = vst [vmem:[#allocation2 + $0x8] sm:$0xff] %v733_v2 }
 0x11f   : > { %v744_v4 = vlaneseq  ;;  %v742_v6 = vld [vmem:[%s1229_s2] sm:$0x3]  ;;  %v757_v14 = vld [vmem:[%s1230_s3 + $0x8] sm:$0xff] }
 0x120   : > { %v756_v13 = vld [vmem:[%s1230_s3] sm:$0xff] }
 0x121   : > { %v745_v5 = vshrl.u32 %v744_v4, 7 }
 0x123   : > { %v746_v7 = vsub.s32 0, %v745_v5  ;;  %v750_v8 = vsub.s32 1, %v745_v5  ;;  %v740_v9 = vld [vmem:[#allocation2] sm:$0xff] }
 0x125   : > { %v741_v10 = vld [vmem:[#allocation2 + $0x8] sm:$0xff]  ;;  %v747_v11 = vrot.slane %v742_v6, %v746_v7  ;;  %v751_v12 = vrot.slane %v742_v6, %v750_v8 }
 0x127   : > { %v754_v15 = vadd.f32 %v747_v11, %v740_v9  ;;  %v755_v16 = vadd.f32 %v751_v12, %v741_v10 }
 0x129   : > { %v758_v17 = vadd.f32 %v756_v13, %v754_v15  ;;  %v759_v18 = vadd.f32 %v757_v14, %v755_v16 }
 0x12b   : > { %760 = vst [vmem:[%s1231_s4] sm:$0xff] %v758_v17  ;;  %761 = vst [vmem:[%s1231_s4 + $0x8] sm:$0xff] %v759_v18 }
 0x12c PF: > { %s14_s17 = sadd.s32 1, %s1090_s17   ;;  %s1232_s15 = smov %s1086_s16 }
 0x12d   : > { %p11_p8 = scmp.ge.s32.totalorder %s14_s17, 5   ;;  %s1233_s16 = smov %s1235_s18 }
 0x12f   :  { %13 = sbr.rel (!%p11_p8) target bundleno = 2 (0x2), region = 83 }

// kernel: cnn_res3_forward.95
= control target key start
LH: loop header
LB: loop body
LE: loop exit
PB: predicated region body
PF: predicated region fallthrough
CT: control target
= control target key end

     0   :  { %vm23_vm0 = vcmask 1043456   ;;  %s385_s0 = inlined_call_operand.vmem [shape: f32[2,4,256], index: 0, kind: input, shape index: {}]   ;;  %s386_s1 = inlined_call_operand.vmem [shape: f32[256,4], index: 1, kind: input, shape index: {}]   ;;  %s387_s2 = inlined_call_operand.vmem [shape: f32[1,4], index: 2, kind: input, shape index: {}]   ;;  %s388_s3 = inlined_call_operand.hbm [shape: f32[2,4], index: 3, kind: output, shape index: {}]  }
   0x1   :  { %v88_v0 = vld [vmem:[%s386_s1 + $0xf8] sm:$0xff]  ;;  %v87_v2 = vld [vmem:[%s386_s1 + $0xf0] sm:$0xff]  ;;  %v86_v4 = vld [vmem:[%s386_s1 + $0xe8] sm:$0xff] }
   0x2   :  { %v72_v1 = vld [vmem:[%s386_s1 + $0x78] sm:$0xff]  ;;  %192 = vmatprep.subr.mxu0 %v88_v0  ;;  %v71_v3 = vld [vmem:[%s386_s1 + $0x70] sm:$0xff]  ;;  %v70_v5 = vld [vmem:[%s386_s1 + $0x68] sm:$0xff] }
   0x3   :  { %193 = vmatpush3.msra.mxu0 %v72_v1  ;;  %v85_v6 = vld [vmem:[%s386_s1 + $0xe0] sm:$0xff]  ;;  %v84_v8 = vld [vmem:[%s386_s1 + $0xd8] sm:$0xff]  ;;  %v83_v10 = vld [vmem:[%s386_s1 + $0xd0] sm:$0xff] }
   0x4   :  { %194 = vmatprep.subr.mxu0 %v87_v2  ;;  %v69_v7 = vld [vmem:[%s386_s1 + $0x60] sm:$0xff]  ;;  %v68_v9 = vld [vmem:[%s386_s1 + $0x58] sm:$0xff]  ;;  %v67_v11 = vld [vmem:[%s386_s1 + $0x50] sm:$0xff] }
   0x5   :  { %195 = vmatpush3.msra.mxu0 %v71_v3  ;;  %v82_v12 = vld [vmem:[%s386_s1 + $0xc8] sm:$0xff]  ;;  %v15_v13 = vld [vmem:[%s385_s0] sm:$0xff] }
   0x6   :  { %196 = vmatprep.subr.mxu0 %v86_v4  ;;  %v66_v14 = vld [vmem:[%s386_s1 + $0x48] sm:$0xff]  ;;  %v19_v16 = vcombine.high %v15_v13, %v15_v13  ;;  %v24_v17 = vsel %vm23_vm0, %v15_v13, 0.0 }
   0x7   :  { %197 = vmatpush3.msra.mxu0 %v70_v5  ;;  %v16_v15 = vld [vmem:[%s385_s0 + $0x8] sm:$0xff] }
   0x8   :  { %198 = vmatprep.subr.mxu0 %v85_v6 }
   0x9   :  { %199 = vmatpush3.msra.mxu0 %v69_v7 }
   0xa   :  { %200 = vmatprep.subr.mxu0 %v84_v8 }
   0xb   :  { %201 = vmatpush3.msra.mxu0 %v68_v9 }
   0xc   :  { %202 = vmatprep.subr.mxu0 %v83_v10 }
   0xd   :  { %8 = vsyncpa [#allocation3], 0  ;;  %203 = vmatpush3.msra.mxu0 %v67_v11  ;;  %v81_v18 = vld [vmem:[%s386_s1 + $0xc0] sm:$0xff]  ;;  %v20_v19 = vcombine.high %v16_v15, %v16_v15  ;;  %v25_v20 = vrot.slane %v24_v17, 4  ;;  %v38_v21 = vsel %vm23_vm0, %v16_v15, 0.0  ;;  %v31_v23 = vsel %vm23_vm0, %v19_v16, 0.0 }
   0xe   :  { %204 = vmatprep.subr.mxu0 %v82_v12  ;;  %v65_v22 = vld [vmem:[%s386_s1 + $0x40] sm:$0xff]  ;;  %v39_v24 = vrot.slane %v38_v21, 4  ;;  %v80_v25 = vld [vmem:[%s386_s1 + $0xb8] sm:$0xff]  ;;  %v32_v26 = vrot.slane %v31_v23, 4  ;;  %v79_v32 = vld [vmem:[%s386_s1 + $0xb0] sm:$0xff]  ;;  %vm100_vm1 = vcmask 1041409  }
   0xf   :  { %205 = vmatpush3.msra.mxu0 %v66_v14  ;;  %v45_v27 = vsel %vm23_vm0, %v20_v19, 0.0  ;;  %v26_v28 = vadd.f32 %v25_v20, %v24_v17  ;;  %v64_v29 = vld [vmem:[%s386_s1 + $0x38] sm:$0xff]  ;;  %v63_v35 = vld [vmem:[%s386_s1 + $0x30] sm:$0xff]  ;;  %v78_v38 = vld [vmem:[%s386_s1 + $0xa8] sm:$0xff]  ;;  %s252_s26 = smov [#allocation2]   ;;  %vm175_vm2 = vcmask 25600  }
  0x10   :  { %206 = vmatprep.subr.mxu0 %v81_v18  ;;  %v46_v30 = vrot.slane %v45_v27, 4  ;;  %v40_v31 = vadd.f32 %v39_v24, %v38_v21  ;;  %v33_v33 = vadd.f32 %v32_v26, %v31_v23  ;;  %v62_v41 = vld [vmem:[%s386_s1 + $0x28] sm:$0xff]  ;;  %v77_v44 = vld [vmem:[%s386_s1 + $0xa0] sm:$0xff]  ;;  %v76_v50 = vld [vmem:[%s386_s1 + $0x98] sm:$0xff]  ;;  %s183_s27 = sshll.u32 %s252_s26, 4  ;;  %s184_s27 = int_to_ptr.vmem [resolvable:$true] %s183_s27 }
  0x11   :  { %207 = vmatpush3.msra.mxu0 %v65_v22  ;;  %v27_v34 = vrot.slane %v26_v28, 2  ;;  %v61_v47 = vld [vmem:[%s386_s1 + $0x20] sm:$0xff]  ;;  %v60_v53 = vld [vmem:[%s386_s1 + $0x18] sm:$0xff]  ;;  %v75_v56 = vld [vmem:[%s386_s1 + $0x90] sm:$0xff]  ;;  %p235_p1 = scmp.lt.s32.totalorder %s184_s27, %s184_s27 }
  0x12   :  { %208 = vmatprep.subr.mxu0 %v80_v25  ;;  %v47_v36 = vadd.f32 %v46_v30, %v45_v27  ;;  %v41_v37 = vrot.slane %v40_v31, 2  ;;  %v34_v39 = vrot.slane %v33_v33, 2  ;;  %v59_v58 = vld [vmem:[%s386_s1 + $0x10] sm:$0xff]  ;;  %v74_v60 = vld [vmem:[%s386_s1 + $0x88] sm:$0xff]  ;;  %v73_v2 = vld [vmem:[%s386_s1 + $0x80] sm:$0xff] }
  0x13   :  { %209 = vmatpush3.msra.mxu0 %v64_v29  ;;  %v28_v40 = vadd.f32 %v27_v34, %v26_v28  ;;  %v58_v0 = vld [vmem:[%s386_s1 + $0x8] sm:$0xff]  ;;  %v57_v3 = vld [vmem:[%s386_s1] sm:$0xff]  ;;  %s230_s1 = scalar_lea.vmem %s184_s27, 32 }
  0x14   :  { %210 = vmatprep.subr.mxu0 %v79_v32  ;;  %v48_v42 = vrot.slane %v47_v36, 2  ;;  %v42_v43 = vadd.f32 %v41_v37, %v40_v31  ;;  %v35_v45 = vadd.f32 %v34_v39, %v33_v33  ;;  %v191_v7 = vld [vmem:[%s387_s2] ss:$0 sm:$0xff]  ;;  %p231_p0 = scmp.ne.s32.totalorder %s184_s27, %s230_s1  ;;  %p236_p2 = scmp.lt.s32.totalorder %s230_s1, %s230_s1 }
  0x15   :  { %211 = vmatpush3.msra.mxu0 %v63_v35  ;;  %v29_v46 = vrot.slane %v28_v40, 1 }
  0x16   :  { %212 = vmatprep.subr.mxu0 %v78_v38  ;;  %v49_v48 = vadd.f32 %v48_v42, %v47_v36  ;;  %v43_v49 = vrot.slane %v42_v43, 1  ;;  %v36_v51 = vrot.slane %v35_v45, 1  ;;  %p237_p3 = por %p236_p2, %p235_p1 }
  0x17   :  { %213 = vmatpush3.msra.mxu0 %v62_v41  ;;  %v30_v52 = vadd.f32 %v29_v46, %v28_v40 }
  0x18   :  { %214 = vmatprep.subr.mxu0 %v77_v44  ;;  %v50_v54 = vrot.slane %v49_v48, 1  ;;  %v44_v55 = vadd.f32 %v43_v49, %v42_v43  ;;  %v37_v57 = vadd.f32 %v36_v51, %v35_v45  ;;  %p238_p4 = pnand %p237_p3, %p231_p0 }
  0x19   :  { %215 = vmatpush3.msra.mxu0 %v61_v47  ;;  %v53_v62 = vmul.f32 0.25, %v30_v52 }
  0x1a   :  { %216 = vmatprep.subr.mxu0 %v76_v50  ;;  %v51_v59 = vadd.f32 %v50_v54, %v49_v48  ;;  %v54_v61 = vmul.f32 0.25, %v37_v57  ;;  %v55_v63 = vmul.f32 0.25, %v44_v55 }
  0x1b   :  { %217 = vmatpush3.msra.mxu0 %v60_v53 }
  0x1c   :  { %218 = vmatprep.subr.mxu0 %v75_v56  ;;  %v56_v1 = vmul.f32 0.25, %v51_v59  ;;  %v101_v5 = vsel %vm100_vm1, %v55_v63, %v53_v62 }
  0x1d   :  { %219 = vmatpush3.msra.mxu0 %v59_v58 }
  0x1e   :  { %220 = vmatprep.subr.mxu0 %v74_v60  ;;  %v102_v4 = vsel %vm100_vm1, %v56_v1, %v54_v61 }
  0x1f   :  { %221 = vmatpush3.msra.mxu0 %v58_v0  ;;  %169 = vmatprep.mubr.f32.mxu0 %v102_v4 }
  0x20   :  { %222 = vmatprep.subr.mxu0 %v73_v2 }
  0x21   :  { %223 = vmatpush3.msra.mxu0 %v57_v3 }
  0x22   :  { %170 = vmatmul.mubr.f32.vlgmr.msra.gmra.mxu0 %v101_v5 }
  0xe2   :  { %v224_v6 = vpop.f32.mrf.mxu0 }
  0xe4   :  { %v225_v8 = vpop.f32.mrf.mxu0 }
  0xe5   :  { %v226_v9 = vadd.f32 %v225_v8, %v224_v6 }
  0xe7   :  { %v172_v10 = vadd.f32 %v226_v9, %v191_v7 }
  0xe9   :  { %176 = vst.msk [vmem:[#allocation2] sm:$0x3] %vm175_vm2, %v172_v10 }
  0xea   :  { %241 = shalt.err (!%p238_p4)
}
  0xeb   :  { %186 = dma.vmem_to_hbm [thread:$0]  %s184_s27, 32, %s388_s3, [#allocation3]  }
  0xec   :  { %250 = dma.done.wait [#allocation3], 32  }
  0xed   :  { %251 = vsyncadd [#allocation3], 4294967264 }
  0xee   :  { %190 = vsyncpa [#allocation3], 1 }

</bundles_post_ra>
